<compile_context>
chip_gen: v7x
topology: tpu7x:2x2x1
jax: 0.10.0
libtpu: 0.0.40
codegen_flags: <defaults>
</compile_context>

<pallas_src>
import functools

import jax
import jax.numpy as jnp
from jax.experimental import pallas as pl
from jax.experimental.pallas import tpu as pltpu

_LEAKY_SLOPE = 0.2
_BN_EPS = 1e-5
_TAPS = ((0, 0), (0, 1), (1, 0), (1, 1))   # (row, col) taps of the k=2/s=1 conv


# ----------------------------------------------------------------------------
# Pallas kernels
# ----------------------------------------------------------------------------
def _conv_lrelu_kernel(x_ref, w_ref, b_ref, o_ref, *, tr, wo):
    """Fused conv(k=4,s=2,p=1) [as 4-tap k=2/s=1 on s2d input] + bias + LeakyReLU.

    x_ref: (1, Hs, Ws, 4*Cin) bf16   -- space-to-depth'd padded input, one image
    w_ref: (16*Cin, Cout)     bf16   -- conv weights (BN scale folded per column)
    b_ref: (1, Cout)          f32    -- folded BN bias (zeros if no BN)
    o_ref: (1, tr*wo, Cout)   bf16   -- output rows [j*tr, (j+1)*tr) flattened
    """
    j = pl.program_id(1)
    r0 = j * tr
    c4 = x_ref.shape[-1]                     # 4 * Cin
    acc = None
    for t, (da, db) in enumerate(_TAPS):
        tap = x_ref[0, pl.ds(r0 + da, tr), pl.ds(db, wo), :]      # (tr, wo, 4*Cin)
        lhs = tap.reshape(tr * wo, c4)                            # collapse rows
        rhs = w_ref[pl.ds(t * c4, c4), :]                         # (4*Cin, Cout)
        part = jnp.dot(lhs, rhs, preferred_element_type=jnp.float32)
        acc = part if acc is None else acc + part
    y = acc + b_ref[...]
    y = jnp.where(y >= 0.0, y, _LEAKY_SLOPE * y)                  # LeakyReLU(0.2)
    # TODO(synk): Dropout(0.3) is identity in eval mode.
    o_ref[0] = y.astype(o_ref.dtype)


def _final_kernel(x_ref, w_ref, b_ref, w5_ref, o_ref, *, ho, wo):
    """Layer-4 conv+BN+LeakyReLU fused with layer-5 conv(4x4 valid, Cout=1)+Sigmoid.

    x_ref : (1, 5, 5, 4*Cin) bf16    w_ref : (16*Cin, C4) bf16
    b_ref : (1, C4) f32              w5_ref: (ho*wo, C4) bf16
    o_ref : (1, 1, 128) f32          (sigmoid prob broadcast over 128 lanes)
    """
    c4 = x_ref.shape[-1]
    logit = jnp.zeros((1, 1), jnp.float32)
    for oi in range(ho):                                          # per output row
        acc = None
        for t, (da, db) in enumerate(_TAPS):
            lhs = x_ref[0, oi + da, pl.ds(db, wo), :]             # (wo, 4*Cin)
            rhs = w_ref[pl.ds(t * c4, c4), :]                     # (4*Cin, C4)
            part = jnp.dot(lhs, rhs, preferred_element_type=jnp.float32)
            acc = part if acc is None else acc + part
        y = acc + b_ref[...]
        y = jnp.where(y >= 0.0, y, _LEAKY_SLOPE * y)              # (wo, C4) f32
        w5 = w5_ref[pl.ds(oi * wo, wo), :].astype(jnp.float32)
        logit = logit + jnp.sum(y * w5, keepdims=True)            # VPU dot (layer 5)
    prob = jax.nn.sigmoid(logit)                                  # (1, 1)
    o_ref[0] = prob * jnp.ones((1, 128), jnp.float32)


# ----------------------------------------------------------------------------
# pallas_call wrappers
# ----------------------------------------------------------------------------
def _conv_layer(xs, w_mat, bias, *, ho, wo, cout, row_blocks):
    n, hs, ws, c4 = xs.shape
    tr = ho // row_blocks
    kern = functools.partial(_conv_lrelu_kernel, tr=tr, wo=wo)
    return pl.pallas_call(
        kern,
        out_shape=jax.ShapeDtypeStruct((n, ho * wo, cout), jnp.bfloat16),
        grid_spec=pltpu.PrefetchScalarGridSpec(
            num_scalar_prefetch=0,
            grid=(n, row_blocks),
            in_specs=[
                pl.BlockSpec((1, hs, ws, c4), lambda i, j: (i, 0, 0, 0)),
                pl.BlockSpec(w_mat.shape, lambda i, j: (0, 0)),
                pl.BlockSpec((1, cout), lambda i, j: (0, 0)),
            ],
            out_specs=pl.BlockSpec((1, tr * wo, cout), lambda i, j: (i, j, 0)),
        ),
        compiler_params=pltpu.CompilerParams(
            dimension_semantics=("parallel", "parallel"),
            vmem_limit_bytes=32 * 1024 * 1024),
    )(xs, w_mat, bias)


def _final_layer(xs, w_mat, bias, w5_mat, *, ho, wo):
    n, hs, ws, c4 = xs.shape
    cout = w_mat.shape[1]
    kern = functools.partial(_final_kernel, ho=ho, wo=wo)
    return pl.pallas_call(
        kern,
        out_shape=jax.ShapeDtypeStruct((n, 1, 128), jnp.float32),
        grid_spec=pltpu.PrefetchScalarGridSpec(
            num_scalar_prefetch=0,
            grid=(n,),
            in_specs=[
                pl.BlockSpec((1, hs, ws, c4), lambda i: (i, 0, 0, 0)),
                pl.BlockSpec(w_mat.shape, lambda i: (0, 0)),
                pl.BlockSpec((1, cout), lambda i: (0, 0)),
                pl.BlockSpec(w5_mat.shape, lambda i: (0, 0)),
            ],
            out_specs=pl.BlockSpec((1, 1, 128), lambda i: (i, 0, 0)),
        ),
        compiler_params=pltpu.CompilerParams(
            dimension_semantics=("parallel",),
            vmem_limit_bytes=32 * 1024 * 1024),
    )(xs, w_mat, bias, w5_mat)


# ----------------------------------------------------------------------------
# Plain-JAX glue: pad + space-to-depth, weight packing (done once at init)
# ----------------------------------------------------------------------------
def _pad_s2d(x_nhwc, pad=1):
    """(N,H,W,C) -> zero-pad spatial by `pad`, space-to-depth by 2:
    (N, (H+2p)/2, (W+2p)/2, 4*C); channel order (pi, pj, c), c fastest."""
    n, h, w, c = x_nhwc.shape
    xp = jnp.pad(x_nhwc, ((0, 0), (pad, pad), (pad, pad), (0, 0)))
    hp, wp = h + 2 * pad, w + 2 * pad
    xs = xp.reshape(n, hp // 2, 2, wp // 2, 2, c)
    xs = jnp.transpose(xs, (0, 1, 3, 2, 4, 5))
    return xs.reshape(n, hp // 2, wp // 2, 4 * c)


def _prep_conv_weight(w_oihw, scale):
    """(Cout,Cin,4,4) OIHW -> (16*Cin, Cout) matching the in-kernel tap/s2d order,
    with the eval-mode BatchNorm scale folded into each output column."""
    cout, cin, _, _ = w_oihw.shape
    w6 = w_oihw.reshape(cout, cin, 2, 2, 2, 2)      # (co, ci, a, pi, b, pj)
    w6 = jnp.transpose(w6, (2, 4, 3, 5, 1, 0))      # (a, b, pi, pj, ci, co)
    w_mat = w6.reshape(16 * cin, cout) * scale[None, :]
    return w_mat.astype(jnp.bfloat16)


def init_discriminator_params(key, in_channel, features):
    cin_pad = ((in_channel + 7) // 8) * 8           # pad Cin -> multiple of 8
    chans = [cin_pad, features, features * 2, features * 4, features * 8]
    has_bn = [False, True, True, True]
    layers = []
    for li in range(4):
        key, wk, gk = jax.random.split(key, 3)
        cin = in_channel if li == 0 else chans[li]
        cout = chans[li + 1]
        w = 0.02 * jax.random.normal(wk, (cout, cin, 4, 4), jnp.float32)  # OIHW
        if li == 0 and cin_pad != cin:
            w = jnp.pad(w, ((0, 0), (0, cin_pad - cin), (0, 0), (0, 0)))
        if has_bn[li]:
            gamma = 1.0 + 0.02 * jax.random.normal(gk, (cout,), jnp.float32)
            beta = jnp.zeros((cout,), jnp.float32)
            running_mean = jnp.zeros((cout,), jnp.float32)
            running_var = jnp.ones((cout,), jnp.float32)
            scale = gamma / jnp.sqrt(running_var + _BN_EPS)
            bias = beta - running_mean * scale
        else:
            scale = jnp.ones((cout,), jnp.float32)
            bias = jnp.zeros((cout,), jnp.float32)
        layers.append({
            "w_mat": _prep_conv_weight(w, scale),                 # (16*Cin, Cout) bf16
            "bias": bias.reshape(1, cout).astype(jnp.float32),
            "cout": cout,
        })
    key, w5k = jax.random.split(key)
    w5 = 0.02 * jax.random.normal(w5k, (1, features * 8, 4, 4), jnp.float32)
    w5_mat = jnp.transpose(w5, (0, 2, 3, 1)).reshape(16, features * 8)
    return {"cin_pad": cin_pad, "layers": layers,
            "w5_mat": w5_mat.astype(jnp.bfloat16)}


# ----------------------------------------------------------------------------
# Forward pass (eval semantics)
# ----------------------------------------------------------------------------
def discriminator_forward(x_nchw, params):
    n = x_nchw.shape[0]
    x = jnp.transpose(x_nchw, (0, 2, 3, 1)).astype(jnp.bfloat16)  # NCHW -> NHWC bf16
    cin = x.shape[-1]
    if params["cin_pad"] > cin:
        x = jnp.pad(x, ((0, 0), (0, 0), (0, 0), (0, params["cin_pad"] - cin)))
    h = x.shape[1]
    layers = params["layers"]
    # layers 1-3: conv (+BN) + LeakyReLU ; Dropout(0.3) is identity in eval mode
    for li in range(3):
        ho = h // 2
        xs = _pad_s2d(x, pad=1)
        lyr = layers[li]
        row_blocks = 2 if ho >= 32 else 1   # >=2 parallel blocks on the big layer (v7x)
        y = _conv_layer(xs, lyr["w_mat"], lyr["bias"],
                        ho=ho, wo=ho, cout=lyr["cout"], row_blocks=row_blocks)
        x = y.reshape(n, ho, ho, lyr["cout"])
        h = ho
    # layer 4 (conv+BN+LeakyReLU) fused with layer 5 (conv 4x4 valid -> Sigmoid)
    xs = _pad_s2d(x, pad=1)
    lyr = layers[3]
    ho = h // 2
    probs = _final_layer(xs, lyr["w_mat"], lyr["bias"], params["w5_mat"],
                         ho=ho, wo=ho)
    return probs[:, 0, :1].reshape(n, 1, 1, 1)


if __name__ == "__main__":
    key = jax.random.PRNGKey(0)
    pkey, xkey = jax.random.split(key)

    in_channel, features = 3, 8
    params = init_discriminator_params(pkey, in_channel, features)

    # DCGAN discriminator geometry: 64x64 input -> 1x1 output after 5 stride-2 convs.
    x = jax.random.normal(xkey, (2, in_channel, 64, 64), jnp.float32)

    fwd = jax.jit(functools.partial(discriminator_forward, params=params))
    out = jax.block_until_ready(fwd(x))

    assert out.shape == (2, 1, 1, 1), out.shape
    assert bool(jnp.all(jnp.isfinite(out)))
    assert bool(jnp.all((out >= 0.0) & (out <= 1.0)))
    print("KERNEL_OK")
</pallas_src>

<mosaic_0001>
module attributes {stable_mosaic.version = 11 : i64} {
  func.func @_conv_lrelu_kernel(%arg0: i32, %arg1: i32, %arg2: memref<1x33x33x32xbf16, #tpu.memory_space<vmem>>, %arg3: memref<128x8xbf16, #tpu.memory_space<vmem>>, %arg4: memref<1x8xf32, #tpu.memory_space<vmem>>, %arg5: memref<1x512x8xbf16, #tpu.memory_space<vmem>>) attributes {dimension_semantics = [#tpu.dimension_semantics<parallel>, #tpu.dimension_semantics<parallel>], iteration_bounds = array<i64: 2, 2>, scalar_prefetch = 0 : i64, scratch_operands = 0 : i64, tpu.core_type = #tpu.core_type<tc>, window_params = [{transform_indices = @transform_0, window_bounds = array<i64: 1, 33, 33, 32>}, {pipeline_mode = #tpu.pipeline_mode<synchronous>, transform_indices = @transform_1, window_bounds = array<i64: 128, 8>}, {pipeline_mode = #tpu.pipeline_mode<synchronous>, transform_indices = @transform_2, window_bounds = array<i64: 1, 8>}, {transform_indices = @transform_3, window_bounds = array<i64: 1, 512, 8>}]} {
    %c16_i32 = arith.constant 16 : i32
    %0 = arith.muli %arg1, %c16_i32 : i32
    %c0_i32 = arith.constant 0 : i32
    %1 = arith.addi %0, %c0_i32 : i32
    %c0 = arith.constant 0 : index
    %2 = arith.index_cast %1 : i32 to index
    %c0_0 = arith.constant 0 : index
    %c0_1 = arith.constant 0 : index
    %3 = vector.load %arg2[%c0, %2, %c0_0, %c0_1] : memref<1x33x33x32xbf16, #tpu.memory_space<vmem>>, vector<1x16x32x32xbf16>
    %4 = vector.shape_cast %3 : vector<1x16x32x32xbf16> to vector<16x32x32xbf16>
    %5 = vector.shape_cast %4 : vector<16x32x32xbf16> to vector<512x32xbf16>
    %c0_2 = arith.constant 0 : index
    %c0_3 = arith.constant 0 : index
    %6 = vector.load %arg3[%c0_2, %c0_3] : memref<128x8xbf16, #tpu.memory_space<vmem>>, vector<32x8xbf16>
    %cst = arith.constant dense<0.000000e+00> : vector<512x8xf32>
    %7 = tpu.matmul %5, %6, %cst {dimension_numbers = #tpu.dot_dimension_numbers<[1], [0], [0], [1], [0, 0, 1, 1], [], []>} : vector<512x32xbf16>, vector<32x8xbf16>, vector<512x8xf32> -> vector<512x8xf32>
    %c0_i32_4 = arith.constant 0 : i32
    %8 = arith.addi %0, %c0_i32_4 : i32
    %c0_5 = arith.constant 0 : index
    %9 = arith.index_cast %8 : i32 to index
    %c1 = arith.constant 1 : index
    %c0_6 = arith.constant 0 : index
    %10 = vector.load %arg2[%c0_5, %9, %c1, %c0_6] : memref<1x33x33x32xbf16, #tpu.memory_space<vmem>>, vector<1x16x32x32xbf16>
    %11 = vector.shape_cast %10 : vector<1x16x32x32xbf16> to vector<16x32x32xbf16>
    %12 = vector.shape_cast %11 : vector<16x32x32xbf16> to vector<512x32xbf16>
    %c32 = arith.constant 32 : index
    %c0_7 = arith.constant 0 : index
    %13 = vector.load %arg3[%c32, %c0_7] : memref<128x8xbf16, #tpu.memory_space<vmem>>, vector<32x8xbf16>
    %cst_8 = arith.constant dense<0.000000e+00> : vector<512x8xf32>
    %14 = tpu.matmul %12, %13, %cst_8 {dimension_numbers = #tpu.dot_dimension_numbers<[1], [0], [0], [1], [0, 0, 1, 1], [], []>} : vector<512x32xbf16>, vector<32x8xbf16>, vector<512x8xf32> -> vector<512x8xf32>
    %15 = arith.addf %7, %14 : vector<512x8xf32>
    %c1_i32 = arith.constant 1 : i32
    %16 = arith.addi %0, %c1_i32 : i32
    %c0_9 = arith.constant 0 : index
    %17 = arith.index_cast %16 : i32 to index
    %c0_10 = arith.constant 0 : index
    %c0_11 = arith.constant 0 : index
    %18 = vector.load %arg2[%c0_9, %17, %c0_10, %c0_11] : memref<1x33x33x32xbf16, #tpu.memory_space<vmem>>, vector<1x16x32x32xbf16>
    %19 = vector.shape_cast %18 : vector<1x16x32x32xbf16> to vector<16x32x32xbf16>
    %20 = vector.shape_cast %19 : vector<16x32x32xbf16> to vector<512x32xbf16>
    %c64 = arith.constant 64 : index
    %c0_12 = arith.constant 0 : index
    %21 = vector.load %arg3[%c64, %c0_12] : memref<128x8xbf16, #tpu.memory_space<vmem>>, vector<32x8xbf16>
    %cst_13 = arith.constant dense<0.000000e+00> : vector<512x8xf32>
    %22 = tpu.matmul %20, %21, %cst_13 {dimension_numbers = #tpu.dot_dimension_numbers<[1], [0], [0], [1], [0, 0, 1, 1], [], []>} : vector<512x32xbf16>, vector<32x8xbf16>, vector<512x8xf32> -> vector<512x8xf32>
    %23 = arith.addf %15, %22 : vector<512x8xf32>
    %c1_i32_14 = arith.constant 1 : i32
    %24 = arith.addi %0, %c1_i32_14 : i32
    %c0_15 = arith.constant 0 : index
    %25 = arith.index_cast %24 : i32 to index
    %c1_16 = arith.constant 1 : index
    %c0_17 = arith.constant 0 : index
    %26 = vector.load %arg2[%c0_15, %25, %c1_16, %c0_17] : memref<1x33x33x32xbf16, #tpu.memory_space<vmem>>, vector<1x16x32x32xbf16>
    %27 = vector.shape_cast %26 : vector<1x16x32x32xbf16> to vector<16x32x32xbf16>
    %28 = vector.shape_cast %27 : vector<16x32x32xbf16> to vector<512x32xbf16>
    %c96 = arith.constant 96 : index
    %c0_18 = arith.constant 0 : index
    %29 = vector.load %arg3[%c96, %c0_18] : memref<128x8xbf16, #tpu.memory_space<vmem>>, vector<32x8xbf16>
    %cst_19 = arith.constant dense<0.000000e+00> : vector<512x8xf32>
    %30 = tpu.matmul %28, %29, %cst_19 {dimension_numbers = #tpu.dot_dimension_numbers<[1], [0], [0], [1], [0, 0, 1, 1], [], []>} : vector<512x32xbf16>, vector<32x8xbf16>, vector<512x8xf32> -> vector<512x8xf32>
    %31 = arith.addf %23, %30 : vector<512x8xf32>
    %c0_20 = arith.constant 0 : index
    %c0_21 = arith.constant 0 : index
    %32 = vector.load %arg4[%c0_20, %c0_21] : memref<1x8xf32, #tpu.memory_space<vmem>>, vector<1x8xf32>
    %33 = vector.broadcast %32 : vector<1x8xf32> to vector<512x8xf32>
    %34 = arith.addf %31, %33 : vector<512x8xf32>
    %cst_22 = arith.constant 0.000000e+00 : f32
    %35 = vector.broadcast %cst_22 : f32 to vector<512x8xf32>
    %36 = arith.cmpf oge, %34, %35 : vector<512x8xf32>
    %cst_23 = arith.constant 2.000000e-01 : f32
    %37 = vector.broadcast %cst_23 : f32 to vector<512x8xf32>
    %38 = arith.mulf %37, %34 : vector<512x8xf32>
    %39 = arith.select %36, %34, %38 : vector<512x8xi1>, vector<512x8xf32>
    %40 = arith.truncf %39 : vector<512x8xf32> to vector<512x8xbf16>
    %c0_24 = arith.constant 0 : index
    %c0_25 = arith.constant 0 : index
    %c0_26 = arith.constant 0 : index
    %41 = vector.load %arg5[%c0_24, %c0_25, %c0_26] : memref<1x512x8xbf16, #tpu.memory_space<vmem>>, vector<1x512x8xbf16>
    %42 = vector.shape_cast %41 : vector<1x512x8xbf16> to vector<512x8xbf16>
    %43 = vector.shape_cast %40 : vector<512x8xbf16> to vector<1x512x8xbf16>
    tpu.vector_store %arg5[%c0_24, %c0_25, %c0_26], %43 {strides = array<i32>} : memref<1x512x8xbf16, #tpu.memory_space<vmem>>, vector<1x512x8xbf16>,
    return
  }
  func.func @transform_0(%arg0: i32, %arg1: i32) -> (i32, i32, i32, i32) {
    %c0_i32 = arith.constant 0 : i32
    %c0_i32_0 = arith.constant 0 : i32
    %c0_i32_1 = arith.constant 0 : i32
    %c0_i32_2 = arith.constant 0 : i32
    return %arg0, %c0_i32, %c0_i32_0, %c0_i32_1 : i32, i32, i32, i32
  }
  func.func @transform_1(%arg0: i32, %arg1: i32) -> (i32, i32) {
    %c0_i32 = arith.constant 0 : i32
    %c0_i32_0 = arith.constant 0 : i32
    %c0_i32_1 = arith.constant 0 : i32
    return %c0_i32, %c0_i32_0 : i32, i32
  }
  func.func @transform_2(%arg0: i32, %arg1: i32) -> (i32, i32) {
    %c0_i32 = arith.constant 0 : i32
    %c0_i32_0 = arith.constant 0 : i32
    %c0_i32_1 = arith.constant 0 : i32
    return %c0_i32, %c0_i32_0 : i32, i32
  }
  func.func @transform_3(%arg0: i32, %arg1: i32) -> (i32, i32, i32) {
    %c0_i32 = arith.constant 0 : i32
    %c0_i32_0 = arith.constant 0 : i32
    return %arg0, %arg1, %c0_i32 : i32, i32, i32
  }
}

module attributes {stable_mosaic.version = 11 : i64} {
  func.func @_conv_lrelu_kernel(%arg0: i32, %arg1: i32, %arg2: memref<1x17x17x32xbf16, #tpu.memory_space<vmem>>, %arg3: memref<128x16xbf16, #tpu.memory_space<vmem>>, %arg4: memref<1x16xf32, #tpu.memory_space<vmem>>, %arg5: memref<1x256x16xbf16, #tpu.memory_space<vmem>>) attributes {dimension_semantics = [#tpu.dimension_semantics<parallel>, #tpu.dimension_semantics<parallel>], iteration_bounds = array<i64: 2, 1>, scalar_prefetch = 0 : i64, scratch_operands = 0 : i64, tpu.core_type = #tpu.core_type<tc>, window_params = [{transform_indices = @transform_0, window_bounds = array<i64: 1, 17, 17, 32>}, {pipeline_mode = #tpu.pipeline_mode<synchronous>, transform_indices = @transform_1, window_bounds = array<i64: 128, 16>}, {pipeline_mode = #tpu.pipeline_mode<synchronous>, transform_indices = @transform_2, window_bounds = array<i64: 1, 16>}, {transform_indices = @transform_3, window_bounds = array<i64: 1, 256, 16>}]} {
    %c16_i32 = arith.constant 16 : i32
    %0 = arith.muli %arg1, %c16_i32 : i32
    %c0_i32 = arith.constant 0 : i32
    %1 = arith.addi %0, %c0_i32 : i32
    %c0 = arith.constant 0 : index
    %2 = arith.index_cast %1 : i32 to index
    %c0_0 = arith.constant 0 : index
    %c0_1 = arith.constant 0 : index
    %3 = vector.load %arg2[%c0, %2, %c0_0, %c0_1] : memref<1x17x17x32xbf16, #tpu.memory_space<vmem>>, vector<1x16x16x32xbf16>
    %4 = vector.shape_cast %3 : vector<1x16x16x32xbf16> to vector<16x16x32xbf16>
    %5 = vector.shape_cast %4 : vector<16x16x32xbf16> to vector<256x32xbf16>
    %c0_2 = arith.constant 0 : index
    %c0_3 = arith.constant 0 : index
    %6 = vector.load %arg3[%c0_2, %c0_3] : memref<128x16xbf16, #tpu.memory_space<vmem>>, vector<32x16xbf16>
    %cst = arith.constant dense<0.000000e+00> : vector<256x16xf32>
    %7 = tpu.matmul %5, %6, %cst {dimension_numbers = #tpu.dot_dimension_numbers<[1], [0], [0], [1], [0, 0, 1, 1], [], []>} : vector<256x32xbf16>, vector<32x16xbf16>, vector<256x16xf32> -> vector<256x16xf32>
    %c0_i32_4 = arith.constant 0 : i32
    %8 = arith.addi %0, %c0_i32_4 : i32
    %c0_5 = arith.constant 0 : index
    %9 = arith.index_cast %8 : i32 to index
    %c1 = arith.constant 1 : index
    %c0_6 = arith.constant 0 : index
    %10 = vector.load %arg2[%c0_5, %9, %c1, %c0_6] : memref<1x17x17x32xbf16, #tpu.memory_space<vmem>>, vector<1x16x16x32xbf16>
    %11 = vector.shape_cast %10 : vector<1x16x16x32xbf16> to vector<16x16x32xbf16>
    %12 = vector.shape_cast %11 : vector<16x16x32xbf16> to vector<256x32xbf16>
    %c32 = arith.constant 32 : index
    %c0_7 = arith.constant 0 : index
    %13 = vector.load %arg3[%c32, %c0_7] : memref<128x16xbf16, #tpu.memory_space<vmem>>, vector<32x16xbf16>
    %cst_8 = arith.constant dense<0.000000e+00> : vector<256x16xf32>
    %14 = tpu.matmul %12, %13, %cst_8 {dimension_numbers = #tpu.dot_dimension_numbers<[1], [0], [0], [1], [0, 0, 1, 1], [], []>} : vector<256x32xbf16>, vector<32x16xbf16>, vector<256x16xf32> -> vector<256x16xf32>
    %15 = arith.addf %7, %14 : vector<256x16xf32>
    %c1_i32 = arith.constant 1 : i32
    %16 = arith.addi %0, %c1_i32 : i32
    %c0_9 = arith.constant 0 : index
    %17 = arith.index_cast %16 : i32 to index
    %c0_10 = arith.constant 0 : index
    %c0_11 = arith.constant 0 : index
    %18 = vector.load %arg2[%c0_9, %17, %c0_10, %c0_11] : memref<1x17x17x32xbf16, #tpu.memory_space<vmem>>, vector<1x16x16x32xbf16>
    %19 = vector.shape_cast %18 : vector<1x16x16x32xbf16> to vector<16x16x32xbf16>
    %20 = vector.shape_cast %19 : vector<16x16x32xbf16> to vector<256x32xbf16>
    %c64 = arith.constant 64 : index
    %c0_12 = arith.constant 0 : index
    %21 = vector.load %arg3[%c64, %c0_12] : memref<128x16xbf16, #tpu.memory_space<vmem>>, vector<32x16xbf16>
    %cst_13 = arith.constant dense<0.000000e+00> : vector<256x16xf32>
    %22 = tpu.matmul %20, %21, %cst_13 {dimension_numbers = #tpu.dot_dimension_numbers<[1], [0], [0], [1], [0, 0, 1, 1], [], []>} : vector<256x32xbf16>, vector<32x16xbf16>, vector<256x16xf32> -> vector<256x16xf32>
    %23 = arith.addf %15, %22 : vector<256x16xf32>
    %c1_i32_14 = arith.constant 1 : i32
    %24 = arith.addi %0, %c1_i32_14 : i32
    %c0_15 = arith.constant 0 : index
    %25 = arith.index_cast %24 : i32 to index
    %c1_16 = arith.constant 1 : index
    %c0_17 = arith.constant 0 : index
    %26 = vector.load %arg2[%c0_15, %25, %c1_16, %c0_17] : memref<1x17x17x32xbf16, #tpu.memory_space<vmem>>, vector<1x16x16x32xbf16>
    %27 = vector.shape_cast %26 : vector<1x16x16x32xbf16> to vector<16x16x32xbf16>
    %28 = vector.shape_cast %27 : vector<16x16x32xbf16> to vector<256x32xbf16>
    %c96 = arith.constant 96 : index
    %c0_18 = arith.constant 0 : index
    %29 = vector.load %arg3[%c96, %c0_18] : memref<128x16xbf16, #tpu.memory_space<vmem>>, vector<32x16xbf16>
    %cst_19 = arith.constant dense<0.000000e+00> : vector<256x16xf32>
    %30 = tpu.matmul %28, %29, %cst_19 {dimension_numbers = #tpu.dot_dimension_numbers<[1], [0], [0], [1], [0, 0, 1, 1], [], []>} : vector<256x32xbf16>, vector<32x16xbf16>, vector<256x16xf32> -> vector<256x16xf32>
    %31 = arith.addf %23, %30 : vector<256x16xf32>
    %c0_20 = arith.constant 0 : index
    %c0_21 = arith.constant 0 : index
    %32 = vector.load %arg4[%c0_20, %c0_21] : memref<1x16xf32, #tpu.memory_space<vmem>>, vector<1x16xf32>
    %33 = vector.broadcast %32 : vector<1x16xf32> to vector<256x16xf32>
    %34 = arith.addf %31, %33 : vector<256x16xf32>
    %cst_22 = arith.constant 0.000000e+00 : f32
    %35 = vector.broadcast %cst_22 : f32 to vector<256x16xf32>
    %36 = arith.cmpf oge, %34, %35 : vector<256x16xf32>
    %cst_23 = arith.constant 2.000000e-01 : f32
    %37 = vector.broadcast %cst_23 : f32 to vector<256x16xf32>
    %38 = arith.mulf %37, %34 : vector<256x16xf32>
    %39 = arith.select %36, %34, %38 : vector<256x16xi1>, vector<256x16xf32>
    %40 = arith.truncf %39 : vector<256x16xf32> to vector<256x16xbf16>
    %c0_24 = arith.constant 0 : index
    %c0_25 = arith.constant 0 : index
    %c0_26 = arith.constant 0 : index
    %41 = vector.load %arg5[%c0_24, %c0_25, %c0_26] : memref<1x256x16xbf16, #tpu.memory_space<vmem>>, vector<1x256x16xbf16>
    %42 = vector.shape_cast %41 : vector<1x256x16xbf16> to vector<256x16xbf16>
    %43 = vector.shape_cast %40 : vector<256x16xbf16> to vector<1x256x16xbf16>
    tpu.vector_store %arg5[%c0_24, %c0_25, %c0_26], %43 {strides = array<i32>} : memref<1x256x16xbf16, #tpu.memory_space<vmem>>, vector<1x256x16xbf16>,
    return
  }
  func.func @transform_0(%arg0: i32, %arg1: i32) -> (i32, i32, i32, i32) {
    %c0_i32 = arith.constant 0 : i32
    %c0_i32_0 = arith.constant 0 : i32
    %c0_i32_1 = arith.constant 0 : i32
    %c0_i32_2 = arith.constant 0 : i32
    return %arg0, %c0_i32, %c0_i32_0, %c0_i32_1 : i32, i32, i32, i32
  }
  func.func @transform_1(%arg0: i32, %arg1: i32) -> (i32, i32) {
    %c0_i32 = arith.constant 0 : i32
    %c0_i32_0 = arith.constant 0 : i32
    %c0_i32_1 = arith.constant 0 : i32
    return %c0_i32, %c0_i32_0 : i32, i32
  }
  func.func @transform_2(%arg0: i32, %arg1: i32) -> (i32, i32) {
    %c0_i32 = arith.constant 0 : i32
    %c0_i32_0 = arith.constant 0 : i32
    %c0_i32_1 = arith.constant 0 : i32
    return %c0_i32, %c0_i32_0 : i32, i32
  }
  func.func @transform_3(%arg0: i32, %arg1: i32) -> (i32, i32, i32) {
    %c0_i32 = arith.constant 0 : i32
    %c0_i32_0 = arith.constant 0 : i32
    return %arg0, %arg1, %c0_i32 : i32, i32, i32
  }
}

module attributes {stable_mosaic.version = 11 : i64} {
  func.func @_conv_lrelu_kernel(%arg0: i32, %arg1: i32, %arg2: memref<1x9x9x64xbf16, #tpu.memory_space<vmem>>, %arg3: memref<256x32xbf16, #tpu.memory_space<vmem>>, %arg4: memref<1x32xf32, #tpu.memory_space<vmem>>, %arg5: memref<1x64x32xbf16, #tpu.memory_space<vmem>>) attributes {dimension_semantics = [#tpu.dimension_semantics<parallel>, #tpu.dimension_semantics<parallel>], iteration_bounds = array<i64: 2, 1>, scalar_prefetch = 0 : i64, scratch_operands = 0 : i64, tpu.core_type = #tpu.core_type<tc>, window_params = [{transform_indices = @transform_0, window_bounds = array<i64: 1, 9, 9, 64>}, {pipeline_mode = #tpu.pipeline_mode<synchronous>, transform_indices = @transform_1, window_bounds = array<i64: 256, 32>}, {pipeline_mode = #tpu.pipeline_mode<synchronous>, transform_indices = @transform_2, window_bounds = array<i64: 1, 32>}, {transform_indices = @transform_3, window_bounds = array<i64: 1, 64, 32>}]} {
    %c8_i32 = arith.constant 8 : i32
    %0 = arith.muli %arg1, %c8_i32 : i32
    %c0_i32 = arith.constant 0 : i32
    %1 = arith.addi %0, %c0_i32 : i32
    %c0 = arith.constant 0 : index
    %2 = arith.index_cast %1 : i32 to index
    %c0_0 = arith.constant 0 : index
    %c0_1 = arith.constant 0 : index
    %3 = vector.load %arg2[%c0, %2, %c0_0, %c0_1] : memref<1x9x9x64xbf16, #tpu.memory_space<vmem>>, vector<1x8x8x64xbf16>
    %4 = vector.shape_cast %3 : vector<1x8x8x64xbf16> to vector<8x8x64xbf16>
    %5 = vector.shape_cast %4 : vector<8x8x64xbf16> to vector<64x64xbf16>
    %c0_2 = arith.constant 0 : index
    %c0_3 = arith.constant 0 : index
    %6 = vector.load %arg3[%c0_2, %c0_3] : memref<256x32xbf16, #tpu.memory_space<vmem>>, vector<64x32xbf16>
    %cst = arith.constant dense<0.000000e+00> : vector<64x32xf32>
    %7 = tpu.matmul %5, %6, %cst {dimension_numbers = #tpu.dot_dimension_numbers<[1], [0], [0], [1], [0, 0, 1, 1], [], []>} : vector<64x64xbf16>, vector<64x32xbf16>, vector<64x32xf32> -> vector<64x32xf32>
    %c0_i32_4 = arith.constant 0 : i32
    %8 = arith.addi %0, %c0_i32_4 : i32
    %c0_5 = arith.constant 0 : index
    %9 = arith.index_cast %8 : i32 to index
    %c1 = arith.constant 1 : index
    %c0_6 = arith.constant 0 : index
    %10 = vector.load %arg2[%c0_5, %9, %c1, %c0_6] : memref<1x9x9x64xbf16, #tpu.memory_space<vmem>>, vector<1x8x8x64xbf16>
    %11 = vector.shape_cast %10 : vector<1x8x8x64xbf16> to vector<8x8x64xbf16>
    %12 = vector.shape_cast %11 : vector<8x8x64xbf16> to vector<64x64xbf16>
    %c64 = arith.constant 64 : index
    %c0_7 = arith.constant 0 : index
    %13 = vector.load %arg3[%c64, %c0_7] : memref<256x32xbf16, #tpu.memory_space<vmem>>, vector<64x32xbf16>
    %cst_8 = arith.constant dense<0.000000e+00> : vector<64x32xf32>
    %14 = tpu.matmul %12, %13, %cst_8 {dimension_numbers = #tpu.dot_dimension_numbers<[1], [0], [0], [1], [0, 0, 1, 1], [], []>} : vector<64x64xbf16>, vector<64x32xbf16>, vector<64x32xf32> -> vector<64x32xf32>
    %15 = arith.addf %7, %14 : vector<64x32xf32>
    %c1_i32 = arith.constant 1 : i32
    %16 = arith.addi %0, %c1_i32 : i32
    %c0_9 = arith.constant 0 : index
    %17 = arith.index_cast %16 : i32 to index
    %c0_10 = arith.constant 0 : index
    %c0_11 = arith.constant 0 : index
    %18 = vector.load %arg2[%c0_9, %17, %c0_10, %c0_11] : memref<1x9x9x64xbf16, #tpu.memory_space<vmem>>, vector<1x8x8x64xbf16>
    %19 = vector.shape_cast %18 : vector<1x8x8x64xbf16> to vector<8x8x64xbf16>
    %20 = vector.shape_cast %19 : vector<8x8x64xbf16> to vector<64x64xbf16>
    %c128 = arith.constant 128 : index
    %c0_12 = arith.constant 0 : index
    %21 = vector.load %arg3[%c128, %c0_12] : memref<256x32xbf16, #tpu.memory_space<vmem>>, vector<64x32xbf16>
    %cst_13 = arith.constant dense<0.000000e+00> : vector<64x32xf32>
    %22 = tpu.matmul %20, %21, %cst_13 {dimension_numbers = #tpu.dot_dimension_numbers<[1], [0], [0], [1], [0, 0, 1, 1], [], []>} : vector<64x64xbf16>, vector<64x32xbf16>, vector<64x32xf32> -> vector<64x32xf32>
    %23 = arith.addf %15, %22 : vector<64x32xf32>
    %c1_i32_14 = arith.constant 1 : i32
    %24 = arith.addi %0, %c1_i32_14 : i32
    %c0_15 = arith.constant 0 : index
    %25 = arith.index_cast %24 : i32 to index
    %c1_16 = arith.constant 1 : index
    %c0_17 = arith.constant 0 : index
    %26 = vector.load %arg2[%c0_15, %25, %c1_16, %c0_17] : memref<1x9x9x64xbf16, #tpu.memory_space<vmem>>, vector<1x8x8x64xbf16>
    %27 = vector.shape_cast %26 : vector<1x8x8x64xbf16> to vector<8x8x64xbf16>
    %28 = vector.shape_cast %27 : vector<8x8x64xbf16> to vector<64x64xbf16>
    %c192 = arith.constant 192 : index
    %c0_18 = arith.constant 0 : index
    %29 = vector.load %arg3[%c192, %c0_18] : memref<256x32xbf16, #tpu.memory_space<vmem>>, vector<64x32xbf16>
    %cst_19 = arith.constant dense<0.000000e+00> : vector<64x32xf32>
    %30 = tpu.matmul %28, %29, %cst_19 {dimension_numbers = #tpu.dot_dimension_numbers<[1], [0], [0], [1], [0, 0, 1, 1], [], []>} : vector<64x64xbf16>, vector<64x32xbf16>, vector<64x32xf32> -> vector<64x32xf32>
    %31 = arith.addf %23, %30 : vector<64x32xf32>
    %c0_20 = arith.constant 0 : index
    %c0_21 = arith.constant 0 : index
    %32 = vector.load %arg4[%c0_20, %c0_21] : memref<1x32xf32, #tpu.memory_space<vmem>>, vector<1x32xf32>
    %33 = vector.broadcast %32 : vector<1x32xf32> to vector<64x32xf32>
    %34 = arith.addf %31, %33 : vector<64x32xf32>
    %cst_22 = arith.constant 0.000000e+00 : f32
    %35 = vector.broadcast %cst_22 : f32 to vector<64x32xf32>
    %36 = arith.cmpf oge, %34, %35 : vector<64x32xf32>
    %cst_23 = arith.constant 2.000000e-01 : f32
    %37 = vector.broadcast %cst_23 : f32 to vector<64x32xf32>
    %38 = arith.mulf %37, %34 : vector<64x32xf32>
    %39 = arith.select %36, %34, %38 : vector<64x32xi1>, vector<64x32xf32>
    %40 = arith.truncf %39 : vector<64x32xf32> to vector<64x32xbf16>
    %c0_24 = arith.constant 0 : index
    %c0_25 = arith.constant 0 : index
    %c0_26 = arith.constant 0 : index
    %41 = vector.load %arg5[%c0_24, %c0_25, %c0_26] : memref<1x64x32xbf16, #tpu.memory_space<vmem>>, vector<1x64x32xbf16>
    %42 = vector.shape_cast %41 : vector<1x64x32xbf16> to vector<64x32xbf16>
    %43 = vector.shape_cast %40 : vector<64x32xbf16> to vector<1x64x32xbf16>
    tpu.vector_store %arg5[%c0_24, %c0_25, %c0_26], %43 {strides = array<i32>} : memref<1x64x32xbf16, #tpu.memory_space<vmem>>, vector<1x64x32xbf16>,
    return
  }
  func.func @transform_0(%arg0: i32, %arg1: i32) -> (i32, i32, i32, i32) {
    %c0_i32 = arith.constant 0 : i32
    %c0_i32_0 = arith.constant 0 : i32
    %c0_i32_1 = arith.constant 0 : i32
    %c0_i32_2 = arith.constant 0 : i32
    return %arg0, %c0_i32, %c0_i32_0, %c0_i32_1 : i32, i32, i32, i32
  }
  func.func @transform_1(%arg0: i32, %arg1: i32) -> (i32, i32) {
    %c0_i32 = arith.constant 0 : i32
    %c0_i32_0 = arith.constant 0 : i32
    %c0_i32_1 = arith.constant 0 : i32
    return %c0_i32, %c0_i32_0 : i32, i32
  }
  func.func @transform_2(%arg0: i32, %arg1: i32) -> (i32, i32) {
    %c0_i32 = arith.constant 0 : i32
    %c0_i32_0 = arith.constant 0 : i32
    %c0_i32_1 = arith.constant 0 : i32
    return %c0_i32, %c0_i32_0 : i32, i32
  }
  func.func @transform_3(%arg0: i32, %arg1: i32) -> (i32, i32, i32) {
    %c0_i32 = arith.constant 0 : i32
    %c0_i32_0 = arith.constant 0 : i32
    return %arg0, %arg1, %c0_i32 : i32, i32, i32
  }
}

module attributes {stable_mosaic.version = 11 : i64} {
  func.func @_final_kernel(%arg0: i32, %arg1: memref<1x5x5x128xbf16, #tpu.memory_space<vmem>>, %arg2: memref<512x64xbf16, #tpu.memory_space<vmem>>, %arg3: memref<1x64xf32, #tpu.memory_space<vmem>>, %arg4: memref<16x64xbf16, #tpu.memory_space<vmem>>, %arg5: memref<1x1x128xf32, #tpu.memory_space<vmem>>) attributes {dimension_semantics = [#tpu.dimension_semantics<parallel>], iteration_bounds = array<i64: 2>, scalar_prefetch = 0 : i64, scratch_operands = 0 : i64, tpu.core_type = #tpu.core_type<tc>, window_params = [{transform_indices = @transform_0, window_bounds = array<i64: 1, 5, 5, 128>}, {pipeline_mode = #tpu.pipeline_mode<synchronous>, transform_indices = @transform_1, window_bounds = array<i64: 512, 64>}, {pipeline_mode = #tpu.pipeline_mode<synchronous>, transform_indices = @transform_2, window_bounds = array<i64: 1, 64>}, {pipeline_mode = #tpu.pipeline_mode<synchronous>, transform_indices = @transform_3, window_bounds = array<i64: 16, 64>}, {transform_indices = @transform_4, window_bounds = array<i64: 1, 1, 128>}]} {
    %cst = arith.constant 0.000000e+00 : f32
    %0 = vector.broadcast %cst : f32 to vector<1x1xf32>
    %c0 = arith.constant 0 : index
    %c0_0 = arith.constant 0 : index
    %c0_1 = arith.constant 0 : index
    %c0_2 = arith.constant 0 : index
    %1 = vector.load %arg1[%c0, %c0_0, %c0_1, %c0_2] : memref<1x5x5x128xbf16, #tpu.memory_space<vmem>>, vector<1x1x4x128xbf16>
    %2 = vector.shape_cast %1 : vector<1x1x4x128xbf16> to vector<4x128xbf16>
    %c0_3 = arith.constant 0 : index
    %c0_4 = arith.constant 0 : index
    %3 = vector.load %arg2[%c0_3, %c0_4] : memref<512x64xbf16, #tpu.memory_space<vmem>>, vector<128x64xbf16>
    %cst_5 = arith.constant dense<0.000000e+00> : vector<4x64xf32>
    %4 = tpu.matmul %2, %3, %cst_5 {dimension_numbers = #tpu.dot_dimension_numbers<[1], [0], [0], [1], [0, 0, 1, 1], [], []>} : vector<4x128xbf16>, vector<128x64xbf16>, vector<4x64xf32> -> vector<4x64xf32>
    %c0_6 = arith.constant 0 : index
    %c0_7 = arith.constant 0 : index
    %c1 = arith.constant 1 : index
    %c0_8 = arith.constant 0 : index
    %5 = vector.load %arg1[%c0_6, %c0_7, %c1, %c0_8] : memref<1x5x5x128xbf16, #tpu.memory_space<vmem>>, vector<1x1x4x128xbf16>
    %6 = vector.shape_cast %5 : vector<1x1x4x128xbf16> to vector<4x128xbf16>
    %c128 = arith.constant 128 : index
    %c0_9 = arith.constant 0 : index
    %7 = vector.load %arg2[%c128, %c0_9] : memref<512x64xbf16, #tpu.memory_space<vmem>>, vector<128x64xbf16>
    %cst_10 = arith.constant dense<0.000000e+00> : vector<4x64xf32>
    %8 = tpu.matmul %6, %7, %cst_10 {dimension_numbers = #tpu.dot_dimension_numbers<[1], [0], [0], [1], [0, 0, 1, 1], [], []>} : vector<4x128xbf16>, vector<128x64xbf16>, vector<4x64xf32> -> vector<4x64xf32>
    %9 = arith.addf %4, %8 : vector<4x64xf32>
    %c0_11 = arith.constant 0 : index
    %c1_12 = arith.constant 1 : index
    %c0_13 = arith.constant 0 : index
    %c0_14 = arith.constant 0 : index
    %10 = vector.load %arg1[%c0_11, %c1_12, %c0_13, %c0_14] : memref<1x5x5x128xbf16, #tpu.memory_space<vmem>>, vector<1x1x4x128xbf16>
    %11 = vector.shape_cast %10 : vector<1x1x4x128xbf16> to vector<4x128xbf16>
    %c256 = arith.constant 256 : index
    %c0_15 = arith.constant 0 : index
    %12 = vector.load %arg2[%c256, %c0_15] : memref<512x64xbf16, #tpu.memory_space<vmem>>, vector<128x64xbf16>
    %cst_16 = arith.constant dense<0.000000e+00> : vector<4x64xf32>
    %13 = tpu.matmul %11, %12, %cst_16 {dimension_numbers = #tpu.dot_dimension_numbers<[1], [0], [0], [1], [0, 0, 1, 1], [], []>} : vector<4x128xbf16>, vector<128x64xbf16>, vector<4x64xf32> -> vector<4x64xf32>
    %14 = arith.addf %9, %13 : vector<4x64xf32>
    %c0_17 = arith.constant 0 : index
    %c1_18 = arith.constant 1 : index
    %c1_19 = arith.constant 1 : index
    %c0_20 = arith.constant 0 : index
    %15 = vector.load %arg1[%c0_17, %c1_18, %c1_19, %c0_20] : memref<1x5x5x128xbf16, #tpu.memory_space<vmem>>, vector<1x1x4x128xbf16>
    %16 = vector.shape_cast %15 : vector<1x1x4x128xbf16> to vector<4x128xbf16>
    %c384 = arith.constant 384 : index
    %c0_21 = arith.constant 0 : index
    %17 = vector.load %arg2[%c384, %c0_21] : memref<512x64xbf16, #tpu.memory_space<vmem>>, vector<128x64xbf16>
    %cst_22 = arith.constant dense<0.000000e+00> : vector<4x64xf32>
    %18 = tpu.matmul %16, %17, %cst_22 {dimension_numbers = #tpu.dot_dimension_numbers<[1], [0], [0], [1], [0, 0, 1, 1], [], []>} : vector<4x128xbf16>, vector<128x64xbf16>, vector<4x64xf32> -> vector<4x64xf32>
    %19 = arith.addf %14, %18 : vector<4x64xf32>
    %c0_23 = arith.constant 0 : index
    %c0_24 = arith.constant 0 : index
    %20 = vector.load %arg3[%c0_23, %c0_24] : memref<1x64xf32, #tpu.memory_space<vmem>>, vector<1x64xf32>
    %21 = vector.broadcast %20 : vector<1x64xf32> to vector<4x64xf32>
    %22 = arith.addf %19, %21 : vector<4x64xf32>
    %cst_25 = arith.constant 0.000000e+00 : f32
    %23 = vector.broadcast %cst_25 : f32 to vector<4x64xf32>
    %24 = arith.cmpf oge, %22, %23 : vector<4x64xf32>
    %cst_26 = arith.constant 2.000000e-01 : f32
    %25 = vector.broadcast %cst_26 : f32 to vector<4x64xf32>
    %26 = arith.mulf %25, %22 : vector<4x64xf32>
    %27 = arith.select %24, %22, %26 : vector<4x64xi1>, vector<4x64xf32>
    %c0_27 = arith.constant 0 : index
    %c0_28 = arith.constant 0 : index
    %28 = vector.load %arg4[%c0_27, %c0_28] : memref<16x64xbf16, #tpu.memory_space<vmem>>, vector<4x64xbf16>
    %29 = arith.extf %28 : vector<4x64xbf16> to vector<4x64xf32>
    %30 = arith.mulf %27, %29 : vector<4x64xf32>
    %31 = vector.shape_cast %30 : vector<4x64xf32> to vector<1x4x64xf32>
    %cst_29 = arith.constant dense<0.000000e+00> : vector<1xf32>
    %32 = vector.multi_reduction <add>, %31, %cst_29 [1, 2] : vector<1x4x64xf32> to vector<1xf32>
    %33 = vector.shape_cast %32 : vector<1xf32> to vector<1x1x1xf32>
    %34 = vector.extract %33[0, 0, 0] : f32 from vector<1x1x1xf32>
    %35 = vector.broadcast %34 : f32 to vector<1x1xf32>
    %36 = arith.addf %0, %35 : vector<1x1xf32>
    %c0_30 = arith.constant 0 : index
    %c1_31 = arith.constant 1 : index
    %c0_32 = arith.constant 0 : index
    %c0_33 = arith.constant 0 : index
    %37 = vector.load %arg1[%c0_30, %c1_31, %c0_32, %c0_33] : memref<1x5x5x128xbf16, #tpu.memory_space<vmem>>, vector<1x1x4x128xbf16>
    %38 = vector.shape_cast %37 : vector<1x1x4x128xbf16> to vector<4x128xbf16>
    %c0_34 = arith.constant 0 : index
    %c0_35 = arith.constant 0 : index
    %39 = vector.load %arg2[%c0_34, %c0_35] : memref<512x64xbf16, #tpu.memory_space<vmem>>, vector<128x64xbf16>
    %cst_36 = arith.constant dense<0.000000e+00> : vector<4x64xf32>
    %40 = tpu.matmul %38, %39, %cst_36 {dimension_numbers = #tpu.dot_dimension_numbers<[1], [0], [0], [1], [0, 0, 1, 1], [], []>} : vector<4x128xbf16>, vector<128x64xbf16>, vector<4x64xf32> -> vector<4x64xf32>
    %c0_37 = arith.constant 0 : index
    %c1_38 = arith.constant 1 : index
    %c1_39 = arith.constant 1 : index
    %c0_40 = arith.constant 0 : index
    %41 = vector.load %arg1[%c0_37, %c1_38, %c1_39, %c0_40] : memref<1x5x5x128xbf16, #tpu.memory_space<vmem>>, vector<1x1x4x128xbf16>
    %42 = vector.shape_cast %41 : vector<1x1x4x128xbf16> to vector<4x128xbf16>
    %c128_41 = arith.constant 128 : index
    %c0_42 = arith.constant 0 : index
    %43 = vector.load %arg2[%c128_41, %c0_42] : memref<512x64xbf16, #tpu.memory_space<vmem>>, vector<128x64xbf16>
    %cst_43 = arith.constant dense<0.000000e+00> : vector<4x64xf32>
    %44 = tpu.matmul %42, %43, %cst_43 {dimension_numbers = #tpu.dot_dimension_numbers<[1], [0], [0], [1], [0, 0, 1, 1], [], []>} : vector<4x128xbf16>, vector<128x64xbf16>, vector<4x64xf32> -> vector<4x64xf32>
    %45 = arith.addf %40, %44 : vector<4x64xf32>
    %c0_44 = arith.constant 0 : index
    %c2 = arith.constant 2 : index
    %c0_45 = arith.constant 0 : index
    %c0_46 = arith.constant 0 : index
    %46 = vector.load %arg1[%c0_44, %c2, %c0_45, %c0_46] : memref<1x5x5x128xbf16, #tpu.memory_space<vmem>>, vector<1x1x4x128xbf16>
    %47 = vector.shape_cast %46 : vector<1x1x4x128xbf16> to vector<4x128xbf16>
    %c256_47 = arith.constant 256 : index
    %c0_48 = arith.constant 0 : index
    %48 = vector.load %arg2[%c256_47, %c0_48] : memref<512x64xbf16, #tpu.memory_space<vmem>>, vector<128x64xbf16>
    %cst_49 = arith.constant dense<0.000000e+00> : vector<4x64xf32>
    %49 = tpu.matmul %47, %48, %cst_49 {dimension_numbers = #tpu.dot_dimension_numbers<[1], [0], [0], [1], [0, 0, 1, 1], [], []>} : vector<4x128xbf16>, vector<128x64xbf16>, vector<4x64xf32> -> vector<4x64xf32>
    %50 = arith.addf %45, %49 : vector<4x64xf32>
    %c0_50 = arith.constant 0 : index
    %c2_51 = arith.constant 2 : index
    %c1_52 = arith.constant 1 : index
    %c0_53 = arith.constant 0 : index
    %51 = vector.load %arg1[%c0_50, %c2_51, %c1_52, %c0_53] : memref<1x5x5x128xbf16, #tpu.memory_space<vmem>>, vector<1x1x4x128xbf16>
    %52 = vector.shape_cast %51 : vector<1x1x4x128xbf16> to vector<4x128xbf16>
    %c384_54 = arith.constant 384 : index
    %c0_55 = arith.constant 0 : index
    %53 = vector.load %arg2[%c384_54, %c0_55] : memref<512x64xbf16, #tpu.memory_space<vmem>>, vector<128x64xbf16>
    %cst_56 = arith.constant dense<0.000000e+00> : vector<4x64xf32>
    %54 = tpu.matmul %52, %53, %cst_56 {dimension_numbers = #tpu.dot_dimension_numbers<[1], [0], [0], [1], [0, 0, 1, 1], [], []>} : vector<4x128xbf16>, vector<128x64xbf16>, vector<4x64xf32> -> vector<4x64xf32>
    %55 = arith.addf %50, %54 : vector<4x64xf32>
    %c0_57 = arith.constant 0 : index
    %c0_58 = arith.constant 0 : index
    %56 = vector.load %arg3[%c0_57, %c0_58] : memref<1x64xf32, #tpu.memory_space<vmem>>, vector<1x64xf32>
    %57 = vector.broadcast %56 : vector<1x64xf32> to vector<4x64xf32>
    %58 = arith.addf %55, %57 : vector<4x64xf32>
    %cst_59 = arith.constant 0.000000e+00 : f32
    %59 = vector.broadcast %cst_59 : f32 to vector<4x64xf32>
    %60 = arith.cmpf oge, %58, %59 : vector<4x64xf32>
    %cst_60 = arith.constant 2.000000e-01 : f32
    %61 = vector.broadcast %cst_60 : f32 to vector<4x64xf32>
    %62 = arith.mulf %61, %58 : vector<4x64xf32>
    %63 = arith.select %60, %58, %62 : vector<4x64xi1>, vector<4x64xf32>
    %c4 = arith.constant 4 : index
    %c0_61 = arith.constant 0 : index
    %64 = vector.load %arg4[%c4, %c0_61] : memref<16x64xbf16, #tpu.memory_space<vmem>>, vector<4x64xbf16>
    %65 = arith.extf %64 : vector<4x64xbf16> to vector<4x64xf32>
    %66 = arith.mulf %63, %65 : vector<4x64xf32>
    %67 = vector.shape_cast %66 : vector<4x64xf32> to vector<1x4x64xf32>
    %cst_62 = arith.constant dense<0.000000e+00> : vector<1xf32>
    %68 = vector.multi_reduction <add>, %67, %cst_62 [1, 2] : vector<1x4x64xf32> to vector<1xf32>
    %69 = vector.shape_cast %68 : vector<1xf32> to vector<1x1x1xf32>
    %70 = vector.extract %69[0, 0, 0] : f32 from vector<1x1x1xf32>
    %71 = vector.broadcast %70 : f32 to vector<1x1xf32>
    %72 = arith.addf %36, %71 : vector<1x1xf32>
    %c0_63 = arith.constant 0 : index
    %c2_64 = arith.constant 2 : index
    %c0_65 = arith.constant 0 : index
    %c0_66 = arith.constant 0 : index
    %73 = vector.load %arg1[%c0_63, %c2_64, %c0_65, %c0_66] : memref<1x5x5x128xbf16, #tpu.memory_space<vmem>>, vector<1x1x4x128xbf16>
    %74 = vector.shape_cast %73 : vector<1x1x4x128xbf16> to vector<4x128xbf16>
    %c0_67 = arith.constant 0 : index
    %c0_68 = arith.constant 0 : index
    %75 = vector.load %arg2[%c0_67, %c0_68] : memref<512x64xbf16, #tpu.memory_space<vmem>>, vector<128x64xbf16>
    %cst_69 = arith.constant dense<0.000000e+00> : vector<4x64xf32>
    %76 = tpu.matmul %74, %75, %cst_69 {dimension_numbers = #tpu.dot_dimension_numbers<[1], [0], [0], [1], [0, 0, 1, 1], [], []>} : vector<4x128xbf16>, vector<128x64xbf16>, vector<4x64xf32> -> vector<4x64xf32>
    %c0_70 = arith.constant 0 : index
    %c2_71 = arith.constant 2 : index
    %c1_72 = arith.constant 1 : index
    %c0_73 = arith.constant 0 : index
    %77 = vector.load %arg1[%c0_70, %c2_71, %c1_72, %c0_73] : memref<1x5x5x128xbf16, #tpu.memory_space<vmem>>, vector<1x1x4x128xbf16>
    %78 = vector.shape_cast %77 : vector<1x1x4x128xbf16> to vector<4x128xbf16>
    %c128_74 = arith.constant 128 : index
    %c0_75 = arith.constant 0 : index
    %79 = vector.load %arg2[%c128_74, %c0_75] : memref<512x64xbf16, #tpu.memory_space<vmem>>, vector<128x64xbf16>
    %cst_76 = arith.constant dense<0.000000e+00> : vector<4x64xf32>
    %80 = tpu.matmul %78, %79, %cst_76 {dimension_numbers = #tpu.dot_dimension_numbers<[1], [0], [0], [1], [0, 0, 1, 1], [], []>} : vector<4x128xbf16>, vector<128x64xbf16>, vector<4x64xf32> -> vector<4x64xf32>
    %81 = arith.addf %76, %80 : vector<4x64xf32>
    %c0_77 = arith.constant 0 : index
    %c3 = arith.constant 3 : index
    %c0_78 = arith.constant 0 : index
    %c0_79 = arith.constant 0 : index
    %82 = vector.load %arg1[%c0_77, %c3, %c0_78, %c0_79] : memref<1x5x5x128xbf16, #tpu.memory_space<vmem>>, vector<1x1x4x128xbf16>
    %83 = vector.shape_cast %82 : vector<1x1x4x128xbf16> to vector<4x128xbf16>
    %c256_80 = arith.constant 256 : index
    %c0_81 = arith.constant 0 : index
    %84 = vector.load %arg2[%c256_80, %c0_81] : memref<512x64xbf16, #tpu.memory_space<vmem>>, vector<128x64xbf16>
    %cst_82 = arith.constant dense<0.000000e+00> : vector<4x64xf32>
    %85 = tpu.matmul %83, %84, %cst_82 {dimension_numbers = #tpu.dot_dimension_numbers<[1], [0], [0], [1], [0, 0, 1, 1], [], []>} : vector<4x128xbf16>, vector<128x64xbf16>, vector<4x64xf32> -> vector<4x64xf32>
    %86 = arith.addf %81, %85 : vector<4x64xf32>
    %c0_83 = arith.constant 0 : index
    %c3_84 = arith.constant 3 : index
    %c1_85 = arith.constant 1 : index
    %c0_86 = arith.constant 0 : index
    %87 = vector.load %arg1[%c0_83, %c3_84, %c1_85, %c0_86] : memref<1x5x5x128xbf16, #tpu.memory_space<vmem>>, vector<1x1x4x128xbf16>
    %88 = vector.shape_cast %87 : vector<1x1x4x128xbf16> to vector<4x128xbf16>
    %c384_87 = arith.constant 384 : index
    %c0_88 = arith.constant 0 : index
    %89 = vector.load %arg2[%c384_87, %c0_88] : memref<512x64xbf16, #tpu.memory_space<vmem>>, vector<128x64xbf16>
    %cst_89 = arith.constant dense<0.000000e+00> : vector<4x64xf32>
    %90 = tpu.matmul %88, %89, %cst_89 {dimension_numbers = #tpu.dot_dimension_numbers<[1], [0], [0], [1], [0, 0, 1, 1], [], []>} : vector<4x128xbf16>, vector<128x64xbf16>, vector<4x64xf32> -> vector<4x64xf32>
    %91 = arith.addf %86, %90 : vector<4x64xf32>
    %c0_90 = arith.constant 0 : index
    %c0_91 = arith.constant 0 : index
    %92 = vector.load %arg3[%c0_90, %c0_91] : memref<1x64xf32, #tpu.memory_space<vmem>>, vector<1x64xf32>
    %93 = vector.broadcast %92 : vector<1x64xf32> to vector<4x64xf32>
    %94 = arith.addf %91, %93 : vector<4x64xf32>
    %cst_92 = arith.constant 0.000000e+00 : f32
    %95 = vector.broadcast %cst_92 : f32 to vector<4x64xf32>
    %96 = arith.cmpf oge, %94, %95 : vector<4x64xf32>
    %cst_93 = arith.constant 2.000000e-01 : f32
    %97 = vector.broadcast %cst_93 : f32 to vector<4x64xf32>
    %98 = arith.mulf %97, %94 : vector<4x64xf32>
    %99 = arith.select %96, %94, %98 : vector<4x64xi1>, vector<4x64xf32>
    %c8 = arith.constant 8 : index
    %c0_94 = arith.constant 0 : index
    %100 = vector.load %arg4[%c8, %c0_94] : memref<16x64xbf16, #tpu.memory_space<vmem>>, vector<4x64xbf16>
    %101 = arith.extf %100 : vector<4x64xbf16> to vector<4x64xf32>
    %102 = arith.mulf %99, %101 : vector<4x64xf32>
    %103 = vector.shape_cast %102 : vector<4x64xf32> to vector<1x4x64xf32>
    %cst_95 = arith.constant dense<0.000000e+00> : vector<1xf32>
    %104 = vector.multi_reduction <add>, %103, %cst_95 [1, 2] : vector<1x4x64xf32> to vector<1xf32>
    %105 = vector.shape_cast %104 : vector<1xf32> to vector<1x1x1xf32>
    %106 = vector.extract %105[0, 0, 0] : f32 from vector<1x1x1xf32>
    %107 = vector.broadcast %106 : f32 to vector<1x1xf32>
    %108 = arith.addf %72, %107 : vector<1x1xf32>
    %c0_96 = arith.constant 0 : index
    %c3_97 = arith.constant 3 : index
    %c0_98 = arith.constant 0 : index
    %c0_99 = arith.constant 0 : index
    %109 = vector.load %arg1[%c0_96, %c3_97, %c0_98, %c0_99] : memref<1x5x5x128xbf16, #tpu.memory_space<vmem>>, vector<1x1x4x128xbf16>
    %110 = vector.shape_cast %109 : vector<1x1x4x128xbf16> to vector<4x128xbf16>
    %c0_100 = arith.constant 0 : index
    %c0_101 = arith.constant 0 : index
    %111 = vector.load %arg2[%c0_100, %c0_101] : memref<512x64xbf16, #tpu.memory_space<vmem>>, vector<128x64xbf16>
    %cst_102 = arith.constant dense<0.000000e+00> : vector<4x64xf32>
    %112 = tpu.matmul %110, %111, %cst_102 {dimension_numbers = #tpu.dot_dimension_numbers<[1], [0], [0], [1], [0, 0, 1, 1], [], []>} : vector<4x128xbf16>, vector<128x64xbf16>, vector<4x64xf32> -> vector<4x64xf32>
    %c0_103 = arith.constant 0 : index
    %c3_104 = arith.constant 3 : index
    %c1_105 = arith.constant 1 : index
    %c0_106 = arith.constant 0 : index
    %113 = vector.load %arg1[%c0_103, %c3_104, %c1_105, %c0_106] : memref<1x5x5x128xbf16, #tpu.memory_space<vmem>>, vector<1x1x4x128xbf16>
    %114 = vector.shape_cast %113 : vector<1x1x4x128xbf16> to vector<4x128xbf16>
    %c128_107 = arith.constant 128 : index
    %c0_108 = arith.constant 0 : index
    %115 = vector.load %arg2[%c128_107, %c0_108] : memref<512x64xbf16, #tpu.memory_space<vmem>>, vector<128x64xbf16>
    %cst_109 = arith.constant dense<0.000000e+00> : vector<4x64xf32>
    %116 = tpu.matmul %114, %115, %cst_109 {dimension_numbers = #tpu.dot_dimension_numbers<[1], [0], [0], [1], [0, 0, 1, 1], [], []>} : vector<4x128xbf16>, vector<128x64xbf16>, vector<4x64xf32> -> vector<4x64xf32>
    %117 = arith.addf %112, %116 : vector<4x64xf32>
    %c0_110 = arith.constant 0 : index
    %c4_111 = arith.constant 4 : index
    %c0_112 = arith.constant 0 : index
    %c0_113 = arith.constant 0 : index
    %118 = vector.load %arg1[%c0_110, %c4_111, %c0_112, %c0_113] : memref<1x5x5x128xbf16, #tpu.memory_space<vmem>>, vector<1x1x4x128xbf16>
    %119 = vector.shape_cast %118 : vector<1x1x4x128xbf16> to vector<4x128xbf16>
    %c256_114 = arith.constant 256 : index
    %c0_115 = arith.constant 0 : index
    %120 = vector.load %arg2[%c256_114, %c0_115] : memref<512x64xbf16, #tpu.memory_space<vmem>>, vector<128x64xbf16>
    %cst_116 = arith.constant dense<0.000000e+00> : vector<4x64xf32>
    %121 = tpu.matmul %119, %120, %cst_116 {dimension_numbers = #tpu.dot_dimension_numbers<[1], [0], [0], [1], [0, 0, 1, 1], [], []>} : vector<4x128xbf16>, vector<128x64xbf16>, vector<4x64xf32> -> vector<4x64xf32>
    %122 = arith.addf %117, %121 : vector<4x64xf32>
    %c0_117 = arith.constant 0 : index
    %c4_118 = arith.constant 4 : index
    %c1_119 = arith.constant 1 : index
    %c0_120 = arith.constant 0 : index
    %123 = vector.load %arg1[%c0_117, %c4_118, %c1_119, %c0_120] : memref<1x5x5x128xbf16, #tpu.memory_space<vmem>>, vector<1x1x4x128xbf16>
    %124 = vector.shape_cast %123 : vector<1x1x4x128xbf16> to vector<4x128xbf16>
    %c384_121 = arith.constant 384 : index
    %c0_122 = arith.constant 0 : index
    %125 = vector.load %arg2[%c384_121, %c0_122] : memref<512x64xbf16, #tpu.memory_space<vmem>>, vector<128x64xbf16>
    %cst_123 = arith.constant dense<0.000000e+00> : vector<4x64xf32>
    %126 = tpu.matmul %124, %125, %cst_123 {dimension_numbers = #tpu.dot_dimension_numbers<[1], [0], [0], [1], [0, 0, 1, 1], [], []>} : vector<4x128xbf16>, vector<128x64xbf16>, vector<4x64xf32> -> vector<4x64xf32>
    %127 = arith.addf %122, %126 : vector<4x64xf32>
    %c0_124 = arith.constant 0 : index
    %c0_125 = arith.constant 0 : index
    %128 = vector.load %arg3[%c0_124, %c0_125] : memref<1x64xf32, #tpu.memory_space<vmem>>, vector<1x64xf32>
    %129 = vector.broadcast %128 : vector<1x64xf32> to vector<4x64xf32>
    %130 = arith.addf %127, %129 : vector<4x64xf32>
    %cst_126 = arith.constant 0.000000e+00 : f32
    %131 = vector.broadcast %cst_126 : f32 to vector<4x64xf32>
    %132 = arith.cmpf oge, %130, %131 : vector<4x64xf32>
    %cst_127 = arith.constant 2.000000e-01 : f32
    %133 = vector.broadcast %cst_127 : f32 to vector<4x64xf32>
    %134 = arith.mulf %133, %130 : vector<4x64xf32>
    %135 = arith.select %132, %130, %134 : vector<4x64xi1>, vector<4x64xf32>
    %c12 = arith.constant 12 : index
    %c0_128 = arith.constant 0 : index
    %136 = vector.load %arg4[%c12, %c0_128] : memref<16x64xbf16, #tpu.memory_space<vmem>>, vector<4x64xbf16>
    %137 = arith.extf %136 : vector<4x64xbf16> to vector<4x64xf32>
    %138 = arith.mulf %135, %137 : vector<4x64xf32>
    %139 = vector.shape_cast %138 : vector<4x64xf32> to vector<1x4x64xf32>
    %cst_129 = arith.constant dense<0.000000e+00> : vector<1xf32>
    %140 = vector.multi_reduction <add>, %139, %cst_129 [1, 2] : vector<1x4x64xf32> to vector<1xf32>
    %141 = vector.shape_cast %140 : vector<1xf32> to vector<1x1x1xf32>
    %142 = vector.extract %141[0, 0, 0] : f32 from vector<1x1x1xf32>
    %143 = vector.broadcast %142 : f32 to vector<1x1xf32>
    %144 = arith.addf %108, %143 : vector<1x1xf32>
    %145 = arith.negf %144 : vector<1x1xf32>
    %146 = math.exp %145 : vector<1x1xf32>
    %cst_130 = arith.constant 1.000000e+00 : f32
    %147 = vector.broadcast %cst_130 : f32 to vector<1x1xf32>
    %148 = arith.addf %147, %146 : vector<1x1xf32>
    %149 = arith.divf %147, %148 : vector<1x1xf32>
    %cst_131 = arith.constant 1.000000e+00 : f32
    %150 = vector.broadcast %cst_131 : f32 to vector<1x128xf32>
    %151 = vector.broadcast %149 : vector<1x1xf32> to vector<1x128xf32>
    %152 = arith.mulf %151, %150 : vector<1x128xf32>
    %c0_132 = arith.constant 0 : index
    %c0_133 = arith.constant 0 : index
    %c0_134 = arith.constant 0 : index
    %153 = vector.load %arg5[%c0_132, %c0_133, %c0_134] : memref<1x1x128xf32, #tpu.memory_space<vmem>>, vector<1x1x128xf32>
    %154 = vector.shape_cast %153 : vector<1x1x128xf32> to vector<1x128xf32>
    %155 = vector.shape_cast %152 : vector<1x128xf32> to vector<1x1x128xf32>
    tpu.vector_store %arg5[%c0_132, %c0_133, %c0_134], %155 {strides = array<i32>} : memref<1x1x128xf32, #tpu.memory_space<vmem>>, vector<1x1x128xf32>,
    return
  }
  func.func @transform_0(%arg0: i32) -> (i32, i32, i32, i32) {
    %c0_i32 = arith.constant 0 : i32
    %c0_i32_0 = arith.constant 0 : i32
    %c0_i32_1 = arith.constant 0 : i32
    %c0_i32_2 = arith.constant 0 : i32
    return %arg0, %c0_i32, %c0_i32_0, %c0_i32_1 : i32, i32, i32, i32
  }
  func.func @transform_1(%arg0: i32) -> (i32, i32) {
    %c0_i32 = arith.constant 0 : i32
    %c0_i32_0 = arith.constant 0 : i32
    %c0_i32_1 = arith.constant 0 : i32
    return %c0_i32, %c0_i32_0 : i32, i32
  }
  func.func @transform_2(%arg0: i32) -> (i32, i32) {
    %c0_i32 = arith.constant 0 : i32
    %c0_i32_0 = arith.constant 0 : i32
    %c0_i32_1 = arith.constant 0 : i32
    return %c0_i32, %c0_i32_0 : i32, i32
  }
  func.func @transform_3(%arg0: i32) -> (i32, i32) {
    %c0_i32 = arith.constant 0 : i32
    %c0_i32_0 = arith.constant 0 : i32
    %c0_i32_1 = arith.constant 0 : i32
    return %c0_i32, %c0_i32_0 : i32, i32
  }
  func.func @transform_4(%arg0: i32) -> (i32, i32, i32) {
    %c0_i32 = arith.constant 0 : i32
    %c0_i32_0 = arith.constant 0 : i32
    %c0_i32_1 = arith.constant 0 : i32
    return %arg0, %c0_i32, %c0_i32_0 : i32, i32, i32
  }
}

</mosaic_0001>

<bundles_post_ra>
// kernel: discriminator_forward.4
= control target key start
LH: loop header
LB: loop body
LE: loop exit
PB: predicated region body
PF: predicated region fallthrough
CT: control target
= control target key end

     0   :  { %s6147_s12 = smov 0   ;;  %s6149_s13 = smov 0   ;;  %s7087_s0 = inlined_call_operand.vmem [shape: bf16[2,33,33,32], index: 0, kind: input, shape index: {}]   ;;  %s7088_s1 = inlined_call_operand.vmem [shape: bf16[128,8], index: 1, kind: input, shape index: {}]   ;;  %s7089_s2 = inlined_call_operand.vmem [shape: f32[1,8], index: 2, kind: input, shape index: {}]   ;;  %s7090_s3 = inlined_call_operand.vmem [shape: bf16[2,1024,8], index: 3, kind: output, shape index: {}]  }
   0x1   :  { %s6151_s14 = smov 0   ;;  %s6153_s15 = smov 0  }
   0x2   :  { %s6155_s16 = smov 0  }
   0x3 LB: > { %s22_s17 = sadd.s32 1, %s6117_s14  ;;  %s25_s18 = sadd.s32 1, %s6121_s15  ;;  %s6125_s16 = sphi %s6155_s16, %s13_s16   ;;  %s6121_s15 = sphi %s6153_s15, %s7096_s15   ;;  %s6117_s14 = sphi %s6151_s14, %s7095_s14   ;;  %s6113_s13 = sphi %s6149_s13, %s7094_s13   ;;  %s6109_s12 = sphi %s6147_s12, %s7093_s12  }
   0x4   : > { %p23_p0 = scmp.ge.s32.totalorder %s22_s17, 2  ;;  %p4761_p1 = scmp.ge.s32.totalorder %s6125_s16, 1 }
   0x5   : > { %p151_p2 = scmp.lt.s32.totalorder %s6125_s16, 5 }
   0x6   : > { %s7098_s17 = smov (%p23_p0, %s22_s17), 0  ;;  %s7100_s18 = smov (!%p23_p0, %s25_s18), %s6121_s15 }
   0x7   : > { %p152_p3 = pnand %p4761_p1, %p151_p2  ;;  %p27_p4 = scmp.ge.s32.totalorder %s7100_s18, 2 }
   0x8   : > { %v5952_v0 = vld [vmem:[%s7088_s1 + $0x20] sm:$0xff] (!%p152_p3)   ;;  %p179_p5 = scmp.lt.s32.totalorder (!%p152_p3), %s6113_s13, 1  ;;  %v5953_v1 = vld [vmem:[%s7088_s1 + $0x28] sm:$0xff] (!%p152_p3)   ;;  %s5246_s23 = smul.u32 (!%p152_p3), 320, %s6109_s12  ;;  %v5955_v2 = vld [vmem:[%s7088_s1 + $0x10] sm:$0xff] (!%p152_p3)   ;;  %vm1102_vm2 = vcmask (!%p152_p3), 261120  }
   0x9   : > { %s7102_s18 = smov (%p27_p4, %s7100_s18), 0  ;;  %155 = sbr.rel (%p152_p3) target bundleno = 518 (0x206), region = 32 }
   0xa   : > { %5583 = vmatprep.subr.bf16.mxu0 (!%p152_p3), %v5952_v0  ;;  %v5957_v3 = vld [vmem:[%s7088_s1 + $0x18] sm:$0xff] (!%p152_p3)   ;;  %5447 = vmatprep.subr.bf16.mxu1 (!%p152_p3), %v5955_v2  ;;  %vm283_vm0 = vsmask.f32 (!%p152_p3), 3328  ;;  %vm284_vm1 = vsmask.f32 (!%p152_p3), 7440  ;;  %v6201_v4 = vld [vmem:[%s7088_s1] sm:$0xff] (!%p152_p3)  }
   0xb   : > { %5584 = vmatpush3.bf16.msra.mxu0 (!%p152_p3), %v5952_v0  ;;  %5448 = vmatpush3.bf16.msra.mxu1 (!%p152_p3), %v5955_v2  ;;  %v5962_v5 = vld [vmem:[%s7088_s1 + $0x30] sm:$0xff] (!%p152_p3)   ;;  %vm6234_vm3 = vmor (!%p152_p3), %vm283_vm0, %vm284_vm1  ;;  %s4763_s21 = sshll.u32 (!%p152_p3), %s6109_s12, 6  ;;  %v6878_v34 = vld [vmem:[%s7089_s2] ss:$0 sm:$0xff] (!%p152_p3)  ;;  %vm4602_vm6 = vcmask (!%p152_p3), 60416  }
   0xc   : > { %5585 = vmatprep.subr.bf16.mxu0 (!%p152_p3), %v5953_v1  ;;  %5449 = vmatprep.subr.bf16.mxu1 (!%p152_p3), %v5957_v3  ;;  %p187_p6 = scmp.lt.s32.totalorder (!%p152_p3), %s4763_s21, 127 }
   0xf   : > { %5586 = vmatpush3.bf16.msra.mxu0 (!%p152_p3), %v5953_v1  ;;  %5450 = vmatpush3.bf16.msra.mxu1 (!%p152_p3), %v5957_v3 }
  0x10   : > { %s7104_s13 = smov (!%p179_p5, %s6113_s13), 1  ;;  %5651 = vmatprep.subr.bf16.mxu0 %v5962_v5  ;;  %5515 = vmatprep.subr.bf16.mxu1 %v6201_v4  ;;  %s7106_s21 = smov (!%p187_p6, %s4763_s21), 127 }
  0x11   : > { %s5911_s26 = smul.u32 660, %s7104_s13  ;;  %s4764_s22 = sshll.u32 %s7104_s13, 7 }
  0x12   : > { %s190_s25 = sadd.s32 %s4764_s22, %s7106_s21 }
  0x13   : > { %s183_s4 = scalar_lea.vmem %s7087_s0, %s5911_s26  ;;  %s4765_s12 = sshll.u32 %s190_s25, 2 }
  0x14   : > { %s6203_s7 = scalar_lea.vmem %s183_s4, %s5246_s23  ;;  %s6887_s27 = scalar_lea.vmem %s7090_s3, %s4765_s12 }
  0x15   : > { %v5954_v6 = vld [vmem:[%s6203_s7 + $0x14] sm:$0xff]   ;;  %v5956_v7 = vld [vmem:[%s6203_s7 + $0x1c] sm:$0xff]   ;;  %v5958_v8 = vld [vmem:[%s6203_s7 + $0x28] sm:$0xff]  }
  0x16   : > { %5587 = vmatprep.mubr.msk.bf16.mxu0 %vm1102_vm2, %v5954_v6  ;;  %v199_v9 = vld [vmem:[%s6203_s7] sm:$0xf]  ;;  %v200_v10 = vld [vmem:[%s6203_s7 + $0x4] sm:$0xf]  ;;  %v6216_v11 = vld [vmem:[%s6203_s7 + $0x8] sm:$0xf] }
  0x17   : > { %5588 = vmatmul.mubr.msk.bf16.vlgmr.msra.gmra.mrb[0].mxu0 %vm1102_vm2, %v5956_v7  ;;  %v6221_v12 = vld [vmem:[%s6203_s7 + $0xc] sm:$0xf]  ;;  %v287_v13 = vshrl.u32 %v199_v9, 16  ;;  %v290_v14 = vshll.u32 %v199_v9, 16  ;;  %v296_v15 = vshll.u32 %v200_v10, 16  ;;  %v300_v16 = vshrl.u32 %v200_v10, 16 }
  0x18   : > { %5591 = vmatprep.mubr.msk.bf16.mxu0 %vm1102_vm2, %v5958_v8  ;;  %5652 = vmatpush3.bf16.msra.mxu0 %v5962_v5  ;;  %v306_v17 = vshll.u32 %v6216_v11, 16  ;;  %v310_v18 = vshrl.u32 %v6216_v11, 16  ;;  %v4836_v19 = vcombine.low %v6216_v11, %v6221_v12  ;;  %v5961_v24 = vld [vmem:[%s6203_s7 + $0x30] sm:$0xff]   ;;  %v316_v28 = vshll.u32 %v6221_v12, 16  ;;  %v5963_v33 = vld [vmem:[%s6203_s7 + $0x3c] sm:$0xff]   ;;  %v5964_v1 = vld [vmem:[%s6203_s7 + $0x44] sm:$0xff]  }
  0x19   : > { %v289_v20 = vrot.slane %v287_v13, 4  ;;  %v292_v21 = vrot.slane %v290_v14, 5  ;;  %v298_v22 = vrot.slane %v296_v15, 5  ;;  %v302_v23 = vrot.slane %v300_v16, 4  ;;  %v267_v27 = vld [vmem:[%s6203_s7 + $0x10] sm:$0x1] }
  0x1a   : > { %v308_v25 = vrot.slane %v306_v17, 5  ;;  %v312_v26 = vrot.slane %v310_v18, 4  ;;  %v320_v29 = vshrl.u32 %v6221_v12, 16  ;;  %v326_v32 = vshll.u32 %v267_v27, 16  ;;  %v203_v38 = vld [vmem:[%s6203_s7 + $0x14] sm:$0xf] }
  0x1b   : > { %v293_v30 = vor.u32 %v292_v21, %v289_v20  ;;  %v303_v31 = vor.u32 %v302_v23, %v298_v22  ;;  %v318_v36 = vrot.slane %v316_v28, 5  ;;  %v204_v39 = vld [vmem:[%s6203_s7 + $0x18] sm:$0xf]  ;;  %v205_v43 = vld [vmem:[%s6203_s7 + $0x1c] sm:$0xf]  ;;  %v331_v44 = vshrl.u32 %v203_v38, 16 }
  0x1c   : > { %v313_v35 = vor.u32 %v312_v26, %v308_v25  ;;  %v322_v37 = vrot.slane %v320_v29, 4  ;;  %v328_v42 = vrot.slane %v326_v32, 5  ;;  %v334_v47 = vshll.u32 %v203_v38, 16  ;;  %v206_v53 = vld [vmem:[%s6203_s7 + $0x20] sm:$0xf]  ;;  %v5965_v5 = vld [vmem:[%s6203_s7 + $0x50] sm:$0xff]  }
  0x1d   : > { %v294_v40 = vrot.slane %v293_v30, 4  ;;  %v304_v41 = vrot.slane %v303_v31, 4  ;;  %v340_v48 = vshll.u32 %v204_v39, 16  ;;  %v333_v51 = vrot.slane %v331_v44, 4  ;;  %v268_v58 = vld [vmem:[%s6203_s7 + $0x24] sm:$0x1] }
  0x1e   : > { %v314_v45 = vrot.slane %v313_v35, 4  ;;  %v323_v46 = vor.u32 %v322_v37, %v318_v36  ;;  %v344_v52 = vshrl.u32 %v204_v39, 16  ;;  %v336_v57 = vrot.slane %v334_v47, 5  ;;  %v207_v6 = vld [vmem:[%s6203_s7 + $0x28] sm:$0xf] }
  0x1f   : > { %5592 = vmatmul.mubr.msk.bf16.gmra.mrb[4].mxu0 %vm1102_vm2, %v5961_v24  ;;  %v299_v49 = vsel %vm6234_vm3, %v294_v40, %v298_v22  ;;  %v309_v50 = vsel %vm6234_vm3, %v304_v41, %v308_v25  ;;  %v342_v59 = vrot.slane %v340_v48, 5  ;;  %v350_v61 = vshll.u32 %v205_v43, 16  ;;  %v208_v13 = vld [vmem:[%s6203_s7 + $0x2c] sm:$0xf]  ;;  %v209_v21 = vld [vmem:[%s6203_s7 + $0x30] sm:$0xf] }
  0x20   : > { %5595 = vmatprep.mubr.msk.bf16.mxu0 %vm1102_vm2, %v5963_v33  ;;  %v4769_v54 = vcombine.low %v299_v49, %v309_v50  ;;  %v319_v55 = vsel %vm6234_vm3, %v314_v45, %v318_v36  ;;  %v324_v56 = vrot.slane %v323_v46, 4  ;;  %v346_v60 = vrot.slane %v344_v52, 4  ;;  %v210_v28 = vld [vmem:[%s6203_s7 + $0x34] sm:$0xf]  ;;  %v269_v37 = vld [vmem:[%s6203_s7 + $0x38] sm:$0x1] }
  0x21   : > { %v354_v62 = vshrl.u32 %v205_v43, 16  ;;  %v337_v0 = vor.u32 %v336_v57, %v333_v51  ;;  %v360_v2 = vshll.u32 %v206_v53, 16  ;;  %v364_v3 = vshrl.u32 %v206_v53, 16  ;;  %v212_v43 = vld [vmem:[%s6203_s7 + $0x40] sm:$0xf]  ;;  %v5966_v46 = vld [vmem:[%s6203_s7 + $0x58] sm:$0xff]  }
  0x22   : > { %5451 = vmatprep.mubr.msk.bf16.mxu1 %vm1102_vm2, %v4769_v54  ;;  %v329_v63 = vsel %vm6234_vm3, %v324_v56, %v328_v42  ;;  %v347_v8 = vor.u32 %v346_v60, %v342_v59  ;;  %v352_v9 = vrot.slane %v350_v61, 5  ;;  %v370_v17 = vshll.u32 %v268_v58, 16  ;;  %v211_v42 = vld [vmem:[%s6203_s7 + $0x3c] sm:$0xf]  ;;  %v5967_v53 = vld [vmem:[%s6203_s7 + $0x64] sm:$0xff]  }
  0x23   : > { %v4770_v7 = vcombine.low %v319_v55, %v329_v63  ;;  %v356_v10 = vrot.slane %v354_v62, 4  ;;  %v338_v14 = vrot.slane %v337_v0, 4  ;;  %v362_v15 = vrot.slane %v360_v2, 5  ;;  %v213_v60 = vld [vmem:[%s6203_s7 + $0x44] sm:$0xf] }
  0x24   : > { %v366_v16 = vrot.slane %v364_v3, 4  ;;  %v348_v18 = vrot.slane %v347_v8, 4  ;;  %v375_v22 = vshrl.u32 %v207_v6, 16  ;;  %v378_v23 = vshll.u32 %v207_v6, 16  ;;  %v214_v8 = vld [vmem:[%s6203_s7 + $0x48] sm:$0xf] }
  0x25   : > { %5452 = vmatmul.mubr.msk.bf16.vlgmr.msra.gmra.mrb[0].mxu1 %vm1102_vm2, %v4770_v7  ;;  %v357_v20 = vor.u32 %v356_v10, %v352_v9  ;;  %v343_v24 = vsel %vm6234_vm3, %v338_v14, %v342_v59  ;;  %v372_v26 = vrot.slane %v370_v17, 5  ;;  %v384_v27 = vshll.u32 %v208_v13, 16 }
  0x26   : > { %5516 = vmatpush3.bf16.msra.mxu1 %v6201_v4  ;;  %v367_v25 = vor.u32 %v366_v16, %v362_v15  ;;  %v353_v29 = vsel %vm6234_vm3, %v348_v18, %v352_v9  ;;  %v377_v31 = vrot.slane %v375_v22, 4  ;;  %v380_v4 = vrot.slane %v378_v23, 5  ;;  %v215_v22 = vld [vmem:[%s6203_s7 + $0x50] sm:$0xf] }
  0x27   : > { %5596 = vmatmul.mubr.msk.bf16.gmra.mrb[8].mxu0 %vm1102_vm2, %v5964_v1  ;;  %v358_v30 = vrot.slane %v357_v20, 4  ;;  %v4771_v32 = vcombine.low %v343_v24, %v353_v29  ;;  %v386_v35 = vrot.slane %v384_v27, 5  ;;  %v388_v36 = vshrl.u32 %v208_v13, 16  ;;  %v5969_v27 = vld [vmem:[%s6203_s7 + $0x78] sm:$0xff]  }
  0x28   : > { %5599 = vmatprep.mubr.msk.bf16.mxu0 %vm1102_vm2, %v5965_v5  ;;  %v368_v33 = vrot.slane %v367_v25, 4  ;;  %v381_v39 = vor.u32 %v380_v4, %v377_v31  ;;  %v394_v40 = vshll.u32 %v209_v21, 16  ;;  %v398_v41 = vshrl.u32 %v209_v21, 16  ;;  %v5968_v21 = vld [vmem:[%s6203_s7 + $0x6c] sm:$0xff]   ;;  %v216_v4 = vld [vmem:[%s6203_s7 + $0x54] sm:$0xf] }
  0x29   : > { %v363_v38 = vsel %vm6234_vm3, %v358_v30, %v362_v15  ;;  %5455 = vmatprep.mubr.msk.bf16.mxu1 %vm1102_vm2, %v4771_v32  ;;  %v390_v45 = vrot.slane %v388_v36, 4  ;;  %v404_v47 = vshll.u32 %v210_v28, 16  ;;  %v408_v48 = vshrl.u32 %v210_v28, 16  ;;  %v270_v15 = vld [vmem:[%s6203_s7 + $0x4c] sm:$0x1] }
  0x2a   : > { %v373_v44 = vsel %vm6234_vm3, %v368_v33, %v372_v26  ;;  %v382_v50 = vrot.slane %v381_v39, 4  ;;  %v396_v51 = vrot.slane %v394_v40, 5  ;;  %v400_v52 = vrot.slane %v398_v41, 4  ;;  %v217_v32 = vld [vmem:[%s6203_s7 + $0x58] sm:$0xf] }
  0x2b   : > { %v4772_v49 = vcombine.low %v363_v38, %v373_v44  ;;  %v391_v54 = vor.u32 %v390_v45, %v386_v35  ;;  %v406_v55 = vrot.slane %v404_v47, 5  ;;  %v410_v56 = vrot.slane %v408_v48, 4 }
  0x2c   : > { %v414_v57 = vshll.u32 %v269_v37, 16  ;;  %v387_v58 = vsel %vm6234_vm3, %v382_v50, %v386_v35  ;;  %v401_v59 = vor.u32 %v400_v52, %v396_v51  ;;  %v419_v61 = vshrl.u32 %v211_v42, 16  ;;  %v218_v50 = vld [vmem:[%s6203_s7 + $0x5c] sm:$0xf] }
  0x2d   : > { %5456 = vmatmul.mubr.msk.bf16.gmra.mrb[4].mxu1 %vm1102_vm2, %v4772_v49  ;;  %v422_v62 = vshll.u32 %v211_v42, 16  ;;  %v392_v63 = vrot.slane %v391_v54, 4  ;;  %v411_v0 = vor.u32 %v410_v56, %v406_v55  ;;  %v428_v2 = vshll.u32 %v212_v43, 16  ;;  %v5970_v56 = vld [vmem:[%s6203_s7 + $0x80] sm:$0xff]  }
  0x2e   : > { %v416_v1 = vrot.slane %v414_v57, 5  ;;  %v402_v3 = vrot.slane %v401_v59, 4  ;;  %v421_v5 = vrot.slane %v419_v61, 4  ;;  %v432_v7 = vshrl.u32 %v212_v43, 16  ;;  %v5978_v57 = vld [vmem:[%s7088_s1 + $0x8] sm:$0xff]  }
  0x2f   : > { %5600 = vmatmul.mubr.msk.bf16.gmra.mrb[12].mxu0 %vm1102_vm2, %v5966_v46  ;;  %v424_v6 = vrot.slane %v422_v62, 5  ;;  %v397_v9 = vsel %vm6234_vm3, %v392_v63, %v396_v51  ;;  %v412_v10 = vrot.slane %v411_v0, 4  ;;  %v430_v13 = vrot.slane %v428_v2, 5  ;;  %v271_v51 = vld [vmem:[%s6203_s7 + $0x60] sm:$0x1]  ;;  %v5971_v62 = vld [vmem:[%s6203_s7 + $0x8c] sm:$0xff]   ;;  %5517 = vmatprep.subr.bf16.mxu1 %v5978_v57 }
  0x30   : > { %5603 = vmatprep.mubr.msk.bf16.mxu0 %vm1102_vm2, %v5967_v53  ;;  %v438_v14 = vshll.u32 %v213_v60, 16  ;;  %v4773_v16 = vcombine.low %v387_v58, %v397_v9  ;;  %v407_v17 = vsel %vm6234_vm3, %v402_v3, %v406_v55  ;;  %v434_v20 = vrot.slane %v432_v7, 4  ;;  %v219_v3 = vld [vmem:[%s6203_s7 + $0x64] sm:$0xf]  ;;  %5518 = vmatpush3.bf16.msra.mxu1 %v5978_v57 }
  0x31   : > { %v425_v18 = vor.u32 %v424_v6, %v421_v5  ;;  %v417_v23 = vsel %vm6234_vm3, %v412_v10, %v416_v1  ;;  %v442_v25 = vshrl.u32 %v213_v60, 16  ;;  %v448_v26 = vshll.u32 %v214_v8, 16  ;;  %v5980_v5 = vld [vmem:[%s7088_s1 + $0x38] sm:$0xff]   ;;  %v220_v10 = vld [vmem:[%s6203_s7 + $0x68] sm:$0xf] }
  0x32   : > { %v440_v24 = vrot.slane %v438_v14, 5  ;;  %5459 = vmatprep.mubr.msk.bf16.mxu1 %vm1102_vm2, %v4773_v16  ;;  %v4774_v28 = vcombine.low %v407_v17, %v417_v23  ;;  %v435_v30 = vor.u32 %v434_v20, %v430_v13  ;;  %v452_v31 = vshrl.u32 %v214_v8, 16  ;;  %5653 = vmatprep.subr.bf16.mxu0 %v5980_v5 }
  0x33   : > { %v426_v29 = vrot.slane %v425_v18, 4  ;;  %v444_v33 = vrot.slane %v442_v25, 4  ;;  %v450_v35 = vrot.slane %v448_v26, 5  ;;  %v458_v36 = vshll.u32 %v270_v15, 16  ;;  %5654 = vmatpush3.bf16.msra.mxu0 %v5980_v5 }
  0x34   : > { %v463_v37 = vshrl.u32 %v215_v22, 16  ;;  %v436_v39 = vrot.slane %v435_v30, 4  ;;  %v454_v40 = vrot.slane %v452_v31, 4  ;;  %v466_v41 = vshll.u32 %v215_v22, 16 }
  0x35   : > { %5460 = vmatmul.mubr.msk.bf16.gmra.mrb[8].mxu1 %vm1102_vm2, %v4774_v28  ;;  %v431_v38 = vsel %vm6234_vm3, %v426_v29, %v430_v13  ;;  %v445_v42 = vor.u32 %v444_v33, %v440_v24  ;;  %v460_v43 = vrot.slane %v458_v36, 5  ;;  %v472_v45 = vshll.u32 %v216_v4, 16  ;;  %v5972_v36 = vld [vmem:[%s6203_s7 + $0x94] sm:$0xff]  }
  0x36   : > { %v465_v44 = vrot.slane %v463_v37, 4  ;;  %v441_v46 = vsel %vm6234_vm3, %v436_v39, %v440_v24  ;;  %v455_v47 = vor.u32 %v454_v40, %v450_v35  ;;  %v468_v48 = vrot.slane %v466_v41, 5  ;;  %v272_v40 = vld [vmem:[%s6203_s7 + $0x74] sm:$0x1] }
  0x37   : > { %5604 = vmatmul.mubr.msk.bf16.gmra.mrb[16].mxu0 %vm1102_vm2, %v5968_v21  ;;  %v476_v49 = vshrl.u32 %v216_v4, 16  ;;  %v4775_v52 = vcombine.low %v431_v38, %v441_v46  ;;  %v446_v53 = vrot.slane %v445_v42, 4  ;;  %v474_v54 = vrot.slane %v472_v45, 5  ;;  %v221_v21 = vld [vmem:[%s6203_s7 + $0x6c] sm:$0xf]  ;;  %v5973_v42 = vld [vmem:[%s6203_s7 + $0xa0] sm:$0xff]  }
  0x38   : > { %5607 = vmatprep.mubr.msk.bf16.mxu0 %vm1102_vm2, %v5969_v27  ;;  %v482_v55 = vshll.u32 %v217_v32, 16  ;;  %v456_v58 = vrot.slane %v455_v47, 4  ;;  %v469_v59 = vor.u32 %v468_v48, %v465_v44  ;;  %v486_v61 = vshrl.u32 %v217_v32, 16  ;;  %v222_v27 = vld [vmem:[%s6203_s7 + $0x70] sm:$0xf] }
  0x39   : > { %v478_v60 = vrot.slane %v476_v49, 4  ;;  %5463 = vmatprep.mubr.msk.bf16.mxu1 %vm1102_vm2, %v4775_v52  ;;  %v451_v63 = vsel %vm6234_vm3, %v446_v53, %v450_v35  ;;  %v492_v1 = vshll.u32 %v218_v50, 16  ;;  %v496_v2 = vshrl.u32 %v218_v50, 16  ;;  %v223_v47 = vld [vmem:[%s6203_s7 + $0x78] sm:$0xf] }
  0x3a   : > { %v484_v0 = vrot.slane %v482_v55, 5  ;;  %v461_v6 = vsel %vm6234_vm3, %v456_v58, %v460_v43  ;;  %v470_v7 = vrot.slane %v469_v59, 4  ;;  %v488_v9 = vrot.slane %v486_v61, 4  ;;  %v224_v52 = vld [vmem:[%s6203_s7 + $0x7c] sm:$0xf] }
  0x3b   : > { %v479_v8 = vor.u32 %v478_v60, %v474_v54  ;;  %v4776_v13 = vcombine.low %v451_v63, %v461_v6  ;;  %v494_v14 = vrot.slane %v492_v1, 5  ;;  %v498_v15 = vrot.slane %v496_v2, 4  ;;  %v225_v59 = vld [vmem:[%s6203_s7 + $0x80] sm:$0xf] }
  0x3c   : > { %v502_v16 = vshll.u32 %v271_v51, 16  ;;  %v475_v17 = vsel %vm6234_vm3, %v470_v7, %v474_v54  ;;  %v489_v20 = vor.u32 %v488_v9, %v484_v0  ;;  %v507_v22 = vshrl.u32 %v219_v3, 16  ;;  %v226_v7 = vld [vmem:[%s6203_s7 + $0x84] sm:$0xf] }
  0x3d   : > { %v480_v18 = vrot.slane %v479_v8, 4  ;;  %5464 = vmatmul.mubr.msk.bf16.gmra.mrb[12].mxu1 %vm1102_vm2, %v4776_v13  ;;  %v499_v23 = vor.u32 %v498_v15, %v494_v14  ;;  %v510_v25 = vshll.u32 %v219_v3, 16  ;;  %v516_v26 = vshll.u32 %v220_v10, 16 }
  0x3e   : > { %v504_v24 = vrot.slane %v502_v16, 5  ;;  %v490_v29 = vrot.slane %v489_v20, 4  ;;  %v509_v30 = vrot.slane %v507_v22, 4  ;;  %v520_v31 = vshrl.u32 %v220_v10, 16  ;;  %v5974_v22 = vld [vmem:[%s6203_s7 + $0xa8] sm:$0xff]  }
  0x3f   : > { %5608 = vmatmul.mubr.msk.bf16.gmra.mrb[20].mxu0 %vm1102_vm2, %v5970_v56  ;;  %v485_v28 = vsel %vm6234_vm3, %v480_v18, %v484_v0  ;;  %v500_v32 = vrot.slane %v499_v23, 4  ;;  %v512_v33 = vrot.slane %v510_v25, 5  ;;  %v518_v35 = vrot.slane %v516_v26, 5  ;;  %v227_v25 = vld [vmem:[%s6203_s7 + $0x8c] sm:$0xf] }
  0x40   : > { %5611 = vmatprep.mubr.msk.bf16.mxu0 %vm1102_vm2, %v5971_v62  ;;  %v4777_v4 = vcombine.low %v475_v17, %v485_v28  ;;  %v495_v37 = vsel %vm6234_vm3, %v490_v29, %v494_v14  ;;  %v522_v38 = vrot.slane %v520_v31, 4  ;;  %v526_v39 = vshll.u32 %v221_v21, 16  ;;  %v273_v14 = vld [vmem:[%s6203_s7 + $0x88] sm:$0x1]  ;;  %v228_v31 = vld [vmem:[%s6203_s7 + $0x90] sm:$0xf] }
  0x41   : > { %v530_v41 = vshrl.u32 %v221_v21, 16  ;;  %v505_v43 = vsel %vm6234_vm3, %v500_v32, %v504_v24  ;;  %v513_v44 = vor.u32 %v512_v33, %v509_v30  ;;  %v536_v45 = vshll.u32 %v222_v27, 16  ;;  %v5975_v30 = vld [vmem:[%s6203_s7 + $0xb4] sm:$0xff]  }
  0x42   : > { %5467 = vmatprep.mubr.msk.bf16.mxu1 %vm1102_vm2, %v4777_v4  ;;  %v540_v46 = vshrl.u32 %v222_v27, 16  ;;  %v4778_v48 = vcombine.low %v495_v37, %v505_v43  ;;  %v523_v49 = vor.u32 %v522_v38, %v518_v35  ;;  %v528_v50 = vrot.slane %v526_v39, 5 }
  0x43   : > { %v532_v51 = vrot.slane %v530_v41, 4  ;;  %v514_v53 = vrot.slane %v513_v44, 4  ;;  %v538_v54 = vrot.slane %v536_v45, 5  ;;  %v546_v56 = vshll.u32 %v272_v40, 16  ;;  %v230_v41 = vld [vmem:[%s6203_s7 + $0x98] sm:$0xf] }
  0x44   : > { %v542_v55 = vrot.slane %v540_v46, 4  ;;  %v524_v57 = vrot.slane %v523_v49, 4  ;;  %v551_v60 = vshrl.u32 %v223_v47, 16  ;;  %v554_v61 = vshll.u32 %v223_v47, 16 }
  0x45   : > { %v533_v58 = vor.u32 %v532_v51, %v528_v50  ;;  %5468 = vmatmul.mubr.msk.bf16.gmra.mrb[16].mxu1 %vm1102_vm2, %v4778_v48  ;;  %v519_v62 = vsel %vm6234_vm3, %v514_v53, %v518_v35  ;;  %v548_v0 = vrot.slane %v546_v56, 5  ;;  %v560_v1 = vshll.u32 %v224_v52, 16 }
  0x46   : > { %v543_v63 = vor.u32 %v542_v55, %v538_v54  ;;  %v529_v2 = vsel %vm6234_vm3, %v524_v57, %v528_v50  ;;  %v553_v5 = vrot.slane %v551_v60, 4  ;;  %v556_v6 = vrot.slane %v554_v61, 5 }
  0x47   : > { %5612 = vmatmul.mubr.msk.bf16.gmra.mrb[24].mxu0 %vm1102_vm2, %v5972_v36  ;;  %v534_v3 = vrot.slane %v533_v58, 4  ;;  %v4779_v8 = vcombine.low %v519_v62, %v529_v2  ;;  %v562_v10 = vrot.slane %v560_v1, 5  ;;  %v564_v13 = vshrl.u32 %v224_v52, 16  ;;  %v229_v36 = vld [vmem:[%s6203_s7 + $0x94] sm:$0xf]  ;;  %v5976_v62 = vld [vmem:[%s6203_s7 + $0xbc] sm:$0xff]  }
  0x48   : > { %5615 = vmatprep.mubr.msk.bf16.mxu0 %vm1102_vm2, %v5973_v42  ;;  %v544_v9 = vrot.slane %v543_v63, 4  ;;  %v557_v16 = vor.u32 %v556_v6, %v553_v5  ;;  %v570_v17 = vshll.u32 %v225_v59, 16  ;;  %v574_v18 = vshrl.u32 %v225_v59, 16  ;;  %v231_v59 = vld [vmem:[%s6203_s7 + $0xa0] sm:$0xf]  ;;  %v5977_v6 = vld [vmem:[%s6203_s7 + $0xc8] sm:$0xff]  }
  0x49   : > { %v539_v15 = vsel %vm6234_vm3, %v534_v3, %v538_v54  ;;  %5471 = vmatprep.mubr.msk.bf16.mxu1 %vm1102_vm2, %v4779_v8  ;;  %v566_v21 = vrot.slane %v564_v13, 4  ;;  %v580_v23 = vshll.u32 %v226_v7, 16  ;;  %v584_v24 = vshrl.u32 %v226_v7, 16  ;;  %v274_v54 = vld [vmem:[%s6203_s7 + $0x9c] sm:$0x1] }
  0x4a   : > { %v549_v20 = vsel %vm6234_vm3, %v544_v9, %v548_v0  ;;  %v558_v27 = vrot.slane %v557_v16, 4  ;;  %v572_v28 = vrot.slane %v570_v17, 5  ;;  %v576_v29 = vrot.slane %v574_v18, 4  ;;  %v232_v7 = vld [vmem:[%s6203_s7 + $0xa4] sm:$0xf] }
  0x4b   : > { %v4780_v26 = vcombine.low %v539_v15, %v549_v20  ;;  %v567_v4 = vor.u32 %v566_v21, %v562_v10  ;;  %v582_v32 = vrot.slane %v580_v23, 5  ;;  %v586_v33 = vrot.slane %v584_v24, 4  ;;  %v233_v13 = vld [vmem:[%s6203_s7 + $0xa8] sm:$0xf] }
  0x4c   : > { %v590_v35 = vshll.u32 %v273_v14, 16  ;;  %v563_v37 = vsel %vm6234_vm3, %v558_v27, %v562_v10  ;;  %v577_v38 = vor.u32 %v576_v29, %v572_v28  ;;  %v595_v39 = vshrl.u32 %v227_v25, 16  ;;  %v275_v29 = vld [vmem:[%s6203_s7 + $0xb0] sm:$0x1] }
  0x4d   : > { %v598_v40 = vshll.u32 %v227_v25, 16  ;;  %5472 = vmatmul.mubr.msk.bf16.gmra.mrb[20].mxu1 %vm1102_vm2, %v4780_v26  ;;  %v568_v42 = vrot.slane %v567_v4, 4  ;;  %v587_v43 = vor.u32 %v586_v33, %v582_v32  ;;  %v604_v45 = vshll.u32 %v228_v31, 16 }
  0x4e   : > { %v592_v44 = vrot.slane %v590_v35, 5  ;;  %v578_v46 = vrot.slane %v577_v38, 4  ;;  %v597_v47 = vrot.slane %v595_v39, 4  ;;  %v608_v49 = vshrl.u32 %v228_v31, 16 }
  0x4f   : > { %5616 = vmatmul.mubr.msk.bf16.gmra.mrb[28].mxu0 %vm1102_vm2, %v5974_v22  ;;  %v600_v48 = vrot.slane %v598_v40, 5  ;;  %v573_v50 = vsel %vm6234_vm3, %v568_v42, %v572_v28  ;;  %v588_v51 = vrot.slane %v587_v43, 4  ;;  %v606_v52 = vrot.slane %v604_v45, 5  ;;  %v234_v28 = vld [vmem:[%s6203_s7 + $0xac] sm:$0xf]  ;;  %v5979_v40 = vld [vmem:[%s6203_s7 + $0xd0] sm:$0xff]  }
  0x50   : > { %5619 = vmatprep.mubr.msk.bf16.mxu0 %vm1102_vm2, %v5975_v30  ;;  %v614_v53 = vshll.u32 %v229_v36, 16  ;;  %v4781_v55 = vcombine.low %v563_v37, %v573_v50  ;;  %v583_v56 = vsel %vm6234_vm3, %v578_v46, %v582_v32  ;;  %v610_v58 = vrot.slane %v608_v49, 4  ;;  %v235_v43 = vld [vmem:[%s6203_s7 + $0xb4] sm:$0xf]  ;;  %v236_v49 = vld [vmem:[%s6203_s7 + $0xb8] sm:$0xf] }
  0x51   : > { %v601_v57 = vor.u32 %v600_v48, %v597_v47  ;;  %v593_v60 = vsel %vm6234_vm3, %v588_v51, %v592_v44  ;;  %v618_v63 = vshrl.u32 %v229_v36, 16  ;;  %v624_v0 = vshll.u32 %v230_v41, 16  ;;  %v5981_v48 = vld [vmem:[%s6203_s7 + $0xdc] sm:$0xff]  }
  0x52   : > { %v616_v61 = vrot.slane %v614_v53, 5  ;;  %5475 = vmatprep.mubr.msk.bf16.mxu1 %vm1102_vm2, %v4781_v55  ;;  %v4782_v1 = vcombine.low %v583_v56, %v593_v60  ;;  %v611_v3 = vor.u32 %v610_v58, %v606_v52  ;;  %v628_v5 = vshrl.u32 %v230_v41, 16 }
  0x53   : > { %v602_v2 = vrot.slane %v601_v57, 4  ;;  %v620_v8 = vrot.slane %v618_v63, 4  ;;  %v626_v9 = vrot.slane %v624_v0, 5  ;;  %v634_v10 = vshll.u32 %v274_v54, 16  ;;  %v237_v57 = vld [vmem:[%s6203_s7 + $0xbc] sm:$0xf] }
  0x54   : > { %v639_v14 = vshrl.u32 %v231_v59, 16  ;;  %v612_v16 = vrot.slane %v611_v3, 4  ;;  %v630_v17 = vrot.slane %v628_v5, 4  ;;  %v642_v18 = vshll.u32 %v231_v59, 16  ;;  %v238_v63 = vld [vmem:[%s6203_s7 + $0xc0] sm:$0xf] }
  0x55   : > { %v607_v15 = vsel %vm6234_vm3, %v602_v2, %v606_v52  ;;  %5476 = vmatmul.mubr.msk.bf16.gmra.mrb[24].mxu1 %vm1102_vm2, %v4782_v1  ;;  %v621_v20 = vor.u32 %v620_v8, %v616_v61  ;;  %v636_v21 = vrot.slane %v634_v10, 5  ;;  %v648_v23 = vshll.u32 %v232_v7, 16 }
  0x56   : > { %v641_v22 = vrot.slane %v639_v14, 4  ;;  %v617_v24 = vsel %vm6234_vm3, %v612_v16, %v616_v61  ;;  %v631_v25 = vor.u32 %v630_v17, %v626_v9  ;;  %v644_v26 = vrot.slane %v642_v18, 5  ;;  %v5983_v17 = vld [vmem:[%s6203_s7 + $0xf0] sm:$0xff]  }
  0x57   : > { %5620 = vmatmul.mubr.msk.bf16.gmra.mrb[32].mxu0 %vm1102_vm2, %v5976_v62  ;;  %v652_v27 = vshrl.u32 %v232_v7, 16  ;;  %v4783_v30 = vcombine.low %v607_v15, %v617_v24  ;;  %v622_v31 = vrot.slane %v621_v20, 4  ;;  %v650_v4 = vrot.slane %v648_v23, 5  ;;  %v276_v15 = vld [vmem:[%s6203_s7 + $0xc4] sm:$0x1] }
  0x58   : > { %5623 = vmatprep.mubr.msk.bf16.mxu0 %vm1102_vm2, %v5977_v6  ;;  %v658_v32 = vshll.u32 %v233_v13, 16  ;;  %v632_v33 = vrot.slane %v631_v25, 4  ;;  %v645_v35 = vor.u32 %v644_v26, %v641_v22  ;;  %v662_v37 = vshrl.u32 %v233_v13, 16  ;;  %v239_v23 = vld [vmem:[%s6203_s7 + $0xc8] sm:$0xf] }
  0x59   : > { %v654_v36 = vrot.slane %v652_v27, 4  ;;  %5479 = vmatprep.mubr.msk.bf16.mxu1 %vm1102_vm2, %v4783_v30  ;;  %v627_v38 = vsel %vm6234_vm3, %v622_v31, %v626_v9  ;;  %v668_v41 = vshll.u32 %v234_v28, 16  ;;  %v672_v42 = vshrl.u32 %v234_v28, 16  ;;  %v5982_v9 = vld [vmem:[%s6203_s7 + $0xe4] sm:$0xff]   ;;  %v240_v24 = vld [vmem:[%s6203_s7 + $0xcc] sm:$0xf] }
  0x5a   : > { %v660_v39 = vrot.slane %v658_v32, 5  ;;  %v637_v44 = vsel %vm6234_vm3, %v632_v33, %v636_v21  ;;  %v646_v45 = vrot.slane %v645_v35, 4  ;;  %v664_v47 = vrot.slane %v662_v37, 4  ;;  %v241_v35 = vld [vmem:[%s6203_s7 + $0xd0] sm:$0xf] }
  0x5b   : > { %v655_v46 = vor.u32 %v654_v36, %v650_v4  ;;  %v4784_v50 = vcombine.low %v627_v38, %v637_v44  ;;  %v670_v51 = vrot.slane %v668_v41, 5  ;;  %v674_v52 = vrot.slane %v672_v42, 4 }
  0x5c   : > { %v678_v53 = vshll.u32 %v275_v29, 16  ;;  %v651_v54 = vsel %vm6234_vm3, %v646_v45, %v650_v4  ;;  %v665_v56 = vor.u32 %v664_v47, %v660_v39  ;;  %v683_v58 = vshrl.u32 %v235_v43, 16 }
  0x5d   : > { %v656_v55 = vrot.slane %v655_v46, 4  ;;  %5480 = vmatmul.mubr.msk.bf16.gmra.mrb[28].mxu1 %vm1102_vm2, %v4784_v50  ;;  %v675_v59 = vor.u32 %v674_v52, %v670_v51  ;;  %v686_v61 = vshll.u32 %v235_v43, 16  ;;  %v692_v62 = vshll.u32 %v236_v49, 16  ;;  %v242_v46 = vld [vmem:[%s6203_s7 + $0xd4] sm:$0xf] }
  0x5e   : > { %v680_v60 = vrot.slane %v678_v53, 5  ;;  %v666_v1 = vrot.slane %v665_v56, 4  ;;  %v685_v2 = vrot.slane %v683_v58, 4  ;;  %v696_v3 = vshrl.u32 %v236_v49, 16  ;;  %v243_v56 = vld [vmem:[%s6203_s7 + $0xdc] sm:$0xf] }
  0x5f   : > { %5624 = vmatmul.mubr.msk.bf16.gmra.mrb[36].mxu0 %vm1102_vm2, %v5979_v40  ;;  %v661_v0 = vsel %vm6234_vm3, %v656_v55, %v660_v39  ;;  %v676_v6 = vrot.slane %v675_v59, 4  ;;  %v688_v7 = vrot.slane %v686_v61, 5  ;;  %v694_v8 = vrot.slane %v692_v62, 5  ;;  %v5984_v59 = vld [vmem:[%s6203_s7 + $0xf8] sm:$0xff]  }
  0x60   : > { %5627 = vmatprep.mubr.msk.bf16.mxu0 %vm1102_vm2, %v5981_v48  ;;  %v4785_v5 = vcombine.low %v651_v54, %v661_v0  ;;  %v671_v10 = vsel %vm6234_vm3, %v666_v1, %v670_v51  ;;  %v698_v13 = vrot.slane %v696_v3, 4  ;;  %v702_v14 = vshll.u32 %v237_v57, 16  ;;  %v277_v51 = vld [vmem:[%s6203_s7 + $0xd8] sm:$0x1]  ;;  %v244_v3 = vld [vmem:[%s6203_s7 + $0xe0] sm:$0xf] }
  0x61   : > { %v706_v16 = vshrl.u32 %v237_v57, 16  ;;  %v681_v18 = vsel %vm6234_vm3, %v676_v6, %v680_v60  ;;  %v689_v20 = vor.u32 %v688_v7, %v685_v2  ;;  %v712_v21 = vshll.u32 %v238_v63, 16  ;;  %v5985_v2 = vld [vmem:[%s6203_s7 + $0x104] sm:$0xff]  }
  0x62   : > { %5483 = vmatprep.mubr.msk.bf16.mxu1 %vm1102_vm2, %v4785_v5  ;;  %v716_v22 = vshrl.u32 %v238_v63, 16  ;;  %v4786_v25 = vcombine.low %v671_v10, %v681_v18  ;;  %v699_v26 = vor.u32 %v698_v13, %v694_v8  ;;  %v704_v27 = vrot.slane %v702_v14, 5 }
  0x63   : > { %v708_v28 = vrot.slane %v706_v16, 4  ;;  %v690_v29 = vrot.slane %v689_v20, 4  ;;  %v714_v30 = vrot.slane %v712_v21, 5  ;;  %v722_v4 = vshll.u32 %v276_v15, 16  ;;  %v246_v21 = vld [vmem:[%s6203_s7 + $0xe8] sm:$0xf] }
  0x64   : > { %v718_v31 = vrot.slane %v716_v22, 4  ;;  %v700_v32 = vrot.slane %v699_v26, 4  ;;  %v727_v36 = vshrl.u32 %v239_v23, 16  ;;  %v730_v37 = vshll.u32 %v239_v23, 16  ;;  %v278_v26 = vld [vmem:[%s6203_s7 + $0xec] sm:$0x1] }
  0x65   : > { %v709_v33 = vor.u32 %v708_v28, %v704_v27  ;;  %5484 = vmatmul.mubr.msk.bf16.gmra.mrb[32].mxu1 %vm1102_vm2, %v4786_v25  ;;  %v695_v38 = vsel %vm6234_vm3, %v690_v29, %v694_v8  ;;  %v724_v40 = vrot.slane %v722_v4, 5  ;;  %v736_v41 = vshll.u32 %v240_v24, 16 }
  0x66   : > { %v719_v39 = vor.u32 %v718_v31, %v714_v30  ;;  %v705_v42 = vsel %vm6234_vm3, %v700_v32, %v704_v27  ;;  %v729_v44 = vrot.slane %v727_v36, 4  ;;  %v732_v45 = vrot.slane %v730_v37, 5  ;;  %v247_v31 = vld [vmem:[%s6203_s7 + $0xf0] sm:$0xf] }
  0x67   : > { %5628 = vmatmul.mubr.msk.bf16.gmra.mrb[40].mxu0 %vm1102_vm2, %v5982_v9  ;;  %v710_v43 = vrot.slane %v709_v33, 4  ;;  %v4787_v47 = vcombine.low %v695_v38, %v705_v42  ;;  %v738_v49 = vrot.slane %v736_v41, 5  ;;  %v740_v50 = vshrl.u32 %v240_v24, 16  ;;  %v245_v9 = vld [vmem:[%s6203_s7 + $0xe4] sm:$0xf]  ;;  %v5986_v38 = vld [vmem:[%s6203_s7 + $0x10c] sm:$0xff]  }
  0x68   : > { %5631 = vmatprep.mubr.msk.bf16.mxu0 %vm1102_vm2, %v5983_v17  ;;  %v720_v48 = vrot.slane %v719_v39, 4  ;;  %v733_v53 = vor.u32 %v732_v45, %v729_v44  ;;  %v746_v54 = vshll.u32 %v241_v35, 16  ;;  %v750_v55 = vshrl.u32 %v241_v35, 16  ;;  %v5987_v41 = vld [vmem:[%s6203_s7 + $0x118] sm:$0xff]  }
  0x69   : > { %v715_v52 = vsel %vm6234_vm3, %v710_v43, %v714_v30  ;;  %5487 = vmatprep.mubr.msk.bf16.mxu1 %vm1102_vm2, %v4787_v47  ;;  %v742_v58 = vrot.slane %v740_v50, 4  ;;  %v756_v60 = vshll.u32 %v242_v46, 16  ;;  %v760_v61 = vshrl.u32 %v242_v46, 16  ;;  %v248_v46 = vld [vmem:[%s6203_s7 + $0xf4] sm:$0xf] }
  0x6a   : > { %v725_v57 = vsel %vm6234_vm3, %v720_v48, %v724_v40  ;;  %v734_v63 = vrot.slane %v733_v53, 4  ;;  %v748_v0 = vrot.slane %v746_v54, 5  ;;  %v752_v1 = vrot.slane %v750_v55, 4  ;;  %v249_v54 = vld [vmem:[%s6203_s7 + $0xf8] sm:$0xf] }
  0x6b   : > { %v4788_v62 = vcombine.low %v715_v52, %v725_v57  ;;  %v743_v5 = vor.u32 %v742_v58, %v738_v49  ;;  %v758_v6 = vrot.slane %v756_v60, 5  ;;  %v762_v7 = vrot.slane %v760_v61, 4 }
  0x6c   : > { %v766_v8 = vshll.u32 %v277_v51, 16  ;;  %v739_v10 = vsel %vm6234_vm3, %v734_v63, %v738_v49  ;;  %v753_v13 = vor.u32 %v752_v1, %v748_v0  ;;  %v771_v14 = vshrl.u32 %v243_v56, 16 }
  0x6d   : > { %v774_v15 = vshll.u32 %v243_v56, 16  ;;  %5488 = vmatmul.mubr.msk.bf16.gmra.mrb[36].mxu1 %vm1102_vm2, %v4788_v62  ;;  %v744_v16 = vrot.slane %v743_v5, 4  ;;  %v763_v17 = vor.u32 %v762_v7, %v758_v6  ;;  %v780_v20 = vshll.u32 %v244_v3, 16 }
  0x6e   : > { %v768_v18 = vrot.slane %v766_v8, 5  ;;  %v754_v22 = vrot.slane %v753_v13, 4  ;;  %v773_v23 = vrot.slane %v771_v14, 4  ;;  %v784_v25 = vshrl.u32 %v244_v3, 16 }
  0x6f   : > { %5632 = vmatmul.mubr.msk.bf16.gmra.mrb[44].mxu0 %vm1102_vm2, %v5984_v59  ;;  %v776_v24 = vrot.slane %v774_v15, 5  ;;  %v749_v27 = vsel %vm6234_vm3, %v744_v16, %v748_v0  ;;  %v764_v28 = vrot.slane %v763_v17, 4  ;;  %v782_v29 = vrot.slane %v780_v20, 5  ;;  %v250_v0 = vld [vmem:[%s6203_s7 + $0xfc] sm:$0xf]  ;;  %v5988_v15 = vld [vmem:[%s6203_s7 + $0x120] sm:$0xff]  }
  0x70   : > { %5635 = vmatprep.mubr.msk.bf16.mxu0 %vm1102_vm2, %v5985_v2  ;;  %v790_v30 = vshll.u32 %v245_v9, 16  ;;  %v4789_v4 = vcombine.low %v739_v10, %v749_v27  ;;  %v759_v32 = vsel %vm6234_vm3, %v754_v22, %v758_v6  ;;  %v786_v35 = vrot.slane %v784_v25, 4  ;;  %v252_v25 = vld [vmem:[%s6203_s7 + $0x108] sm:$0xf] }
  0x71   : > { %v777_v33 = vor.u32 %v776_v24, %v773_v23  ;;  %v769_v36 = vsel %vm6234_vm3, %v764_v28, %v768_v18  ;;  %v794_v39 = vshrl.u32 %v245_v9, 16  ;;  %v800_v40 = vshll.u32 %v246_v21, 16  ;;  %v279_v9 = vld [vmem:[%s6203_s7 + $0x100] sm:$0x1]  ;;  %v251_v18 = vld [vmem:[%s6203_s7 + $0x104] sm:$0xf] }
  0x72   : > { %v792_v37 = vrot.slane %v790_v30, 5  ;;  %5491 = vmatprep.mubr.msk.bf16.mxu1 %vm1102_vm2, %v4789_v4  ;;  %v4790_v42 = vcombine.low %v759_v32, %v769_v36  ;;  %v787_v44 = vor.u32 %v786_v35, %v782_v29  ;;  %v804_v45 = vshrl.u32 %v246_v21, 16  ;;  %v5989_v24 = vld [vmem:[%s6203_s7 + $0x12c] sm:$0xff]  }
  0x73   : > { %v778_v43 = vrot.slane %v777_v33, 4  ;;  %v796_v47 = vrot.slane %v794_v39, 4  ;;  %v802_v48 = vrot.slane %v800_v40, 5  ;;  %v810_v49 = vshll.u32 %v278_v26, 16  ;;  %v253_v36 = vld [vmem:[%s6203_s7 + $0x10c] sm:$0xf] }
  0x74   : > { %v815_v50 = vshrl.u32 %v247_v31, 16  ;;  %v788_v52 = vrot.slane %v787_v44, 4  ;;  %v806_v53 = vrot.slane %v804_v45, 4  ;;  %v818_v55 = vshll.u32 %v247_v31, 16 }
  0x75   : > { %v783_v51 = vsel %vm6234_vm3, %v778_v43, %v782_v29  ;;  %5492 = vmatmul.mubr.msk.bf16.gmra.mrb[40].mxu1 %vm1102_vm2, %v4790_v42  ;;  %v797_v56 = vor.u32 %v796_v47, %v792_v37  ;;  %v812_v57 = vrot.slane %v810_v49, 5  ;;  %v824_v59 = vshll.u32 %v248_v46, 16  ;;  %v254_v43 = vld [vmem:[%s6203_s7 + $0x110] sm:$0xf] }
  0x76   : > { %v817_v58 = vrot.slane %v815_v50, 4  ;;  %v793_v60 = vsel %vm6234_vm3, %v788_v52, %v792_v37  ;;  %v807_v61 = vor.u32 %v806_v53, %v802_v48  ;;  %v820_v62 = vrot.slane %v818_v55, 5  ;;  %v5990_v55 = vld [vmem:[%s6203_s7 + $0x134] sm:$0xff]  }
  0x77   : > { %5636 = vmatmul.mubr.msk.bf16.gmra.mrb[48].mxu0 %vm1102_vm2, %v5986_v38  ;;  %v828_v63 = vshrl.u32 %v248_v46, 16  ;;  %v4791_v1 = vcombine.low %v783_v51, %v793_v60  ;;  %v798_v2 = vrot.slane %v797_v56, 4  ;;  %v826_v3 = vrot.slane %v824_v59, 5  ;;  %v280_v51 = vld [vmem:[%s6203_s7 + $0x114] sm:$0x1] }
  0x78   : > { %5639 = vmatprep.mubr.msk.bf16.mxu0 %vm1102_vm2, %v5987_v41  ;;  %v834_v5 = vshll.u32 %v249_v54, 16  ;;  %v808_v6 = vrot.slane %v807_v61, 4  ;;  %v821_v7 = vor.u32 %v820_v62, %v817_v58  ;;  %v838_v10 = vshrl.u32 %v249_v54, 16  ;;  %v255_v58 = vld [vmem:[%s6203_s7 + $0x118] sm:$0xf] }
  0x79   : > { %v830_v8 = vrot.slane %v828_v63, 4  ;;  %5495 = vmatprep.mubr.msk.bf16.mxu1 %vm1102_vm2, %v4791_v1  ;;  %v803_v13 = vsel %vm6234_vm3, %v798_v2, %v802_v48  ;;  %v844_v16 = vshll.u32 %v250_v0, 16  ;;  %v848_v17 = vshrl.u32 %v250_v0, 16  ;;  %v5991_v63 = vld [vmem:[%s6203_s7 + $0x140] sm:$0xff]   ;;  %v256_v0 = vld [vmem:[%s6203_s7 + $0x11c] sm:$0xf] }
  0x7a   : > { %v836_v14 = vrot.slane %v834_v5, 5  ;;  %v813_v20 = vsel %vm6234_vm3, %v808_v6, %v812_v57  ;;  %v822_v21 = vrot.slane %v821_v7, 4  ;;  %v840_v23 = vrot.slane %v838_v10, 4 }
  0x7b   : > { %v831_v22 = vor.u32 %v830_v8, %v826_v3  ;;  %v4792_v26 = vcombine.low %v803_v13, %v813_v20  ;;  %v846_v27 = vrot.slane %v844_v16, 5  ;;  %v850_v28 = vrot.slane %v848_v17, 4 }
  0x7c   : > { %v854_v29 = vshll.u32 %v279_v9, 16  ;;  %v827_v30 = vsel %vm6234_vm3, %v822_v21, %v826_v3  ;;  %v841_v4 = vor.u32 %v840_v23, %v836_v14  ;;  %v859_v32 = vshrl.u32 %v251_v18, 16 }
  0x7d   : > { %v832_v31 = vrot.slane %v831_v22, 4  ;;  %5496 = vmatmul.mubr.msk.bf16.gmra.mrb[44].mxu1 %vm1102_vm2, %v4792_v26  ;;  %v851_v33 = vor.u32 %v850_v28, %v846_v27  ;;  %v862_v37 = vshll.u32 %v251_v18, 16  ;;  %v868_v38 = vshll.u32 %v252_v25, 16  ;;  %v258_v22 = vld [vmem:[%s6203_s7 + $0x124] sm:$0xf] }
  0x7e   : > { %v856_v35 = vrot.slane %v854_v29, 5  ;;  %v842_v40 = vrot.slane %v841_v4, 4  ;;  %v861_v41 = vrot.slane %v859_v32, 4  ;;  %v872_v42 = vshrl.u32 %v252_v25, 16 }
  0x7f   : > { %5640 = vmatmul.mubr.msk.bf16.gmra.mrb[52].mxu0 %vm1102_vm2, %v5988_v15  ;;  %v837_v39 = vsel %vm6234_vm3, %v832_v31, %v836_v14  ;;  %v852_v45 = vrot.slane %v851_v33, 4  ;;  %v864_v46 = vrot.slane %v862_v37, 5  ;;  %v870_v47 = vrot.slane %v868_v38, 5  ;;  %v257_v15 = vld [vmem:[%s6203_s7 + $0x120] sm:$0xf]  ;;  %v5992_v33 = vld [vmem:[%s6203_s7 + $0x148] sm:$0xff]  }
  0x80   : > { %5643 = vmatprep.mubr.msk.bf16.mxu0 %vm1102_vm2, %v5989_v24  ;;  %v4793_v44 = vcombine.low %v827_v30, %v837_v39  ;;  %v847_v48 = vsel %vm6234_vm3, %v842_v40, %v846_v27  ;;  %v874_v49 = vrot.slane %v872_v42, 4  ;;  %v878_v50 = vshll.u32 %v253_v36, 16  ;;  %v281_v30 = vld [vmem:[%s6203_s7 + $0x128] sm:$0x1]  ;;  %v5033_v37 = vld [vmem:[%s6203_s7 + $0x14] sm:$0xf] }
  0x81   : > { %v882_v52 = vshrl.u32 %v253_v36, 16  ;;  %v857_v53 = vsel %vm6234_vm3, %v852_v45, %v856_v35  ;;  %v865_v54 = vor.u32 %v864_v46, %v861_v41  ;;  %v888_v56 = vshll.u32 %v254_v43, 16  ;;  %v5034_v42 = vld [vmem:[%s6203_s7 + $0x18] sm:$0xf] }
  0x82   : > { %5499 = vmatprep.mubr.msk.bf16.mxu1 %vm1102_vm2, %v4793_v44  ;;  %v892_v57 = vshrl.u32 %v254_v43, 16  ;;  %v4794_v59 = vcombine.low %v847_v48, %v857_v53  ;;  %v875_v60 = vor.u32 %v874_v49, %v870_v47  ;;  %v880_v61 = vrot.slane %v878_v50, 5  ;;  %v5035_v49 = vld [vmem:[%s6203_s7 + $0x1c] sm:$0xf] }
  0x83   : > { %v884_v62 = vrot.slane %v882_v52, 4  ;;  %v866_v1 = vrot.slane %v865_v54, 4  ;;  %v890_v2 = vrot.slane %v888_v56, 5  ;;  %v898_v5 = vshll.u32 %v280_v51, 16 }
  0x84   : > { %v894_v3 = vrot.slane %v892_v57, 4  ;;  %v876_v6 = vrot.slane %v875_v60, 4  ;;  %v903_v8 = vshrl.u32 %v255_v58, 16  ;;  %v906_v9 = vshll.u32 %v255_v58, 16  ;;  %v259_v60 = vld [vmem:[%s6203_s7 + $0x12c] sm:$0xf] }
  0x85   : > { %v885_v7 = vor.u32 %v884_v62, %v880_v61  ;;  %5500 = vmatmul.mubr.msk.bf16.gmra.mrb[48].mxu1 %vm1102_vm2, %v4794_v59  ;;  %v871_v10 = vsel %vm6234_vm3, %v866_v1, %v870_v47  ;;  %v900_v14 = vrot.slane %v898_v5, 5  ;;  %v912_v16 = vshll.u32 %v256_v0, 16 }
  0x86   : > { %v895_v13 = vor.u32 %v894_v3, %v890_v2  ;;  %v881_v17 = vsel %vm6234_vm3, %v876_v6, %v880_v61  ;;  %v905_v20 = vrot.slane %v903_v8, 4  ;;  %v908_v21 = vrot.slane %v906_v9, 5  ;;  %v260_v6 = vld [vmem:[%s6203_s7 + $0x130] sm:$0xf] }
  0x87   : > { %5644 = vmatmul.mubr.msk.bf16.gmra.mrb[56].mxu0 %vm1102_vm2, %v5990_v55  ;;  %v886_v18 = vrot.slane %v885_v7, 4  ;;  %v4795_v23 = vcombine.low %v871_v10, %v881_v17  ;;  %v914_v25 = vrot.slane %v912_v16, 5  ;;  %v916_v26 = vshrl.u32 %v256_v0, 16  ;;  %v261_v10 = vld [vmem:[%s6203_s7 + $0x134] sm:$0xf] }
  0x88   : > { %5647 = vmatprep.mubr.msk.bf16.mxu0 %vm1102_vm2, %v5991_v63  ;;  %v896_v24 = vrot.slane %v895_v13, 4  ;;  %v909_v28 = vor.u32 %v908_v21, %v905_v20  ;;  %v922_v29 = vshll.u32 %v257_v15, 16  ;;  %v926_v31 = vshrl.u32 %v257_v15, 16 }
  0x89   : > { %v891_v27 = vsel %vm6234_vm3, %v886_v18, %v890_v2  ;;  %5503 = vmatprep.mubr.msk.bf16.mxu1 %vm1102_vm2, %v4795_v23  ;;  %v918_v32 = vrot.slane %v916_v26, 4  ;;  %v932_v35 = vshll.u32 %v258_v22, 16  ;;  %v936_v36 = vshrl.u32 %v258_v22, 16  ;;  %v5036_v18 = vld [vmem:[%s6203_s7 + $0x20] sm:$0xf] }
  0x8a   : > { %v901_v4 = vsel %vm6234_vm3, %v896_v24, %v900_v14  ;;  %v910_v39 = vrot.slane %v909_v28, 4  ;;  %v924_v40 = vrot.slane %v922_v29, 5  ;;  %v928_v41 = vrot.slane %v926_v31, 4  ;;  %v5037_v31 = vld [vmem:[%s6203_s7 + $0x24] sm:$0x1] }
  0x8b   : > { %v4796_v38 = vcombine.low %v891_v27, %v901_v4  ;;  %v919_v43 = vor.u32 %v918_v32, %v914_v25  ;;  %v934_v44 = vrot.slane %v932_v35, 5  ;;  %v938_v45 = vrot.slane %v936_v36, 4 }
  0x8c   : > { %v942_v46 = vshll.u32 %v281_v30, 16  ;;  %v915_v47 = vsel %vm6234_vm3, %v910_v39, %v914_v25  ;;  %v929_v48 = vor.u32 %v928_v41, %v924_v40  ;;  %v2819_v50 = vshrl.u32 %v5033_v37, 16 }
  0x8d   : > { %v2822_v51 = vshll.u32 %v5033_v37, 16  ;;  %5504 = vmatmul.mubr.msk.bf16.gmra.mrb[52].mxu1 %vm1102_vm2, %v4796_v38  ;;  %v920_v52 = vrot.slane %v919_v43, 4  ;;  %v939_v53 = vor.u32 %v938_v45, %v934_v44  ;;  %v2828_v55 = vshll.u32 %v5034_v42, 16  ;;  %v262_v37 = vld [vmem:[%s6203_s7 + $0x138] sm:$0xf] }
  0x8e   : > { %v944_v54 = vrot.slane %v942_v46, 5  ;;  %v930_v56 = vrot.slane %v929_v48, 4  ;;  %v2821_v57 = vrot.slane %v2819_v50, 4  ;;  %v2832_v59 = vshrl.u32 %v5034_v42, 16  ;;  %v282_v45 = vld [vmem:[%s6203_s7 + $0x13c] sm:$0x1] }
  0x8f   : > { %5648 = vmatmul.mubr.msk.bf16.gmra.mrb[60].mxu0 %vm1102_vm2, %v5992_v33  ;;  %v2824_v58 = vrot.slane %v2822_v51, 5  ;;  %v925_v61 = vsel %vm6234_vm3, %v920_v52, %v924_v40  ;;  %v940_v62 = vrot.slane %v939_v53, 4  ;;  %v2830_v63 = vrot.slane %v2828_v55, 5  ;;  %v5038_v51 = vld [vmem:[%s6203_s7 + $0x28] sm:$0xf] }
  0x90   : > { %v2838_v0 = vshll.u32 %v5035_v49, 16  ;;  %v4797_v1 = vcombine.low %v915_v47, %v925_v61  ;;  %v935_v2 = vsel %vm6234_vm3, %v930_v56, %v934_v44  ;;  %v2834_v5 = vrot.slane %v2832_v59, 4  ;;  %v5039_v56 = vld [vmem:[%s6203_s7 + $0x2c] sm:$0xf] }
  0x91   : > { %v2825_v3 = vor.u32 %v2824_v58, %v2821_v57  ;;  %v945_v7 = vsel %vm6234_vm3, %v940_v62, %v944_v54  ;;  %v2842_v9 = vshrl.u32 %v5035_v49, 16  ;;  %v947_v13 = vshrl.u32 %v259_v60, 16 }
  0x92   : > { %v2840_v8 = vrot.slane %v2838_v0, 5  ;;  %5507 = vmatprep.mubr.msk.bf16.mxu1 %vm1102_vm2, %v4797_v1  ;;  %v4798_v14 = vcombine.low %v935_v2, %v945_v7  ;;  %v2835_v16 = vor.u32 %v2834_v5, %v2830_v63  ;;  %v950_v17 = vshll.u32 %v259_v60, 16 }
  0x93   : > { %v2826_v15 = vrot.slane %v2825_v3, 4  ;;  %v2844_v20 = vrot.slane %v2842_v9, 4  ;;  %v949_v21 = vrot.slane %v947_v13, 4  ;;  %v956_v22 = vshll.u32 %v260_v6, 16  ;;  %v5040_v3 = vld [vmem:[%s6203_s7 + $0x30] sm:$0xf] }
  0x94   : > { %v960_v23 = vshrl.u32 %v260_v6, 16  ;;  %v2836_v25 = vrot.slane %v2835_v16, 4  ;;  %v952_v26 = vrot.slane %v950_v17, 5  ;;  %v966_v27 = vshll.u32 %v261_v10, 16  ;;  %v5041_v13 = vld [vmem:[%s6203_s7 + $0x34] sm:$0xf] }
  0x95   : > { %v2831_v24 = vsel %vm6234_vm3, %v2826_v15, %v2830_v63  ;;  %5508 = vmatmul.mubr.msk.bf16.gmra.mrb[56].mxu1 %vm1102_vm2, %v4798_v14  ;;  %v2845_v28 = vor.u32 %v2844_v20, %v2840_v8  ;;  %v958_v29 = vrot.slane %v956_v22, 5  ;;  %v2848_v4 = vshll.u32 %v5036_v18, 16 }
  0x96   : > { %v962_v30 = vrot.slane %v960_v23, 4  ;;  %v2841_v32 = vsel %vm6234_vm3, %v2836_v25, %v2840_v8  ;;  %v953_v33 = vor.u32 %v952_v26, %v949_v21  ;;  %v968_v35 = vrot.slane %v966_v27, 5  ;;  %v5042_v23 = vld [vmem:[%s6203_s7 + $0x38] sm:$0x1]  ;;  %v6024_v26 = vld [vmem:[%s6203_s7] sm:$0xf] }
  0x97   : > { %v2852_v36 = vshrl.u32 %v5036_v18, 16  ;;  %v2846_v38 = vrot.slane %v2845_v28, 4  ;;  %v5113_v39 = vcombine.low %v2831_v24, %v2841_v32  ;;  %v2850_v41 = vrot.slane %v2848_v4, 5  ;;  %v6025_v27 = vld [vmem:[%s6203_s7 + $0x4] sm:$0xf] }
  0x98   : > { %v963_v40 = vor.u32 %v962_v30, %v958_v29  ;;  %v954_v42 = vrot.slane %v953_v33, 4  ;;  %v2858_v44 = vshll.u32 %v5037_v31, 16  ;;  %v970_v46 = vshrl.u32 %v261_v10, 16  ;;  %v5043_v30 = vld [vmem:[%s6203_s7 + $0x3c] sm:$0xf] }
  0x99   : > { %v2854_v43 = vrot.slane %v2852_v36, 4  ;;  %5655 = vmatprep.mubr.msk.bf16.mxu0 %vm1102_vm2, %v5113_v39  ;;  %v2851_v48 = vsel %vm6234_vm3, %v2846_v38, %v2850_v41  ;;  %v976_v49 = vshll.u32 %v262_v37, 16  ;;  %v980_v50 = vshrl.u32 %v262_v37, 16 }
  0x9a   : > { %v964_v47 = vrot.slane %v963_v40, 4  ;;  %v959_v52 = vsel %vm6234_vm3, %v954_v42, %v958_v29  ;;  %v2860_v54 = vrot.slane %v2858_v44, 5  ;;  %v972_v55 = vrot.slane %v970_v46, 4 }
  0x9b   : > { %v2855_v53 = vor.u32 %v2854_v43, %v2850_v41  ;;  %v978_v58 = vrot.slane %v976_v49, 5  ;;  %v982_v59 = vrot.slane %v980_v50, 4  ;;  %v986_v60 = vshll.u32 %v282_v45, 16 }
  0x9c   : > { %v969_v57 = vsel %vm6234_vm3, %v964_v47, %v968_v35  ;;  %v973_v63 = vor.u32 %v972_v55, %v968_v35  ;;  %v2863_v0 = vshrl.u32 %v5038_v51, 16  ;;  %v2866_v5 = vshll.u32 %v5038_v51, 16  ;;  %v5044_v35 = vld [vmem:[%s6203_s7 + $0x40] sm:$0xf]  ;;  %v5045_v47 = vld [vmem:[%s6203_s7 + $0x44] sm:$0xf] }
  0x9d   : > { %v4799_v61 = vcombine.low %v959_v52, %v969_v57  ;;  %v2856_v62 = vrot.slane %v2855_v53, 4  ;;  %v983_v1 = vor.u32 %v982_v59, %v978_v58  ;;  %v988_v2 = vrot.slane %v986_v60, 5  ;;  %v5046_v53 = vld [vmem:[%s6203_s7 + $0x48] sm:$0xf] }
  0x9e   : > { %v2872_v6 = vshll.u32 %v5039_v56, 16  ;;  %v974_v8 = vrot.slane %v973_v63, 4  ;;  %v2865_v9 = vrot.slane %v2863_v0, 4  ;;  %v2876_v10 = vshrl.u32 %v5039_v56, 16 }
  0x9f   : > { %5511 = vmatprep.mubr.msk.bf16.mxu1 %vm1102_vm2, %v4799_v61  ;;  %v2861_v7 = vsel %vm6234_vm3, %v2856_v62, %v2860_v54  ;;  %v984_v15 = vrot.slane %v983_v1, 4  ;;  %v2868_v16 = vrot.slane %v2866_v5, 5  ;;  %v2882_v21 = vshll.u32 %v5040_v3, 16  ;;  %v5047_v62 = vld [vmem:[%s6203_s7 + $0x4c] sm:$0x1] }
  0xa0   : > { %v5114_v14 = vcombine.low %v2851_v48, %v2861_v7  ;;  %v2874_v17 = vrot.slane %v2872_v6, 5  ;;  %v979_v18 = vsel %vm6234_vm3, %v974_v8, %v978_v58  ;;  %v2878_v20 = vrot.slane %v2876_v10, 4  ;;  %v6026_v1 = vld [vmem:[%s6203_s7 + $0x14] sm:$0xf]  ;;  %v5048_v10 = vld [vmem:[%s6203_s7 + $0x50] sm:$0xf] }
  0xa1   : > { %v2886_v22 = vshrl.u32 %v5040_v3, 16  ;;  %v989_v24 = vsel %vm6234_vm3, %v984_v15, %v988_v2  ;;  %v2869_v25 = vor.u32 %v2868_v16, %v2865_v9  ;;  %v4835_v28 = vcombine.low %v6024_v26, %v6025_v27  ;;  %v6027_v2 = vld [vmem:[%s6203_s7 + $0x18] sm:$0xf]  ;;  %v6028_v26 = vld [vmem:[%s6203_s7 + $0x1c] sm:$0xf] }
  0xa2   : > { %5656 = vmatmul.mubr.msk.bf16.vlgmr.msra.gmra.mrb[0].mxu0 %vm1102_vm2, %v5114_v14  ;;  %v2892_v29 = vshll.u32 %v5041_v13, 16  ;;  %v4800_v31 = vcombine.low %v979_v18, %v989_v24  ;;  %v2879_v4 = vor.u32 %v2878_v20, %v2874_v17  ;;  %v2884_v32 = vrot.slane %v2882_v21, 5  ;;  %v6029_v27 = vld [vmem:[%s6203_s7 + $0x20] sm:$0xf] }
  0xa3   : > { %v2888_v33 = vrot.slane %v2886_v22, 4  ;;  %v2870_v36 = vrot.slane %v2869_v25, 4  ;;  %v2896_v38 = vshrl.u32 %v5041_v13, 16  ;;  %v2902_v39 = vshll.u32 %v5042_v23, 16  ;;  %v5050_v23 = vld [vmem:[%s6203_s7 + $0x58] sm:$0xf] }
  0xa4   : > { %v2894_v37 = vrot.slane %v2892_v29, 5  ;;  %5512 = vmatmul.mubr.msk.bf16.gmra.mrb[60].mxu1 %vm1102_vm2, %v4800_v31  ;;  %v2880_v40 = vrot.slane %v2879_v4, 4  ;;  %v2907_v42 = vshrl.u32 %v5043_v30, 16  ;;  %v2910_v43 = vshll.u32 %v5043_v30, 16 }
  0xa5   : > { %v2889_v41 = vor.u32 %v2888_v33, %v2884_v32  ;;  %v2875_v44 = vsel %vm6234_vm3, %v2870_v36, %v2874_v17  ;;  %5519 = vmatprep.mubr.msk.bf16.mxu1 %vm1102_vm2, %v4835_v28  ;;  %v2898_v45 = vrot.slane %v2896_v38, 4  ;;  %v2904_v46 = vrot.slane %v2902_v39, 5  ;;  %v5049_v17 = vld [vmem:[%s6203_s7 + $0x54] sm:$0xf] }
  0xa6   : > { %v2916_v48 = vshll.u32 %v5044_v35, 16  ;;  %v2885_v49 = vsel %vm6234_vm3, %v2880_v40, %v2884_v32  ;;  %v2909_v51 = vrot.slane %v2907_v42, 4  ;;  %v2912_v52 = vrot.slane %v2910_v43, 5 }
  0xa7   : > { %v2890_v50 = vrot.slane %v2889_v41, 4  ;;  %v5115_v54 = vcombine.low %v2875_v44, %v2885_v49  ;;  %v2899_v55 = vor.u32 %v2898_v45, %v2894_v37  ;;  %v2920_v57 = vshrl.u32 %v5044_v35, 16  ;;  %v5051_v35 = vld [vmem:[%s6203_s7 + $0x5c] sm:$0xf]  ;;  %v5052_v44 = vld [vmem:[%s6203_s7 + $0x60] sm:$0x1] }
  0xa8   : > { %v2918_v56 = vrot.slane %v2916_v48, 5  ;;  %v2913_v59 = vor.u32 %v2912_v52, %v2909_v51  ;;  %v2926_v60 = vshll.u32 %v5045_v47, 16  ;;  %v2930_v61 = vshrl.u32 %v5045_v47, 16  ;;  %v6030_v47 = vld [vmem:[%s6203_s7 + $0x28] sm:$0xf] }
  0xa9   : > { %v2895_v58 = vsel %vm6234_vm3, %v2890_v50, %v2894_v37  ;;  %5659 = vmatprep.mubr.msk.bf16.mxu0 %vm1102_vm2, %v5115_v54  ;;  %v2900_v63 = vrot.slane %v2899_v55, 4  ;;  %v2922_v0 = vrot.slane %v2920_v57, 4  ;;  %v4837_v3 = vcombine.low %v6026_v1, %v6027_v2  ;;  %v6031_v48 = vld [vmem:[%s6203_s7 + $0x2c] sm:$0xf]  ;;  %v5053_v51 = vld [vmem:[%s6203_s7 + $0x64] sm:$0xf] }
  0xaa   : > { %v2936_v5 = vshll.u32 %v5046_v53, 16  ;;  %v2914_v6 = vrot.slane %v2913_v59, 4  ;;  %v2928_v7 = vrot.slane %v2926_v60, 5  ;;  %v2932_v8 = vrot.slane %v2930_v61, 4  ;;  %v6032_v60 = vld [vmem:[%s6203_s7 + $0x30] sm:$0xf] }
  0xab   : > { %v2940_v9 = vshrl.u32 %v5046_v53, 16  ;;  %v2905_v13 = vsel %vm6234_vm3, %v2900_v63, %v2904_v46  ;;  %v2923_v14 = vor.u32 %v2922_v0, %v2918_v56  ;;  %v2946_v16 = vshll.u32 %v5047_v62, 16  ;;  %v6033_v61 = vld [vmem:[%s6203_s7 + $0x34] sm:$0xf] }
  0xac   : > { %v2938_v15 = vrot.slane %v2936_v5, 5  ;;  %v5116_v18 = vcombine.low %v2895_v58, %v2905_v13  ;;  %5520 = vmatmul.mubr.msk.bf16.vlgmr.msra.gmra.mrb[0].mxu1 %vm1102_vm2, %v4836_v19  ;;  %v2919_v20 = vsel %vm6234_vm3, %v2914_v6, %v2918_v56  ;;  %v2933_v21 = vor.u32 %v2932_v8, %v2928_v7  ;;  %v5054_v56 = vld [vmem:[%s6203_s7 + $0x68] sm:$0xf]  ;;  %v5055_v6 = vld [vmem:[%s6203_s7 + $0x6c] sm:$0xf] }
  0xad   : > { %v2942_v22 = vrot.slane %v2940_v9, 4  ;;  %v2924_v24 = vrot.slane %v2923_v14, 4  ;;  %5523 = vmatprep.mubr.msk.bf16.mxu1 %vm1102_vm2, %v4837_v3  ;;  %v2948_v25 = vrot.slane %v2946_v16, 5  ;;  %v4838_v28 = vcombine.low %v6028_v26, %v6029_v27  ;;  %v6034_v27 = vld [vmem:[%s6203_s7 + $0x3c] sm:$0xf] }
  0xae   : > { %v2951_v29 = vshrl.u32 %v5048_v10, 16  ;;  %5660 = vmatmul.mubr.msk.bf16.gmra.mrb[4].mxu0 %vm1102_vm2, %v5116_v18  ;;  %v2934_v11 = vrot.slane %v2933_v21, 4  ;;  %v2954_v19 = vshll.u32 %v5048_v10, 16  ;;  %v2960_v30 = vshll.u32 %v5049_v17, 16 }
  0xaf   : > { %v2943_v12 = vor.u32 %v2942_v22, %v2938_v15  ;;  %v2929_v31 = vsel %vm6234_vm3, %v2924_v24, %v2928_v7  ;;  %v2964_v32 = vshrl.u32 %v5049_v17, 16  ;;  %v2970_v33 = vshll.u32 %v5050_v23, 16 }
  0xb0   : > { %v2953_v4 = vrot.slane %v2951_v29, 4  ;;  %v5117_v36 = vcombine.low %v2919_v20, %v2929_v31  ;;  %v2939_v37 = vsel %vm6234_vm3, %v2934_v11, %v2938_v15  ;;  %v2956_v39 = vrot.slane %v2954_v19, 5  ;;  %v5056_v15 = vld [vmem:[%s6203_s7 + $0x70] sm:$0xf]  ;;  %v5057_v11 = vld [vmem:[%s6203_s7 + $0x74] sm:$0x1] }
  0xb1   : > { %v2944_v38 = vrot.slane %v2943_v12, 4  ;;  %v2962_v40 = vrot.slane %v2960_v30, 5  ;;  %v2966_v41 = vrot.slane %v2964_v32, 4  ;;  %v2972_v42 = vrot.slane %v2970_v33, 5  ;;  %v5058_v32 = vld [vmem:[%s6203_s7 + $0x78] sm:$0xf] }
  0xb2   : > { %v2974_v43 = vshrl.u32 %v5050_v23, 16  ;;  %5663 = vmatprep.mubr.msk.bf16.mxu0 %vm1102_vm2, %v5117_v36  ;;  %v2957_v46 = vor.u32 %v2956_v39, %v2953_v4  ;;  %v4839_v49 = vcombine.low %v6030_v47, %v6031_v48  ;;  %v2980_v50 = vshll.u32 %v5051_v35, 16 }
  0xb3   : > { %v2949_v45 = vsel %vm6234_vm3, %v2944_v38, %v2948_v25  ;;  %v2967_v53 = vor.u32 %v2966_v41, %v2962_v40  ;;  %v2984_v55 = vshrl.u32 %v5051_v35, 16  ;;  %v2990_v59 = vshll.u32 %v5052_v44, 16  ;;  %v5059_v38 = vld [vmem:[%s6203_s7 + $0x7c] sm:$0xf] }
  0xb4   : > { %v5118_v52 = vcombine.low %v2939_v37, %v2949_v45  ;;  %v2976_v54 = vrot.slane %v2974_v43, 4  ;;  %5524 = vmatmul.mubr.msk.bf16.gmra.mrb[4].mxu1 %vm1102_vm2, %v4838_v28  ;;  %v2958_v57 = vrot.slane %v2957_v46, 4  ;;  %v2982_v58 = vrot.slane %v2980_v50, 5  ;;  %v6035_v28 = vld [vmem:[%s6203_s7 + $0x40] sm:$0xf] }
  0xb5   : > { %v4840_v62 = vcombine.low %v6032_v60, %v6033_v61  ;;  %v2968_v63 = vrot.slane %v2967_v53, 4  ;;  %5527 = vmatprep.mubr.msk.bf16.mxu1 %vm1102_vm2, %v4839_v49  ;;  %v2986_v1 = vrot.slane %v2984_v55, 4  ;;  %v2995_v2 = vshrl.u32 %v5053_v51, 16  ;;  %v6037_v43 = vld [vmem:[%s6203_s7 + $0x48] sm:$0xf] }
  0xb6   : > { %v2977_v0 = vor.u32 %v2976_v54, %v2972_v42  ;;  %5664 = vmatmul.mubr.msk.bf16.gmra.mrb[8].mxu0 %vm1102_vm2, %v5118_v52  ;;  %v2963_v3 = vsel %vm6234_vm3, %v2958_v57, %v2962_v40  ;;  %v2992_v5 = vrot.slane %v2990_v59, 5  ;;  %v2998_v7 = vshll.u32 %v5053_v51, 16  ;;  %v5060_v52 = vld [vmem:[%s6203_s7 + $0x80] sm:$0xf] }
  0xb7   : > { %v3004_v8 = vshll.u32 %v5054_v56, 16  ;;  %v2973_v9 = vsel %vm6234_vm3, %v2968_v63, %v2972_v42  ;;  %v2987_v13 = vor.u32 %v2986_v1, %v2982_v58  ;;  %v2997_v14 = vrot.slane %v2995_v2, 4  ;;  %v6036_v42 = vld [vmem:[%s6203_s7 + $0x44] sm:$0xf] }
  0xb8   : > { %v2978_v10 = vrot.slane %v2977_v0, 4  ;;  %v5119_v16 = vcombine.low %v2963_v3, %v2973_v9  ;;  %v3000_v17 = vrot.slane %v2998_v7, 5  ;;  %v3008_v20 = vshrl.u32 %v5054_v56, 16  ;;  %v5062_v3 = vld [vmem:[%s6203_s7 + $0x88] sm:$0x1] }
  0xb9   : > { %v3006_v18 = vrot.slane %v3004_v8, 5  ;;  %v2988_v22 = vrot.slane %v2987_v13, 4  ;;  %v3014_v23 = vshll.u32 %v5055_v6, 16  ;;  %v3018_v24 = vshrl.u32 %v5055_v6, 16  ;;  %v6038_v6 = vld [vmem:[%s6203_s7 + $0x50] sm:$0xf] }
  0xba   : > { %v2983_v21 = vsel %vm6234_vm3, %v2978_v10, %v2982_v58  ;;  %5667 = vmatprep.mubr.msk.bf16.mxu0 %vm1102_vm2, %v5119_v16  ;;  %v3001_v25 = vor.u32 %v3000_v17, %v2997_v14  ;;  %v3010_v26 = vrot.slane %v3008_v20, 4  ;;  %v4841_v29 = vcombine.low %v6034_v27, %v6035_v28  ;;  %v5061_v58 = vld [vmem:[%s6203_s7 + $0x84] sm:$0xf]  ;;  %v6039_v7 = vld [vmem:[%s6203_s7 + $0x54] sm:$0xf] }
  0xbb   : > { %v3024_v12 = vshll.u32 %v5056_v15, 16  ;;  %v2993_v19 = vsel %vm6234_vm3, %v2988_v22, %v2992_v5  ;;  %v3016_v30 = vrot.slane %v3014_v23, 5  ;;  %v3020_v31 = vrot.slane %v3018_v24, 4  ;;  %v5063_v13 = vld [vmem:[%s6203_s7 + $0x8c] sm:$0xf] }
  0xbc   : > { %v3028_v4 = vshrl.u32 %v5056_v15, 16  ;;  %v5120_v33 = vcombine.low %v2983_v21, %v2993_v19  ;;  %5528 = vmatmul.mubr.msk.bf16.gmra.mrb[8].mxu1 %vm1102_vm2, %v4840_v62  ;;  %v3002_v35 = vrot.slane %v3001_v25, 4  ;;  %v3011_v36 = vor.u32 %v3010_v26, %v3006_v18  ;;  %v5064_v23 = vld [vmem:[%s6203_s7 + $0x90] sm:$0xf]  ;;  %v6040_v26 = vld [vmem:[%s6203_s7 + $0x58] sm:$0xf] }
  0xbd   : > { %v3026_v37 = vrot.slane %v3024_v12, 5  ;;  %5531 = vmatprep.mubr.msk.bf16.mxu1 %vm1102_vm2, %v4841_v29  ;;  %v3021_v39 = vor.u32 %v3020_v31, %v3016_v30  ;;  %v3034_v41 = vshll.u32 %v5057_v11, 16  ;;  %v4842_v44 = vcombine.low %v6036_v42, %v6037_v43  ;;  %v6041_v27 = vld [vmem:[%s6203_s7 + $0x5c] sm:$0xf] }
  0xbe   : > { %v3030_v40 = vrot.slane %v3028_v4, 4  ;;  %5668 = vmatmul.mubr.msk.bf16.gmra.mrb[12].mxu0 %vm1102_vm2, %v5120_v33  ;;  %v3007_v45 = vsel %vm6234_vm3, %v3002_v35, %v3006_v18  ;;  %v3012_v46 = vrot.slane %v3011_v36, 4  ;;  %v3039_v47 = vshrl.u32 %v5058_v32, 16 }
  0xbf   : > { %v3042_v48 = vshll.u32 %v5058_v32, 16  ;;  %v3022_v49 = vrot.slane %v3021_v39, 4  ;;  %v3036_v51 = vrot.slane %v3034_v41, 5  ;;  %v3048_v53 = vshll.u32 %v5059_v38, 16 }
  0xc0   : > { %v3031_v50 = vor.u32 %v3030_v40, %v3026_v37  ;;  %v3017_v54 = vsel %vm6234_vm3, %v3012_v46, %v3016_v30  ;;  %v3041_v55 = vrot.slane %v3039_v47, 4  ;;  %v3052_v57 = vshrl.u32 %v5059_v38, 16  ;;  %v5065_v30 = vld [vmem:[%s6203_s7 + $0x94] sm:$0xf]  ;;  %v5066_v40 = vld [vmem:[%s6203_s7 + $0x98] sm:$0xf] }
  0xc1   : > { %v3044_v56 = vrot.slane %v3042_v48, 5  ;;  %v5121_v59 = vcombine.low %v3007_v45, %v3017_v54  ;;  %v3027_v60 = vsel %vm6234_vm3, %v3022_v49, %v3026_v37  ;;  %v3050_v62 = vrot.slane %v3048_v53, 5  ;;  %v5067_v45 = vld [vmem:[%s6203_s7 + $0x9c] sm:$0x1]  ;;  %v6042_v49 = vld [vmem:[%s6203_s7 + $0x64] sm:$0xf] }
  0xc2   : > { %v3032_v61 = vrot.slane %v3031_v50, 4  ;;  %v3054_v0 = vrot.slane %v3052_v57, 4  ;;  %v3058_v1 = vshll.u32 %v5060_v52, 16  ;;  %v3062_v2 = vshrl.u32 %v5060_v52, 16  ;;  %v6043_v50 = vld [vmem:[%s6203_s7 + $0x68] sm:$0xf] }
  0xc3   : > { %v3045_v63 = vor.u32 %v3044_v56, %v3041_v55  ;;  %5671 = vmatprep.mubr.msk.bf16.mxu0 %vm1102_vm2, %v5121_v59  ;;  %v4843_v8 = vcombine.low %v6038_v6, %v6039_v7  ;;  %v3068_v9 = vshll.u32 %v5061_v58, 16  ;;  %v3072_v10 = vshrl.u32 %v5061_v58, 16  ;;  %v5068_v52 = vld [vmem:[%s6203_s7 + $0xa0] sm:$0xf] }
  0xc4   : > { %v3037_v5 = vsel %vm6234_vm3, %v3032_v61, %v3036_v51  ;;  %5532 = vmatmul.mubr.msk.bf16.gmra.mrb[12].mxu1 %vm1102_vm2, %v4842_v44  ;;  %v3055_v16 = vor.u32 %v3054_v0, %v3050_v62  ;;  %v3060_v17 = vrot.slane %v3058_v1, 5  ;;  %v3064_v18 = vrot.slane %v3062_v2, 4  ;;  %v6045_v0 = vld [vmem:[%s6203_s7 + $0x70] sm:$0xf]  ;;  %v5069_v2 = vld [vmem:[%s6203_s7 + $0xa4] sm:$0xf] }
  0xc5   : > { %v5122_v14 = vcombine.low %v3027_v60, %v3037_v5  ;;  %v3046_v15 = vrot.slane %v3045_v63, 4  ;;  %5535 = vmatprep.mubr.msk.bf16.mxu1 %vm1102_vm2, %v4843_v8  ;;  %v3070_v20 = vrot.slane %v3068_v9, 5  ;;  %v3074_v21 = vrot.slane %v3072_v10, 4  ;;  %v6044_v63 = vld [vmem:[%s6203_s7 + $0x6c] sm:$0xf] }
  0xc6   : > { %v3078_v22 = vshll.u32 %v5062_v3, 16  ;;  %v3056_v25 = vrot.slane %v3055_v16, 4  ;;  %v4844_v28 = vcombine.low %v6040_v26, %v6041_v27  ;;  %v3083_v29 = vshrl.u32 %v5063_v13, 16  ;;  %v5070_v9 = vld [vmem:[%s6203_s7 + $0xa8] sm:$0xf] }
  0xc7   : > { %5672 = vmatmul.mubr.msk.bf16.gmra.mrb[16].mxu0 %vm1102_vm2, %v5122_v14  ;;  %v3051_v24 = vsel %vm6234_vm3, %v3046_v15, %v3050_v62  ;;  %v3065_v11 = vor.u32 %v3064_v18, %v3060_v17  ;;  %v3075_v12 = vor.u32 %v3074_v21, %v3070_v20  ;;  %v3086_v31 = vshll.u32 %v5063_v13, 16  ;;  %v5071_v21 = vld [vmem:[%s6203_s7 + $0xac] sm:$0xf]  ;;  %v5072_v26 = vld [vmem:[%s6203_s7 + $0xb0] sm:$0x1] }
  0xc8   : > { %v3080_v19 = vrot.slane %v3078_v22, 5  ;;  %v3061_v4 = vsel %vm6234_vm3, %v3056_v25, %v3060_v17  ;;  %v3085_v32 = vrot.slane %v3083_v29, 4  ;;  %v3092_v33 = vshll.u32 %v5064_v23, 16 }
  0xc9   : > { %v3096_v35 = vshrl.u32 %v5064_v23, 16  ;;  %v5123_v36 = vcombine.low %v3051_v24, %v3061_v4  ;;  %v3066_v37 = vrot.slane %v3065_v11, 4  ;;  %v3076_v38 = vrot.slane %v3075_v12, 4  ;;  %v6046_v11 = vld [vmem:[%s6203_s7 + $0x78] sm:$0xf] }
  0xca   : > { %v3088_v39 = vrot.slane %v3086_v31, 5  ;;  %v3094_v41 = vrot.slane %v3092_v33, 5  ;;  %v3102_v43 = vshll.u32 %v5065_v30, 16  ;;  %v3106_v44 = vshrl.u32 %v5065_v30, 16  ;;  %v6047_v12 = vld [vmem:[%s6203_s7 + $0x7c] sm:$0xf] }
  0xcb   : > { %v3098_v42 = vrot.slane %v3096_v35, 4  ;;  %5675 = vmatprep.mubr.msk.bf16.mxu0 %vm1102_vm2, %v5123_v36  ;;  %v3071_v46 = vsel %vm6234_vm3, %v3066_v37, %v3070_v20  ;;  %v3081_v47 = vsel %vm6234_vm3, %v3076_v38, %v3080_v19  ;;  %v4845_v51 = vcombine.low %v6042_v49, %v6043_v50  ;;  %v5073_v38 = vld [vmem:[%s6203_s7 + $0xb4] sm:$0xf] }
  0xcc   : > { %v3089_v48 = vor.u32 %v3088_v39, %v3085_v32  ;;  %v5124_v53 = vcombine.low %v3071_v46, %v3081_v47  ;;  %5536 = vmatmul.mubr.msk.bf16.gmra.mrb[16].mxu1 %vm1102_vm2, %v4844_v28  ;;  %v3104_v55 = vrot.slane %v3102_v43, 5  ;;  %v3108_v56 = vrot.slane %v3106_v44, 4  ;;  %v5074_v43 = vld [vmem:[%s6203_s7 + $0xb8] sm:$0xf]  ;;  %v6048_v47 = vld [vmem:[%s6203_s7 + $0x80] sm:$0xf] }
  0xcd   : > { %v3099_v54 = vor.u32 %v3098_v42, %v3094_v41  ;;  %5539 = vmatprep.mubr.msk.bf16.mxu1 %vm1102_vm2, %v4845_v51  ;;  %v3112_v58 = vshll.u32 %v5066_v40, 16  ;;  %v3116_v59 = vshrl.u32 %v5066_v40, 16  ;;  %v3122_v60 = vshll.u32 %v5067_v45, 16 }
  0xce   : > { %v3090_v57 = vrot.slane %v3089_v48, 4  ;;  %v3109_v62 = vor.u32 %v3108_v56, %v3104_v55  ;;  %v4846_v1 = vcombine.low %v6044_v63, %v6045_v0  ;;  %v3127_v3 = vshrl.u32 %v5068_v52, 16  ;;  %v6049_v48 = vld [vmem:[%s6203_s7 + $0x84] sm:$0xf] }
  0xcf   : > { %5676 = vmatmul.mubr.msk.bf16.gmra.mrb[20].mxu0 %vm1102_vm2, %v5124_v53  ;;  %v3100_v61 = vrot.slane %v3099_v54, 4  ;;  %v3114_v6 = vrot.slane %v3112_v58, 5  ;;  %v3118_v7 = vrot.slane %v3116_v59, 4  ;;  %v3124_v8 = vrot.slane %v3122_v60, 5  ;;  %v5076_v59 = vld [vmem:[%s6203_s7 + $0xc0] sm:$0xf] }
  0xd0   : > { %v3095_v5 = vsel %vm6234_vm3, %v3090_v57, %v3094_v41  ;;  %v3110_v13 = vrot.slane %v3109_v62, 4  ;;  %v3129_v14 = vrot.slane %v3127_v3, 4  ;;  %v3130_v15 = vshll.u32 %v5068_v52, 16  ;;  %v5075_v52 = vld [vmem:[%s6203_s7 + $0xbc] sm:$0xf] }
  0xd1   : > { %v3105_v10 = vsel %vm6234_vm3, %v3100_v61, %v3104_v55  ;;  %v3119_v17 = vor.u32 %v3118_v7, %v3114_v6  ;;  %v3136_v18 = vshll.u32 %v5069_v2, 16  ;;  %v3140_v20 = vshrl.u32 %v5069_v2, 16  ;;  %v6050_v7 = vld [vmem:[%s6203_s7 + $0x8c] sm:$0xf] }
  0xd2   : > { %v5125_v16 = vcombine.low %v3095_v5, %v3105_v10  ;;  %v3115_v22 = vsel %vm6234_vm3, %v3110_v13, %v3114_v6  ;;  %v3132_v23 = vrot.slane %v3130_v15, 5  ;;  %v3146_v24 = vshll.u32 %v5070_v9, 16  ;;  %v5077_v10 = vld [vmem:[%s6203_s7 + $0xc4] sm:$0x1] }
  0xd3   : > { %v3150_v25 = vshrl.u32 %v5070_v9, 16  ;;  %v3120_v27 = vrot.slane %v3119_v17, 4  ;;  %v3138_v28 = vrot.slane %v3136_v18, 5  ;;  %v3142_v29 = vrot.slane %v3140_v20, 4  ;;  %v5078_v18 = vld [vmem:[%s6203_s7 + $0xc8] sm:$0xf] }
  0xd4   : > { %5679 = vmatprep.mubr.msk.bf16.mxu0 %vm1102_vm2, %v5125_v16  ;;  %v4847_v19 = vcombine.low %v6046_v11, %v6047_v12  ;;  %5540 = vmatmul.mubr.msk.bf16.gmra.mrb[20].mxu1 %vm1102_vm2, %v4846_v1  ;;  %v3133_v30 = vor.u32 %v3132_v23, %v3129_v14  ;;  %v3148_v31 = vrot.slane %v3146_v24, 5  ;;  %v3156_v32 = vshll.u32 %v5071_v21, 16  ;;  %v5079_v24 = vld [vmem:[%s6203_s7 + $0xcc] sm:$0xf] }
  0xd5   : > { %v3152_v4 = vrot.slane %v3150_v25, 4  ;;  %v3125_v33 = vsel %vm6234_vm3, %v3120_v27, %v3124_v8  ;;  %v3143_v35 = vor.u32 %v3142_v29, %v3138_v28  ;;  %v3160_v36 = vshrl.u32 %v5071_v21, 16  ;;  %v6051_v8 = vld [vmem:[%s6203_s7 + $0x90] sm:$0xf]  ;;  %v6053_v29 = vld [vmem:[%s6203_s7 + $0x98] sm:$0xf] }
  0xd6   : > { %5543 = vmatprep.mubr.msk.bf16.mxu1 %vm1102_vm2, %v4847_v19  ;;  %v3166_v37 = vshll.u32 %v5072_v26, 16  ;;  %v5126_v39 = vcombine.low %v3115_v22, %v3125_v33  ;;  %v3134_v40 = vrot.slane %v3133_v30, 4  ;;  %v3158_v42 = vrot.slane %v3156_v32, 5  ;;  %v5080_v30 = vld [vmem:[%s6203_s7 + $0xd0] sm:$0xf] }
  0xd7   : > { %v3153_v41 = vor.u32 %v3152_v4, %v3148_v31  ;;  %v3144_v44 = vrot.slane %v3143_v35, 4  ;;  %v3162_v45 = vrot.slane %v3160_v36, 4  ;;  %v4848_v49 = vcombine.low %v6048_v47, %v6049_v48 }
  0xd8   : > { %v3168_v46 = vrot.slane %v3166_v37, 5  ;;  %5680 = vmatmul.mubr.msk.bf16.gmra.mrb[24].mxu0 %vm1102_vm2, %v5126_v39  ;;  %v3139_v50 = vsel %vm6234_vm3, %v3134_v40, %v3138_v28  ;;  %v3171_v53 = vshrl.u32 %v5073_v38, 16  ;;  %v3174_v54 = vshll.u32 %v5073_v38, 16  ;;  %v6052_v28 = vld [vmem:[%s6203_s7 + $0x94] sm:$0xf] }
  0xd9   : > { %v3154_v51 = vrot.slane %v3153_v41, 4  ;;  %v3149_v55 = vsel %vm6234_vm3, %v3144_v44, %v3148_v31  ;;  %v3163_v56 = vor.u32 %v3162_v45, %v3158_v42  ;;  %v3180_v57 = vshll.u32 %v5074_v43, 16  ;;  %v5081_v41 = vld [vmem:[%s6203_s7 + $0xd4] sm:$0xf] }
  0xda   : > { %v3184_v58 = vshrl.u32 %v5074_v43, 16  ;;  %v5127_v60 = vcombine.low %v3139_v50, %v3149_v55  ;;  %v3173_v62 = vrot.slane %v3171_v53, 4  ;;  %v3176_v63 = vrot.slane %v3174_v54, 5  ;;  %v6055_v50 = vld [vmem:[%s6203_s7 + $0xa4] sm:$0xf] }
  0xdb   : > { %v3159_v61 = vsel %vm6234_vm3, %v3154_v51, %v3158_v42  ;;  %v3164_v0 = vrot.slane %v3163_v56, 4  ;;  %v3182_v1 = vrot.slane %v3180_v57, 5  ;;  %v3190_v3 = vshll.u32 %v5075_v52, 16  ;;  %v5083_v57 = vld [vmem:[%s6203_s7 + $0xdc] sm:$0xf] }
  0xdc   : > { %v3186_v2 = vrot.slane %v3184_v58, 4  ;;  %5683 = vmatprep.mubr.msk.bf16.mxu0 %vm1102_vm2, %v5127_v60  ;;  %5544 = vmatmul.mubr.msk.bf16.gmra.mrb[24].mxu1 %vm1102_vm2, %v4848_v49  ;;  %v3177_v5 = vor.u32 %v3176_v63, %v3173_v62  ;;  %v3194_v6 = vshrl.u32 %v5075_v52, 16  ;;  %v4849_v9 = vcombine.low %v6050_v7, %v6051_v8  ;;  %v6054_v49 = vld [vmem:[%s6203_s7 + $0xa0] sm:$0xf]  ;;  %v5082_v52 = vld [vmem:[%s6203_s7 + $0xd8] sm:$0x1] }
  0xdd   : > { %v3200_v13 = vshll.u32 %v5076_v59, 16  ;;  %v3169_v14 = vsel %vm6234_vm3, %v3164_v0, %v3168_v46  ;;  %v3192_v16 = vrot.slane %v3190_v3, 5  ;;  %v3204_v17 = vshrl.u32 %v5076_v59, 16  ;;  %v5084_v62 = vld [vmem:[%s6203_s7 + $0xe0] sm:$0xf] }
  0xde   : > { %v3187_v15 = vor.u32 %v3186_v2, %v3182_v1  ;;  %v5128_v20 = vcombine.low %v3159_v61, %v3169_v14  ;;  %v3178_v21 = vrot.slane %v3177_v5, 4  ;;  %5547 = vmatprep.mubr.msk.bf16.mxu1 %vm1102_vm2, %v4849_v9  ;;  %v3196_v22 = vrot.slane %v3194_v6, 4  ;;  %v6056_v2 = vld [vmem:[%s6203_s7 + $0xa8] sm:$0xf]  ;;  %v6057_v3 = vld [vmem:[%s6203_s7 + $0xac] sm:$0xf] }
  0xdf   : > { %v3202_v23 = vrot.slane %v3200_v13, 5  ;;  %v3206_v26 = vrot.slane %v3204_v17, 4  ;;  %v3210_v27 = vshll.u32 %v5077_v10, 16  ;;  %v4850_v11 = vcombine.low %v6052_v28, %v6053_v29  ;;  %v5085_v9 = vld [vmem:[%s6203_s7 + $0xe4] sm:$0xf] }
  0xe0   : > { %v3188_v25 = vrot.slane %v3187_v15, 4  ;;  %5684 = vmatmul.mubr.msk.bf16.gmra.mrb[28].mxu0 %vm1102_vm2, %v5128_v20  ;;  %v3183_v12 = vsel %vm6234_vm3, %v3178_v21, %v3182_v1  ;;  %v3197_v19 = vor.u32 %v3196_v22, %v3192_v16  ;;  %v3215_v31 = vshrl.u32 %v5078_v18, 16 }
  0xe1   : > { %v3218_v4 = vshll.u32 %v5078_v18, 16  ;;  %v3207_v33 = vor.u32 %v3206_v26, %v3202_v23  ;;  %v3212_v35 = vrot.slane %v3210_v27, 5  ;;  %v3224_v36 = vshll.u32 %v5079_v24, 16  ;;  %v5086_v26 = vld [vmem:[%s6203_s7 + $0xe8] sm:$0xf] }
  0xe2   : > { %v3193_v32 = vsel %vm6234_vm3, %v3188_v25, %v3192_v16  ;;  %v3198_v38 = vrot.slane %v3197_v19, 4  ;;  %v3217_v39 = vrot.slane %v3215_v31, 4  ;;  %v3228_v44 = vshrl.u32 %v5079_v24, 16 }
  0xe3   : > { %v5129_v37 = vcombine.low %v3183_v12, %v3193_v32  ;;  %v3220_v40 = vrot.slane %v3218_v4, 5  ;;  %v3208_v42 = vrot.slane %v3207_v33, 4  ;;  %v3226_v43 = vrot.slane %v3224_v36, 5  ;;  %v5087_v12 = vld [vmem:[%s6203_s7 + $0xec] sm:$0x1] }
  0xe4   : > { %v3234_v45 = vshll.u32 %v5080_v30, 16  ;;  %v3203_v46 = vsel %vm6234_vm3, %v3198_v38, %v3202_v23  ;;  %5548 = vmatmul.mubr.msk.bf16.gmra.mrb[28].mxu1 %vm1102_vm2, %v4850_v11  ;;  %v3238_v48 = vshrl.u32 %v5080_v30, 16  ;;  %v4851_v51 = vcombine.low %v6054_v49, %v6055_v50  ;;  %v6058_v4 = vld [vmem:[%s6203_s7 + $0xb4] sm:$0xf]  ;;  %v6059_v32 = vld [vmem:[%s6203_s7 + $0xb8] sm:$0xf] }
  0xe5   : > { %5687 = vmatprep.mubr.msk.bf16.mxu0 %vm1102_vm2, %v5129_v37  ;;  %v3221_v47 = vor.u32 %v3220_v40, %v3217_v39  ;;  %v3213_v53 = vsel %vm6234_vm3, %v3208_v42, %v3212_v35  ;;  %v3230_v54 = vrot.slane %v3228_v44, 4  ;;  %v3244_v56 = vshll.u32 %v5081_v41, 16  ;;  %v5088_v39 = vld [vmem:[%s6203_s7 + $0xf0] sm:$0xf]  ;;  %v5089_v44 = vld [vmem:[%s6203_s7 + $0xf4] sm:$0xf] }
  0xe6   : > { %v3236_v55 = vrot.slane %v3234_v45, 5  ;;  %v5130_v58 = vcombine.low %v3203_v46, %v3213_v53  ;;  %5551 = vmatprep.mubr.msk.bf16.mxu1 %vm1102_vm2, %v4851_v51  ;;  %v3240_v60 = vrot.slane %v3238_v48, 4  ;;  %v3248_v61 = vshrl.u32 %v5081_v41, 16  ;;  %v6060_v48 = vld [vmem:[%s6203_s7 + $0xbc] sm:$0xf] }
  0xe7   : > { %v3222_v59 = vrot.slane %v3221_v47, 4  ;;  %v3231_v63 = vor.u32 %v3230_v54, %v3226_v43  ;;  %v3246_v0 = vrot.slane %v3244_v56, 5  ;;  %v3254_v1 = vshll.u32 %v5082_v52, 16  ;;  %v6061_v49 = vld [vmem:[%s6203_s7 + $0xc0] sm:$0xf] }
  0xe8   : > { %v4852_v5 = vcombine.low %v6056_v2, %v6057_v3  ;;  %5688 = vmatmul.mubr.msk.bf16.gmra.mrb[32].mxu0 %vm1102_vm2, %v5130_v58  ;;  %v3241_v7 = vor.u32 %v3240_v60, %v3236_v55  ;;  %v3250_v8 = vrot.slane %v3248_v61, 4  ;;  %v3259_v10 = vshrl.u32 %v5083_v57, 16  ;;  %v5090_v54 = vld [vmem:[%s6203_s7 + $0xf8] sm:$0xf] }
  0xe9   : > { %v3227_v6 = vsel %vm6234_vm3, %v3222_v59, %v3226_v43  ;;  %v3232_v13 = vrot.slane %v3231_v63, 4  ;;  %v3256_v14 = vrot.slane %v3254_v1, 5  ;;  %v3262_v15 = vshll.u32 %v5083_v57, 16 }
  0xea   : > { %v3268_v16 = vshll.u32 %v5084_v62, 16  ;;  %v3242_v17 = vrot.slane %v3241_v7, 4  ;;  %v3251_v18 = vor.u32 %v3250_v8, %v3246_v0  ;;  %v3261_v20 = vrot.slane %v3259_v10, 4  ;;  %v6063_v10 = vld [vmem:[%s6203_s7 + $0xcc] sm:$0xf] }
  0xeb   : > { %v3272_v21 = vshrl.u32 %v5084_v62, 16  ;;  %v3237_v22 = vsel %vm6234_vm3, %v3232_v13, %v3236_v55  ;;  %v3264_v23 = vrot.slane %v3262_v15, 5  ;;  %v3278_v25 = vshll.u32 %v5085_v9, 16 }
  0xec   : > { %v3270_v24 = vrot.slane %v3268_v16, 5  ;;  %v5131_v27 = vcombine.low %v3227_v6, %v3237_v22  ;;  %v3247_v28 = vsel %vm6234_vm3, %v3242_v17, %v3246_v0  ;;  %v3252_v29 = vrot.slane %v3251_v18, 4  ;;  %5552 = vmatmul.mubr.msk.bf16.gmra.mrb[32].mxu1 %vm1102_vm2, %v4852_v5  ;;  %v5091_v0 = vld [vmem:[%s6203_s7 + $0xfc] sm:$0xf] }
  0xed   : > { %v3274_v11 = vrot.slane %v3272_v21, 4  ;;  %v3265_v19 = vor.u32 %v3264_v23, %v3261_v20  ;;  %v3280_v30 = vrot.slane %v3278_v25, 5  ;;  %v3282_v31 = vshrl.u32 %v5085_v9, 16  ;;  %v6062_v9 = vld [vmem:[%s6203_s7 + $0xc8] sm:$0xf] }
  0xee   : > { %v4853_v33 = vcombine.low %v6058_v4, %v6059_v32  ;;  %5691 = vmatprep.mubr.msk.bf16.mxu0 %vm1102_vm2, %v5131_v27  ;;  %v3257_v35 = vsel %vm6234_vm3, %v3252_v29, %v3256_v14  ;;  %v3288_v37 = vshll.u32 %v5086_v26, 16  ;;  %v3292_v38 = vshrl.u32 %v5086_v26, 16  ;;  %v5092_v14 = vld [vmem:[%s6203_s7 + $0x100] sm:$0x1]  ;;  %v5093_v20 = vld [vmem:[%s6203_s7 + $0x104] sm:$0xf] }
  0xef   : > { %v3275_v36 = vor.u32 %v3274_v11, %v3270_v24  ;;  %v5132_v40 = vcombine.low %v3247_v28, %v3257_v35  ;;  %v3266_v41 = vrot.slane %v3265_v19, 4  ;;  %v3284_v42 = vrot.slane %v3282_v31, 4  ;;  %v5094_v25 = vld [vmem:[%s6203_s7 + $0x108] sm:$0xf]  ;;  %v6064_v29 = vld [vmem:[%s6203_s7 + $0xd0] sm:$0xf] }
  0xf0   : > { %5555 = vmatprep.mubr.msk.bf16.mxu1 %vm1102_vm2, %v4853_v33  ;;  %v3298_v43 = vshll.u32 %v5087_v12, 16  ;;  %v3290_v46 = vrot.slane %v3288_v37, 5  ;;  %v3294_v47 = vrot.slane %v3292_v38, 4  ;;  %v4854_v50 = vcombine.low %v6060_v48, %v6061_v49  ;;  %v6065_v11 = vld [vmem:[%s6203_s7 + $0xd4] sm:$0xf] }
  0xf1   : > { %v3276_v45 = vrot.slane %v3275_v36, 4  ;;  %5692 = vmatmul.mubr.msk.bf16.gmra.mrb[36].mxu0 %vm1102_vm2, %v5132_v40  ;;  %v3271_v51 = vsel %vm6234_vm3, %v3266_v41, %v3270_v24  ;;  %v3285_v52 = vor.u32 %v3284_v42, %v3280_v30  ;;  %v3303_v55 = vshrl.u32 %v5088_v39, 16  ;;  %v5095_v35 = vld [vmem:[%s6203_s7 + $0x10c] sm:$0xf]  ;;  %v5096_v42 = vld [vmem:[%s6203_s7 + $0x110] sm:$0xf] }
  0xf2   : > { %v3300_v53 = vrot.slane %v3298_v43, 5  ;;  %v3295_v57 = vor.u32 %v3294_v47, %v3290_v46  ;;  %v3306_v58 = vshll.u32 %v5088_v39, 16  ;;  %v3312_v59 = vshll.u32 %v5089_v44, 16 }
  0xf3   : > { %v3281_v56 = vsel %vm6234_vm3, %v3276_v45, %v3280_v30  ;;  %v3286_v61 = vrot.slane %v3285_v52, 4  ;;  %v3305_v62 = vrot.slane %v3303_v55, 4  ;;  %v3316_v63 = vshrl.u32 %v5089_v44, 16 }
  0xf4   : > { %v5133_v60 = vcombine.low %v3271_v51, %v3281_v56  ;;  %v3296_v1 = vrot.slane %v3295_v57, 4  ;;  %5556 = vmatmul.mubr.msk.bf16.gmra.mrb[36].mxu1 %vm1102_vm2, %v4854_v50  ;;  %v3308_v2 = vrot.slane %v3306_v58, 5  ;;  %v3314_v3 = vrot.slane %v3312_v59, 5  ;;  %v5097_v56 = vld [vmem:[%s6203_s7 + $0x114] sm:$0x1] }
  0xf5   : > { %v3322_v5 = vshll.u32 %v5090_v54, 16  ;;  %v3291_v6 = vsel %vm6234_vm3, %v3286_v61, %v3290_v46  ;;  %v3318_v7 = vrot.slane %v3316_v63, 4  ;;  %v3326_v8 = vshrl.u32 %v5090_v54, 16  ;;  %v6067_v54 = vld [vmem:[%s6203_s7 + $0xe0] sm:$0xf] }
  0xf6   : > { %5695 = vmatprep.mubr.msk.bf16.mxu0 %vm1102_vm2, %v5133_v60  ;;  %v4855_v13 = vcombine.low %v6062_v9, %v6063_v10  ;;  %v3301_v15 = vsel %vm6234_vm3, %v3296_v1, %v3300_v53  ;;  %v3309_v16 = vor.u32 %v3308_v2, %v3305_v62  ;;  %v3332_v18 = vshll.u32 %v5091_v0, 16  ;;  %v6066_v53 = vld [vmem:[%s6203_s7 + $0xdc] sm:$0xf]  ;;  %v5098_v62 = vld [vmem:[%s6203_s7 + $0x118] sm:$0xf] }
  0xf7   : > { %v3324_v17 = vrot.slane %v3322_v5, 5  ;;  %v5134_v21 = vcombine.low %v3291_v6, %v3301_v15  ;;  %v3319_v22 = vor.u32 %v3318_v7, %v3314_v3  ;;  %v3328_v23 = vrot.slane %v3326_v8, 4  ;;  %v6068_v8 = vld [vmem:[%s6203_s7 + $0xe4] sm:$0xf]  ;;  %v6069_v9 = vld [vmem:[%s6203_s7 + $0xe8] sm:$0xf] }
  0xf8   : > { %5559 = vmatprep.mubr.msk.bf16.mxu1 %vm1102_vm2, %v4855_v13  ;;  %v3336_v24 = vshrl.u32 %v5091_v0, 16  ;;  %v3310_v26 = vrot.slane %v3309_v16, 4  ;;  %v3334_v27 = vrot.slane %v3332_v18, 5  ;;  %v3342_v28 = vshll.u32 %v5092_v14, 16 }
  0xf9   : > { %v4856_v12 = vcombine.low %v6064_v29, %v6065_v11  ;;  %5696 = vmatmul.mubr.msk.bf16.gmra.mrb[40].mxu0 %vm1102_vm2, %v5134_v21  ;;  %v3320_v19 = vrot.slane %v3319_v22, 4  ;;  %v3329_v30 = vor.u32 %v3328_v23, %v3324_v17  ;;  %v3347_v4 = vshrl.u32 %v5093_v20, 16  ;;  %v5100_v21 = vld [vmem:[%s6203_s7 + $0x120] sm:$0xf] }
  0xfa   : > { %v3338_v31 = vrot.slane %v3336_v24, 4  ;;  %v3315_v32 = vsel %vm6234_vm3, %v3310_v26, %v3314_v3  ;;  %v3344_v33 = vrot.slane %v3342_v28, 5  ;;  %v3350_v36 = vshll.u32 %v5093_v20, 16  ;;  %v5099_v3 = vld [vmem:[%s6203_s7 + $0x11c] sm:$0xf] }
  0xfb   : > { %v3356_v37 = vshll.u32 %v5094_v25, 16  ;;  %v3325_v38 = vsel %vm6234_vm3, %v3320_v19, %v3324_v17  ;;  %v3330_v39 = vrot.slane %v3329_v30, 4  ;;  %v3349_v41 = vrot.slane %v3347_v4, 4 }
  0xfc   : > { %v3339_v40 = vor.u32 %v3338_v31, %v3334_v27  ;;  %v5135_v43 = vcombine.low %v3315_v32, %v3325_v38  ;;  %5560 = vmatmul.mubr.msk.bf16.gmra.mrb[40].mxu1 %vm1102_vm2, %v4856_v12  ;;  %v3352_v44 = vrot.slane %v3350_v36, 5  ;;  %v3360_v46 = vshrl.u32 %v5094_v25, 16  ;;  %v5102_v32 = vld [vmem:[%s6203_s7 + $0x128] sm:$0x1]  ;;  %v6071_v36 = vld [vmem:[%s6203_s7 + $0xf4] sm:$0xf] }
  0xfd   : > { %v3358_v45 = vrot.slane %v3356_v37, 5  ;;  %v3335_v47 = vsel %vm6234_vm3, %v3330_v39, %v3334_v27  ;;  %v3366_v49 = vshll.u32 %v5095_v35, 16  ;;  %v3370_v50 = vshrl.u32 %v5095_v35, 16  ;;  %v5101_v27 = vld [vmem:[%s6203_s7 + $0x124] sm:$0xf] }
  0xfe   : > { %v3340_v48 = vrot.slane %v3339_v40, 4  ;;  %5699 = vmatprep.mubr.msk.bf16.mxu0 %vm1102_vm2, %v5135_v43  ;;  %v3353_v51 = vor.u32 %v3352_v44, %v3349_v41  ;;  %v3362_v52 = vrot.slane %v3360_v46, 4  ;;  %v4857_v55 = vcombine.low %v6066_v53, %v6067_v54  ;;  %v6070_v35 = vld [vmem:[%s6203_s7 + $0xf0] sm:$0xf]  ;;  %v5103_v40 = vld [vmem:[%s6203_s7 + $0x12c] sm:$0xf] }
  0xff   : > { %v3376_v57 = vshll.u32 %v5096_v42, 16  ;;  %v3368_v59 = vrot.slane %v3366_v49, 5  ;;  %v3372_v60 = vrot.slane %v3370_v50, 4  ;;  %v3380_v61 = vshrl.u32 %v5096_v42, 16  ;;  %v5104_v49 = vld [vmem:[%s6203_s7 + $0x130] sm:$0xf] }
 0x100   : > { %v3345_v58 = vsel %vm6234_vm3, %v3340_v48, %v3344_v33  ;;  %v3354_v0 = vrot.slane %v3353_v51, 4  ;;  %v3363_v1 = vor.u32 %v3362_v52, %v3358_v45  ;;  %5563 = vmatprep.mubr.msk.bf16.mxu1 %vm1102_vm2, %v4857_v55  ;;  %v3386_v7 = vshll.u32 %v5097_v56, 16  ;;  %v6072_v52 = vld [vmem:[%s6203_s7 + $0xf8] sm:$0xf]  ;;  %v6073_v53 = vld [vmem:[%s6203_s7 + $0xfc] sm:$0xf] }
 0x101   : > { %v5136_v63 = vcombine.low %v3335_v47, %v3345_v58  ;;  %v3378_v2 = vrot.slane %v3376_v57, 5  ;;  %v3373_v5 = vor.u32 %v3372_v60, %v3368_v59  ;;  %v3382_v6 = vrot.slane %v3380_v61, 4 }
 0x102   : > { %v4858_v10 = vcombine.low %v6068_v8, %v6069_v9  ;;  %v3359_v13 = vsel %vm6234_vm3, %v3354_v0, %v3358_v45  ;;  %v3364_v14 = vrot.slane %v3363_v1, 4  ;;  %v3391_v15 = vshrl.u32 %v5098_v62, 16 }
 0x103   : > { %5700 = vmatmul.mubr.msk.bf16.gmra.mrb[44].mxu0 %vm1102_vm2, %v5136_v63  ;;  %v3394_v16 = vshll.u32 %v5098_v62, 16  ;;  %v3374_v17 = vrot.slane %v3373_v5, 4  ;;  %v3383_v18 = vor.u32 %v3382_v6, %v3378_v2  ;;  %v3388_v20 = vrot.slane %v3386_v7, 5  ;;  %v5106_v6 = vld [vmem:[%s6203_s7 + $0x138] sm:$0xf] }
 0x104   : > { %v3400_v22 = vshll.u32 %v5099_v3, 16  ;;  %v3369_v23 = vsel %vm6234_vm3, %v3364_v14, %v3368_v59  ;;  %5564 = vmatmul.mubr.msk.bf16.gmra.mrb[44].mxu1 %vm1102_vm2, %v4858_v10  ;;  %v3393_v24 = vrot.slane %v3391_v15, 4  ;;  %v3404_v26 = vshrl.u32 %v5099_v3, 16  ;;  %v5105_v59 = vld [vmem:[%s6203_s7 + $0x134] sm:$0xf] }
 0x105   : > { %v3396_v25 = vrot.slane %v3394_v16, 5  ;;  %v5137_v28 = vcombine.low %v3359_v13, %v3369_v23  ;;  %v3379_v29 = vsel %vm6234_vm3, %v3374_v17, %v3378_v2  ;;  %v3384_v11 = vrot.slane %v3383_v18, 4  ;;  %v5107_v13 = vld [vmem:[%s6203_s7 + $0x13c] sm:$0x1]  ;;  %v6074_v17 = vld [vmem:[%s6203_s7 + $0x104] sm:$0xf] }
 0x106   : > { %v3402_v12 = vrot.slane %v3400_v22, 5  ;;  %v3406_v30 = vrot.slane %v3404_v26, 4  ;;  %v3410_v31 = vshll.u32 %v5100_v21, 16  ;;  %v3414_v4 = vshrl.u32 %v5100_v21, 16  ;;  %v6075_v18 = vld [vmem:[%s6203_s7 + $0x108] sm:$0xf] }
 0x107   : > { %v3397_v19 = vor.u32 %v3396_v25, %v3393_v24  ;;  %5703 = vmatprep.mubr.msk.bf16.mxu0 %vm1102_vm2, %v5137_v28  ;;  %v3389_v33 = vsel %vm6234_vm3, %v3384_v11, %v3388_v20  ;;  %v4859_v37 = vcombine.low %v6070_v35, %v6071_v36  ;;  %v3420_v38 = vshll.u32 %v5101_v27, 16  ;;  %v5108_v21 = vld [vmem:[%s6203_s7 + $0x140] sm:$0xf] }
 0x108   : > { %v3424_v39 = vshrl.u32 %v5101_v27, 16  ;;  %v5138_v41 = vcombine.low %v3379_v29, %v3389_v33  ;;  %v3407_v43 = vor.u32 %v3406_v30, %v3402_v12  ;;  %v3412_v44 = vrot.slane %v3410_v31, 5  ;;  %v6077_v30 = vld [vmem:[%s6203_s7 + $0x110] sm:$0xf] }
 0x109   : > { %v3398_v42 = vrot.slane %v3397_v19, 4  ;;  %5567 = vmatprep.mubr.msk.bf16.mxu1 %vm1102_vm2, %v4859_v37  ;;  %v3416_v45 = vrot.slane %v3414_v4, 4  ;;  %v3422_v46 = vrot.slane %v3420_v38, 5  ;;  %v3430_v48 = vshll.u32 %v5102_v32, 16  ;;  %v6076_v19 = vld [vmem:[%s6203_s7 + $0x10c] sm:$0xf] }
 0x10a   : > { %v3426_v47 = vrot.slane %v3424_v39, 4  ;;  %v3408_v51 = vrot.slane %v3407_v43, 4  ;;  %v4860_v54 = vcombine.low %v6072_v52, %v6073_v53  ;;  %v3435_v55 = vshrl.u32 %v5103_v40, 16  ;;  %v5109_v4 = vld [vmem:[%s6203_s7 + $0x144] sm:$0xf] }
 0x10b   : > { %5704 = vmatmul.mubr.msk.bf16.gmra.mrb[48].mxu0 %vm1102_vm2, %v5138_v41  ;;  %v3403_v50 = vsel %vm6234_vm3, %v3398_v42, %v3402_v12  ;;  %v3417_v56 = vor.u32 %v3416_v45, %v3412_v44  ;;  %v3432_v58 = vrot.slane %v3430_v48, 5  ;;  %v3438_v60 = vshll.u32 %v5103_v40, 16  ;;  %v5110_v38 = vld [vmem:[%s6203_s7 + $0x148] sm:$0xf]  ;;  %v5112_v52 = vld [vmem:[%s6203_s7 + $0x150] sm:$0x1] }
 0x10c   : > { %v3427_v57 = vor.u32 %v3426_v47, %v3422_v46  ;;  %v3413_v61 = vsel %vm6234_vm3, %v3408_v51, %v3412_v44  ;;  %5568 = vmatmul.mubr.msk.bf16.gmra.mrb[48].mxu1 %vm1102_vm2, %v4860_v54  ;;  %v3437_v62 = vrot.slane %v3435_v55, 4  ;;  %v3444_v63 = vshll.u32 %v5104_v49, 16  ;;  %v5111_v47 = vld [vmem:[%s6203_s7 + $0x14c] sm:$0xf] }
 0x10d   : > { %v3448_v0 = vshrl.u32 %v5104_v49, 16  ;;  %v5139_v1 = vcombine.low %v3403_v50, %v3413_v61  ;;  %v3418_v2 = vrot.slane %v3417_v56, 4  ;;  %v3440_v5 = vrot.slane %v3438_v60, 5  ;;  %v6078_v56 = vld [vmem:[%s6203_s7 + $0x118] sm:$0xf] }
 0x10e   : > { %v3428_v3 = vrot.slane %v3427_v57, 4  ;;  %v3446_v7 = vrot.slane %v3444_v63, 5  ;;  %v3454_v9 = vshll.u32 %v5105_v59, 16  ;;  %v3458_v10 = vshrl.u32 %v5105_v59, 16  ;;  %v6079_v57 = vld [vmem:[%s6203_s7 + $0x11c] sm:$0xf] }
 0x10f   : > { %v3450_v8 = vrot.slane %v3448_v0, 4  ;;  %5707 = vmatprep.mubr.msk.bf16.mxu0 %vm1102_vm2, %v5139_v1  ;;  %v3423_v14 = vsel %vm6234_vm3, %v3418_v2, %v3422_v46  ;;  %v3441_v16 = vor.u32 %v3440_v5, %v3437_v62  ;;  %v4861_v20 = vcombine.low %v6074_v17, %v6075_v18  ;;  %v6082_v17 = vld [vmem:[%s6203_s7 + $0x12c] sm:$0xf]  ;;  %v6083_v18 = vld [vmem:[%s6203_s7 + $0x130] sm:$0xf] }
 0x110   : > { %v3433_v15 = vsel %vm6234_vm3, %v3428_v3, %v3432_v58  ;;  %v3456_v24 = vrot.slane %v3454_v9, 5  ;;  %v3460_v25 = vrot.slane %v3458_v10, 4  ;;  %v3464_v27 = vshll.u32 %v5106_v6, 16  ;;  %v6080_v10 = vld [vmem:[%s6203_s7 + $0x120] sm:$0xf] }
 0x111   : > { %v5140_v22 = vcombine.low %v3423_v14, %v3433_v15  ;;  %v3451_v23 = vor.u32 %v3450_v8, %v3446_v7  ;;  %v3442_v26 = vrot.slane %v3441_v16, 4  ;;  %5571 = vmatprep.mubr.msk.bf16.mxu1 %vm1102_vm2, %v4861_v20  ;;  %v3468_v28 = vshrl.u32 %v5106_v6, 16 }
 0x112   : > { %v3474_v29 = vshll.u32 %v5107_v13, 16  ;;  %v3461_v12 = vor.u32 %v3460_v25, %v3456_v24  ;;  %v4862_v31 = vcombine.low %v6076_v19, %v6077_v30  ;;  %v3479_v32 = vshrl.u32 %v5108_v21, 16  ;;  %v6081_v13 = vld [vmem:[%s6203_s7 + $0x124] sm:$0xf] }
 0x113   : > { %5708 = vmatmul.mubr.msk.bf16.gmra.mrb[52].mxu0 %vm1102_vm2, %v5140_v22  ;;  %v3452_v11 = vrot.slane %v3451_v23, 4  ;;  %v3447_v33 = vsel %vm6234_vm3, %v3442_v26, %v3446_v7  ;;  %v3466_v35 = vrot.slane %v3464_v27, 5  ;;  %v3470_v36 = vrot.slane %v3468_v28, 4  ;;  %v6084_v28 = vld [vmem:[%s6203_s7 + $0x134] sm:$0xf] }
 0x114   : > { %v3476_v37 = vrot.slane %v3474_v29, 5  ;;  %v3462_v40 = vrot.slane %v3461_v12, 4  ;;  %5572 = vmatmul.mubr.msk.bf16.gmra.mrb[52].mxu1 %vm1102_vm2, %v4862_v31  ;;  %v3481_v41 = vrot.slane %v3479_v32, 4  ;;  %v3482_v42 = vshll.u32 %v5108_v21, 16  ;;  %v6085_v29 = vld [vmem:[%s6203_s7 + $0x138] sm:$0xf] }
 0x115   : > { %v3457_v39 = vsel %vm6234_vm3, %v3452_v11, %v3456_v24  ;;  %v3471_v44 = vor.u32 %v3470_v36, %v3466_v35  ;;  %v3488_v45 = vshll.u32 %v5109_v4, 16  ;;  %v3492_v46 = vshrl.u32 %v5109_v4, 16 }
 0x116   : > { %v5141_v43 = vcombine.low %v3447_v33, %v3457_v39  ;;  %v3467_v48 = vsel %vm6234_vm3, %v3462_v40, %v3466_v35  ;;  %v3484_v49 = vrot.slane %v3482_v42, 5  ;;  %v3498_v50 = vshll.u32 %v5110_v38, 16 }
 0x117   : > { %v3502_v51 = vshrl.u32 %v5110_v38, 16  ;;  %v3472_v53 = vrot.slane %v3471_v44, 4  ;;  %v3490_v54 = vrot.slane %v3488_v45, 5  ;;  %v3494_v55 = vrot.slane %v3492_v46, 4 }
 0x118   : > { %5711 = vmatprep.mubr.msk.bf16.mxu0 %vm1102_vm2, %v5141_v43  ;;  %v4863_v58 = vcombine.low %v6078_v56, %v6079_v57  ;;  %v3485_v59 = vor.u32 %v3484_v49, %v3481_v41  ;;  %v3500_v60 = vrot.slane %v3498_v50, 5  ;;  %v3508_v62 = vshll.u32 %v5111_v47, 16 }
 0x119   : > { %v3504_v61 = vrot.slane %v3502_v51, 4  ;;  %v3477_v63 = vsel %vm6234_vm3, %v3472_v53, %v3476_v37  ;;  %v3495_v0 = vor.u32 %v3494_v55, %v3490_v54  ;;  %v3512_v1 = vshrl.u32 %v5111_v47, 16 }
 0x11a   : > { %5575 = vmatprep.mubr.msk.bf16.mxu1 %vm1102_vm2, %v4863_v58  ;;  %v3518_v2 = vshll.u32 %v5112_v52, 16  ;;  %v5142_v3 = vcombine.low %v3467_v48, %v3477_v63  ;;  %v3486_v5 = vrot.slane %v3485_v59, 4  ;;  %v3510_v7 = vrot.slane %v3508_v62, 5 }
 0x11b   : > { %v3505_v6 = vor.u32 %v3504_v61, %v3500_v60  ;;  %v3496_v8 = vrot.slane %v3495_v0, 4  ;;  %v3514_v9 = vrot.slane %v3512_v1, 4  ;;  %v4864_v14 = vcombine.low %v6080_v10, %v6081_v13 }
 0x11c   : > { %5712 = vmatmul.mubr.msk.bf16.gmra.mrb[56].mxu0 %vm1102_vm2, %v5142_v3  ;;  %v3491_v15 = vsel %vm6234_vm3, %v3486_v5, %v3490_v54  ;;  %v4865_v20 = vcombine.low %v6082_v17, %v6083_v18  ;;  %v3520_v23 = vrot.slane %v3518_v2, 5  ;;  %v4866_v11 = vcombine.low %v6084_v28, %v6085_v29 }
 0x11d   : > { %v3506_v16 = vrot.slane %v3505_v6, 4  ;;  %v3501_v21 = vsel %vm6234_vm3, %v3496_v8, %v3500_v60  ;;  %v3515_v22 = vor.u32 %v3514_v9, %v3510_v7  ;;  %5576 = vmatmul.mubr.msk.bf16.gmra.mrb[56].mxu1 %vm1102_vm2, %v4864_v14 }
 0x11e   : > { %v5143_v24 = vcombine.low %v3491_v15, %v3501_v21  ;;  %5579 = vmatprep.mubr.msk.bf16.mxu1 %vm1102_vm2, %v4865_v20 }
 0x11f   : > { %v3511_v25 = vsel %vm6234_vm3, %v3506_v16, %v3510_v7  ;;  %v3516_v26 = vrot.slane %v3515_v22, 4 }
 0x120   : > { %5715 = vmatprep.mubr.msk.bf16.mxu0 %vm1102_vm2, %v5143_v24 }
 0x121   : > { %v3521_v27 = vsel %vm6234_vm3, %v3516_v26, %v3520_v23 }
 0x122   : > { %v5144_v12 = vcombine.low %v3511_v25, %v3521_v27 }
 0x124   : > { %5716 = vmatmul.mubr.msk.bf16.gmra.mrb[60].mxu0 %vm1102_vm2, %v5144_v12 }
 0x125   : > { %5580 = vmatmul.mubr.msk.bf16.gmra.mrb[60].mxu1 %vm1102_vm2, %v4866_v11 }
 0x175   : > { %v5657_v19 = vpop.f32.mrb[0].mxu0 }
 0x176   : > { %v3764_v30 = vpop.f32.mrb[1].mxu0 }
 0x177   : > { %v5658_v31 = vpop.f32.mrb[2].mxu0 }
 0x178   : > { %v3767_v4 = vpop.f32.mrb[3].mxu0 }
 0x17f   : > { %v5521_v32 = vpop.f32.mrb[0].mxu1 }
 0x180   : > { %v5719_v33 = vadd.f32 %v5657_v19, %v5521_v32  ;;  %v1790_v35 = vpop.f32.mrb[1].mxu1 }
 0x181   : > { %v5661_v36 = vpop.f32.mrb[4].mxu0  ;;  %v5720_v37 = vadd.f32 %v3764_v30, %v1790_v35  ;;  %v5522_v38 = vpop.f32.mrb[2].mxu1 }
 0x182   : > { %v4092_v39 = vadd.f32 %v5719_v33, %v6878_v34  ;;  %v3780_v40 = vpop.f32.mrb[5].mxu0  ;;  %v5721_v41 = vadd.f32 %v5658_v31, %v5522_v38  ;;  %v1793_v42 = vpop.f32.mrb[3].mxu1 }
 0x183   : > { %v4090_v43 = vadd.f32 %v5720_v37, %v6878_v34  ;;  %v5662_v44 = vpop.f32.mrb[6].mxu0  ;;  %v5722_v45 = vadd.f32 %v3767_v4, %v1793_v42 }
 0x184   : > { %vm4156_vm4 = vcmp.ge.f32.partialorder %v4092_v39, 0.0  ;;  %v4220_v46 = vmul.f32 0.2, %v4092_v39  ;;  %v4093_v47 = vadd.f32 %v5721_v41, %v6878_v34  ;;  %v3783_v48 = vpop.f32.mrb[7].mxu0 }
 0x185   : > { %vm4154_vm5 = vcmp.ge.f32.partialorder %v4090_v43, 0.0  ;;  %v4218_v49 = vmul.f32 0.2, %v4090_v43  ;;  %v4091_v50 = vadd.f32 %v5722_v45, %v6878_v34 }
 0x186   : > { %v4284_v51 = vsel %vm4156_vm4, %v4092_v39, %v4220_v46  ;;  %vm4157_vm7 = vcmp.ge.f32.partialorder %v4093_v47, 0.0  ;;  %v4221_v52 = vmul.f32 0.2, %v4093_v47 }
 0x187   : > { %v5249_v53 = vpack.c.bf16 %v4284_v51, %v4284_v51  ;;  %v4282_v54 = vsel %vm4154_vm5, %v4090_v43, %v4218_v49  ;;  %vm4155_vm8 = vcmp.ge.f32.partialorder %v4091_v50, 0.0  ;;  %v4219_v55 = vmul.f32 0.2, %v4091_v50  ;;  %v5525_v56 = vpop.f32.mrb[4].mxu1 }
 0x188   : > { %v5247_v57 = vpack.c.bf16 %v4282_v54, %v4282_v54  ;;  %v4285_v58 = vsel %vm4157_vm7, %v4093_v47, %v4221_v52  ;;  %v5723_v59 = vadd.f32 %v5661_v36, %v5525_v56  ;;  %v1806_v60 = vpop.f32.mrb[5].mxu1 }
 0x189   : > { %4605 = vst.msk [vmem:[%s6887_s27 + $0x8] sm:$0xf] %vm4602_vm6, %v5249_v53  ;;  %v5250_v61 = vpack.c.bf16 %v4285_v58, %v4285_v58  ;;  %v4283_v62 = vsel %vm4155_vm8, %v4091_v50, %v4219_v55  ;;  %v5665_v63 = vpop.f32.mrb[8].mxu0  ;;  %v5724_v0 = vadd.f32 %v3780_v40, %v1806_v60  ;;  %v5526_v1 = vpop.f32.mrb[6].mxu1 }
 0x18a   : > { %4603 = vst.msk [vmem:[%s6887_s27] sm:$0xf] %vm4602_vm6, %v5247_v57  ;;  %v5248_v2 = vpack.c.bf16 %v4283_v62, %v4283_v62  ;;  %v4096_v3 = vadd.f32 %v5723_v59, %v6878_v34  ;;  %v3796_v5 = vpop.f32.mrb[9].mxu0  ;;  %v5725_v6 = vadd.f32 %v5662_v44, %v5526_v1  ;;  %v1809_v7 = vpop.f32.mrb[7].mxu1 }
 0x18b   : > { %4606 = vst.msk [vmem:[%s6887_s27 + $0xc] sm:$0xf] %vm4602_vm6, %v5250_v61  ;;  %v4094_v8 = vadd.f32 %v5724_v0, %v6878_v34  ;;  %v5666_v9 = vpop.f32.mrb[10].mxu0  ;;  %v5726_v10 = vadd.f32 %v3783_v48, %v1809_v7 }
 0x18c   : > { %4604 = vst.msk [vmem:[%s6887_s27 + $0x4] sm:$0xf] %vm4602_vm6, %v5248_v2  ;;  %vm4160_vm9 = vcmp.ge.f32.partialorder %v4096_v3, 0.0  ;;  %v4224_v13 = vmul.f32 0.2, %v4096_v3  ;;  %v4097_v14 = vadd.f32 %v5725_v6, %v6878_v34  ;;  %v3799_v15 = vpop.f32.mrb[11].mxu0 }
 0x18d   : > { %vm4158_vm10 = vcmp.ge.f32.partialorder %v4094_v8, 0.0  ;;  %v4222_v16 = vmul.f32 0.2, %v4094_v8  ;;  %v4095_v17 = vadd.f32 %v5726_v10, %v6878_v34 }
 0x18e   : > { %v4288_v18 = vsel %vm4160_vm9, %v4096_v3, %v4224_v13  ;;  %vm4161_vm11 = vcmp.ge.f32.partialorder %v4097_v14, 0.0  ;;  %v4225_v20 = vmul.f32 0.2, %v4097_v14 }
 0x18f   : > { %v5253_v21 = vpack.c.bf16 %v4288_v18, %v4288_v18  ;;  %v4286_v22 = vsel %vm4158_vm10, %v4094_v8, %v4222_v16  ;;  %vm4159_vm12 = vcmp.ge.f32.partialorder %v4095_v17, 0.0  ;;  %v4223_v23 = vmul.f32 0.2, %v4095_v17  ;;  %v5529_v24 = vpop.f32.mrb[8].mxu1 }
 0x190   : > { %v5251_v25 = vpack.c.bf16 %v4286_v22, %v4286_v22  ;;  %v4289_v26 = vsel %vm4161_vm11, %v4097_v14, %v4225_v20  ;;  %v5727_v27 = vadd.f32 %v5665_v63, %v5529_v24  ;;  %v1822_v28 = vpop.f32.mrb[9].mxu1 }
 0x191   : > { %4609 = vst.msk [vmem:[%s6887_s27 + $0x18] sm:$0xf] %vm4602_vm6, %v5253_v21  ;;  %v5254_v29 = vpack.c.bf16 %v4289_v26, %v4289_v26  ;;  %v4287_v11 = vsel %vm4159_vm12, %v4095_v17, %v4223_v23  ;;  %v5669_v12 = vpop.f32.mrb[12].mxu0  ;;  %v5728_v19 = vadd.f32 %v3796_v5, %v1822_v28  ;;  %v5530_v30 = vpop.f32.mrb[10].mxu1 }
 0x192   : > { %4607 = vst.msk [vmem:[%s6887_s27 + $0x10] sm:$0xf] %vm4602_vm6, %v5251_v25  ;;  %v5252_v31 = vpack.c.bf16 %v4287_v11, %v4287_v11  ;;  %v4100_v4 = vadd.f32 %v5727_v27, %v6878_v34  ;;  %v3812_v32 = vpop.f32.mrb[13].mxu0  ;;  %v5729_v33 = vadd.f32 %v5666_v9, %v5530_v30  ;;  %v1825_v35 = vpop.f32.mrb[11].mxu1 }
 0x193   : > { %4610 = vst.msk [vmem:[%s6887_s27 + $0x1c] sm:$0xf] %vm4602_vm6, %v5254_v29  ;;  %v4098_v36 = vadd.f32 %v5728_v19, %v6878_v34  ;;  %v5670_v37 = vpop.f32.mrb[14].mxu0  ;;  %v5730_v38 = vadd.f32 %v3799_v15, %v1825_v35 }
 0x194   : > { %4608 = vst.msk [vmem:[%s6887_s27 + $0x14] sm:$0xf] %vm4602_vm6, %v5252_v31  ;;  %vm4164_vm13 = vcmp.ge.f32.partialorder %v4100_v4, 0.0  ;;  %v4228_v39 = vmul.f32 0.2, %v4100_v4  ;;  %v4101_v40 = vadd.f32 %v5729_v33, %v6878_v34  ;;  %v3815_v41 = vpop.f32.mrb[15].mxu0 }
 0x195   : > { %vm4162_vm14 = vcmp.ge.f32.partialorder %v4098_v36, 0.0  ;;  %v4226_v42 = vmul.f32 0.2, %v4098_v36  ;;  %v4099_v43 = vadd.f32 %v5730_v38, %v6878_v34 }
 0x196   : > { %v4292_v44 = vsel %vm4164_vm13, %v4100_v4, %v4228_v39  ;;  %vm4165_vm15 = vcmp.ge.f32.partialorder %v4101_v40, 0.0  ;;  %v4229_v45 = vmul.f32 0.2, %v4101_v40 }
 0x197   : > { %v5257_v46 = vpack.c.bf16 %v4292_v44, %v4292_v44  ;;  %v4290_v47 = vsel %vm4162_vm14, %v4098_v36, %v4226_v42  ;;  %vm4163_vm0 = vcmp.ge.f32.partialorder %v4099_v43, 0.0  ;;  %v4227_v48 = vmul.f32 0.2, %v4099_v43  ;;  %v5533_v49 = vpop.f32.mrb[12].mxu1 }
 0x198   : > { %v5255_v50 = vpack.c.bf16 %v4290_v47, %v4290_v47  ;;  %v4293_v51 = vsel %vm4165_vm15, %v4101_v40, %v4229_v45  ;;  %v5731_v52 = vadd.f32 %v5669_v12, %v5533_v49  ;;  %v1838_v53 = vpop.f32.mrb[13].mxu1 }
 0x199   : > { %4613 = vst.msk [vmem:[%s6887_s27 + $0x28] sm:$0xf] %vm4602_vm6, %v5257_v46  ;;  %v5258_v54 = vpack.c.bf16 %v4293_v51, %v4293_v51  ;;  %v4291_v55 = vsel %vm4163_vm0, %v4099_v43, %v4227_v48  ;;  %v5732_v57 = vadd.f32 %v3812_v32, %v1838_v53  ;;  %v5534_v58 = vpop.f32.mrb[14].mxu1 }
 0x19a   : > { %v5673_v56 = vpop.f32.mrb[16].mxu0  ;;  %4611 = vst.msk [vmem:[%s6887_s27 + $0x20] sm:$0xf] %vm4602_vm6, %v5255_v50  ;;  %v5256_v59 = vpack.c.bf16 %v4291_v55, %v4291_v55  ;;  %v4104_v60 = vadd.f32 %v5731_v52, %v6878_v34  ;;  %v5733_v62 = vadd.f32 %v5670_v37, %v5534_v58  ;;  %v1841_v63 = vpop.f32.mrb[15].mxu1 }
 0x19b   : > { %v3828_v61 = vpop.f32.mrb[17].mxu0  ;;  %4614 = vst.msk [vmem:[%s6887_s27 + $0x2c] sm:$0xf] %vm4602_vm6, %v5258_v54  ;;  %v4102_v0 = vadd.f32 %v5732_v57, %v6878_v34  ;;  %v5734_v2 = vadd.f32 %v3815_v41, %v1841_v63 }
 0x19c   : > { %v5674_v1 = vpop.f32.mrb[18].mxu0  ;;  %4612 = vst.msk [vmem:[%s6887_s27 + $0x24] sm:$0xf] %vm4602_vm6, %v5256_v59  ;;  %vm4168_vm1 = vcmp.ge.f32.partialorder %v4104_v60, 0.0  ;;  %v4232_v3 = vmul.f32 0.2, %v4104_v60  ;;  %v4105_v5 = vadd.f32 %v5733_v62, %v6878_v34 }
 0x19d   : > { %v3831_v6 = vpop.f32.mrb[19].mxu0  ;;  %vm4166_vm2 = vcmp.ge.f32.partialorder %v4102_v0, 0.0  ;;  %v4230_v7 = vmul.f32 0.2, %v4102_v0  ;;  %v4103_v8 = vadd.f32 %v5734_v2, %v6878_v34 }
 0x19e   : > { %v4296_v9 = vsel %vm4168_vm1, %v4104_v60, %v4232_v3  ;;  %vm4169_vm3 = vcmp.ge.f32.partialorder %v4105_v5, 0.0  ;;  %v4233_v10 = vmul.f32 0.2, %v4105_v5 }
 0x19f   : > { %v5261_v13 = vpack.c.bf16 %v4296_v9, %v4296_v9  ;;  %v4294_v14 = vsel %vm4166_vm2, %v4102_v0, %v4230_v7  ;;  %vm4167_vm4 = vcmp.ge.f32.partialorder %v4103_v8, 0.0  ;;  %v4231_v15 = vmul.f32 0.2, %v4103_v8  ;;  %v5537_v16 = vpop.f32.mrb[16].mxu1 }
 0x1a0   : > { %v5259_v17 = vpack.c.bf16 %v4294_v14, %v4294_v14  ;;  %v4297_v18 = vsel %vm4169_vm3, %v4105_v5, %v4233_v10  ;;  %v5735_v20 = vadd.f32 %v5673_v56, %v5537_v16  ;;  %v1854_v21 = vpop.f32.mrb[17].mxu1 }
 0x1a1   : > { %4617 = vst.msk [vmem:[%s6887_s27 + $0x38] sm:$0xf] %vm4602_vm6, %v5261_v13  ;;  %v5262_v22 = vpack.c.bf16 %v4297_v18, %v4297_v18  ;;  %v4295_v23 = vsel %vm4167_vm4, %v4103_v8, %v4231_v15  ;;  %v5736_v25 = vadd.f32 %v3828_v61, %v1854_v21  ;;  %v5538_v26 = vpop.f32.mrb[18].mxu1 }
 0x1a2   : > { %v5677_v24 = vpop.f32.mrb[20].mxu0  ;;  %4615 = vst.msk [vmem:[%s6887_s27 + $0x30] sm:$0xf] %vm4602_vm6, %v5259_v17  ;;  %v5260_v27 = vpack.c.bf16 %v4295_v23, %v4295_v23  ;;  %v4108_v28 = vadd.f32 %v5735_v20, %v6878_v34  ;;  %v5737_v11 = vadd.f32 %v5674_v1, %v5538_v26  ;;  %v1857_v12 = vpop.f32.mrb[19].mxu1 }
 0x1a3   : > { %v3844_v29 = vpop.f32.mrb[21].mxu0  ;;  %4618 = vst.msk [vmem:[%s6887_s27 + $0x3c] sm:$0xf] %vm4602_vm6, %v5262_v22  ;;  %v4106_v19 = vadd.f32 %v5736_v25, %v6878_v34  ;;  %v5738_v31 = vadd.f32 %v3831_v6, %v1857_v12 }
 0x1a4   : > { %v5678_v30 = vpop.f32.mrb[22].mxu0  ;;  %4616 = vst.msk [vmem:[%s6887_s27 + $0x34] sm:$0xf] %vm4602_vm6, %v5260_v27  ;;  %vm4172_vm5 = vcmp.ge.f32.partialorder %v4108_v28, 0.0  ;;  %v4236_v4 = vmul.f32 0.2, %v4108_v28  ;;  %v4109_v32 = vadd.f32 %v5737_v11, %v6878_v34 }
 0x1a5   : > { %v3847_v33 = vpop.f32.mrb[23].mxu0  ;;  %vm4170_vm7 = vcmp.ge.f32.partialorder %v4106_v19, 0.0  ;;  %v4234_v35 = vmul.f32 0.2, %v4106_v19  ;;  %v4107_v36 = vadd.f32 %v5738_v31, %v6878_v34 }
 0x1a6   : > { %v4300_v37 = vsel %vm4172_vm5, %v4108_v28, %v4236_v4  ;;  %vm4173_vm8 = vcmp.ge.f32.partialorder %v4109_v32, 0.0  ;;  %v4237_v38 = vmul.f32 0.2, %v4109_v32 }
 0x1a7   : > { %v5265_v39 = vpack.c.bf16 %v4300_v37, %v4300_v37  ;;  %v4298_v40 = vsel %vm4170_vm7, %v4106_v19, %v4234_v35  ;;  %vm4171_vm9 = vcmp.ge.f32.partialorder %v4107_v36, 0.0  ;;  %v4235_v41 = vmul.f32 0.2, %v4107_v36  ;;  %v5541_v42 = vpop.f32.mrb[20].mxu1 }
 0x1a8   : > { %v5263_v43 = vpack.c.bf16 %v4298_v40, %v4298_v40  ;;  %v4301_v44 = vsel %vm4173_vm8, %v4109_v32, %v4237_v38  ;;  %v5739_v45 = vadd.f32 %v5677_v24, %v5541_v42  ;;  %v1870_v46 = vpop.f32.mrb[21].mxu1 }
 0x1a9   : > { %4621 = vst.msk [vmem:[%s6887_s27 + $0x48] sm:$0xf] %vm4602_vm6, %v5265_v39  ;;  %v5266_v47 = vpack.c.bf16 %v4301_v44, %v4301_v44  ;;  %v4299_v48 = vsel %vm4171_vm9, %v4107_v36, %v4235_v41  ;;  %v5740_v49 = vadd.f32 %v3844_v29, %v1870_v46  ;;  %v5542_v50 = vpop.f32.mrb[22].mxu1 }
 0x1aa   : > { %4619 = vst.msk [vmem:[%s6887_s27 + $0x40] sm:$0xf] %vm4602_vm6, %v5263_v43  ;;  %v5264_v51 = vpack.c.bf16 %v4299_v48, %v4299_v48  ;;  %v4112_v52 = vadd.f32 %v5739_v45, %v6878_v34  ;;  %v5741_v53 = vadd.f32 %v5678_v30, %v5542_v50  ;;  %v1873_v54 = vpop.f32.mrb[23].mxu1 }
 0x1ab   : > { %4622 = vst.msk [vmem:[%s6887_s27 + $0x4c] sm:$0xf] %vm4602_vm6, %v5266_v47  ;;  %v5681_v55 = vpop.f32.mrb[24].mxu0  ;;  %v4110_v56 = vadd.f32 %v5740_v49, %v6878_v34  ;;  %v5742_v57 = vadd.f32 %v3847_v33, %v1873_v54 }
 0x1ac   : > { %4620 = vst.msk [vmem:[%s6887_s27 + $0x44] sm:$0xf] %vm4602_vm6, %v5264_v51  ;;  %vm4176_vm10 = vcmp.ge.f32.partialorder %v4112_v52, 0.0  ;;  %v4240_v58 = vmul.f32 0.2, %v4112_v52  ;;  %v3860_v59 = vpop.f32.mrb[25].mxu0  ;;  %v4113_v60 = vadd.f32 %v5741_v53, %v6878_v34 }
 0x1ad   : > { %vm4174_vm11 = vcmp.ge.f32.partialorder %v4110_v56, 0.0  ;;  %v4238_v61 = vmul.f32 0.2, %v4110_v56  ;;  %v5682_v62 = vpop.f32.mrb[26].mxu0  ;;  %v4111_v63 = vadd.f32 %v5742_v57, %v6878_v34 }
 0x1ae   : > { %v4304_v0 = vsel %vm4176_vm10, %v4112_v52, %v4240_v58  ;;  %vm4177_vm12 = vcmp.ge.f32.partialorder %v4113_v60, 0.0  ;;  %v4241_v1 = vmul.f32 0.2, %v4113_v60  ;;  %v3863_v2 = vpop.f32.mrb[27].mxu0 }
 0x1af   : > { %v5269_v3 = vpack.c.bf16 %v4304_v0, %v4304_v0  ;;  %v4302_v5 = vsel %vm4174_vm11, %v4110_v56, %v4238_v61  ;;  %vm4175_vm13 = vcmp.ge.f32.partialorder %v4111_v63, 0.0  ;;  %v4239_v6 = vmul.f32 0.2, %v4111_v63  ;;  %v5545_v7 = vpop.f32.mrb[24].mxu1 }
 0x1b0   : > { %v5267_v8 = vpack.c.bf16 %v4302_v5, %v4302_v5  ;;  %v4305_v9 = vsel %vm4177_vm12, %v4113_v60, %v4241_v1  ;;  %v5743_v10 = vadd.f32 %v5681_v55, %v5545_v7  ;;  %v1886_v13 = vpop.f32.mrb[25].mxu1 }
 0x1b1   : > { %4625 = vst.msk [vmem:[%s6887_s27 + $0x58] sm:$0xf] %vm4602_vm6, %v5269_v3  ;;  %v5270_v14 = vpack.c.bf16 %v4305_v9, %v4305_v9  ;;  %v4303_v15 = vsel %vm4175_vm13, %v4111_v63, %v4239_v6  ;;  %v5744_v16 = vadd.f32 %v3860_v59, %v1886_v13  ;;  %v5546_v17 = vpop.f32.mrb[26].mxu1 }
 0x1b2   : > { %4623 = vst.msk [vmem:[%s6887_s27 + $0x50] sm:$0xf] %vm4602_vm6, %v5267_v8  ;;  %v5268_v18 = vpack.c.bf16 %v4303_v15, %v4303_v15  ;;  %v4116_v20 = vadd.f32 %v5743_v10, %v6878_v34  ;;  %v5745_v21 = vadd.f32 %v5682_v62, %v5546_v17  ;;  %v1889_v22 = vpop.f32.mrb[27].mxu1 }
 0x1b3   : > { %4626 = vst.msk [vmem:[%s6887_s27 + $0x5c] sm:$0xf] %vm4602_vm6, %v5270_v14  ;;  %v5685_v23 = vpop.f32.mrb[28].mxu0  ;;  %v4114_v24 = vadd.f32 %v5744_v16, %v6878_v34  ;;  %v5746_v25 = vadd.f32 %v3863_v2, %v1889_v22 }
 0x1b4   : > { %4624 = vst.msk [vmem:[%s6887_s27 + $0x54] sm:$0xf] %vm4602_vm6, %v5268_v18  ;;  %vm4180_vm14 = vcmp.ge.f32.partialorder %v4116_v20, 0.0  ;;  %v4244_v26 = vmul.f32 0.2, %v4116_v20  ;;  %v3876_v27 = vpop.f32.mrb[29].mxu0  ;;  %v4117_v28 = vadd.f32 %v5745_v21, %v6878_v34 }
 0x1b5   : > { %vm4178_vm15 = vcmp.ge.f32.partialorder %v4114_v24, 0.0  ;;  %v4242_v29 = vmul.f32 0.2, %v4114_v24  ;;  %v5686_v11 = vpop.f32.mrb[30].mxu0  ;;  %v4115_v12 = vadd.f32 %v5746_v25, %v6878_v34 }
 0x1b6   : > { %v4308_v19 = vsel %vm4180_vm14, %v4116_v20, %v4244_v26  ;;  %vm4181_vm0 = vcmp.ge.f32.partialorder %v4117_v28, 0.0  ;;  %v4245_v30 = vmul.f32 0.2, %v4117_v28  ;;  %v3879_v31 = vpop.f32.mrb[31].mxu0 }
 0x1b7   : > { %v5273_v4 = vpack.c.bf16 %v4308_v19, %v4308_v19  ;;  %v4306_v32 = vsel %vm4178_vm15, %v4114_v24, %v4242_v29  ;;  %vm4179_vm1 = vcmp.ge.f32.partialorder %v4115_v12, 0.0  ;;  %v4243_v33 = vmul.f32 0.2, %v4115_v12  ;;  %v5549_v35 = vpop.f32.mrb[28].mxu1 }
 0x1b8   : > { %v5271_v36 = vpack.c.bf16 %v4306_v32, %v4306_v32  ;;  %v4309_v37 = vsel %vm4181_vm0, %v4117_v28, %v4245_v30  ;;  %v5747_v38 = vadd.f32 %v5685_v23, %v5549_v35  ;;  %v1902_v39 = vpop.f32.mrb[29].mxu1 }
 0x1b9   : > { %4629 = vst.msk [vmem:[%s6887_s27 + $0x68] sm:$0xf] %vm4602_vm6, %v5273_v4  ;;  %v5274_v40 = vpack.c.bf16 %v4309_v37, %v4309_v37  ;;  %v4307_v41 = vsel %vm4179_vm1, %v4115_v12, %v4243_v33  ;;  %v5748_v42 = vadd.f32 %v3876_v27, %v1902_v39  ;;  %v5550_v43 = vpop.f32.mrb[30].mxu1 }
 0x1ba   : > { %4627 = vst.msk [vmem:[%s6887_s27 + $0x60] sm:$0xf] %vm4602_vm6, %v5271_v36  ;;  %v5272_v44 = vpack.c.bf16 %v4307_v41, %v4307_v41  ;;  %v4120_v45 = vadd.f32 %v5747_v38, %v6878_v34  ;;  %v5749_v46 = vadd.f32 %v5686_v11, %v5550_v43  ;;  %v1905_v47 = vpop.f32.mrb[31].mxu1 }
 0x1bb   : > { %4630 = vst.msk [vmem:[%s6887_s27 + $0x6c] sm:$0xf] %vm4602_vm6, %v5274_v40  ;;  %v5689_v48 = vpop.f32.mrb[32].mxu0  ;;  %v4118_v49 = vadd.f32 %v5748_v42, %v6878_v34  ;;  %v5750_v50 = vadd.f32 %v3879_v31, %v1905_v47 }
 0x1bc   : > { %4628 = vst.msk [vmem:[%s6887_s27 + $0x64] sm:$0xf] %vm4602_vm6, %v5272_v44  ;;  %vm4184_vm2 = vcmp.ge.f32.partialorder %v4120_v45, 0.0  ;;  %v4248_v51 = vmul.f32 0.2, %v4120_v45  ;;  %v3892_v52 = vpop.f32.mrb[33].mxu0  ;;  %v4121_v53 = vadd.f32 %v5749_v46, %v6878_v34 }
 0x1bd   : > { %vm4182_vm3 = vcmp.ge.f32.partialorder %v4118_v49, 0.0  ;;  %v4246_v54 = vmul.f32 0.2, %v4118_v49  ;;  %v5690_v55 = vpop.f32.mrb[34].mxu0  ;;  %v4119_v56 = vadd.f32 %v5750_v50, %v6878_v34 }
 0x1be   : > { %v4312_v57 = vsel %vm4184_vm2, %v4120_v45, %v4248_v51  ;;  %vm4185_vm4 = vcmp.ge.f32.partialorder %v4121_v53, 0.0  ;;  %v4249_v58 = vmul.f32 0.2, %v4121_v53  ;;  %v3895_v59 = vpop.f32.mrb[35].mxu0 }
 0x1bf   : > { %v5277_v60 = vpack.c.bf16 %v4312_v57, %v4312_v57  ;;  %v4310_v61 = vsel %vm4182_vm3, %v4118_v49, %v4246_v54  ;;  %vm4183_vm5 = vcmp.ge.f32.partialorder %v4119_v56, 0.0  ;;  %v4247_v62 = vmul.f32 0.2, %v4119_v56  ;;  %v5553_v63 = vpop.f32.mrb[32].mxu1 }
 0x1c0   : > { %v5275_v0 = vpack.c.bf16 %v4310_v61, %v4310_v61  ;;  %v4313_v1 = vsel %vm4185_vm4, %v4121_v53, %v4249_v58  ;;  %v5751_v2 = vadd.f32 %v5689_v48, %v5553_v63  ;;  %v1918_v3 = vpop.f32.mrb[33].mxu1 }
 0x1c1   : > { %4633 = vst.msk [vmem:[%s6887_s27 + $0x78] sm:$0xf] %vm4602_vm6, %v5277_v60  ;;  %v5278_v5 = vpack.c.bf16 %v4313_v1, %v4313_v1  ;;  %v4311_v6 = vsel %vm4183_vm5, %v4119_v56, %v4247_v62  ;;  %v5752_v7 = vadd.f32 %v3892_v52, %v1918_v3  ;;  %v5554_v8 = vpop.f32.mrb[34].mxu1 }
 0x1c2   : > { %4631 = vst.msk [vmem:[%s6887_s27 + $0x70] sm:$0xf] %vm4602_vm6, %v5275_v0  ;;  %v5276_v9 = vpack.c.bf16 %v4311_v6, %v4311_v6  ;;  %v4124_v10 = vadd.f32 %v5751_v2, %v6878_v34  ;;  %v5753_v13 = vadd.f32 %v5690_v55, %v5554_v8  ;;  %v1921_v14 = vpop.f32.mrb[35].mxu1 }
 0x1c3   : > { %4634 = vst.msk [vmem:[%s6887_s27 + $0x7c] sm:$0xf] %vm4602_vm6, %v5278_v5  ;;  %v4122_v15 = vadd.f32 %v5752_v7, %v6878_v34  ;;  %v5754_v16 = vadd.f32 %v3895_v59, %v1921_v14 }
 0x1c4   : > { %4632 = vst.msk [vmem:[%s6887_s27 + $0x74] sm:$0xf] %vm4602_vm6, %v5276_v9  ;;  %v5693_v17 = vpop.f32.mrb[36].mxu0  ;;  %vm4188_vm7 = vcmp.ge.f32.partialorder %v4124_v10, 0.0  ;;  %v4252_v18 = vmul.f32 0.2, %v4124_v10  ;;  %v4125_v20 = vadd.f32 %v5753_v13, %v6878_v34 }
 0x1c5   : > { %v3908_v21 = vpop.f32.mrb[37].mxu0  ;;  %vm4186_vm8 = vcmp.ge.f32.partialorder %v4122_v15, 0.0  ;;  %v4250_v22 = vmul.f32 0.2, %v4122_v15  ;;  %v4123_v23 = vadd.f32 %v5754_v16, %v6878_v34 }
 0x1c6   : > { %v4316_v24 = vsel %vm4188_vm7, %v4124_v10, %v4252_v18  ;;  %v5694_v25 = vpop.f32.mrb[38].mxu0  ;;  %vm4189_vm9 = vcmp.ge.f32.partialorder %v4125_v20, 0.0  ;;  %v4253_v26 = vmul.f32 0.2, %v4125_v20 }
 0x1c7   : > { %v5281_v27 = vpack.c.bf16 %v4316_v24, %v4316_v24  ;;  %v4314_v28 = vsel %vm4186_vm8, %v4122_v15, %v4250_v22  ;;  %v3911_v29 = vpop.f32.mrb[39].mxu0  ;;  %vm4187_vm10 = vcmp.ge.f32.partialorder %v4123_v23, 0.0  ;;  %v4251_v11 = vmul.f32 0.2, %v4123_v23  ;;  %v5557_v12 = vpop.f32.mrb[36].mxu1 }
 0x1c8   : > { %v5279_v19 = vpack.c.bf16 %v4314_v28, %v4314_v28  ;;  %v4317_v30 = vsel %vm4189_vm9, %v4125_v20, %v4253_v26  ;;  %v5755_v31 = vadd.f32 %v5693_v17, %v5557_v12  ;;  %v1934_v4 = vpop.f32.mrb[37].mxu1 }
 0x1c9   : > { %4637 = vst.msk [vmem:[%s6887_s27 + $0x88] sm:$0xf] %vm4602_vm6, %v5281_v27  ;;  %v5282_v32 = vpack.c.bf16 %v4317_v30, %v4317_v30  ;;  %v4315_v33 = vsel %vm4187_vm10, %v4123_v23, %v4251_v11  ;;  %v5756_v35 = vadd.f32 %v3908_v21, %v1934_v4  ;;  %v5558_v36 = vpop.f32.mrb[38].mxu1 }
 0x1ca   : > { %4635 = vst.msk [vmem:[%s6887_s27 + $0x80] sm:$0xf] %vm4602_vm6, %v5279_v19  ;;  %v5280_v37 = vpack.c.bf16 %v4315_v33, %v4315_v33  ;;  %v4128_v38 = vadd.f32 %v5755_v31, %v6878_v34  ;;  %v5757_v39 = vadd.f32 %v5694_v25, %v5558_v36  ;;  %v1937_v40 = vpop.f32.mrb[39].mxu1 }
 0x1cb   : > { %4638 = vst.msk [vmem:[%s6887_s27 + $0x8c] sm:$0xf] %vm4602_vm6, %v5282_v32  ;;  %v4126_v41 = vadd.f32 %v5756_v35, %v6878_v34  ;;  %v5758_v42 = vadd.f32 %v3911_v29, %v1937_v40 }
 0x1cc   : > { %4636 = vst.msk [vmem:[%s6887_s27 + $0x84] sm:$0xf] %vm4602_vm6, %v5280_v37  ;;  %v5697_v43 = vpop.f32.mrb[40].mxu0  ;;  %vm4192_vm11 = vcmp.ge.f32.partialorder %v4128_v38, 0.0  ;;  %v4256_v44 = vmul.f32 0.2, %v4128_v38  ;;  %v4129_v45 = vadd.f32 %v5757_v39, %v6878_v34 }
 0x1cd   : > { %v3924_v46 = vpop.f32.mrb[41].mxu0  ;;  %vm4190_vm12 = vcmp.ge.f32.partialorder %v4126_v41, 0.0  ;;  %v4254_v47 = vmul.f32 0.2, %v4126_v41  ;;  %v4127_v48 = vadd.f32 %v5758_v42, %v6878_v34 }
 0x1ce   : > { %v4320_v49 = vsel %vm4192_vm11, %v4128_v38, %v4256_v44  ;;  %v5698_v50 = vpop.f32.mrb[42].mxu0  ;;  %vm4193_vm13 = vcmp.ge.f32.partialorder %v4129_v45, 0.0  ;;  %v4257_v51 = vmul.f32 0.2, %v4129_v45 }
 0x1cf   : > { %v5285_v52 = vpack.c.bf16 %v4320_v49, %v4320_v49  ;;  %v4318_v53 = vsel %vm4190_vm12, %v4126_v41, %v4254_v47  ;;  %v3927_v54 = vpop.f32.mrb[43].mxu0  ;;  %vm4191_vm14 = vcmp.ge.f32.partialorder %v4127_v48, 0.0  ;;  %v4255_v55 = vmul.f32 0.2, %v4127_v48  ;;  %v5561_v56 = vpop.f32.mrb[40].mxu1 }
 0x1d0   : > { %v5283_v57 = vpack.c.bf16 %v4318_v53, %v4318_v53  ;;  %v4321_v58 = vsel %vm4193_vm13, %v4129_v45, %v4257_v51  ;;  %v5759_v59 = vadd.f32 %v5697_v43, %v5561_v56  ;;  %v1950_v60 = vpop.f32.mrb[41].mxu1 }
 0x1d1   : > { %4641 = vst.msk [vmem:[%s6887_s27 + $0x98] sm:$0xf] %vm4602_vm6, %v5285_v52  ;;  %v5286_v61 = vpack.c.bf16 %v4321_v58, %v4321_v58  ;;  %v4319_v62 = vsel %vm4191_vm14, %v4127_v48, %v4255_v55  ;;  %v5760_v63 = vadd.f32 %v3924_v46, %v1950_v60  ;;  %v5562_v0 = vpop.f32.mrb[42].mxu1 }
 0x1d2   : > { %4639 = vst.msk [vmem:[%s6887_s27 + $0x90] sm:$0xf] %vm4602_vm6, %v5283_v57  ;;  %v5284_v1 = vpack.c.bf16 %v4319_v62, %v4319_v62  ;;  %v4132_v2 = vadd.f32 %v5759_v59, %v6878_v34  ;;  %v5761_v3 = vadd.f32 %v5698_v50, %v5562_v0  ;;  %v1953_v5 = vpop.f32.mrb[43].mxu1 }
 0x1d3   : > { %4642 = vst.msk [vmem:[%s6887_s27 + $0x9c] sm:$0xf] %vm4602_vm6, %v5286_v61  ;;  %v4130_v6 = vadd.f32 %v5760_v63, %v6878_v34  ;;  %v5762_v7 = vadd.f32 %v3927_v54, %v1953_v5 }
 0x1d4   : > { %4640 = vst.msk [vmem:[%s6887_s27 + $0x94] sm:$0xf] %vm4602_vm6, %v5284_v1  ;;  %vm4196_vm15 = vcmp.ge.f32.partialorder %v4132_v2, 0.0  ;;  %v4260_v8 = vmul.f32 0.2, %v4132_v2  ;;  %v4133_v9 = vadd.f32 %v5761_v3, %v6878_v34 }
 0x1d5   : > { %vm4194_vm0 = vcmp.ge.f32.partialorder %v4130_v6, 0.0  ;;  %v4258_v13 = vmul.f32 0.2, %v4130_v6  ;;  %v4131_v14 = vadd.f32 %v5762_v7, %v6878_v34 }
 0x1d6   : > { %v5701_v10 = vpop.f32.mrb[44].mxu0  ;;  %v4324_v15 = vsel %vm4196_vm15, %v4132_v2, %v4260_v8  ;;  %vm4197_vm1 = vcmp.ge.f32.partialorder %v4133_v9, 0.0  ;;  %v4261_v17 = vmul.f32 0.2, %v4133_v9 }
 0x1d7   : > { %v3940_v16 = vpop.f32.mrb[45].mxu0  ;;  %v5289_v18 = vpack.c.bf16 %v4324_v15, %v4324_v15  ;;  %v4322_v20 = vsel %vm4194_vm0, %v4130_v6, %v4258_v13  ;;  %vm4195_vm2 = vcmp.ge.f32.partialorder %v4131_v14, 0.0  ;;  %v4259_v22 = vmul.f32 0.2, %v4131_v14  ;;  %v5565_v23 = vpop.f32.mrb[44].mxu1 }
 0x1d8   : > { %v5702_v21 = vpop.f32.mrb[46].mxu0  ;;  %v5287_v24 = vpack.c.bf16 %v4322_v20, %v4322_v20  ;;  %v4325_v25 = vsel %vm4197_vm1, %v4133_v9, %v4261_v17  ;;  %v5763_v27 = vadd.f32 %v5701_v10, %v5565_v23  ;;  %v1966_v28 = vpop.f32.mrb[45].mxu1 }
 0x1d9   : > { %v3943_v26 = vpop.f32.mrb[47].mxu0  ;;  %4645 = vst.msk [vmem:[%s6887_s27 + $0xa8] sm:$0xf] %vm4602_vm6, %v5289_v18  ;;  %v5290_v29 = vpack.c.bf16 %v4325_v25, %v4325_v25  ;;  %v4323_v11 = vsel %vm4195_vm2, %v4131_v14, %v4259_v22  ;;  %v5764_v12 = vadd.f32 %v3940_v16, %v1966_v28  ;;  %v5566_v19 = vpop.f32.mrb[46].mxu1 }
 0x1da   : > { %4643 = vst.msk [vmem:[%s6887_s27 + $0xa0] sm:$0xf] %vm4602_vm6, %v5287_v24  ;;  %v5288_v30 = vpack.c.bf16 %v4323_v11, %v4323_v11  ;;  %v4136_v31 = vadd.f32 %v5763_v27, %v6878_v34  ;;  %v5765_v4 = vadd.f32 %v5702_v21, %v5566_v19  ;;  %v1969_v32 = vpop.f32.mrb[47].mxu1 }
 0x1db   : > { %4646 = vst.msk [vmem:[%s6887_s27 + $0xac] sm:$0xf] %vm4602_vm6, %v5290_v29  ;;  %v4134_v33 = vadd.f32 %v5764_v12, %v6878_v34  ;;  %v5766_v35 = vadd.f32 %v3943_v26, %v1969_v32 }
 0x1dc   : > { %4644 = vst.msk [vmem:[%s6887_s27 + $0xa4] sm:$0xf] %vm4602_vm6, %v5288_v30  ;;  %vm4200_vm3 = vcmp.ge.f32.partialorder %v4136_v31, 0.0  ;;  %v4264_v36 = vmul.f32 0.2, %v4136_v31  ;;  %v4137_v37 = vadd.f32 %v5765_v4, %v6878_v34 }
 0x1dd   : > { %vm4198_vm4 = vcmp.ge.f32.partialorder %v4134_v33, 0.0  ;;  %v4262_v39 = vmul.f32 0.2, %v4134_v33  ;;  %v4135_v40 = vadd.f32 %v5766_v35, %v6878_v34 }
 0x1de   : > { %v5705_v38 = vpop.f32.mrb[48].mxu0  ;;  %v4328_v41 = vsel %vm4200_vm3, %v4136_v31, %v4264_v36  ;;  %vm4201_vm5 = vcmp.ge.f32.partialorder %v4137_v37, 0.0  ;;  %v4265_v43 = vmul.f32 0.2, %v4137_v37 }
 0x1df   : > { %v3956_v42 = vpop.f32.mrb[49].mxu0  ;;  %v5293_v44 = vpack.c.bf16 %v4328_v41, %v4328_v41  ;;  %v4326_v45 = vsel %vm4198_vm4, %v4134_v33, %v4262_v39  ;;  %vm4199_vm7 = vcmp.ge.f32.partialorder %v4135_v40, 0.0  ;;  %v4263_v47 = vmul.f32 0.2, %v4135_v40  ;;  %v5569_v48 = vpop.f32.mrb[48].mxu1 }
 0x1e0   : > { %v5706_v46 = vpop.f32.mrb[50].mxu0  ;;  %v5291_v49 = vpack.c.bf16 %v4326_v45, %v4326_v45  ;;  %v4329_v50 = vsel %vm4201_vm5, %v4137_v37, %v4265_v43  ;;  %v5767_v52 = vadd.f32 %v5705_v38, %v5569_v48  ;;  %v1982_v53 = vpop.f32.mrb[49].mxu1 }
 0x1e1   : > { %v3959_v51 = vpop.f32.mrb[51].mxu0  ;;  %4649 = vst.msk [vmem:[%s6887_s27 + $0xb8] sm:$0xf] %vm4602_vm6, %v5293_v44  ;;  %v5294_v54 = vpack.c.bf16 %v4329_v50, %v4329_v50  ;;  %v4327_v55 = vsel %vm4199_vm7, %v4135_v40, %v4263_v47  ;;  %v5768_v56 = vadd.f32 %v3956_v42, %v1982_v53  ;;  %v5570_v57 = vpop.f32.mrb[50].mxu1 }
 0x1e2   : > { %4647 = vst.msk [vmem:[%s6887_s27 + $0xb0] sm:$0xf] %vm4602_vm6, %v5291_v49  ;;  %v5292_v58 = vpack.c.bf16 %v4327_v55, %v4327_v55  ;;  %v4140_v59 = vadd.f32 %v5767_v52, %v6878_v34  ;;  %v5769_v60 = vadd.f32 %v5706_v46, %v5570_v57  ;;  %v1985_v61 = vpop.f32.mrb[51].mxu1 }
 0x1e3   : > { %4650 = vst.msk [vmem:[%s6887_s27 + $0xbc] sm:$0xf] %vm4602_vm6, %v5294_v54  ;;  %v4138_v62 = vadd.f32 %v5768_v56, %v6878_v34  ;;  %v5770_v63 = vadd.f32 %v3959_v51, %v1985_v61  ;;  %v6086_v51 = vld [vmem:[%s7089_s2] ss:$0 sm:$0xff] }
 0x1e4   : > { %4648 = vst.msk [vmem:[%s6887_s27 + $0xb4] sm:$0xf] %vm4602_vm6, %v5292_v58  ;;  %vm4204_vm8 = vcmp.ge.f32.partialorder %v4140_v59, 0.0  ;;  %v4268_v0 = vmul.f32 0.2, %v4140_v59  ;;  %v4141_v1 = vadd.f32 %v5769_v60, %v6878_v34 }
 0x1e5   : > { %vm4202_vm9 = vcmp.ge.f32.partialorder %v4138_v62, 0.0  ;;  %v4266_v3 = vmul.f32 0.2, %v4138_v62  ;;  %v4139_v5 = vadd.f32 %v5770_v63, %v6878_v34 }
 0x1e6   : > { %v5709_v2 = vpop.f32.mrb[52].mxu0  ;;  %v4332_v6 = vsel %vm4204_vm8, %v4140_v59, %v4268_v0  ;;  %vm4205_vm10 = vcmp.ge.f32.partialorder %v4141_v1, 0.0  ;;  %v4269_v8 = vmul.f32 0.2, %v4141_v1 }
 0x1e7   : > { %v3972_v7 = vpop.f32.mrb[53].mxu0  ;;  %v5297_v9 = vpack.c.bf16 %v4332_v6, %v4332_v6  ;;  %v4330_v10 = vsel %vm4202_vm9, %v4138_v62, %v4266_v3  ;;  %vm4203_vm11 = vcmp.ge.f32.partialorder %v4139_v5, 0.0  ;;  %v4267_v14 = vmul.f32 0.2, %v4139_v5  ;;  %v5573_v15 = vpop.f32.mrb[52].mxu1 }
 0x1e8   : > { %v5710_v13 = vpop.f32.mrb[54].mxu0  ;;  %v5295_v16 = vpack.c.bf16 %v4330_v10, %v4330_v10  ;;  %v4333_v17 = vsel %vm4205_vm10, %v4141_v1, %v4269_v8  ;;  %v5771_v20 = vadd.f32 %v5709_v2, %v5573_v15  ;;  %v1998_v21 = vpop.f32.mrb[53].mxu1 }
 0x1e9   : > { %v3975_v18 = vpop.f32.mrb[55].mxu0  ;;  %4653 = vst.msk [vmem:[%s6887_s27 + $0xc8] sm:$0xf] %vm4602_vm6, %v5297_v9  ;;  %v5298_v22 = vpack.c.bf16 %v4333_v17, %v4333_v17  ;;  %v4331_v23 = vsel %vm4203_vm11, %v4139_v5, %v4267_v14  ;;  %v5772_v24 = vadd.f32 %v3972_v7, %v1998_v21  ;;  %v5574_v25 = vpop.f32.mrb[54].mxu1 }
 0x1ea   : > { %4651 = vst.msk [vmem:[%s6887_s27 + $0xc0] sm:$0xf] %vm4602_vm6, %v5295_v16  ;;  %v5296_v26 = vpack.c.bf16 %v4331_v23, %v4331_v23  ;;  %v4144_v27 = vadd.f32 %v5771_v20, %v6878_v34  ;;  %v5773_v28 = vadd.f32 %v5710_v13, %v5574_v25  ;;  %v2001_v29 = vpop.f32.mrb[55].mxu1 }
 0x1eb   : > { %4654 = vst.msk [vmem:[%s6887_s27 + $0xcc] sm:$0xf] %vm4602_vm6, %v5298_v22  ;;  %v4142_v11 = vadd.f32 %v5772_v24, %v6878_v34  ;;  %v5774_v12 = vadd.f32 %v3975_v18, %v2001_v29 }
 0x1ec   : > { %4652 = vst.msk [vmem:[%s6887_s27 + $0xc4] sm:$0xf] %vm4602_vm6, %v5296_v26  ;;  %vm4208_vm12 = vcmp.ge.f32.partialorder %v4144_v27, 0.0  ;;  %v4272_v19 = vmul.f32 0.2, %v4144_v27  ;;  %v4145_v30 = vadd.f32 %v5773_v28, %v6878_v34 }
 0x1ed   : > { %vm4206_vm13 = vcmp.ge.f32.partialorder %v4142_v11, 0.0  ;;  %v4270_v31 = vmul.f32 0.2, %v4142_v11  ;;  %v4143_v4 = vadd.f32 %v5774_v12, %v6878_v34 }
 0x1ee   : > { %v4336_v32 = vsel %vm4208_vm12, %v4144_v27, %v4272_v19  ;;  %vm4209_vm14 = vcmp.ge.f32.partialorder %v4145_v30, 0.0  ;;  %v4273_v33 = vmul.f32 0.2, %v4145_v30 }
 0x1ef   : > { %v5713_v35 = vpop.f32.mrb[56].mxu0  ;;  %v5301_v36 = vpack.c.bf16 %v4336_v32, %v4336_v32  ;;  %v4334_v37 = vsel %vm4206_vm13, %v4142_v11, %v4270_v31  ;;  %vm4207_vm15 = vcmp.ge.f32.partialorder %v4143_v4, 0.0  ;;  %v4271_v38 = vmul.f32 0.2, %v4143_v4 }
 0x1f0   : > { %v3988_v39 = vpop.f32.mrb[57].mxu0  ;;  %v5299_v40 = vpack.c.bf16 %v4334_v37, %v4334_v37  ;;  %v4337_v41 = vsel %vm4209_vm14, %v4145_v30, %v4273_v33  ;;  %v5577_v42 = vpop.f32.mrb[56].mxu1 }
 0x1f1   : > { %4657 = vst.msk [vmem:[%s6887_s27 + $0xd8] sm:$0xf] %vm4602_vm6, %v5301_v36  ;;  %v5714_v43 = vpop.f32.mrb[58].mxu0  ;;  %v5302_v44 = vpack.c.bf16 %v4337_v41, %v4337_v41  ;;  %v4335_v34 = vsel %vm4207_vm15, %v4143_v4, %v4271_v38  ;;  %v5775_v45 = vadd.f32 %v5713_v35, %v5577_v42  ;;  %v2014_v46 = vpop.f32.mrb[57].mxu1 }
 0x1f2   : > { %4655 = vst.msk [vmem:[%s6887_s27 + $0xd0] sm:$0xf] %vm4602_vm6, %v5299_v40  ;;  %v3991_v47 = vpop.f32.mrb[59].mxu0  ;;  %v5300_v48 = vpack.c.bf16 %v4335_v34, %v4335_v34  ;;  %v5776_v49 = vadd.f32 %v3988_v39, %v2014_v46  ;;  %v5578_v50 = vpop.f32.mrb[58].mxu1 }
 0x1f3   : > { %4658 = vst.msk [vmem:[%s6887_s27 + $0xdc] sm:$0xf] %vm4602_vm6, %v5302_v44  ;;  %v4148_v52 = vadd.f32 %v6086_v51, %v5775_v45  ;;  %v5777_v53 = vadd.f32 %v5714_v43, %v5578_v50  ;;  %v2017_v54 = vpop.f32.mrb[59].mxu1 }
 0x1f4   : > { %4656 = vst.msk [vmem:[%s6887_s27 + $0xd4] sm:$0xf] %vm4602_vm6, %v5300_v48  ;;  %v4146_v55 = vadd.f32 %v6086_v51, %v5776_v49  ;;  %v5778_v56 = vadd.f32 %v3991_v47, %v2017_v54 }
 0x1f5   : > { %vm4212_vm0 = vcmp.ge.f32.partialorder %v4148_v52, 0.0  ;;  %v4276_v57 = vmul.f32 0.2, %v4148_v52  ;;  %v4149_v58 = vadd.f32 %v6086_v51, %v5777_v53 }
 0x1f6   : > { %vm4210_vm1 = vcmp.ge.f32.partialorder %v4146_v55, 0.0  ;;  %v4274_v59 = vmul.f32 0.2, %v4146_v55  ;;  %v4147_v60 = vadd.f32 %v6086_v51, %v5778_v56 }
 0x1f7   : > { %v5717_v61 = vpop.f32.mrb[60].mxu0  ;;  %v4340_v62 = vsel %vm4212_vm0, %v4148_v52, %v4276_v57  ;;  %vm4213_vm2 = vcmp.ge.f32.partialorder %v4149_v58, 0.0  ;;  %v4277_v63 = vmul.f32 0.2, %v4149_v58 }
 0x1f8   : > { %v5305_v0 = vpack.c.bf16 %v4340_v62, %v4340_v62  ;;  %v4004_v1 = vpop.f32.mrb[61].mxu0  ;;  %v4338_v2 = vsel %vm4210_vm1, %v4146_v55, %v4274_v59  ;;  %vm4211_vm3 = vcmp.ge.f32.partialorder %v4147_v60, 0.0  ;;  %v4275_v3 = vmul.f32 0.2, %v4147_v60  ;;  %v5581_v5 = vpop.f32.mrb[60].mxu1 }
 0x1f9   : > { %v5303_v6 = vpack.c.bf16 %v4338_v2, %v4338_v2  ;;  %v5718_v7 = vpop.f32.mrb[62].mxu0  ;;  %v4341_v8 = vsel %vm4213_vm2, %v4149_v58, %v4277_v63  ;;  %v5779_v9 = vadd.f32 %v5717_v61, %v5581_v5  ;;  %v2030_v10 = vpop.f32.mrb[61].mxu1 }
 0x1fa   : > { %4661 = vst.msk [vmem:[%s6887_s27 + $0xe8] sm:$0xf] %vm4602_vm6, %v5305_v0  ;;  %v5306_v13 = vpack.c.bf16 %v4341_v8, %v4341_v8  ;;  %v4007_v14 = vpop.f32.mrb[63].mxu0  ;;  %v4339_v15 = vsel %vm4211_vm3, %v4147_v60, %v4275_v3  ;;  %v5780_v16 = vadd.f32 %v4004_v1, %v2030_v10  ;;  %v5582_v17 = vpop.f32.mrb[62].mxu1 }
 0x1fb   : > { %4659 = vst.msk [vmem:[%s6887_s27 + $0xe0] sm:$0xf] %vm4602_vm6, %v5303_v6  ;;  %v5304_v18 = vpack.c.bf16 %v4339_v15, %v4339_v15  ;;  %v4152_v20 = vadd.f32 %v6086_v51, %v5779_v9  ;;  %v5781_v21 = vadd.f32 %v5718_v7, %v5582_v17  ;;  %v2033_v22 = vpop.f32.mrb[63].mxu1 }
 0x1fc   : > { %4662 = vst.msk [vmem:[%s6887_s27 + $0xec] sm:$0xf] %vm4602_vm6, %v5306_v13  ;;  %v4150_v23 = vadd.f32 %v6086_v51, %v5780_v16  ;;  %v5782_v24 = vadd.f32 %v4007_v14, %v2033_v22 }
 0x1fd   : > { %4660 = vst.msk [vmem:[%s6887_s27 + $0xe4] sm:$0xf] %vm4602_vm6, %v5304_v18  ;;  %vm4216_vm4 = vcmp.ge.f32.partialorder %v4152_v20, 0.0  ;;  %v4280_v25 = vmul.f32 0.2, %v4152_v20  ;;  %v4153_v26 = vadd.f32 %v6086_v51, %v5781_v21 }
 0x1fe   : > { %vm4214_vm5 = vcmp.ge.f32.partialorder %v4150_v23, 0.0  ;;  %v4278_v27 = vmul.f32 0.2, %v4150_v23  ;;  %v4151_v28 = vadd.f32 %v6086_v51, %v5782_v24 }
 0x1ff   : > { %v4344_v29 = vsel %vm4216_vm4, %v4152_v20, %v4280_v25  ;;  %vm4217_vm7 = vcmp.ge.f32.partialorder %v4153_v26, 0.0  ;;  %v4281_v11 = vmul.f32 0.2, %v4153_v26 }
 0x200   : > { %v5309_v12 = vpack.c.bf16 %v4344_v29, %v4344_v29  ;;  %v4342_v19 = vsel %vm4214_vm5, %v4150_v23, %v4278_v27  ;;  %vm4215_vm8 = vcmp.ge.f32.partialorder %v4151_v28, 0.0  ;;  %v4279_v30 = vmul.f32 0.2, %v4151_v28 }
 0x201   : > { %v5307_v31 = vpack.c.bf16 %v4342_v19, %v4342_v19  ;;  %v4345_v4 = vsel %vm4217_vm7, %v4153_v26, %v4281_v11 }
 0x202   : > { %4665 = vst.msk [vmem:[%s6887_s27 + $0xf8] sm:$0xf] %vm4602_vm6, %v5309_v12  ;;  %v5310_v32 = vpack.c.bf16 %v4345_v4, %v4345_v4  ;;  %v4343_v33 = vsel %vm4215_vm8, %v4151_v28, %v4279_v30 }
 0x203   : > { %4663 = vst.msk [vmem:[%s6887_s27 + $0xf0] sm:$0xf] %vm4602_vm6, %v5307_v31  ;;  %v5308_v35 = vpack.c.bf16 %v4343_v33, %v4343_v33 }
 0x204   : > { %4666 = vst.msk [vmem:[%s6887_s27 + $0xfc] sm:$0xf] %vm4602_vm6, %v5310_v32 }
 0x205   : > { %4664 = vst.msk [vmem:[%s6887_s27 + $0xf4] sm:$0xf] %vm4602_vm6, %v5308_v35 }
 0x206 PF: > { %s13_s16 = sadd.s32 1, %s6125_s16   ;;  %s7093_s12 = smov %s6117_s14 }
 0x207   : > { %p10_p7 = scmp.ge.s32.totalorder %s13_s16, 6   ;;  %s7094_s13 = smov %s6121_s15 }
 0x208   : > { %s7095_s14 = smov %s7098_s17  ;;  %s7096_s15 = smov %s7102_s18 }
 0x209   :  { %12 = sbr.rel (!%p10_p7) target bundleno = 3 (0x3), region = 64 }

// kernel: discriminator_forward.5
= control target key start
LH: loop header
LB: loop body
LE: loop exit
PB: predicated region body
PF: predicated region fallthrough
CT: control target
= control target key end

     0   :  { %s3419_s12 = smov 0   ;;  %s3421_s13 = smov 0   ;;  %s4065_s0 = inlined_call_operand.vmem [shape: bf16[2,17,17,32], index: 0, kind: input, shape index: {}]   ;;  %s4066_s1 = inlined_call_operand.vmem [shape: bf16[128,16], index: 1, kind: input, shape index: {}]   ;;  %s4067_s2 = inlined_call_operand.vmem [shape: f32[1,16], index: 2, kind: input, shape index: {}]   ;;  %s4068_s3 = inlined_call_operand.vmem [shape: bf16[2,256,16], index: 3, kind: output, shape index: {}]  }
   0x1   :  { %s3423_s14 = smov 0  }
   0x2 LB: > { %s25_s15 = sadd.s32 1, %s3393_s13  ;;  %p2710_p0 = scmp.ge.s32.totalorder %s3397_s14, 1  ;;  %s3397_s14 = sphi %s3423_s14, %s13_s14   ;;  %s3393_s13 = sphi %s3421_s13, %s4072_s13   ;;  %s3389_s12 = sphi %s3419_s12, %s4071_s12  }
   0x3   : > { %p27_p1 = scmp.ge.s32.totalorder %s25_s15, 2  ;;  %p151_p2 = scmp.lt.s32.totalorder %s3397_s14, 3 }
   0x5   : > { %s4074_s15 = smov (%p27_p1, %s25_s15), 0  ;;  %p152_p3 = pnand %p2710_p0, %p151_p2 }
   0x6   : > { %v3335_v0 = vld [vmem:[%s4066_s1 + $0x20] sm:$0xff] (!%p152_p3)   ;;  %p179_p4 = scmp.lt.s32.totalorder (!%p152_p3), %s3389_s12, 1  ;;  %v3336_v1 = vld [vmem:[%s4066_s1 + $0x28] sm:$0xff] (!%p152_p3)   ;;  %v3338_v2 = vld [vmem:[%s4066_s1 + $0x10] sm:$0xff] (!%p152_p3)   ;;  %vm251_vm0 = vsmask.f32 (!%p152_p3), 3328 }
   0x7   : > { %155 = sbr.rel (%p152_p3) target bundleno = 393 (0x189), region = 32  ;;  %3142 = vmatprep.subr.bf16.mxu0 (!%p152_p3), %v3335_v0  ;;  %v3340_v3 = vld [vmem:[%s4066_s1 + $0x18] sm:$0xff] (!%p152_p3)   ;;  %3070 = vmatprep.subr.bf16.mxu1 (!%p152_p3), %v3338_v2  ;;  %vm252_vm1 = vsmask.f32 (!%p152_p3), 7440  ;;  %v3455_v4 = vld [vmem:[%s4066_s1] sm:$0xff] (!%p152_p3)   ;;  %vm702_vm2 = vcmask (!%p152_p3), 261120  }
   0x8   : > { %3143 = vmatpush3.bf16.msra.mxu0 (!%p152_p3), %v3335_v0  ;;  %3071 = vmatpush3.bf16.msra.mxu1 (!%p152_p3), %v3338_v2  ;;  %v3344_v5 = vld [vmem:[%s4066_s1 + $0x30] sm:$0xff] (!%p152_p3)   ;;  %vm3499_vm3 = vmor (!%p152_p3), %vm251_vm0, %vm252_vm1  ;;  %v3952_v34 = vld [vmem:[%s4067_s2] ss:$0 sm:$0xff] (!%p152_p3)  ;;  %vm2586_vm6 = vcmask (!%p152_p3), 125952  }
   0x9   : > { %3144 = vmatprep.subr.bf16.mxu0 (!%p152_p3), %v3336_v1  ;;  %3072 = vmatprep.subr.bf16.mxu1 (!%p152_p3), %v3340_v3 }
   0xc   : > { %3145 = vmatpush3.bf16.msra.mxu0 (!%p152_p3), %v3336_v1  ;;  %3073 = vmatpush3.bf16.msra.mxu1 (!%p152_p3), %v3340_v3 }
   0xd   : > { %3178 = vmatprep.subr.bf16.mxu0 (!%p152_p3), %v3344_v5  ;;  %3106 = vmatprep.subr.bf16.mxu1 (!%p152_p3), %v3455_v4 }
   0xe   : > { %s4076_s12 = smov (!%p179_p4, %s3389_s12), 1 }
   0xf   : > { %s3310_s24 = smul.u32 204, %s4076_s12  ;;  %s2965_s11 = sshll.u32 %s4076_s12, 7 }
  0x10   : > { %s3962_s18 = scalar_lea.vmem %s4068_s3, %s2965_s11 }
  0x11   : > { %s3460_s29 = scalar_lea.vmem %s4065_s0, %s3310_s24 }
  0x12   : > { %v3337_v6 = vld [vmem:[%s3460_s29 + $0xc] sm:$0xff]   ;;  %v3339_v7 = vld [vmem:[%s3460_s29 + $0x18] sm:$0xff]   ;;  %v3341_v8 = vld [vmem:[%s3460_s29 + $0x24] sm:$0xff]  }
  0x13   : > { %3146 = vmatprep.mubr.msk.bf16.mxu0 %vm702_vm2, %v3337_v6  ;;  %v3471_v9 = vld [vmem:[%s3460_s29] sm:$0xf]  ;;  %v3474_v10 = vld [vmem:[%s3460_s29 + $0x4] sm:$0xf]  ;;  %v235_v11 = vld [vmem:[%s3460_s29 + $0x8] sm:$0x1] }
  0x14   : > { %3147 = vmatmul.mubr.msk.bf16.vlgmr.msra.gmra.mrb[0].mxu0 %vm702_vm2, %v3339_v7  ;;  %v255_v12 = vshrl.u32 %v3471_v9, 16  ;;  %v258_v13 = vshll.u32 %v3471_v9, 16  ;;  %v264_v14 = vshll.u32 %v3474_v10, 16  ;;  %v268_v15 = vshrl.u32 %v3474_v10, 16  ;;  %v3343_v17 = vld [vmem:[%s3460_s29 + $0x30] sm:$0xff]   ;;  %v3345_v38 = vld [vmem:[%s3460_s29 + $0x3c] sm:$0xff]  }
  0x15   : > { %3150 = vmatprep.mubr.msk.bf16.mxu0 %vm702_vm2, %v3341_v8  ;;  %3179 = vmatpush3.bf16.msra.mxu0 %v3344_v5  ;;  %v274_v16 = vshll.u32 %v235_v11, 16  ;;  %v3485_v18 = vld [vmem:[%s3460_s29 + $0xc] sm:$0xf]  ;;  %v2748_v19 = vcombine.low %v3471_v9, %v3474_v10  ;;  %v3490_v24 = vld [vmem:[%s3460_s29 + $0x10] sm:$0xf]  ;;  %v3347_v2 = vld [vmem:[%s3460_s29 + $0x54] sm:$0xff]  }
  0x16   : > { %v257_v20 = vrot.slane %v255_v12, 4  ;;  %v260_v21 = vrot.slane %v258_v13, 5  ;;  %v266_v22 = vrot.slane %v264_v14, 5  ;;  %v270_v23 = vrot.slane %v268_v15, 4  ;;  %v236_v26 = vld [vmem:[%s3460_s29 + $0x14] sm:$0x1] }
  0x17   : > { %v276_v25 = vrot.slane %v274_v16, 5  ;;  %v279_v27 = vshrl.u32 %v3485_v18, 16  ;;  %v282_v28 = vshll.u32 %v3485_v18, 16  ;;  %v288_v29 = vshll.u32 %v3490_v24, 16  ;;  %v3505_v39 = vld [vmem:[%s3460_s29 + $0x18] sm:$0xf] }
  0x18   : > { %v261_v30 = vor.u32 %v260_v21, %v257_v20  ;;  %v271_v31 = vor.u32 %v270_v23, %v266_v22  ;;  %v292_v32 = vshrl.u32 %v3490_v24, 16  ;;  %v298_v33 = vshll.u32 %v236_v26, 16  ;;  %v3510_v45 = vld [vmem:[%s3460_s29 + $0x1c] sm:$0xf]  ;;  %v237_v47 = vld [vmem:[%s3460_s29 + $0x20] sm:$0x1] }
  0x19   : > { %v281_v35 = vrot.slane %v279_v27, 4  ;;  %v284_v36 = vrot.slane %v282_v28, 5  ;;  %v290_v37 = vrot.slane %v288_v29, 5  ;;  %v2749_v40 = vcombine.low %v3485_v18, %v3490_v24  ;;  %v3346_v59 = vld [vmem:[%s3460_s29 + $0x48] sm:$0xff]   ;;  %v3525_v60 = vld [vmem:[%s3460_s29 + $0x24] sm:$0xf] }
  0x1a   : > { %v262_v41 = vrot.slane %v261_v30, 4  ;;  %v272_v42 = vrot.slane %v271_v31, 4  ;;  %v294_v43 = vrot.slane %v292_v32, 4  ;;  %v300_v44 = vrot.slane %v298_v33, 5  ;;  %v3528_v1 = vld [vmem:[%s3460_s29 + $0x28] sm:$0xf] }
  0x1b   : > { %v285_v46 = vor.u32 %v284_v36, %v281_v35  ;;  %v303_v48 = vshrl.u32 %v3505_v39, 16  ;;  %v306_v49 = vshll.u32 %v3505_v39, 16  ;;  %v312_v50 = vshll.u32 %v3510_v45, 16  ;;  %v238_v6 = vld [vmem:[%s3460_s29 + $0x2c] sm:$0x1] }
  0x1c   : > { %3151 = vmatmul.mubr.msk.bf16.gmra.mrb[4].mxu0 %vm702_vm2, %v3343_v17  ;;  %v267_v51 = vsel %vm3499_vm3, %v262_v41, %v266_v22  ;;  %v277_v52 = vsel %vm3499_vm3, %v272_v42, %v276_v25  ;;  %v295_v53 = vor.u32 %v294_v43, %v290_v37  ;;  %v316_v54 = vshrl.u32 %v3510_v45, 16  ;;  %v3541_v15 = vld [vmem:[%s3460_s29 + $0x30] sm:$0xf]  ;;  %v3544_v22 = vld [vmem:[%s3460_s29 + $0x34] sm:$0xf] }
  0x1d   : > { %3154 = vmatprep.mubr.msk.bf16.mxu0 %vm702_vm2, %v3345_v38  ;;  %v2714_v55 = vcombine.low %v267_v51, %v277_v52  ;;  %v286_v56 = vrot.slane %v285_v46, 4  ;;  %v305_v57 = vrot.slane %v303_v48, 4  ;;  %v308_v58 = vrot.slane %v306_v49, 5  ;;  %v239_v28 = vld [vmem:[%s3460_s29 + $0x38] sm:$0x1]  ;;  %v3348_v46 = vld [vmem:[%s3460_s29 + $0x60] sm:$0xff]  }
  0x1e   : > { %v296_v61 = vrot.slane %v295_v53, 4  ;;  %v314_v62 = vrot.slane %v312_v50, 5  ;;  %v318_v63 = vrot.slane %v316_v54, 4  ;;  %v322_v0 = vshll.u32 %v237_v47, 16  ;;  %v3560_v38 = vld [vmem:[%s3460_s29 + $0x3c] sm:$0xf] }
  0x1f   : > { %3074 = vmatprep.mubr.msk.bf16.mxu1 %vm702_vm2, %v2714_v55  ;;  %v291_v3 = vsel %vm3499_vm3, %v286_v56, %v290_v37  ;;  %v309_v5 = vor.u32 %v308_v58, %v305_v57  ;;  %v327_v7 = vshrl.u32 %v3525_v60, 16  ;;  %v330_v8 = vshll.u32 %v3525_v60, 16  ;;  %v3564_v47 = vld [vmem:[%s3460_s29 + $0x40] sm:$0xf]  ;;  %v240_v51 = vld [vmem:[%s3460_s29 + $0x44] sm:$0x1] }
  0x20   : > { %v301_v11 = vsel %vm3499_vm3, %v296_v61, %v300_v44  ;;  %v319_v12 = vor.u32 %v318_v63, %v314_v62  ;;  %v324_v13 = vrot.slane %v322_v0, 5  ;;  %v336_v14 = vshll.u32 %v3528_v1, 16  ;;  %v3352_v52 = vld [vmem:[%s4066_s1 + $0x8] sm:$0xff]  }
  0x21   : > { %v2715_v16 = vcombine.low %v291_v3, %v301_v11  ;;  %v310_v17 = vrot.slane %v309_v5, 4  ;;  %v329_v20 = vrot.slane %v327_v7, 4  ;;  %v332_v21 = vrot.slane %v330_v8, 5  ;;  %v3580_v5 = vld [vmem:[%s3460_s29 + $0x48] sm:$0xf] }
  0x22   : > { %v320_v23 = vrot.slane %v319_v12, 4  ;;  %v338_v25 = vrot.slane %v336_v14, 5  ;;  %v340_v26 = vshrl.u32 %v3528_v1, 16  ;;  %v346_v27 = vshll.u32 %v238_v6, 16  ;;  %v3585_v12 = vld [vmem:[%s3460_s29 + $0x4c] sm:$0xf] }
  0x23   : > { %3075 = vmatmul.mubr.msk.bf16.vlgmr.msra.gmra.mrb[0].mxu1 %vm702_vm2, %v2715_v16  ;;  %v315_v29 = vsel %vm3499_vm3, %v310_v17, %v314_v62  ;;  %v333_v30 = vor.u32 %v332_v21, %v329_v20  ;;  %v351_v31 = vshrl.u32 %v3541_v15, 16  ;;  %v354_v32 = vshll.u32 %v3541_v15, 16  ;;  %v3349_v62 = vld [vmem:[%s3460_s29 + $0x6c] sm:$0xff]  }
  0x24   : > { %3155 = vmatmul.mubr.msk.bf16.gmra.mrb[8].mxu0 %vm702_vm2, %v3346_v59  ;;  %3107 = vmatpush3.bf16.msra.mxu1 %v3455_v4  ;;  %v325_v33 = vsel %vm3499_vm3, %v320_v23, %v324_v13  ;;  %v342_v35 = vrot.slane %v340_v26, 4  ;;  %v348_v36 = vrot.slane %v346_v27, 5  ;;  %v360_v37 = vshll.u32 %v3544_v22, 16  ;;  %v241_v20 = vld [vmem:[%s3460_s29 + $0x50] sm:$0x1] }
  0x25   : > { %3158 = vmatprep.mubr.msk.bf16.mxu0 %vm702_vm2, %v3347_v2  ;;  %v2716_v41 = vcombine.low %v315_v29, %v325_v33  ;;  %v334_v42 = vrot.slane %v333_v30, 4  ;;  %v353_v43 = vrot.slane %v351_v31, 4  ;;  %v356_v44 = vrot.slane %v354_v32, 5  ;;  %3108 = vmatprep.subr.bf16.mxu1 %v3352_v52  ;;  %v3595_v27 = vld [vmem:[%s3460_s29 + $0x54] sm:$0xf]  ;;  %v3354_v33 = vld [vmem:[%s4066_s1 + $0x38] sm:$0xff]  }
  0x26   : > { %v343_v4 = vor.u32 %v342_v35, %v338_v25  ;;  %v362_v48 = vrot.slane %v360_v37, 5  ;;  %v364_v49 = vshrl.u32 %v3544_v22, 16  ;;  %v370_v50 = vshll.u32 %v239_v28, 16  ;;  %v3601_v32 = vld [vmem:[%s3460_s29 + $0x58] sm:$0xf]  ;;  %3180 = vmatprep.subr.bf16.mxu0 %v3354_v33 }
  0x27   : > { %3078 = vmatprep.mubr.msk.bf16.mxu1 %vm702_vm2, %v2716_v41  ;;  %v339_v53 = vsel %vm3499_vm3, %v334_v42, %v338_v25  ;;  %v357_v54 = vor.u32 %v356_v44, %v353_v43  ;;  %v375_v55 = vshrl.u32 %v3560_v38, 16  ;;  %v378_v56 = vshll.u32 %v3560_v38, 16  ;;  %v3350_v42 = vld [vmem:[%s3460_s29 + $0x78] sm:$0xff]   ;;  %3181 = vmatpush3.bf16.msra.mxu0 %v3354_v33 }
  0x28   : > { %v344_v57 = vrot.slane %v343_v4, 4  ;;  %v366_v58 = vrot.slane %v364_v49, 4  ;;  %v372_v59 = vrot.slane %v370_v50, 5  ;;  %v384_v61 = vshll.u32 %v3564_v47, 16  ;;  %3109 = vmatpush3.bf16.msra.mxu1 %v3352_v52 }
  0x29   : > { %v358_v63 = vrot.slane %v357_v54, 4  ;;  %v377_v0 = vrot.slane %v375_v55, 4  ;;  %v380_v2 = vrot.slane %v378_v56, 5  ;;  %v388_v3 = vshrl.u32 %v3564_v47, 16  ;;  %v3615_v54 = vld [vmem:[%s3460_s29 + $0x60] sm:$0xf] }
  0x2a   : > { %v349_v6 = vsel %vm3499_vm3, %v344_v57, %v348_v36  ;;  %v367_v7 = vor.u32 %v366_v58, %v362_v48  ;;  %v386_v8 = vrot.slane %v384_v61, 5  ;;  %v394_v11 = vshll.u32 %v240_v51, 16 }
  0x2b   : > { %v2717_v13 = vcombine.low %v339_v53, %v349_v6  ;;  %v363_v14 = vsel %vm3499_vm3, %v358_v63, %v362_v48  ;;  %v381_v16 = vor.u32 %v380_v2, %v377_v0  ;;  %v390_v17 = vrot.slane %v388_v3, 4  ;;  %v242_v48 = vld [vmem:[%s3460_s29 + $0x5c] sm:$0x1]  ;;  %v3351_v53 = vld [vmem:[%s3460_s29 + $0x84] sm:$0xff]  }
  0x2c   : > { %3159 = vmatmul.mubr.msk.bf16.gmra.mrb[12].mxu0 %vm702_vm2, %v3348_v46  ;;  %v368_v21 = vrot.slane %v367_v7, 4  ;;  %v396_v23 = vrot.slane %v394_v11, 5  ;;  %v399_v25 = vshrl.u32 %v3580_v5, 16  ;;  %v402_v26 = vshll.u32 %v3580_v5, 16 }
  0x2d   : > { %3162 = vmatprep.mubr.msk.bf16.mxu0 %vm702_vm2, %v3349_v62  ;;  %3079 = vmatmul.mubr.msk.bf16.gmra.mrb[4].mxu1 %vm702_vm2, %v2717_v13  ;;  %v382_v28 = vrot.slane %v381_v16, 4  ;;  %v391_v29 = vor.u32 %v390_v17, %v386_v8  ;;  %v408_v30 = vshll.u32 %v3585_v12, 16  ;;  %v412_v31 = vshrl.u32 %v3585_v12, 16 }
  0x2e   : > { %v373_v35 = vsel %vm3499_vm3, %v368_v21, %v372_v59  ;;  %v401_v36 = vrot.slane %v399_v25, 4  ;;  %v404_v37 = vrot.slane %v402_v26, 5  ;;  %v418_v41 = vshll.u32 %v241_v20, 16  ;;  %v3624_v59 = vld [vmem:[%s3460_s29 + $0x64] sm:$0xf] }
  0x2f   : > { %v2718_v43 = vcombine.low %v363_v14, %v373_v35  ;;  %v387_v44 = vsel %vm3499_vm3, %v382_v28, %v386_v8  ;;  %v392_v46 = vrot.slane %v391_v29, 4  ;;  %v410_v4 = vrot.slane %v408_v30, 5  ;;  %v243_v8 = vld [vmem:[%s3460_s29 + $0x68] sm:$0x1]  ;;  %v3639_v30 = vld [vmem:[%s3460_s29 + $0x6c] sm:$0xf] }
  0x30   : > { %v405_v49 = vor.u32 %v404_v37, %v401_v36  ;;  %v414_v50 = vrot.slane %v412_v31, 4  ;;  %v420_v51 = vrot.slane %v418_v41, 5  ;;  %v423_v52 = vshrl.u32 %v3595_v27, 16  ;;  %v3353_v37 = vld [vmem:[%s3460_s29 + $0x90] sm:$0xff]  }
  0x31   : > { %3082 = vmatprep.mubr.msk.bf16.mxu1 %vm702_vm2, %v2718_v43  ;;  %v397_v55 = vsel %vm3499_vm3, %v392_v46, %v396_v23  ;;  %v426_v56 = vshll.u32 %v3595_v27, 16  ;;  %v432_v57 = vshll.u32 %v3601_v32, 16  ;;  %v436_v58 = vshrl.u32 %v3601_v32, 16  ;;  %v3643_v41 = vld [vmem:[%s3460_s29 + $0x70] sm:$0xf] }
  0x32   : > { %v2719_v61 = vcombine.low %v387_v44, %v397_v55  ;;  %v406_v62 = vrot.slane %v405_v49, 4  ;;  %v415_v63 = vor.u32 %v414_v50, %v410_v4  ;;  %v425_v0 = vrot.slane %v423_v52, 4  ;;  %v244_v46 = vld [vmem:[%s3460_s29 + $0x74] sm:$0x1] }
  0x33   : > { %v428_v2 = vrot.slane %v426_v56, 5  ;;  %v434_v3 = vrot.slane %v432_v57, 5  ;;  %v438_v6 = vrot.slane %v436_v58, 4  ;;  %v442_v7 = vshll.u32 %v242_v48, 16  ;;  %v3355_v48 = vld [vmem:[%s3460_s29 + $0x9c] sm:$0xff]  }
  0x34   : > { %3163 = vmatmul.mubr.msk.bf16.gmra.mrb[16].mxu0 %vm702_vm2, %v3350_v42  ;;  %v411_v11 = vsel %vm3499_vm3, %v406_v62, %v410_v4  ;;  %v416_v13 = vrot.slane %v415_v63, 4  ;;  %v447_v14 = vshrl.u32 %v3615_v54, 16  ;;  %v450_v16 = vshll.u32 %v3615_v54, 16  ;;  %v3656_v58 = vld [vmem:[%s3460_s29 + $0x78] sm:$0xf] }
  0x35   : > { %3166 = vmatprep.mubr.msk.bf16.mxu0 %vm702_vm2, %v3351_v53  ;;  %3083 = vmatmul.mubr.msk.bf16.gmra.mrb[8].mxu1 %vm702_vm2, %v2719_v61  ;;  %v429_v17 = vor.u32 %v428_v2, %v425_v0  ;;  %v439_v20 = vor.u32 %v438_v6, %v434_v3  ;;  %v444_v21 = vrot.slane %v442_v7, 5  ;;  %v456_v23 = vshll.u32 %v3624_v59, 16  ;;  %v3659_v61 = vld [vmem:[%s3460_s29 + $0x7c] sm:$0xf] }
  0x36   : > { %v421_v25 = vsel %vm3499_vm3, %v416_v13, %v420_v51  ;;  %v449_v26 = vrot.slane %v447_v14, 4  ;;  %v452_v28 = vrot.slane %v450_v16, 5  ;;  %v460_v29 = vshrl.u32 %v3624_v59, 16 }
  0x37   : > { %v2720_v31 = vcombine.low %v411_v11, %v421_v25  ;;  %v430_v33 = vrot.slane %v429_v17, 4  ;;  %v440_v35 = vrot.slane %v439_v20, 4  ;;  %v458_v36 = vrot.slane %v456_v23, 5 }
  0x38   : > { %v453_v42 = vor.u32 %v452_v28, %v449_v26  ;;  %v462_v43 = vrot.slane %v460_v29, 4  ;;  %v466_v44 = vshll.u32 %v243_v8, 16  ;;  %v471_v4 = vshrl.u32 %v3639_v30, 16  ;;  %v3675_v26 = vld [vmem:[%s3460_s29 + $0x84] sm:$0xf] }
  0x39   : > { %3086 = vmatprep.mubr.msk.bf16.mxu1 %vm702_vm2, %v2720_v31  ;;  %v435_v49 = vsel %vm3499_vm3, %v430_v33, %v434_v3  ;;  %v445_v50 = vsel %vm3499_vm3, %v440_v35, %v444_v21  ;;  %v474_v51 = vshll.u32 %v3639_v30, 16  ;;  %v480_v52 = vshll.u32 %v3643_v41, 16  ;;  %v245_v3 = vld [vmem:[%s3460_s29 + $0x80] sm:$0x1]  ;;  %v3356_v35 = vld [vmem:[%s3460_s29 + $0xa8] sm:$0xff]  }
  0x3a   : > { %v2721_v53 = vcombine.low %v435_v49, %v445_v50  ;;  %v454_v55 = vrot.slane %v453_v42, 4  ;;  %v463_v56 = vor.u32 %v462_v43, %v458_v36  ;;  %v468_v57 = vrot.slane %v466_v44, 5  ;;  %v246_v50 = vld [vmem:[%s3460_s29 + $0x8c] sm:$0x1] }
  0x3b   : > { %v473_v62 = vrot.slane %v471_v4, 4  ;;  %v476_v63 = vrot.slane %v474_v51, 5  ;;  %v482_v0 = vrot.slane %v480_v52, 5  ;;  %v484_v2 = vshrl.u32 %v3643_v41, 16 }
  0x3c   : > { %3167 = vmatmul.mubr.msk.bf16.gmra.mrb[20].mxu0 %vm702_vm2, %v3353_v37  ;;  %v459_v6 = vsel %vm3499_vm3, %v454_v55, %v458_v36  ;;  %v464_v7 = vrot.slane %v463_v56, 4  ;;  %v490_v8 = vshll.u32 %v244_v46, 16  ;;  %v495_v11 = vshrl.u32 %v3656_v58, 16  ;;  %v3679_v36 = vld [vmem:[%s3460_s29 + $0x88] sm:$0xf]  ;;  %v3357_v37 = vld [vmem:[%s3460_s29 + $0xb4] sm:$0xff]  }
  0x3d   : > { %3170 = vmatprep.mubr.msk.bf16.mxu0 %vm702_vm2, %v3355_v48  ;;  %3087 = vmatmul.mubr.msk.bf16.gmra.mrb[12].mxu1 %vm702_vm2, %v2721_v53  ;;  %v477_v13 = vor.u32 %v476_v63, %v473_v62  ;;  %v486_v14 = vrot.slane %v484_v2, 4  ;;  %v498_v16 = vshll.u32 %v3656_v58, 16  ;;  %v504_v17 = vshll.u32 %v3659_v61, 16 }
  0x3e   : > { %v469_v20 = vsel %vm3499_vm3, %v464_v7, %v468_v57  ;;  %v492_v21 = vrot.slane %v490_v8, 5  ;;  %v497_v23 = vrot.slane %v495_v11, 4  ;;  %v508_v25 = vshrl.u32 %v3659_v61, 16  ;;  %v3690_v57 = vld [vmem:[%s3460_s29 + $0x90] sm:$0xf] }
  0x3f   : > { %v2722_v28 = vcombine.low %v459_v6, %v469_v20  ;;  %v478_v29 = vrot.slane %v477_v13, 4  ;;  %v487_v31 = vor.u32 %v486_v14, %v482_v0  ;;  %v500_v33 = vrot.slane %v498_v16, 5 }
  0x40   : > { %v506_v42 = vrot.slane %v504_v17, 5  ;;  %v510_v43 = vrot.slane %v508_v25, 4  ;;  %v514_v44 = vshll.u32 %v245_v3, 16  ;;  %v519_v46 = vshrl.u32 %v3675_v26, 16  ;;  %v3697_v3 = vld [vmem:[%s3460_s29 + $0x94] sm:$0xf] }
  0x41   : > { %3090 = vmatprep.mubr.msk.bf16.mxu1 %vm702_vm2, %v2722_v28  ;;  %v483_v4 = vsel %vm3499_vm3, %v478_v29, %v482_v0  ;;  %v488_v48 = vrot.slane %v487_v31, 4  ;;  %v501_v49 = vor.u32 %v500_v33, %v497_v23  ;;  %v522_v51 = vshll.u32 %v3675_v26, 16  ;;  %v247_v17 = vld [vmem:[%s3460_s29 + $0x98] sm:$0x1]  ;;  %v3710_v29 = vld [vmem:[%s3460_s29 + $0x9c] sm:$0xf] }
  0x42   : > { %v511_v52 = vor.u32 %v510_v43, %v506_v42  ;;  %v516_v53 = vrot.slane %v514_v44, 5  ;;  %v521_v55 = vrot.slane %v519_v46, 4  ;;  %v528_v56 = vshll.u32 %v3679_v36, 16  ;;  %v3714_v43 = vld [vmem:[%s3460_s29 + $0xa0] sm:$0xf] }
  0x43   : > { %v493_v62 = vsel %vm3499_vm3, %v488_v48, %v492_v21  ;;  %v502_v63 = vrot.slane %v501_v49, 4  ;;  %v524_v0 = vrot.slane %v522_v51, 5  ;;  %v532_v2 = vshrl.u32 %v3679_v36, 16  ;;  %v248_v51 = vld [vmem:[%s3460_s29 + $0xa4] sm:$0x1] }
  0x44   : > { %3171 = vmatmul.mubr.msk.bf16.gmra.mrb[24].mxu0 %vm702_vm2, %v3356_v35  ;;  %v2723_v6 = vcombine.low %v483_v4, %v493_v62  ;;  %v512_v7 = vrot.slane %v511_v52, 4  ;;  %v530_v8 = vrot.slane %v528_v56, 5  ;;  %v538_v11 = vshll.u32 %v246_v50, 16 }
  0x45   : > { %3174 = vmatprep.mubr.msk.bf16.mxu0 %vm702_vm2, %v3357_v37  ;;  %v507_v13 = vsel %vm3499_vm3, %v502_v63, %v506_v42  ;;  %v525_v14 = vor.u32 %v524_v0, %v521_v55  ;;  %v534_v16 = vrot.slane %v532_v2, 4  ;;  %v543_v20 = vshrl.u32 %v3690_v57, 16  ;;  %v3358_v42 = vld [vmem:[%s3460_s29 + $0xc0] sm:$0xff]   ;;  %v2848_v0 = vld [vmem:[%s3460_s29 + $0xc] sm:$0xf] }
  0x46   : > { %3091 = vmatmul.mubr.msk.bf16.gmra.mrb[16].mxu1 %vm702_vm2, %v2723_v6  ;;  %v517_v21 = vsel %vm3499_vm3, %v512_v7, %v516_v53  ;;  %v540_v23 = vrot.slane %v538_v11, 5  ;;  %v546_v25 = vshll.u32 %v3690_v57, 16  ;;  %v552_v28 = vshll.u32 %v3697_v3, 16  ;;  %v2849_v11 = vld [vmem:[%s3460_s29 + $0x10] sm:$0xf] }
  0x47   : > { %v2724_v31 = vcombine.low %v507_v13, %v517_v21  ;;  %v526_v33 = vrot.slane %v525_v14, 4  ;;  %v535_v35 = vor.u32 %v534_v16, %v530_v8  ;;  %v545_v37 = vrot.slane %v543_v20, 4 }
  0x48   : > { %v548_v44 = vrot.slane %v546_v25, 5  ;;  %v554_v46 = vrot.slane %v552_v28, 5  ;;  %v556_v4 = vshrl.u32 %v3697_v3, 16  ;;  %v562_v48 = vshll.u32 %v247_v17, 16 }
  0x49   : > { %3094 = vmatprep.mubr.msk.bf16.mxu1 %vm702_vm2, %v2724_v31  ;;  %v531_v49 = vsel %vm3499_vm3, %v526_v33, %v530_v8  ;;  %v536_v50 = vrot.slane %v535_v35, 4  ;;  %v567_v52 = vshrl.u32 %v3710_v29, 16  ;;  %v570_v53 = vshll.u32 %v3710_v29, 16  ;;  %v2850_v33 = vld [vmem:[%s3460_s29 + $0x14] sm:$0x1] }
  0x4a   : > { %v549_v55 = vor.u32 %v548_v44, %v545_v37  ;;  %v558_v56 = vrot.slane %v556_v4, 4  ;;  %v564_v62 = vrot.slane %v562_v48, 5  ;;  %v576_v63 = vshll.u32 %v3714_v43, 16 }
  0x4b   : > { %v541_v2 = vsel %vm3499_vm3, %v536_v50, %v540_v23  ;;  %v569_v6 = vrot.slane %v567_v52, 4  ;;  %v572_v7 = vrot.slane %v570_v53, 5  ;;  %v580_v8 = vshrl.u32 %v3714_v43, 16 }
  0x4c   : > { %3175 = vmatmul.mubr.msk.bf16.gmra.mrb[28].mxu0 %vm702_vm2, %v3358_v42  ;;  %v2725_v13 = vcombine.low %v531_v49, %v541_v2  ;;  %v550_v14 = vrot.slane %v549_v55, 4  ;;  %v559_v16 = vor.u32 %v558_v56, %v554_v46  ;;  %v578_v17 = vrot.slane %v576_v63, 5  ;;  %v3735_v49 = vld [vmem:[%s3460_s29 + $0xa8] sm:$0xf]  ;;  %v3740_v55 = vld [vmem:[%s3460_s29 + $0xac] sm:$0xf] }
  0x4d   : > { %v573_v20 = vor.u32 %v572_v7, %v569_v6  ;;  %v582_v21 = vrot.slane %v580_v8, 4  ;;  %v586_v25 = vshll.u32 %v248_v51, 16  ;;  %v1635_v28 = vshrl.u32 %v2848_v0, 16  ;;  %v249_v7 = vld [vmem:[%s3460_s29 + $0xb0] sm:$0x1] }
  0x4e   : > { %3095 = vmatmul.mubr.msk.bf16.gmra.mrb[20].mxu1 %vm702_vm2, %v2725_v13  ;;  %v555_v23 = vsel %vm3499_vm3, %v550_v14, %v554_v46  ;;  %v560_v31 = vrot.slane %v559_v16, 4  ;;  %v1638_v35 = vshll.u32 %v2848_v0, 16  ;;  %v1644_v37 = vshll.u32 %v2849_v11, 16 }
  0x4f   : > { %v574_v42 = vrot.slane %v573_v20, 4  ;;  %v583_v44 = vor.u32 %v582_v21, %v578_v17  ;;  %v588_v4 = vrot.slane %v586_v25, 5  ;;  %v1637_v48 = vrot.slane %v1635_v28, 4 }
  0x50   : > { %v565_v50 = vsel %vm3499_vm3, %v560_v31, %v564_v62  ;;  %v1640_v51 = vrot.slane %v1638_v35, 5  ;;  %v1646_v52 = vrot.slane %v1644_v37, 5  ;;  %v1648_v53 = vshrl.u32 %v2849_v11, 16 }
  0x51   : > { %v2726_v46 = vcombine.low %v555_v23, %v565_v50  ;;  %v579_v56 = vsel %vm3499_vm3, %v574_v42, %v578_v17  ;;  %v584_v63 = vrot.slane %v583_v44, 4  ;;  %v1654_v0 = vshll.u32 %v2850_v33, 16  ;;  %v2851_v17 = vld [vmem:[%s3460_s29 + $0x18] sm:$0xf]  ;;  %v2852_v23 = vld [vmem:[%s3460_s29 + $0x1c] sm:$0xf] }
  0x52   : > { %v1641_v2 = vor.u32 %v1640_v51, %v1637_v48  ;;  %v1650_v6 = vrot.slane %v1648_v53, 4  ;;  %v591_v8 = vshrl.u32 %v3735_v49, 16  ;;  %v594_v62 = vshll.u32 %v3735_v49, 16 }
  0x53   : > { %3098 = vmatprep.mubr.msk.bf16.mxu1 %vm702_vm2, %v2726_v46  ;;  %v589_v11 = vsel %vm3499_vm3, %v584_v63, %v588_v4  ;;  %v1656_v13 = vrot.slane %v1654_v0, 5  ;;  %v600_v14 = vshll.u32 %v3740_v55, 16  ;;  %v604_v16 = vshrl.u32 %v3740_v55, 16  ;;  %v2853_v46 = vld [vmem:[%s3460_s29 + $0x20] sm:$0x1] }
  0x54   : > { %v2727_v20 = vcombine.low %v579_v56, %v589_v11  ;;  %v1642_v21 = vrot.slane %v1641_v2, 4  ;;  %v1651_v25 = vor.u32 %v1650_v6, %v1646_v52  ;;  %v593_v28 = vrot.slane %v591_v8, 4  ;;  %v3759_v63 = vld [vmem:[%s3460_s29 + $0xb4] sm:$0xf]  ;;  %v3764_v8 = vld [vmem:[%s3460_s29 + $0xb8] sm:$0xf] }
  0x55   : > { %v596_v31 = vrot.slane %v594_v62, 5  ;;  %v602_v33 = vrot.slane %v600_v14, 5  ;;  %v606_v35 = vrot.slane %v604_v16, 4  ;;  %v610_v37 = vshll.u32 %v249_v7, 16 }
  0x56   : > { %3099 = vmatmul.mubr.msk.bf16.gmra.mrb[24].mxu1 %vm702_vm2, %v2727_v20  ;;  %v1647_v42 = vsel %vm3499_vm3, %v1642_v21, %v1646_v52  ;;  %v1652_v44 = vrot.slane %v1651_v25, 4  ;;  %v1659_v4 = vshrl.u32 %v2851_v17, 16  ;;  %v1662_v48 = vshll.u32 %v2851_v17, 16 }
  0x57   : > { %v597_v50 = vor.u32 %v596_v31, %v593_v28  ;;  %v607_v51 = vor.u32 %v606_v35, %v602_v33  ;;  %v612_v53 = vrot.slane %v610_v37, 5  ;;  %v1668_v56 = vshll.u32 %v2852_v23, 16  ;;  %v250_v28 = vld [vmem:[%s3460_s29 + $0xbc] sm:$0x1]  ;;  %v2854_v35 = vld [vmem:[%s3460_s29 + $0x24] sm:$0xf] }
  0x58   : > { %v1657_v0 = vsel %vm3499_vm3, %v1652_v44, %v1656_v13  ;;  %v1661_v2 = vrot.slane %v1659_v4, 4  ;;  %v1664_v6 = vrot.slane %v1662_v48, 5  ;;  %v1672_v7 = vshrl.u32 %v2852_v23, 16  ;;  %v2855_v48 = vld [vmem:[%s3460_s29 + $0x28] sm:$0xf] }
  0x59   : > { %v2896_v52 = vcombine.low %v1647_v42, %v1657_v0  ;;  %v598_v62 = vrot.slane %v597_v50, 4  ;;  %v608_v11 = vrot.slane %v607_v51, 4  ;;  %v1670_v14 = vrot.slane %v1668_v56, 5 }
  0x5a   : > { %v1665_v16 = vor.u32 %v1664_v6, %v1661_v2  ;;  %v1674_v17 = vrot.slane %v1672_v7, 4  ;;  %v1678_v20 = vshll.u32 %v2853_v46, 16  ;;  %v615_v21 = vshrl.u32 %v3759_v63, 16  ;;  %v2856_v2 = vld [vmem:[%s3460_s29 + $0x2c] sm:$0x1] }
  0x5b   : > { %3182 = vmatprep.mubr.msk.bf16.mxu0 %vm702_vm2, %v2896_v52  ;;  %v603_v13 = vsel %vm3499_vm3, %v598_v62, %v602_v33  ;;  %v613_v25 = vsel %vm3499_vm3, %v608_v11, %v612_v53  ;;  %v618_v23 = vshll.u32 %v3759_v63, 16  ;;  %v624_v31 = vshll.u32 %v3764_v8, 16 }
  0x5c   : > { %v2728_v37 = vcombine.low %v603_v13, %v613_v25  ;;  %v1666_v42 = vrot.slane %v1665_v16, 4  ;;  %v1675_v44 = vor.u32 %v1674_v17, %v1670_v14  ;;  %v1680_v4 = vrot.slane %v1678_v20, 5  ;;  %v2857_v16 = vld [vmem:[%s3460_s29 + $0x30] sm:$0xf] }
  0x5d   : > { %v617_v50 = vrot.slane %v615_v21, 4  ;;  %v620_v51 = vrot.slane %v618_v23, 5  ;;  %v626_v46 = vrot.slane %v624_v31, 5  ;;  %v628_v33 = vshrl.u32 %v3764_v8, 16 }
  0x5e   : > { %3102 = vmatprep.mubr.msk.bf16.mxu1 %vm702_vm2, %v2728_v37  ;;  %v1671_v53 = vsel %vm3499_vm3, %v1666_v42, %v1670_v14  ;;  %v1676_v56 = vrot.slane %v1675_v44, 4  ;;  %v634_v0 = vshll.u32 %v250_v28, 16  ;;  %v1683_v6 = vshrl.u32 %v2854_v35, 16  ;;  %v2858_v28 = vld [vmem:[%s3460_s29 + $0x34] sm:$0xf] }
  0x5f   : > { %v621_v7 = vor.u32 %v620_v51, %v617_v50  ;;  %v630_v52 = vrot.slane %v628_v33, 4  ;;  %v1686_v62 = vshll.u32 %v2854_v35, 16  ;;  %v1692_v11 = vshll.u32 %v2855_v48, 16  ;;  %v2859_v33 = vld [vmem:[%s3460_s29 + $0x38] sm:$0x1] }
  0x60   : > { %v1681_v17 = vsel %vm3499_vm3, %v1676_v56, %v1680_v4  ;;  %v636_v20 = vrot.slane %v634_v0, 5  ;;  %v1685_v21 = vrot.slane %v1683_v6, 4  ;;  %v1696_v13 = vshrl.u32 %v2855_v48, 16 }
  0x61   : > { %v2897_v25 = vcombine.low %v1671_v53, %v1681_v17  ;;  %v622_v23 = vrot.slane %v621_v7, 4  ;;  %v631_v14 = vor.u32 %v630_v52, %v626_v46  ;;  %v1688_v31 = vrot.slane %v1686_v62, 5  ;;  %v2860_v7 = vld [vmem:[%s3460_s29 + $0x3c] sm:$0xf]  ;;  %v2861_v17 = vld [vmem:[%s3460_s29 + $0x40] sm:$0xf] }
  0x62   : > { %v1694_v37 = vrot.slane %v1692_v11, 5  ;;  %v1698_v42 = vrot.slane %v1696_v13, 4  ;;  %v1702_v44 = vshll.u32 %v2856_v2, 16  ;;  %v1707_v50 = vshrl.u32 %v2857_v16, 16 }
  0x63   : > { %3183 = vmatmul.mubr.msk.bf16.vlgmr.msra.gmra.mrb[0].mxu0 %vm702_vm2, %v2897_v25  ;;  %v627_v35 = vsel %vm3499_vm3, %v622_v23, %v626_v46  ;;  %v632_v4 = vrot.slane %v631_v14, 4  ;;  %v1689_v51 = vor.u32 %v1688_v31, %v1685_v21  ;;  %v1710_v48 = vshll.u32 %v2857_v16, 16  ;;  %v2862_v31 = vld [vmem:[%s3460_s29 + $0x44] sm:$0x1] }
  0x64   : > { %v1699_v53 = vor.u32 %v1698_v42, %v1694_v37  ;;  %v1704_v56 = vrot.slane %v1702_v44, 5  ;;  %v1709_v0 = vrot.slane %v1707_v50, 4  ;;  %v1716_v6 = vshll.u32 %v2858_v28, 16 }
  0x65   : > { %v637_v2 = vsel %vm3499_vm3, %v632_v4, %v636_v20  ;;  %v1690_v52 = vrot.slane %v1689_v51, 4  ;;  %v1712_v62 = vrot.slane %v1710_v48, 5  ;;  %v1720_v11 = vshrl.u32 %v2858_v28, 16 }
  0x66   : > { %v2729_v13 = vcombine.low %v627_v35, %v637_v2  ;;  %v1700_v46 = vrot.slane %v1699_v53, 4  ;;  %v1718_v25 = vrot.slane %v1716_v6, 5  ;;  %v1726_v21 = vshll.u32 %v2859_v33, 16  ;;  %v2863_v35 = vld [vmem:[%s3460_s29 + $0x48] sm:$0xf] }
  0x67   : > { %v1695_v16 = vsel %vm3499_vm3, %v1690_v52, %v1694_v37  ;;  %v1713_v23 = vor.u32 %v1712_v62, %v1709_v0  ;;  %v1722_v14 = vrot.slane %v1720_v11, 4  ;;  %v1731_v42 = vshrl.u32 %v2860_v7, 16  ;;  %v2865_v11 = vld [vmem:[%s3460_s29 + $0x50] sm:$0x1] }
  0x68   : > { %3103 = vmatmul.mubr.msk.bf16.gmra.mrb[28].mxu1 %vm702_vm2, %v2729_v13  ;;  %v1705_v20 = vsel %vm3499_vm3, %v1700_v46, %v1704_v56  ;;  %v1728_v28 = vrot.slane %v1726_v21, 5  ;;  %v1734_v44 = vshll.u32 %v2860_v7, 16  ;;  %v1740_v50 = vshll.u32 %v2861_v17, 16  ;;  %v2864_v56 = vld [vmem:[%s3460_s29 + $0x4c] sm:$0xf] }
  0x69   : > { %v2898_v4 = vcombine.low %v1695_v16, %v1705_v20  ;;  %3110 = vmatprep.mubr.msk.bf16.mxu1 %vm702_vm2, %v2748_v19  ;;  %v1714_v37 = vrot.slane %v1713_v23, 4  ;;  %v1723_v51 = vor.u32 %v1722_v14, %v1718_v25  ;;  %v1733_v33 = vrot.slane %v1731_v42, 4  ;;  %v2866_v23 = vld [vmem:[%s3460_s29 + $0x54] sm:$0xf] }
  0x6a   : > { %v1736_v48 = vrot.slane %v1734_v44, 5  ;;  %v1742_v53 = vrot.slane %v1740_v50, 5  ;;  %v1744_v0 = vshrl.u32 %v2861_v17, 16  ;;  %v1750_v6 = vshll.u32 %v2862_v31, 16 }
  0x6b   : > { %3186 = vmatprep.mubr.msk.bf16.mxu0 %vm702_vm2, %v2898_v4  ;;  %v1719_v7 = vsel %vm3499_vm3, %v1714_v37, %v1718_v25  ;;  %v1724_v2 = vrot.slane %v1723_v51, 4  ;;  %v2750_v9 = vcombine.low %v3505_v39, %v3510_v45  ;;  %v1755_v10 = vshrl.u32 %v2863_v35, 16  ;;  %v2867_v39 = vld [vmem:[%s3460_s29 + $0x58] sm:$0xf] }
  0x6c   : > { %v1737_v19 = vor.u32 %v1736_v48, %v1733_v33  ;;  %v1746_v52 = vrot.slane %v1744_v0, 4  ;;  %v1752_v62 = vrot.slane %v1750_v6, 5  ;;  %v1758_v13 = vshll.u32 %v2863_v35, 16  ;;  %v2869_v6 = vld [vmem:[%s3460_s29 + $0x60] sm:$0xf] }
  0x6d   : > { %v1729_v17 = vsel %vm3499_vm3, %v1724_v2, %v1728_v28  ;;  %v1757_v46 = vrot.slane %v1755_v10, 4  ;;  %v1764_v21 = vshll.u32 %v2864_v56, 16  ;;  %v1768_v16 = vshrl.u32 %v2864_v56, 16  ;;  %v2870_v10 = vld [vmem:[%s3460_s29 + $0x64] sm:$0xf] }
  0x6e   : > { %v2899_v14 = vcombine.low %v1719_v7, %v1729_v17  ;;  %v1738_v25 = vrot.slane %v1737_v19, 4  ;;  %v1747_v31 = vor.u32 %v1746_v52, %v1742_v53  ;;  %v1760_v42 = vrot.slane %v1758_v13, 5  ;;  %v2871_v17 = vld [vmem:[%s3460_s29 + $0x68] sm:$0x1] }
  0x6f   : > { %v1766_v45 = vrot.slane %v1764_v21, 5  ;;  %v1770_v20 = vrot.slane %v1768_v16, 4  ;;  %v1774_v44 = vshll.u32 %v2865_v11, 16  ;;  %v2751_v50 = vcombine.low %v3525_v60, %v3528_v1  ;;  %v2868_v60 = vld [vmem:[%s3460_s29 + $0x5c] sm:$0x1] }
  0x70   : > { %3187 = vmatmul.mubr.msk.bf16.gmra.mrb[4].mxu0 %vm702_vm2, %v2899_v14  ;;  %3111 = vmatmul.mubr.msk.bf16.vlgmr.msra.gmra.mrb[0].mxu1 %vm702_vm2, %v2749_v40  ;;  %v1743_v28 = vsel %vm3499_vm3, %v1738_v25, %v1742_v53  ;;  %v1748_v35 = vrot.slane %v1747_v31, 4  ;;  %v1761_v4 = vor.u32 %v1760_v42, %v1757_v46  ;;  %v1779_v37 = vshrl.u32 %v2866_v23, 16  ;;  %v2872_v31 = vld [vmem:[%s3460_s29 + $0x6c] sm:$0xf] }
  0x71   : > { %3114 = vmatprep.mubr.msk.bf16.mxu1 %vm702_vm2, %v2750_v9  ;;  %v1771_v51 = vor.u32 %v1770_v20, %v1766_v45  ;;  %v1776_v33 = vrot.slane %v1774_v44, 5  ;;  %v1782_v1 = vshll.u32 %v2866_v23, 16  ;;  %v1788_v48 = vshll.u32 %v2867_v39, 16 }
  0x72   : > { %v1753_v18 = vsel %vm3499_vm3, %v1748_v35, %v1752_v62  ;;  %v1762_v24 = vrot.slane %v1761_v4, 4  ;;  %v1781_v40 = vrot.slane %v1779_v37, 4  ;;  %v1792_v0 = vshrl.u32 %v2867_v39, 16 }
  0x73   : > { %v2900_v53 = vcombine.low %v1743_v28, %v1753_v18  ;;  %v1772_v56 = vrot.slane %v1771_v51, 4  ;;  %v1784_v7 = vrot.slane %v1782_v1, 5  ;;  %v1790_v2 = vrot.slane %v1788_v48, 5 }
  0x74   : > { %v1767_v9 = vsel %vm3499_vm3, %v1762_v24, %v1766_v45  ;;  %v1794_v19 = vrot.slane %v1792_v0, 4  ;;  %v1798_v52 = vshll.u32 %v2868_v60, 16  ;;  %v2752_v11 = vcombine.low %v3541_v15, %v3544_v22  ;;  %v2873_v22 = vld [vmem:[%s3460_s29 + $0x70] sm:$0xf]  ;;  %v2875_v24 = vld [vmem:[%s3460_s29 + $0x78] sm:$0xf] }
  0x75   : > { %3190 = vmatprep.mubr.msk.bf16.mxu0 %vm702_vm2, %v2900_v53  ;;  %v1777_v62 = vsel %vm3499_vm3, %v1772_v56, %v1776_v33  ;;  %v1785_v13 = vor.u32 %v1784_v7, %v1781_v40  ;;  %v1803_v46 = vshrl.u32 %v2869_v6, 16  ;;  %v1806_v21 = vshll.u32 %v2869_v6, 16  ;;  %v2874_v33 = vld [vmem:[%s3460_s29 + $0x74] sm:$0x1] }
  0x76   : > { %v2901_v16 = vcombine.low %v1767_v9, %v1777_v62  ;;  %v1795_v23 = vor.u32 %v1794_v19, %v1790_v2  ;;  %v1800_v14 = vrot.slane %v1798_v52, 5  ;;  %v1812_v25 = vshll.u32 %v2870_v10, 16 }
  0x77   : > { %v1786_v42 = vrot.slane %v1785_v13, 4  ;;  %v1805_v39 = vrot.slane %v1803_v46, 4  ;;  %v1808_v45 = vrot.slane %v1806_v21, 5  ;;  %v1816_v15 = vshrl.u32 %v2870_v10, 16 }
  0x78   : > { %3191 = vmatmul.mubr.msk.bf16.gmra.mrb[8].mxu0 %vm702_vm2, %v2901_v16  ;;  %3115 = vmatmul.mubr.msk.bf16.gmra.mrb[4].mxu1 %vm702_vm2, %v2751_v50  ;;  %v1796_v20 = vrot.slane %v1795_v23, 4  ;;  %v1814_v44 = vrot.slane %v1812_v25, 5  ;;  %v1822_v28 = vshll.u32 %v2871_v17, 16  ;;  %v2753_v35 = vcombine.low %v3560_v38, %v3564_v47  ;;  %v2877_v17 = vld [vmem:[%s3460_s29 + $0x80] sm:$0x1] }
  0x79   : > { %v1791_v4 = vsel %vm3499_vm3, %v1786_v42, %v1790_v2  ;;  %3118 = vmatprep.mubr.msk.bf16.mxu1 %vm702_vm2, %v2752_v11  ;;  %v1809_v37 = vor.u32 %v1808_v45, %v1805_v39  ;;  %v1818_v51 = vrot.slane %v1816_v15, 4  ;;  %v1827_v60 = vshrl.u32 %v2872_v31, 16  ;;  %v2876_v2 = vld [vmem:[%s3460_s29 + $0x7c] sm:$0xf]  ;;  %v2878_v25 = vld [vmem:[%s3460_s29 + $0x84] sm:$0xf] }
  0x7a   : > { %v1801_v1 = vsel %vm3499_vm3, %v1796_v20, %v1800_v14  ;;  %v1824_v50 = vrot.slane %v1822_v28, 5  ;;  %v1830_v48 = vshll.u32 %v2872_v31, 16  ;;  %v1836_v18 = vshll.u32 %v2873_v22, 16  ;;  %v2879_v39 = vld [vmem:[%s3460_s29 + $0x88] sm:$0xf] }
  0x7b   : > { %v2902_v40 = vcombine.low %v1791_v4, %v1801_v1  ;;  %v1810_v0 = vrot.slane %v1809_v37, 4  ;;  %v1819_v38 = vor.u32 %v1818_v51, %v1814_v44  ;;  %v1829_v47 = vrot.slane %v1827_v60, 4 }
  0x7c   : > { %v1832_v6 = vrot.slane %v1830_v48, 5  ;;  %v1838_v53 = vrot.slane %v1836_v18, 5  ;;  %v1840_v56 = vshrl.u32 %v2873_v22, 16  ;;  %v1846_v7 = vshll.u32 %v2874_v33, 16  ;;  %v2880_v33 = vld [vmem:[%s3460_s29 + $0x8c] sm:$0x1] }
  0x7d   : > { %3194 = vmatprep.mubr.msk.bf16.mxu0 %vm702_vm2, %v2902_v40  ;;  %v1815_v10 = vsel %vm3499_vm3, %v1810_v0, %v1814_v44  ;;  %v1820_v9 = vrot.slane %v1819_v38, 4  ;;  %v2754_v19 = vcombine.low %v3580_v5, %v3585_v12  ;;  %v1851_v52 = vshrl.u32 %v2875_v24, 16  ;;  %v2881_v18 = vld [vmem:[%s3460_s29 + $0x90] sm:$0xf] }
  0x7e   : > { %v1833_v11 = vor.u32 %v1832_v6, %v1829_v47  ;;  %v1842_v62 = vrot.slane %v1840_v56, 4  ;;  %v1848_v13 = vrot.slane %v1846_v7, 5  ;;  %v1854_v46 = vshll.u32 %v2875_v24, 16  ;;  %v2882_v47 = vld [vmem:[%s3460_s29 + $0x94] sm:$0xf] }
  0x7f   : > { %v1825_v21 = vsel %vm3499_vm3, %v1820_v9, %v1824_v50  ;;  %v1853_v16 = vrot.slane %v1851_v52, 4  ;;  %v1860_v23 = vshll.u32 %v2876_v2, 16  ;;  %v1864_v14 = vshrl.u32 %v2876_v2, 16  ;;  %v2883_v9 = vld [vmem:[%s3460_s29 + $0x98] sm:$0x1] }
  0x80   : > { %v2903_v31 = vcombine.low %v1815_v10, %v1825_v21  ;;  %3119 = vmatmul.mubr.msk.bf16.gmra.mrb[8].mxu1 %vm702_vm2, %v2753_v35  ;;  %v1834_v42 = vrot.slane %v1833_v11, 4  ;;  %v1843_v5 = vor.u32 %v1842_v62, %v1838_v53  ;;  %v1856_v12 = vrot.slane %v1854_v46, 5  ;;  %v2884_v46 = vld [vmem:[%s3460_s29 + $0x9c] sm:$0xf] }
  0x81   : > { %3122 = vmatprep.mubr.msk.bf16.mxu1 %vm702_vm2, %v2754_v19  ;;  %v1862_v45 = vrot.slane %v1860_v23, 5  ;;  %v1866_v15 = vrot.slane %v1864_v14, 4  ;;  %v1870_v22 = vshll.u32 %v2877_v17, 16  ;;  %v2755_v20 = vcombine.low %v3595_v27, %v3601_v32  ;;  %v2885_v23 = vld [vmem:[%s3460_s29 + $0xa0] sm:$0xf] }
  0x82   : > { %3195 = vmatmul.mubr.msk.bf16.gmra.mrb[12].mxu0 %vm702_vm2, %v2903_v31  ;;  %v1839_v44 = vsel %vm3499_vm3, %v1834_v42, %v1838_v53  ;;  %v1844_v28 = vrot.slane %v1843_v5, 4  ;;  %v1857_v35 = vor.u32 %v1856_v12, %v1853_v16  ;;  %v1875_v4 = vshrl.u32 %v2878_v25, 16 }
  0x83   : > { %v1867_v37 = vor.u32 %v1866_v15, %v1862_v45  ;;  %v1872_v51 = vrot.slane %v1870_v22, 5  ;;  %v1878_v60 = vshll.u32 %v2878_v25, 16  ;;  %v1884_v1 = vshll.u32 %v2879_v39, 16 }
  0x84   : > { %v1849_v50 = vsel %vm3499_vm3, %v1844_v28, %v1848_v13  ;;  %v1858_v48 = vrot.slane %v1857_v35, 4  ;;  %v1877_v27 = vrot.slane %v1875_v4, 4  ;;  %v1888_v32 = vshrl.u32 %v2879_v39, 16  ;;  %v2887_v35 = vld [vmem:[%s3460_s29 + $0xa8] sm:$0xf] }
  0x85   : > { %v2904_v24 = vcombine.low %v1839_v44, %v1849_v50  ;;  %v1868_v40 = vrot.slane %v1867_v37, 4  ;;  %v1880_v0 = vrot.slane %v1878_v60, 5  ;;  %v1886_v38 = vrot.slane %v1884_v1, 5  ;;  %v2888_v50 = vld [vmem:[%s3460_s29 + $0xac] sm:$0xf] }
  0x86   : > { %v1863_v6 = vsel %vm3499_vm3, %v1858_v48, %v1862_v45  ;;  %v1890_v53 = vrot.slane %v1888_v32, 4  ;;  %v1894_v56 = vshll.u32 %v2880_v33, 16  ;;  %v2756_v7 = vcombine.low %v3615_v54, %v3624_v59  ;;  %v2886_v45 = vld [vmem:[%s3460_s29 + $0xa4] sm:$0x1] }
  0x87   : > { %3198 = vmatprep.mubr.msk.bf16.mxu0 %vm702_vm2, %v2904_v24  ;;  %v1873_v2 = vsel %vm3499_vm3, %v1868_v40, %v1872_v51  ;;  %v1881_v10 = vor.u32 %v1880_v0, %v1877_v27  ;;  %v1899_v19 = vshrl.u32 %v2881_v18, 16  ;;  %v1902_v52 = vshll.u32 %v2881_v18, 16 }
  0x88   : > { %v2905_v11 = vcombine.low %v1863_v6, %v1873_v2  ;;  %3123 = vmatmul.mubr.msk.bf16.gmra.mrb[12].mxu1 %vm702_vm2, %v2755_v20  ;;  %v1891_v62 = vor.u32 %v1890_v53, %v1886_v38  ;;  %v1896_v13 = vrot.slane %v1894_v56, 5  ;;  %v1908_v17 = vshll.u32 %v2882_v47, 16  ;;  %v2890_v2 = vld [vmem:[%s3460_s29 + $0xb4] sm:$0xf] }
  0x89   : > { %v1882_v21 = vrot.slane %v1881_v10, 4  ;;  %3126 = vmatprep.mubr.msk.bf16.mxu1 %vm702_vm2, %v2756_v7  ;;  %v1901_v54 = vrot.slane %v1899_v19, 4  ;;  %v1904_v59 = vrot.slane %v1902_v52, 5  ;;  %v1912_v16 = vshrl.u32 %v2882_v47, 16  ;;  %v2891_v19 = vld [vmem:[%s3460_s29 + $0xb8] sm:$0xf] }
  0x8a   : > { %3199 = vmatmul.mubr.msk.bf16.gmra.mrb[16].mxu0 %vm702_vm2, %v2905_v11  ;;  %v1892_v14 = vrot.slane %v1891_v62, 4  ;;  %v1910_v25 = vrot.slane %v1908_v17, 5  ;;  %v1918_v31 = vshll.u32 %v2883_v9, 16  ;;  %v2757_v42 = vcombine.low %v3639_v30, %v3643_v41 }
  0x8b   : > { %v1887_v5 = vsel %vm3499_vm3, %v1882_v21, %v1886_v38  ;;  %v1905_v12 = vor.u32 %v1904_v59, %v1901_v54  ;;  %v1914_v39 = vrot.slane %v1912_v16, 4  ;;  %v1923_v15 = vshrl.u32 %v2884_v46, 16  ;;  %v2889_v38 = vld [vmem:[%s3460_s29 + $0xb0] sm:$0x1] }
  0x8c   : > { %v1897_v22 = vsel %vm3499_vm3, %v1892_v14, %v1896_v13  ;;  %v1920_v20 = vrot.slane %v1918_v31, 5  ;;  %v1926_v44 = vshll.u32 %v2884_v46, 16  ;;  %v1932_v28 = vshll.u32 %v2885_v23, 16 }
  0x8d   : > { %v2906_v4 = vcombine.low %v1887_v5, %v1897_v22  ;;  %v1906_v37 = vrot.slane %v1905_v12, 4  ;;  %v1915_v51 = vor.u32 %v1914_v39, %v1910_v25  ;;  %v1925_v30 = vrot.slane %v1923_v15, 4  ;;  %v2894_v22 = vld [vmem:[%s3460_s29 + $0xc4] sm:$0xf] }
  0x8e   : > { %v1928_v41 = vrot.slane %v1926_v44, 5  ;;  %v1934_v33 = vrot.slane %v1932_v28, 5  ;;  %v1936_v60 = vshrl.u32 %v2885_v23, 16  ;;  %v1942_v1 = vshll.u32 %v2886_v45, 16  ;;  %v2892_v23 = vld [vmem:[%s3460_s29 + $0xbc] sm:$0x1] }
  0x8f   : > { %3202 = vmatprep.mubr.msk.bf16.mxu0 %vm702_vm2, %v2906_v4  ;;  %v1911_v48 = vsel %vm3499_vm3, %v1906_v37, %v1910_v25  ;;  %v1916_v27 = vrot.slane %v1915_v51, 4  ;;  %v2758_v32 = vcombine.low %v3656_v58, %v3659_v61  ;;  %v1947_v18 = vshrl.u32 %v2887_v35, 16  ;;  %v2895_v51 = vld [vmem:[%s3460_s29 + $0xc8] sm:$0x1] }
  0x90   : > { %3127 = vmatmul.mubr.msk.bf16.gmra.mrb[16].mxu1 %vm702_vm2, %v2757_v42  ;;  %v1929_v24 = vor.u32 %v1928_v41, %v1925_v30  ;;  %v1938_v40 = vrot.slane %v1936_v60, 4  ;;  %v1944_v0 = vrot.slane %v1942_v1, 5  ;;  %v1950_v47 = vshll.u32 %v2887_v35, 16 }
  0x91   : > { %v1921_v6 = vsel %vm3499_vm3, %v1916_v27, %v1920_v20  ;;  %3130 = vmatprep.mubr.msk.bf16.mxu1 %vm702_vm2, %v2758_v32  ;;  %v1949_v53 = vrot.slane %v1947_v18, 4  ;;  %v1956_v56 = vshll.u32 %v2888_v50, 16  ;;  %v1960_v7 = vshrl.u32 %v2888_v50, 16 }
  0x92   : > { %v2907_v10 = vcombine.low %v1911_v48, %v1921_v6  ;;  %v1930_v58 = vrot.slane %v1929_v24, 4  ;;  %v1939_v61 = vor.u32 %v1938_v40, %v1934_v33  ;;  %v1952_v9 = vrot.slane %v1950_v47, 5 }
  0x93   : > { %v1958_v52 = vrot.slane %v1956_v56, 5  ;;  %v1962_v11 = vrot.slane %v1960_v7, 4  ;;  %v1966_v62 = vshll.u32 %v2889_v38, 16  ;;  %v2759_v13 = vcombine.low %v3675_v26, %v3679_v36  ;;  %v2893_v36 = vld [vmem:[%s3460_s29 + $0xc0] sm:$0xf] }
  0x94   : > { %3203 = vmatmul.mubr.msk.bf16.gmra.mrb[20].mxu0 %vm702_vm2, %v2907_v10  ;;  %v1935_v17 = vsel %vm3499_vm3, %v1930_v58, %v1934_v33  ;;  %v1940_v46 = vrot.slane %v1939_v61, 4  ;;  %v1953_v21 = vor.u32 %v1952_v9, %v1949_v53  ;;  %v1971_v54 = vshrl.u32 %v2890_v2, 16 }
  0x95   : > { %v1963_v59 = vor.u32 %v1962_v11, %v1958_v52  ;;  %v1968_v16 = vrot.slane %v1966_v62, 5  ;;  %v1974_v14 = vshll.u32 %v2890_v2, 16  ;;  %v1980_v25 = vshll.u32 %v2891_v19, 16 }
  0x96   : > { %v1945_v31 = vsel %vm3499_vm3, %v1940_v46, %v1944_v0  ;;  %v1954_v42 = vrot.slane %v1953_v21, 4  ;;  %v1973_v5 = vrot.slane %v1971_v54, 4  ;;  %v1984_v26 = vshrl.u32 %v2891_v19, 16 }
  0x97   : > { %v2908_v12 = vcombine.low %v1935_v17, %v1945_v31  ;;  %v1964_v39 = vrot.slane %v1963_v59, 4  ;;  %v1976_v45 = vrot.slane %v1974_v14, 5  ;;  %v1982_v15 = vrot.slane %v1980_v25, 5 }
  0x98   : > { %v1959_v20 = vsel %vm3499_vm3, %v1954_v42, %v1958_v52  ;;  %3131 = vmatmul.mubr.msk.bf16.gmra.mrb[20].mxu1 %vm702_vm2, %v2759_v13  ;;  %v1986_v44 = vrot.slane %v1984_v26, 4  ;;  %v1990_v28 = vshll.u32 %v2892_v23, 16  ;;  %v2760_v35 = vcombine.low %v3690_v57, %v3697_v3 }
  0x99   : > { %3206 = vmatprep.mubr.msk.bf16.mxu0 %vm702_vm2, %v2908_v12  ;;  %v1969_v4 = vsel %vm3499_vm3, %v1964_v39, %v1968_v16  ;;  %v1977_v37 = vor.u32 %v1976_v45, %v1973_v5  ;;  %v1995_v30 = vshrl.u32 %v2893_v36, 16  ;;  %v1998_v41 = vshll.u32 %v2893_v36, 16 }
  0x9a   : > { %v2909_v33 = vcombine.low %v1959_v20, %v1969_v4  ;;  %v1987_v60 = vor.u32 %v1986_v44, %v1982_v15  ;;  %v1992_v1 = vrot.slane %v1990_v28, 5  ;;  %3134 = vmatprep.mubr.msk.bf16.mxu1 %vm702_vm2, %v2760_v35  ;;  %v2004_v50 = vshll.u32 %v2894_v22, 16 }
  0x9b   : > { %v1978_v48 = vrot.slane %v1977_v37, 4  ;;  %v1997_v27 = vrot.slane %v1995_v30, 4  ;;  %v2000_v32 = vrot.slane %v1998_v41, 5  ;;  %v2008_v18 = vshrl.u32 %v2894_v22, 16 }
  0x9c   : > { %3207 = vmatmul.mubr.msk.bf16.gmra.mrb[24].mxu0 %vm702_vm2, %v2909_v33  ;;  %v1988_v57 = vrot.slane %v1987_v60, 4  ;;  %v2006_v3 = vrot.slane %v2004_v50, 5  ;;  %v2014_v24 = vshll.u32 %v2895_v51, 16  ;;  %v2761_v40 = vcombine.low %v3710_v29, %v3714_v43 }
  0x9d   : > { %v1983_v0 = vsel %vm3499_vm3, %v1978_v48, %v1982_v15  ;;  %v2001_v38 = vor.u32 %v2000_v32, %v1997_v27  ;;  %v2010_v47 = vrot.slane %v2008_v18, 4  ;;  %v2762_v6 = vcombine.low %v3735_v49, %v3740_v55 }
  0x9e   : > { %v1993_v53 = vsel %vm3499_vm3, %v1988_v57, %v1992_v1  ;;  %v2016_v10 = vrot.slane %v2014_v24, 5  ;;  %v2763_v58 = vcombine.low %v3759_v63, %v3764_v8 }
  0x9f   : > { %v2910_v56 = vcombine.low %v1983_v0, %v1993_v53  ;;  %v2002_v7 = vrot.slane %v2001_v38, 4  ;;  %v2011_v2 = vor.u32 %v2010_v47, %v2006_v3 }
  0xa0   : > { %3135 = vmatmul.mubr.msk.bf16.gmra.mrb[24].mxu1 %vm702_vm2, %v2761_v40 }
  0xa1   : > { %3210 = vmatprep.mubr.msk.bf16.mxu0 %vm702_vm2, %v2910_v56  ;;  %v2007_v29 = vsel %vm3499_vm3, %v2002_v7, %v2006_v3  ;;  %v2012_v43 = vrot.slane %v2011_v2, 4  ;;  %3138 = vmatprep.mubr.msk.bf16.mxu1 %vm702_vm2, %v2762_v6 }
  0xa3   : > { %v2017_v49 = vsel %vm3499_vm3, %v2012_v43, %v2016_v10 }
  0xa4   : > { %v2911_v55 = vcombine.low %v2007_v29, %v2017_v49 }
  0xa6   : > { %3211 = vmatmul.mubr.msk.bf16.gmra.mrb[28].mxu0 %vm702_vm2, %v2911_v55 }
  0xa8   : > { %3139 = vmatmul.mubr.msk.bf16.gmra.mrb[28].mxu1 %vm702_vm2, %v2763_v58 }
 0x136   : > { %v3184_v61 = vpop.f32.mrb[0].mxu0 }
 0x137   : > { %v2164_v9 = vpop.f32.mrb[1].mxu0 }
 0x138   : > { %v3185_v19 = vpop.f32.mrb[2].mxu0 }
 0x139   : > { %v2167_v52 = vpop.f32.mrb[3].mxu0 }
 0x143   : > { %v3188_v11 = vpop.f32.mrb[4].mxu0  ;;  %v3112_v62 = vpop.f32.mrb[0].mxu1 }
 0x144   : > { %v3214_v13 = vadd.f32 %v3184_v61, %v3112_v62  ;;  %v2180_v17 = vpop.f32.mrb[5].mxu0  ;;  %v1086_v46 = vpop.f32.mrb[1].mxu1 }
 0x145   : > { %v3215_v63 = vadd.f32 %v2164_v9, %v1086_v46  ;;  %v3189_v8 = vpop.f32.mrb[6].mxu0  ;;  %v3113_v21 = vpop.f32.mrb[2].mxu1 }
 0x146   : > { %v2332_v54 = vadd.f32 %v3214_v13, %v3952_v34  ;;  %v3216_v59 = vadd.f32 %v3185_v19, %v3113_v21  ;;  %v2183_v16 = vpop.f32.mrb[7].mxu0  ;;  %v1089_v23 = vpop.f32.mrb[3].mxu1 }
 0x147   : > { %v2330_v14 = vadd.f32 %v3215_v63, %v3952_v34  ;;  %v3217_v25 = vadd.f32 %v2167_v52, %v1089_v23 }
 0x148   : > { %vm2364_vm4 = vcmp.ge.f32.partialorder %v2332_v54, 0.0  ;;  %v2396_v31 = vmul.f32 0.2, %v2332_v54  ;;  %v2333_v42 = vadd.f32 %v3216_v59, %v3952_v34 }
 0x149   : > { %vm2362_vm5 = vcmp.ge.f32.partialorder %v2330_v14, 0.0  ;;  %v2394_v5 = vmul.f32 0.2, %v2330_v14  ;;  %v2331_v26 = vadd.f32 %v3217_v25, %v3952_v34 }
 0x14a   : > { %v2428_v36 = vsel %vm2364_vm4, %v2332_v54, %v2396_v31  ;;  %vm2365_vm7 = vcmp.ge.f32.partialorder %v2333_v42, 0.0  ;;  %v2397_v12 = vmul.f32 0.2, %v2333_v42 }
 0x14b   : > { %v2968_v39 = vpack.c.bf16 %v2428_v36, %v2428_v36  ;;  %v2426_v45 = vsel %vm2362_vm5, %v2330_v14, %v2394_v5  ;;  %vm2363_vm8 = vcmp.ge.f32.partialorder %v2331_v26, 0.0  ;;  %v2395_v15 = vmul.f32 0.2, %v2331_v26  ;;  %v3192_v22 = vpop.f32.mrb[8].mxu0  ;;  %v3116_v20 = vpop.f32.mrb[4].mxu1 }
 0x14c   : > { %v2966_v44 = vpack.c.bf16 %v2426_v45, %v2426_v45  ;;  %v2429_v28 = vsel %vm2365_vm7, %v2333_v42, %v2397_v12  ;;  %v3218_v35 = vadd.f32 %v3188_v11, %v3116_v20  ;;  %v2196_v4 = vpop.f32.mrb[9].mxu0  ;;  %v1102_v37 = vpop.f32.mrb[5].mxu1 }
 0x14d   : > { %2589 = vst.msk [vmem:[%s3962_s18 + $0x8] sm:$0xf] %vm2586_vm6, %v2968_v39  ;;  %v2969_v51 = vpack.c.bf16 %v2429_v28, %v2429_v28  ;;  %v2427_v30 = vsel %vm2363_vm8, %v2331_v26, %v2395_v15  ;;  %v3219_v41 = vadd.f32 %v2180_v17, %v1102_v37  ;;  %v3193_v33 = vpop.f32.mrb[10].mxu0  ;;  %v3117_v60 = vpop.f32.mrb[6].mxu1 }
 0x14e   : > { %2587 = vst.msk [vmem:[%s3962_s18] sm:$0xf] %vm2586_vm6, %v2966_v44  ;;  %v2967_v1 = vpack.c.bf16 %v2427_v30, %v2427_v30  ;;  %v2336_v50 = vadd.f32 %v3218_v35, %v3952_v34  ;;  %v3220_v48 = vadd.f32 %v3189_v8, %v3117_v60  ;;  %v2199_v27 = vpop.f32.mrb[11].mxu0  ;;  %v1105_v32 = vpop.f32.mrb[7].mxu1 }
 0x14f   : > { %2590 = vst.msk [vmem:[%s3962_s18 + $0xc] sm:$0xf] %vm2586_vm6, %v2969_v51  ;;  %v2334_v18 = vadd.f32 %v3219_v41, %v3952_v34  ;;  %v3221_v57 = vadd.f32 %v2183_v16, %v1105_v32 }
 0x150   : > { %2588 = vst.msk [vmem:[%s3962_s18 + $0x4] sm:$0xf] %vm2586_vm6, %v2967_v1  ;;  %vm2368_vm9 = vcmp.ge.f32.partialorder %v2336_v50, 0.0  ;;  %v2400_v3 = vmul.f32 0.2, %v2336_v50  ;;  %v2337_v24 = vadd.f32 %v3220_v48, %v3952_v34 }
 0x151   : > { %vm2366_vm10 = vcmp.ge.f32.partialorder %v2334_v18, 0.0  ;;  %v2398_v40 = vmul.f32 0.2, %v2334_v18  ;;  %v2335_v0 = vadd.f32 %v3221_v57, %v3952_v34 }
 0x152   : > { %v2432_v38 = vsel %vm2368_vm9, %v2336_v50, %v2400_v3  ;;  %vm2369_vm11 = vcmp.ge.f32.partialorder %v2337_v24, 0.0  ;;  %v2401_v47 = vmul.f32 0.2, %v2337_v24 }
 0x153   : > { %v2972_v6 = vpack.c.bf16 %v2432_v38, %v2432_v38  ;;  %v2430_v53 = vsel %vm2366_vm10, %v2334_v18, %v2398_v40  ;;  %vm2367_vm12 = vcmp.ge.f32.partialorder %v2335_v0, 0.0  ;;  %v2399_v56 = vmul.f32 0.2, %v2335_v0  ;;  %v3120_v7 = vpop.f32.mrb[8].mxu1 }
 0x154   : > { %v2970_v2 = vpack.c.bf16 %v2430_v53, %v2430_v53  ;;  %v2433_v10 = vsel %vm2369_vm11, %v2337_v24, %v2401_v47  ;;  %v3222_v29 = vadd.f32 %v3192_v22, %v3120_v7  ;;  %v1118_v43 = vpop.f32.mrb[9].mxu1 }
 0x155   : > { %2593 = vst.msk [vmem:[%s3962_s18 + $0x18] sm:$0xf] %vm2586_vm6, %v2972_v6  ;;  %v2973_v49 = vpack.c.bf16 %v2433_v10, %v2433_v10  ;;  %v2431_v55 = vsel %vm2367_vm12, %v2335_v0, %v2399_v56  ;;  %v3196_v58 = vpop.f32.mrb[12].mxu0  ;;  %v3223_v61 = vadd.f32 %v2196_v4, %v1118_v43  ;;  %v3121_v9 = vpop.f32.mrb[10].mxu1 }
 0x156   : > { %2591 = vst.msk [vmem:[%s3962_s18 + $0x10] sm:$0xf] %vm2586_vm6, %v2970_v2  ;;  %v2971_v19 = vpack.c.bf16 %v2431_v55, %v2431_v55  ;;  %v2340_v52 = vadd.f32 %v3222_v29, %v3952_v34  ;;  %v2212_v11 = vpop.f32.mrb[13].mxu0  ;;  %v3224_v62 = vadd.f32 %v3193_v33, %v3121_v9  ;;  %v1121_v13 = vpop.f32.mrb[11].mxu1 }
 0x157   : > { %2594 = vst.msk [vmem:[%s3962_s18 + $0x1c] sm:$0xf] %vm2586_vm6, %v2973_v49  ;;  %v2338_v17 = vadd.f32 %v3223_v61, %v3952_v34  ;;  %v3197_v46 = vpop.f32.mrb[14].mxu0  ;;  %v3225_v63 = vadd.f32 %v2199_v27, %v1121_v13 }
 0x158   : > { %2592 = vst.msk [vmem:[%s3962_s18 + $0x14] sm:$0xf] %vm2586_vm6, %v2971_v19  ;;  %vm2372_vm13 = vcmp.ge.f32.partialorder %v2340_v52, 0.0  ;;  %v2404_v8 = vmul.f32 0.2, %v2340_v52  ;;  %v2341_v21 = vadd.f32 %v3224_v62, %v3952_v34  ;;  %v2215_v54 = vpop.f32.mrb[15].mxu0 }
 0x159   : > { %vm2370_vm14 = vcmp.ge.f32.partialorder %v2338_v17, 0.0  ;;  %v2402_v59 = vmul.f32 0.2, %v2338_v17  ;;  %v2339_v16 = vadd.f32 %v3225_v63, %v3952_v34 }
 0x15a   : > { %v2436_v23 = vsel %vm2372_vm13, %v2340_v52, %v2404_v8  ;;  %vm2373_vm15 = vcmp.ge.f32.partialorder %v2341_v21, 0.0  ;;  %v2405_v14 = vmul.f32 0.2, %v2341_v21 }
 0x15b   : > { %v2976_v25 = vpack.c.bf16 %v2436_v23, %v2436_v23  ;;  %v2434_v31 = vsel %vm2370_vm14, %v2338_v17, %v2402_v59  ;;  %vm2371_vm0 = vcmp.ge.f32.partialorder %v2339_v16, 0.0  ;;  %v2403_v42 = vmul.f32 0.2, %v2339_v16  ;;  %v3124_v5 = vpop.f32.mrb[12].mxu1 }
 0x15c   : > { %v2974_v26 = vpack.c.bf16 %v2434_v31, %v2434_v31  ;;  %v2437_v36 = vsel %vm2373_vm15, %v2341_v21, %v2405_v14  ;;  %v3226_v12 = vadd.f32 %v3196_v58, %v3124_v5  ;;  %v1134_v39 = vpop.f32.mrb[13].mxu1 }
 0x15d   : > { %2597 = vst.msk [vmem:[%s3962_s18 + $0x28] sm:$0xf] %vm2586_vm6, %v2976_v25  ;;  %v2977_v45 = vpack.c.bf16 %v2437_v36, %v2437_v36  ;;  %v2435_v15 = vsel %vm2371_vm0, %v2339_v16, %v2403_v42  ;;  %v3200_v22 = vpop.f32.mrb[16].mxu0  ;;  %v3227_v20 = vadd.f32 %v2212_v11, %v1134_v39  ;;  %v3125_v44 = vpop.f32.mrb[14].mxu1 }
 0x15e   : > { %2595 = vst.msk [vmem:[%s3962_s18 + $0x20] sm:$0xf] %vm2586_vm6, %v2974_v26  ;;  %v2975_v28 = vpack.c.bf16 %v2435_v15, %v2435_v15  ;;  %v2344_v35 = vadd.f32 %v3226_v12, %v3952_v34  ;;  %v2228_v4 = vpop.f32.mrb[17].mxu0  ;;  %v3228_v37 = vadd.f32 %v3197_v46, %v3125_v44  ;;  %v1137_v51 = vpop.f32.mrb[15].mxu1 }
 0x15f   : > { %2598 = vst.msk [vmem:[%s3962_s18 + $0x2c] sm:$0xf] %vm2586_vm6, %v2977_v45  ;;  %v2342_v30 = vadd.f32 %v3227_v20, %v3952_v34  ;;  %v3201_v41 = vpop.f32.mrb[18].mxu0  ;;  %v3229_v33 = vadd.f32 %v2215_v54, %v1137_v51 }
 0x160   : > { %2596 = vst.msk [vmem:[%s3962_s18 + $0x24] sm:$0xf] %vm2586_vm6, %v2975_v28  ;;  %vm2376_vm1 = vcmp.ge.f32.partialorder %v2344_v35, 0.0  ;;  %v2408_v60 = vmul.f32 0.2, %v2344_v35  ;;  %v2345_v1 = vadd.f32 %v3228_v37, %v3952_v34  ;;  %v2231_v50 = vpop.f32.mrb[19].mxu0 }
 0x161   : > { %vm2374_vm2 = vcmp.ge.f32.partialorder %v2342_v30, 0.0  ;;  %v2406_v48 = vmul.f32 0.2, %v2342_v30  ;;  %v2343_v27 = vadd.f32 %v3229_v33, %v3952_v34 }
 0x162   : > { %v2440_v32 = vsel %vm2376_vm1, %v2344_v35, %v2408_v60  ;;  %vm2377_vm3 = vcmp.ge.f32.partialorder %v2345_v1, 0.0  ;;  %v2409_v18 = vmul.f32 0.2, %v2345_v1 }
 0x163   : > { %v2980_v57 = vpack.c.bf16 %v2440_v32, %v2440_v32  ;;  %v2438_v3 = vsel %vm2374_vm2, %v2342_v30, %v2406_v48  ;;  %vm2375_vm4 = vcmp.ge.f32.partialorder %v2343_v27, 0.0  ;;  %v2407_v24 = vmul.f32 0.2, %v2343_v27  ;;  %v3128_v40 = vpop.f32.mrb[16].mxu1 }
 0x164   : > { %v2978_v0 = vpack.c.bf16 %v2438_v3, %v2438_v3  ;;  %v2441_v38 = vsel %vm2377_vm3, %v2345_v1, %v2409_v18  ;;  %v3230_v47 = vadd.f32 %v3200_v22, %v3128_v40  ;;  %v1150_v6 = vpop.f32.mrb[17].mxu1 }
 0x165   : > { %2601 = vst.msk [vmem:[%s3962_s18 + $0x38] sm:$0xf] %vm2586_vm6, %v2980_v57  ;;  %v2981_v53 = vpack.c.bf16 %v2441_v38, %v2441_v38  ;;  %v2439_v56 = vsel %vm2375_vm4, %v2343_v27, %v2407_v24  ;;  %v3231_v7 = vadd.f32 %v2228_v4, %v1150_v6  ;;  %v3129_v2 = vpop.f32.mrb[18].mxu1 }
 0x166   : > { %2599 = vst.msk [vmem:[%s3962_s18 + $0x30] sm:$0xf] %vm2586_vm6, %v2978_v0  ;;  %v2979_v10 = vpack.c.bf16 %v2439_v56, %v2439_v56  ;;  %v2348_v29 = vadd.f32 %v3230_v47, %v3952_v34  ;;  %v3232_v43 = vadd.f32 %v3201_v41, %v3129_v2  ;;  %v1153_v49 = vpop.f32.mrb[19].mxu1 }
 0x167   : > { %2602 = vst.msk [vmem:[%s3962_s18 + $0x3c] sm:$0xf] %vm2586_vm6, %v2981_v53  ;;  %v3204_v55 = vpop.f32.mrb[20].mxu0  ;;  %v2346_v58 = vadd.f32 %v3231_v7, %v3952_v34  ;;  %v3233_v61 = vadd.f32 %v2231_v50, %v1153_v49 }
 0x168   : > { %2600 = vst.msk [vmem:[%s3962_s18 + $0x34] sm:$0xf] %vm2586_vm6, %v2979_v10  ;;  %vm2380_vm5 = vcmp.ge.f32.partialorder %v2348_v29, 0.0  ;;  %v2412_v9 = vmul.f32 0.2, %v2348_v29  ;;  %v2244_v19 = vpop.f32.mrb[21].mxu0  ;;  %v2349_v52 = vadd.f32 %v3232_v43, %v3952_v34 }
 0x169   : > { %vm2378_vm7 = vcmp.ge.f32.partialorder %v2346_v58, 0.0  ;;  %v2410_v11 = vmul.f32 0.2, %v2346_v58  ;;  %v3205_v62 = vpop.f32.mrb[22].mxu0  ;;  %v2347_v13 = vadd.f32 %v3233_v61, %v3952_v34 }
 0x16a   : > { %v2444_v17 = vsel %vm2380_vm5, %v2348_v29, %v2412_v9  ;;  %vm2381_vm8 = vcmp.ge.f32.partialorder %v2349_v52, 0.0  ;;  %v2413_v46 = vmul.f32 0.2, %v2349_v52  ;;  %v2247_v63 = vpop.f32.mrb[23].mxu0 }
 0x16b   : > { %v2984_v8 = vpack.c.bf16 %v2444_v17, %v2444_v17  ;;  %v2442_v21 = vsel %vm2378_vm7, %v2346_v58, %v2410_v11  ;;  %vm2379_vm9 = vcmp.ge.f32.partialorder %v2347_v13, 0.0  ;;  %v2411_v54 = vmul.f32 0.2, %v2347_v13  ;;  %v3132_v59 = vpop.f32.mrb[20].mxu1 }
 0x16c   : > { %v2982_v16 = vpack.c.bf16 %v2442_v21, %v2442_v21  ;;  %v2445_v23 = vsel %vm2381_vm8, %v2349_v52, %v2413_v46  ;;  %v3234_v14 = vadd.f32 %v3204_v55, %v3132_v59  ;;  %v1166_v25 = vpop.f32.mrb[21].mxu1 }
 0x16d   : > { %2605 = vst.msk [vmem:[%s3962_s18 + $0x48] sm:$0xf] %vm2586_vm6, %v2984_v8  ;;  %v2985_v31 = vpack.c.bf16 %v2445_v23, %v2445_v23  ;;  %v2443_v42 = vsel %vm2379_vm9, %v2347_v13, %v2411_v54  ;;  %v3235_v5 = vadd.f32 %v2244_v19, %v1166_v25  ;;  %v3133_v26 = vpop.f32.mrb[22].mxu1 }
 0x16e   : > { %2603 = vst.msk [vmem:[%s3962_s18 + $0x40] sm:$0xf] %vm2586_vm6, %v2982_v16  ;;  %v2983_v36 = vpack.c.bf16 %v2443_v42, %v2443_v42  ;;  %v2352_v12 = vadd.f32 %v3234_v14, %v3952_v34  ;;  %v3236_v39 = vadd.f32 %v3205_v62, %v3133_v26  ;;  %v1169_v45 = vpop.f32.mrb[23].mxu1 }
 0x16f   : > { %2606 = vst.msk [vmem:[%s3962_s18 + $0x4c] sm:$0xf] %vm2586_vm6, %v2985_v31  ;;  %v3208_v15 = vpop.f32.mrb[24].mxu0  ;;  %v2350_v22 = vadd.f32 %v3235_v5, %v3952_v34  ;;  %v3237_v20 = vadd.f32 %v2247_v63, %v1169_v45 }
 0x170   : > { %2604 = vst.msk [vmem:[%s3962_s18 + $0x44] sm:$0xf] %vm2586_vm6, %v2983_v36  ;;  %vm2384_vm10 = vcmp.ge.f32.partialorder %v2352_v12, 0.0  ;;  %v2416_v44 = vmul.f32 0.2, %v2352_v12  ;;  %v2260_v28 = vpop.f32.mrb[25].mxu0  ;;  %v2353_v35 = vadd.f32 %v3236_v39, %v3952_v34 }
 0x171   : > { %vm2382_vm11 = vcmp.ge.f32.partialorder %v2350_v22, 0.0  ;;  %v2414_v4 = vmul.f32 0.2, %v2350_v22  ;;  %v3209_v37 = vpop.f32.mrb[26].mxu0  ;;  %v2351_v51 = vadd.f32 %v3237_v20, %v3952_v34 }
 0x172   : > { %v2448_v30 = vsel %vm2384_vm10, %v2352_v12, %v2416_v44  ;;  %vm2385_vm12 = vcmp.ge.f32.partialorder %v2353_v35, 0.0  ;;  %v2417_v41 = vmul.f32 0.2, %v2353_v35  ;;  %v2263_v33 = vpop.f32.mrb[27].mxu0 }
 0x173   : > { %v2988_v60 = vpack.c.bf16 %v2448_v30, %v2448_v30  ;;  %v2446_v1 = vsel %vm2382_vm11, %v2350_v22, %v2414_v4  ;;  %vm2383_vm13 = vcmp.ge.f32.partialorder %v2351_v51, 0.0  ;;  %v2415_v50 = vmul.f32 0.2, %v2351_v51  ;;  %v3136_v48 = vpop.f32.mrb[24].mxu1 }
 0x174   : > { %v2986_v27 = vpack.c.bf16 %v2446_v1, %v2446_v1  ;;  %v2449_v32 = vsel %vm2385_vm12, %v2353_v35, %v2417_v41  ;;  %v3238_v18 = vadd.f32 %v3208_v15, %v3136_v48  ;;  %v1182_v57 = vpop.f32.mrb[25].mxu1 }
 0x175   : > { %2609 = vst.msk [vmem:[%s3962_s18 + $0x58] sm:$0xf] %vm2586_vm6, %v2988_v60  ;;  %v2989_v3 = vpack.c.bf16 %v2449_v32, %v2449_v32  ;;  %v2447_v24 = vsel %vm2383_vm13, %v2351_v51, %v2415_v50  ;;  %v3239_v40 = vadd.f32 %v2260_v28, %v1182_v57  ;;  %v3137_v0 = vpop.f32.mrb[26].mxu1 }
 0x176   : > { %2607 = vst.msk [vmem:[%s3962_s18 + $0x50] sm:$0xf] %vm2586_vm6, %v2986_v27  ;;  %v2987_v38 = vpack.c.bf16 %v2447_v24, %v2447_v24  ;;  %v2356_v47 = vadd.f32 %v3238_v18, %v3952_v34  ;;  %v3240_v6 = vadd.f32 %v3209_v37, %v3137_v0  ;;  %v1185_v53 = vpop.f32.mrb[27].mxu1 }
 0x177   : > { %2610 = vst.msk [vmem:[%s3962_s18 + $0x5c] sm:$0xf] %vm2586_vm6, %v2989_v3  ;;  %v2354_v56 = vadd.f32 %v3239_v40, %v3952_v34  ;;  %v3241_v7 = vadd.f32 %v2263_v33, %v1185_v53 }
 0x178   : > { %2608 = vst.msk [vmem:[%s3962_s18 + $0x54] sm:$0xf] %vm2586_vm6, %v2987_v38  ;;  %vm2388_vm14 = vcmp.ge.f32.partialorder %v2356_v47, 0.0  ;;  %v2420_v2 = vmul.f32 0.2, %v2356_v47  ;;  %v2357_v10 = vadd.f32 %v3240_v6, %v3952_v34 }
 0x179   : > { %v3212_v29 = vpop.f32.mrb[28].mxu0  ;;  %vm2386_vm15 = vcmp.ge.f32.partialorder %v2354_v56, 0.0  ;;  %v2418_v43 = vmul.f32 0.2, %v2354_v56  ;;  %v2355_v49 = vadd.f32 %v3241_v7, %v3952_v34 }
 0x17a   : > { %v2452_v55 = vsel %vm2388_vm14, %v2356_v47, %v2420_v2  ;;  %v2276_v58 = vpop.f32.mrb[29].mxu0  ;;  %vm2389_vm0 = vcmp.ge.f32.partialorder %v2357_v10, 0.0  ;;  %v2421_v61 = vmul.f32 0.2, %v2357_v10 }
 0x17b   : > { %v2992_v9 = vpack.c.bf16 %v2452_v55, %v2452_v55  ;;  %v2450_v19 = vsel %vm2386_vm15, %v2354_v56, %v2418_v43  ;;  %v3213_v52 = vpop.f32.mrb[30].mxu0  ;;  %vm2387_vm1 = vcmp.ge.f32.partialorder %v2355_v49, 0.0  ;;  %v2419_v11 = vmul.f32 0.2, %v2355_v49  ;;  %v3140_v62 = vpop.f32.mrb[28].mxu1 }
 0x17c   : > { %v2990_v13 = vpack.c.bf16 %v2450_v19, %v2450_v19  ;;  %v2453_v17 = vsel %vm2389_vm0, %v2357_v10, %v2421_v61  ;;  %v2279_v46 = vpop.f32.mrb[31].mxu0  ;;  %v3242_v63 = vadd.f32 %v3212_v29, %v3140_v62  ;;  %v1198_v8 = vpop.f32.mrb[29].mxu1 }
 0x17d   : > { %2613 = vst.msk [vmem:[%s3962_s18 + $0x68] sm:$0xf] %vm2586_vm6, %v2992_v9  ;;  %v2993_v21 = vpack.c.bf16 %v2453_v17, %v2453_v17  ;;  %v2451_v54 = vsel %vm2387_vm1, %v2355_v49, %v2419_v11  ;;  %v3243_v59 = vadd.f32 %v2276_v58, %v1198_v8  ;;  %v3141_v16 = vpop.f32.mrb[30].mxu1 }
 0x17e   : > { %2611 = vst.msk [vmem:[%s3962_s18 + $0x60] sm:$0xf] %vm2586_vm6, %v2990_v13  ;;  %v2991_v23 = vpack.c.bf16 %v2451_v54, %v2451_v54  ;;  %v2360_v14 = vadd.f32 %v3242_v63, %v3952_v34  ;;  %v3244_v25 = vadd.f32 %v3213_v52, %v3141_v16  ;;  %v1201_v31 = vpop.f32.mrb[31].mxu1 }
 0x17f   : > { %2614 = vst.msk [vmem:[%s3962_s18 + $0x6c] sm:$0xf] %vm2586_vm6, %v2993_v21  ;;  %v2358_v42 = vadd.f32 %v3243_v59, %v3952_v34  ;;  %v3245_v5 = vadd.f32 %v2279_v46, %v1201_v31 }
 0x180   : > { %2612 = vst.msk [vmem:[%s3962_s18 + $0x64] sm:$0xf] %vm2586_vm6, %v2991_v23  ;;  %vm2392_vm2 = vcmp.ge.f32.partialorder %v2360_v14, 0.0  ;;  %v2424_v26 = vmul.f32 0.2, %v2360_v14  ;;  %v2361_v36 = vadd.f32 %v3244_v25, %v3952_v34 }
 0x181   : > { %vm2390_vm3 = vcmp.ge.f32.partialorder %v2358_v42, 0.0  ;;  %v2422_v12 = vmul.f32 0.2, %v2358_v42  ;;  %v2359_v39 = vadd.f32 %v3245_v5, %v3952_v34 }
 0x182   : > { %v2456_v45 = vsel %vm2392_vm2, %v2360_v14, %v2424_v26  ;;  %vm2393_vm4 = vcmp.ge.f32.partialorder %v2361_v36, 0.0  ;;  %v2425_v15 = vmul.f32 0.2, %v2361_v36 }
 0x183   : > { %v2996_v22 = vpack.c.bf16 %v2456_v45, %v2456_v45  ;;  %v2454_v20 = vsel %vm2390_vm3, %v2358_v42, %v2422_v12  ;;  %vm2391_vm5 = vcmp.ge.f32.partialorder %v2359_v39, 0.0  ;;  %v2423_v44 = vmul.f32 0.2, %v2359_v39 }
 0x184   : > { %v2994_v28 = vpack.c.bf16 %v2454_v20, %v2454_v20  ;;  %v2457_v35 = vsel %vm2393_vm4, %v2361_v36, %v2425_v15 }
 0x185   : > { %2617 = vst.msk [vmem:[%s3962_s18 + $0x78] sm:$0xf] %vm2586_vm6, %v2996_v22  ;;  %v2997_v4 = vpack.c.bf16 %v2457_v35, %v2457_v35  ;;  %v2455_v37 = vsel %vm2391_vm5, %v2359_v39, %v2423_v44 }
 0x186   : > { %2615 = vst.msk [vmem:[%s3962_s18 + $0x70] sm:$0xf] %vm2586_vm6, %v2994_v28  ;;  %v2995_v51 = vpack.c.bf16 %v2455_v37, %v2455_v37 }
 0x187   : > { %2618 = vst.msk [vmem:[%s3962_s18 + $0x7c] sm:$0xf] %vm2586_vm6, %v2997_v4 }
 0x188   : > { %2616 = vst.msk [vmem:[%s3962_s18 + $0x74] sm:$0xf] %vm2586_vm6, %v2995_v51 }
 0x189 PF: > { %s13_s14 = sadd.s32 1, %s3397_s14   ;;  %s4071_s12 = smov %s3393_s13 }
 0x18a   : > { %p10_p5 = scmp.ge.s32.totalorder %s13_s14, 4   ;;  %s4072_s13 = smov %s4074_s15 }
 0x18c   :  { %12 = sbr.rel (!%p10_p5) target bundleno = 2 (0x2), region = 64 }

// kernel: discriminator_forward.6
= control target key start
LH: loop header
LB: loop body
LE: loop exit
PB: predicated region body
PF: predicated region fallthrough
CT: control target
= control target key end

     0   :  { %s1467_s12 = smov 0   ;;  %s1469_s13 = smov 0   ;;  %s1715_s0 = inlined_call_operand.vmem [shape: bf16[2,9,9,64], index: 0, kind: input, shape index: {}]   ;;  %s1716_s1 = inlined_call_operand.vmem [shape: bf16[256,32], index: 1, kind: input, shape index: {}]   ;;  %s1717_s2 = inlined_call_operand.vmem [shape: f32[1,32], index: 2, kind: input, shape index: {}]   ;;  %s1718_s3 = inlined_call_operand.vmem [shape: bf16[2,64,32], index: 3, kind: output, shape index: {}]  }
   0x1   :  { %s1471_s14 = smov 0  }
   0x2 LB: > { %s25_s15 = sadd.s32 1, %s1441_s13  ;;  %p1158_p0 = scmp.ge.s32.totalorder %s1445_s14, 1  ;;  %s1445_s14 = sphi %s1471_s14, %s13_s14   ;;  %s1441_s13 = sphi %s1469_s13, %s1722_s13   ;;  %s1437_s12 = sphi %s1467_s12, %s1721_s12  }
   0x3   : > { %p27_p1 = scmp.ge.s32.totalorder %s25_s15, 2  ;;  %p151_p2 = scmp.lt.s32.totalorder %s1445_s14, 3 }
   0x5   : > { %s1724_s15 = smov (%p27_p1, %s25_s15), 0  ;;  %p152_p3 = pnand %p1158_p0, %p151_p2 }
   0x6   : > { %v1399_v0 = vld [vmem:[%s1716_s1 + $0x20] sm:$0xff] (!%p152_p3)   ;;  %p179_p4 = scmp.lt.s32.totalorder (!%p152_p3), %s1437_s12, 1  ;;  %v1401_v2 = vld [vmem:[%s1716_s1 + $0x28] sm:$0xff] (!%p152_p3)   ;;  %v1403_v4 = vld [vmem:[%s1716_s1 + $0x30] sm:$0xff] (!%p152_p3)   ;;  %vm382_vm0 = vcmask (!%p152_p3), 523264   ;;  %vm1058_vm6 = vcmask (!%p152_p3), 257024  }
   0x7   : > { %155 = sbr.rel (%p152_p3) target bundleno = 290 (0x122), region = 32  ;;  %v1400_v1 = vld [vmem:[%s1716_s1 + $0x40] sm:$0xff] (!%p152_p3)   ;;  %1286 = vmatprep.subr.bf16.mxu1 (!%p152_p3), %v1399_v0  ;;  %v1402_v3 = vld [vmem:[%s1716_s1 + $0x48] sm:$0xff] (!%p152_p3)   ;;  %v1404_v5 = vld [vmem:[%s1716_s1 + $0x50] sm:$0xff] (!%p152_p3)   ;;  %vm223_vm1 = vsmask.f32 (!%p152_p3), 3328 }
   0x8   : > { %1318 = vmatprep.subr.bf16.mxu0 (!%p152_p3), %v1400_v1  ;;  %1287 = vmatpush3.bf16.msra.mxu1 (!%p152_p3), %v1399_v0  ;;  %v1405_v6 = vld [vmem:[%s1716_s1 + $0x38] sm:$0xff] (!%p152_p3)   ;;  %vm224_vm2 = vsmask.f32 (!%p152_p3), 7440  ;;  %v1534_v19 = vld [vmem:[%s1716_s1] sm:$0xff] (!%p152_p3)   ;;  %v1412_v51 = vld [vmem:[%s1716_s1 + $0x68] sm:$0xff] (!%p152_p3)  }
   0x9   : > { %1319 = vmatpush3.bf16.msra.mxu0 (!%p152_p3), %v1400_v1  ;;  %1288 = vmatprep.subr.bf16.mxu1 (!%p152_p3), %v1401_v2  ;;  %v1406_v7 = vld [vmem:[%s1716_s1 + $0x58] sm:$0xff] (!%p152_p3)   ;;  %v1410_v20 = vld [vmem:[%s1716_s1 + $0x60] sm:$0xff] (!%p152_p3)   ;;  %vm1541_vm3 = vmor (!%p152_p3), %vm223_vm1, %vm224_vm2 }
   0xa   : > { %1320 = vmatprep.subr.bf16.mxu0 (!%p152_p3), %v1402_v3 }
   0xc   : > { %1289 = vmatpush3.bf16.msra.mxu1 (!%p152_p3), %v1401_v2 }
   0xd   : > { %1321 = vmatpush3.bf16.msra.mxu0 (!%p152_p3), %v1402_v3  ;;  %1290 = vmatprep.subr.bf16.mxu1 (!%p152_p3), %v1403_v4 }
   0xe   : > { %s1726_s12 = smov (!%p179_p4, %s1437_s12), 1  ;;  %1322 = vmatprep.subr.bf16.mxu0 %v1404_v5 }
   0xf   : > { %s1374_s26 = smul.u32 72, %s1726_s12  ;;  %s1245_s4 = sshll.u32 %s1726_s12, 5 }
  0x10   : > { %1291 = vmatpush3.bf16.msra.mxu1 %v1403_v4  ;;  %s1688_s7 = scalar_lea.vmem %s1718_s3, %s1245_s4 }
  0x11   : > { %s1512_s6 = scalar_lea.vmem %s1715_s0, %s1374_s26  ;;  %1323 = vmatpush3.bf16.msra.mxu0 %v1404_v5  ;;  %1292 = vmatprep.subr.bf16.mxu1 %v1405_v6  ;;  %v1411_v5 = vld [vmem:[%s1716_s1 + $0x8] sm:$0xff]  }
  0x12   : > { %v1407_v8 = vld [vmem:[%s1512_s6 + $0x8] ss:$8 sps:$4 sm:$0xff]   ;;  %v1519_v9 = vld [vmem:[%s1512_s6] sm:$0xf]  ;;  %v215_v11 = vld [vmem:[%s1512_s6 + $0x4] sm:$0x1]  ;;  %1324 = vmatprep.subr.bf16.mxu0 %v1406_v7 }
  0x13   : > { %v1522_v10 = vld [vmem:[%s1512_s6 + $0x8] sm:$0xf]  ;;  %1326 = vmatprep.mubr.msk.bf16.mxu0 %vm382_vm0, %v1407_v8  ;;  %v216_v12 = vld [vmem:[%s1512_s6 + $0xc] sm:$0x1]  ;;  %v227_v13 = vshrl.u32 %v1519_v9, 16  ;;  %v230_v14 = vshll.u32 %v1519_v9, 16 }
  0x14   : > { %v236_v15 = vshll.u32 %v215_v11, 16  ;;  %v241_v16 = vshrl.u32 %v1522_v10, 16  ;;  %v244_v17 = vshll.u32 %v1522_v10, 16  ;;  %v250_v18 = vshll.u32 %v216_v12, 16  ;;  %v1409_v28 = vld [vmem:[%s1512_s6 + $0x18] ss:$8 sps:$4 sm:$0xff]   ;;  %1293 = vmatpush3.bf16.msra.mxu1 %v1405_v6 }
  0x15   : > { %v229_v21 = vrot.slane %v227_v13, 4  ;;  %v232_v22 = vrot.slane %v230_v14, 5  ;;  %v1547_v30 = vld [vmem:[%s1512_s6 + $0x10] sm:$0xf]  ;;  %1325 = vmatpush3.bf16.msra.mxu0 %v1406_v7  ;;  %1302 = vmatprep.subr.bf16.mxu1 %v1534_v19  ;;  %v1551_v32 = vld [vmem:[%s1512_s6 + $0x18] sm:$0xf] }
  0x16   : > { %v238_v23 = vrot.slane %v236_v15, 5  ;;  %v243_v24 = vrot.slane %v241_v16, 4  ;;  %v246_v26 = vrot.slane %v244_v17, 5  ;;  %v252_v27 = vrot.slane %v250_v18, 5  ;;  %v217_v33 = vld [vmem:[%s1512_s6 + $0x14] sm:$0x1]  ;;  %1334 = vmatprep.subr.bf16.mxu0 %v1410_v20 }
  0x17   : > { %v233_v29 = vor.u32 %v232_v22, %v229_v21  ;;  %v218_v34 = vld [vmem:[%s1512_s6 + $0x1c] sm:$0x1]  ;;  %v255_v36 = vshrl.u32 %v1547_v30, 16  ;;  %v258_v37 = vshll.u32 %v1547_v30, 16  ;;  %v264_v38 = vshll.u32 %v217_v33, 16  ;;  %v1416_v15 = vld [vmem:[%s1716_s1 + $0x70] sm:$0xff]  }
  0x18   : > { %v247_v31 = vor.u32 %v246_v26, %v243_v24  ;;  %v269_v40 = vshrl.u32 %v1551_v32, 16  ;;  %v272_v41 = vshll.u32 %v1551_v32, 16  ;;  %v278_v42 = vshll.u32 %v218_v34, 16  ;;  %1327 = vmatmul.mubr.msk.bf16.vlgmr.msra.gmra.mrb[0].mxu0 %vm382_vm0, %v1409_v28  ;;  %v1413_v54 = vld [vmem:[%s1512_s6 + $0x28] ss:$8 sps:$4 sm:$0xff]  }
  0x19   : > { %v234_v35 = vrot.slane %v233_v29, 4  ;;  %v257_v44 = vrot.slane %v255_v36, 4  ;;  %v260_v45 = vrot.slane %v258_v37, 5  ;;  %v266_v46 = vrot.slane %v264_v38, 5  ;;  %1335 = vmatpush3.bf16.msra.mxu0 %v1410_v20  ;;  %v1569_v56 = vld [vmem:[%s1512_s6 + $0x20] sm:$0xf]  ;;  %1330 = vmatprep.mubr.msk.bf16.mxu0 %vm382_vm0, %v1413_v54 }
  0x1a   : > { %v248_v39 = vrot.slane %v247_v31, 4  ;;  %v271_v48 = vrot.slane %v269_v40, 4  ;;  %v274_v49 = vrot.slane %v272_v41, 5  ;;  %v280_v50 = vrot.slane %v278_v42, 5  ;;  %1336 = vmatprep.subr.bf16.mxu0 %v1412_v51  ;;  %v1572_v57 = vld [vmem:[%s1512_s6 + $0x28] sm:$0xf] }
  0x1b   : > { %v239_v43 = vsel %vm1541_vm3, %v234_v35, %v238_v23  ;;  %v261_v53 = vor.u32 %v260_v45, %v257_v44  ;;  %v219_v58 = vld [vmem:[%s1512_s6 + $0x24] sm:$0x1]  ;;  %v220_v60 = vld [vmem:[%s1512_s6 + $0x2c] sm:$0x1]  ;;  %v283_v61 = vshrl.u32 %v1569_v56, 16  ;;  %v286_v62 = vshll.u32 %v1569_v56, 16 }
  0x1c   : > { %v253_v47 = vsel %vm1541_vm3, %v248_v39, %v252_v27  ;;  %v275_v55 = vor.u32 %v274_v49, %v271_v48  ;;  %v292_v63 = vshll.u32 %v219_v58, 16  ;;  %v297_v1 = vshrl.u32 %v1572_v57, 16  ;;  %v1415_v18 = vld [vmem:[%s1512_s6 + $0x38] ss:$8 sps:$4 sm:$0xff]   ;;  %v1594_v21 = vld [vmem:[%s1512_s6 + $0x30] sm:$0xf] }
  0x1d   : > { %v1162_v52 = vcombine.low %v239_v43, %v253_v47  ;;  %v262_v59 = vrot.slane %v261_v53, 4  ;;  %1337 = vmatpush3.bf16.msra.mxu0 %v1412_v51  ;;  %v300_v2 = vshll.u32 %v1572_v57, 16  ;;  %v306_v3 = vshll.u32 %v220_v60, 16  ;;  %v1597_v22 = vld [vmem:[%s1512_s6 + $0x38] sm:$0xf]  ;;  %v1414_v35 = vld [vmem:[%s1716_s1 + $0x10] sm:$0xff]  }
  0x1e   : > { %v276_v0 = vrot.slane %v275_v55, 4  ;;  %v285_v6 = vrot.slane %v283_v61, 4  ;;  %v288_v7 = vrot.slane %v286_v62, 5  ;;  %v294_v8 = vrot.slane %v292_v63, 5  ;;  %1338 = vmatprep.subr.bf16.mxu0 %v1416_v15  ;;  %v221_v24 = vld [vmem:[%s1512_s6 + $0x34] sm:$0x1] }
  0x1f   : > { %1294 = vmatprep.mubr.msk.bf16.mxu1 %vm382_vm0, %v1162_v52  ;;  %v267_v4 = vsel %vm1541_vm3, %v262_v59, %v266_v46  ;;  %v299_v12 = vrot.slane %v297_v1, 4  ;;  %v302_v13 = vrot.slane %v300_v2, 5  ;;  %v308_v14 = vrot.slane %v306_v3, 5  ;;  %v222_v26 = vld [vmem:[%s1512_s6 + $0x3c] sm:$0x1] }
  0x20   : > { %v281_v11 = vsel %vm1541_vm3, %v276_v0, %v280_v50  ;;  %v289_v17 = vor.u32 %v288_v7, %v285_v6  ;;  %1331 = vmatmul.mubr.msk.bf16.gmra.mrb[4].mxu0 %vm382_vm0, %v1415_v18  ;;  %v311_v27 = vshrl.u32 %v1594_v21, 16  ;;  %v314_v29 = vshll.u32 %v1594_v21, 16  ;;  %v1418_v42 = vld [vmem:[%s1716_s1 + $0x78] sm:$0xff]   ;;  %v1206_v46 = vld [vmem:[%s1512_s6 + $0x8] sm:$0xf] }
  0x21   : > { %v1163_v16 = vcombine.low %v267_v4, %v281_v11  ;;  %v303_v20 = vor.u32 %v302_v13, %v299_v12  ;;  %v320_v31 = vshll.u32 %v221_v24, 16  ;;  %v325_v33 = vshrl.u32 %v1597_v22, 16  ;;  %1339 = vmatpush3.bf16.msra.mxu0 %v1416_v15  ;;  %v1207_v49 = vld [vmem:[%s1512_s6 + $0xc] sm:$0x1]  ;;  %v1208_v50 = vld [vmem:[%s1512_s6 + $0x10] sm:$0xf] }
  0x22   : > { %v290_v23 = vrot.slane %v289_v17, 4  ;;  %v313_v36 = vrot.slane %v311_v27, 4  ;;  %v334_v37 = vshll.u32 %v222_v26, 16  ;;  %v316_v39 = vrot.slane %v314_v29, 5  ;;  %1340 = vmatprep.subr.bf16.mxu0 %v1418_v42  ;;  %v1209_v51 = vld [vmem:[%s1512_s6 + $0x14] sm:$0x1] }
  0x23   : > { %1295 = vmatmul.mubr.msk.bf16.vlgmr.msra.gmra.mrb[0].mxu1 %vm382_vm0, %v1163_v16  ;;  %v304_v28 = vrot.slane %v303_v20, 4  ;;  %v322_v40 = vrot.slane %v320_v31, 5  ;;  %v327_v41 = vrot.slane %v325_v33, 4  ;;  %v1174_v47 = vcombine.low %v1519_v9, %v1522_v10  ;;  %v1417_v9 = vld [vmem:[%s1716_s1 + $0x18] sm:$0xff]   ;;  %v1214_v24 = vld [vmem:[%s1512_s6 + $0x28] sm:$0xf] }
  0x24   : > { %1303 = vmatpush3.bf16.msra.mxu1 %v1534_v19  ;;  %v295_v34 = vsel %vm1541_vm3, %v290_v23, %v294_v8  ;;  %v328_v19 = vshll.u32 %v1597_v22, 16  ;;  %v336_v45 = vrot.slane %v334_v37, 5  ;;  %v317_v48 = vor.u32 %v316_v39, %v313_v36  ;;  %v1210_v59 = vld [vmem:[%s1512_s6 + $0x18] sm:$0xf]  ;;  %v1211_v0 = vld [vmem:[%s1512_s6 + $0x1c] sm:$0x1] }
  0x25   : > { %1304 = vmatprep.subr.bf16.mxu1 %v1411_v5  ;;  %v309_v38 = vsel %vm1541_vm3, %v304_v28, %v308_v14  ;;  %v1175_v52 = vcombine.low %v1547_v30, %v1551_v32  ;;  %v1176_v53 = vcombine.low %v1569_v56, %v1572_v57  ;;  %v747_v10 = vshrl.u32 %v1206_v46, 16  ;;  %1341 = vmatpush3.bf16.msra.mxu0 %v1418_v42  ;;  %v1213_v14 = vld [vmem:[%s1512_s6 + $0x24] sm:$0x1]  ;;  %v1215_v31 = vld [vmem:[%s1512_s6 + $0x2c] sm:$0x1] }
  0x26   : > { %v1164_v43 = vcombine.low %v295_v34, %v309_v38  ;;  %v330_v44 = vrot.slane %v328_v19, 5  ;;  %v750_v55 = vshll.u32 %v1206_v46, 16  ;;  %v756_v58 = vshll.u32 %v1207_v49, 16  ;;  %v1216_v39 = vld [vmem:[%s1512_s6 + $0x30] sm:$0xf] }
  0x27   : > { %v318_v60 = vrot.slane %v317_v48, 4  ;;  %v761_v61 = vshrl.u32 %v1208_v50, 16  ;;  %v764_v62 = vshll.u32 %v1208_v50, 16  ;;  %v770_v63 = vshll.u32 %v1209_v51, 16  ;;  %v1218_v46 = vld [vmem:[%s1512_s6 + $0x38] sm:$0xf] }
  0x28   : > { %1305 = vmatpush3.bf16.msra.mxu1 %v1411_v5  ;;  %1298 = vmatprep.mubr.msk.bf16.mxu1 %vm382_vm0, %v1164_v43  ;;  %v331_v54 = vor.u32 %v330_v44, %v327_v41  ;;  %v749_v2 = vrot.slane %v747_v10, 4  ;;  %v752_v3 = vrot.slane %v750_v55, 5  ;;  %v758_v4 = vrot.slane %v756_v58, 5  ;;  %v1212_v5 = vld [vmem:[%s1512_s6 + $0x20] sm:$0xf] }
  0x29   : > { %1306 = vmatprep.subr.bf16.mxu1 %v1414_v35  ;;  %v323_v6 = vsel %vm1541_vm3, %v318_v60, %v322_v40  ;;  %v763_v7 = vrot.slane %v761_v61, 4  ;;  %v766_v8 = vrot.slane %v764_v62, 5  ;;  %v772_v11 = vrot.slane %v770_v63, 5  ;;  %v1217_v40 = vld [vmem:[%s1512_s6 + $0x34] sm:$0x1] }
  0x2a   : > { %v332_v1 = vrot.slane %v331_v54, 4  ;;  %v753_v13 = vor.u32 %v752_v3, %v749_v2  ;;  %v775_v15 = vshrl.u32 %v1210_v59, 16  ;;  %v778_v16 = vshll.u32 %v1210_v59, 16  ;;  %v1219_v55 = vld [vmem:[%s1512_s6 + $0x3c] sm:$0x1] }
  0x2b   : > { %v767_v18 = vor.u32 %v766_v8, %v763_v7  ;;  %v784_v20 = vshll.u32 %v1211_v0, 16  ;;  %v789_v23 = vshrl.u32 %v1212_v5, 16  ;;  %v792_v29 = vshll.u32 %v1212_v5, 16  ;;  %v1220_v61 = vld [vmem:[%s1512_s6 + $0x40] sm:$0xf] }
  0x2c   : > { %1307 = vmatpush3.bf16.msra.mxu1 %v1414_v35  ;;  %v337_v12 = vsel %vm1541_vm3, %v332_v1, %v336_v45  ;;  %v754_v26 = vrot.slane %v753_v13, 4  ;;  %v777_v27 = vrot.slane %v775_v15, 4  ;;  %v780_v28 = vrot.slane %v778_v16, 5  ;;  %v1221_v2 = vld [vmem:[%s1512_s6 + $0x44] sm:$0x1] }
  0x2d   : > { %1308 = vmatprep.subr.bf16.mxu1 %v1417_v9  ;;  %v1165_v17 = vcombine.low %v323_v6, %v337_v12  ;;  %v768_v33 = vrot.slane %v767_v18, 4  ;;  %v786_v34 = vrot.slane %v784_v20, 5  ;;  %v791_v35 = vrot.slane %v789_v23, 4 }
  0x2e   : > { %v798_v36 = vshll.u32 %v1213_v14, 16  ;;  %v759_v19 = vsel %vm1541_vm3, %v754_v26, %v758_v4  ;;  %v781_v37 = vor.u32 %v780_v28, %v777_v27  ;;  %v794_v38 = vrot.slane %v792_v29, 5 }
  0x2f   : > { %1299 = vmatmul.mubr.msk.bf16.gmra.mrb[4].mxu1 %vm382_vm0, %v1165_v17  ;;  %v803_v41 = vshrl.u32 %v1214_v24, 16  ;;  %v773_v42 = vsel %vm1541_vm3, %v768_v33, %v772_v11  ;;  %v806_v44 = vshll.u32 %v1214_v24, 16  ;;  %v812_v45 = vshll.u32 %v1215_v31, 16 }
  0x30   : > { %1309 = vmatpush3.bf16.msra.mxu1 %v1417_v9  ;;  %1310 = vmatprep.mubr.msk.bf16.mxu1 %vm382_vm0, %v1174_v47  ;;  %v800_v43 = vrot.slane %v798_v36, 5  ;;  %v1222_v48 = vcombine.low %v759_v19, %v773_v42  ;;  %v782_v49 = vrot.slane %v781_v37, 4  ;;  %v795_v50 = vor.u32 %v794_v38, %v791_v35 }
  0x31   : > { %v805_v51 = vrot.slane %v803_v41, 4  ;;  %v808_v47 = vrot.slane %v806_v44, 5  ;;  %v814_v54 = vrot.slane %v812_v45, 5  ;;  %v817_v9 = vshrl.u32 %v1216_v39, 16 }
  0x32   : > { %v820_v10 = vshll.u32 %v1216_v39, 16  ;;  %1342 = vmatprep.mubr.msk.bf16.mxu0 %vm382_vm0, %v1222_v48  ;;  %v787_v58 = vsel %vm1541_vm3, %v782_v49, %v786_v34  ;;  %v796_v59 = vrot.slane %v795_v50, 4  ;;  %v826_v60 = vshll.u32 %v1217_v40, 16  ;;  %v1234_v34 = vld [vmem:[%s1717_s2] ss:$0 sm:$0xff] }
  0x33   : > { %v831_v62 = vshrl.u32 %v1218_v46, 16  ;;  %v809_v63 = vor.u32 %v808_v47, %v805_v51  ;;  %v819_v0 = vrot.slane %v817_v9, 4  ;;  %v834_v3 = vshll.u32 %v1218_v46, 16 }
  0x34   : > { %v822_v1 = vrot.slane %v820_v10, 5  ;;  %v801_v4 = vsel %vm1541_vm3, %v796_v59, %v800_v43  ;;  %v828_v5 = vrot.slane %v826_v60, 5  ;;  %v840_v7 = vshll.u32 %v1219_v55, 16 }
  0x35   : > { %v833_v6 = vrot.slane %v831_v62, 4  ;;  %v1223_v8 = vcombine.low %v787_v58, %v801_v4  ;;  %v810_v11 = vrot.slane %v809_v63, 4  ;;  %v836_v13 = vrot.slane %v834_v3, 5 }
  0x36   : > { %v823_v12 = vor.u32 %v822_v1, %v819_v0  ;;  %v845_v14 = vshrl.u32 %v1220_v61, 16  ;;  %v848_v15 = vshll.u32 %v1220_v61, 16  ;;  %v854_v16 = vshll.u32 %v1221_v2, 16 }
  0x37   : > { %1311 = vmatmul.mubr.msk.bf16.vlgmr.msra.gmra.mrb[0].mxu1 %vm382_vm0, %v1175_v52  ;;  %1343 = vmatmul.mubr.msk.bf16.vlgmr.msra.gmra.mrb[0].mxu0 %vm382_vm0, %v1223_v8  ;;  %v815_v17 = vsel %vm1541_vm3, %v810_v11, %v814_v54  ;;  %v837_v30 = vor.u32 %v836_v13, %v833_v6  ;;  %v842_v32 = vrot.slane %v840_v7, 5  ;;  %v1177_v56 = vcombine.low %v1594_v21, %v1597_v22 }
  0x38   : > { %1314 = vmatprep.mubr.msk.bf16.mxu1 %vm382_vm0, %v1176_v53  ;;  %v824_v18 = vrot.slane %v823_v12, 4  ;;  %v847_v52 = vrot.slane %v845_v14, 4  ;;  %v850_v20 = vrot.slane %v848_v15, 5  ;;  %v856_v26 = vrot.slane %v854_v16, 5 }
  0x39   : > { %v838_v24 = vrot.slane %v837_v30, 4 }
  0x3a   : > { %v829_v23 = vsel %vm1541_vm3, %v824_v18, %v828_v5  ;;  %v851_v53 = vor.u32 %v850_v20, %v847_v52 }
  0x3b   : > { %v1224_v57 = vcombine.low %v815_v17, %v829_v23  ;;  %v843_v27 = vsel %vm1541_vm3, %v838_v24, %v842_v32 }
  0x3c   : > { %v852_v28 = vrot.slane %v851_v53, 4 }
  0x3d   : > { %1346 = vmatprep.mubr.msk.bf16.mxu0 %vm382_vm0, %v1224_v57 }
  0x3e   : > { %v857_v29 = vsel %vm1541_vm3, %v852_v28, %v856_v26 }
  0x3f   : > { %1315 = vmatmul.mubr.msk.bf16.gmra.mrb[4].mxu1 %vm382_vm0, %v1177_v56  ;;  %v1225_v31 = vcombine.low %v843_v27, %v857_v29 }
  0x41   : > { %1347 = vmatmul.mubr.msk.bf16.gmra.mrb[4].mxu0 %vm382_vm0, %v1225_v31 }
 0x10a   : > { %v1312_v33 = vpop.f32.mrb[0].mxu1  ;;  %v1344_v22 = vpop.f32.mrb[0].mxu0 }
 0x10b   : > { %v550_v21 = vpop.f32.mrb[1].mxu1  ;;  %v1350_v36 = vadd.f32 %v1344_v22, %v1312_v33  ;;  %v948_v19 = vpop.f32.mrb[1].mxu0 }
 0x10c   : > { %v1313_v35 = vpop.f32.mrb[2].mxu1  ;;  %v1351_v38 = vadd.f32 %v948_v19, %v550_v21  ;;  %v1345_v39 = vpop.f32.mrb[2].mxu0 }
 0x10d   : > { %v553_v37 = vpop.f32.mrb[3].mxu1  ;;  %v996_v40 = vadd.f32 %v1350_v36, %v1234_v34  ;;  %v1352_v25 = vadd.f32 %v1345_v39, %v1313_v35  ;;  %v951_v41 = vpop.f32.mrb[3].mxu0 }
 0x10e   : > { %v994_v42 = vadd.f32 %v1351_v38, %v1234_v34  ;;  %v1353_v43 = vadd.f32 %v951_v41, %v553_v37 }
 0x10f   : > { %vm1004_vm4 = vcmp.ge.f32.partialorder %v996_v40, 0.0  ;;  %v1012_v44 = vmul.f32 0.2, %v996_v40  ;;  %v997_v45 = vadd.f32 %v1352_v25, %v1234_v34 }
 0x110   : > { %vm1002_vm5 = vcmp.ge.f32.partialorder %v994_v42, 0.0  ;;  %v1010_v46 = vmul.f32 0.2, %v994_v42  ;;  %v995_v48 = vadd.f32 %v1353_v43, %v1234_v34 }
 0x111   : > { %v1020_v50 = vsel %vm1004_vm4, %v996_v40, %v1012_v44  ;;  %vm1005_vm7 = vcmp.ge.f32.partialorder %v997_v45, 0.0  ;;  %v1013_v51 = vmul.f32 0.2, %v997_v45 }
 0x112   : > { %v1316_v49 = vpop.f32.mrb[4].mxu1  ;;  %v1248_v54 = vpack.c.bf16 %v1020_v50, %v1020_v50  ;;  %v1018_v9 = vsel %vm1002_vm5, %v994_v42, %v1010_v46  ;;  %vm1003_vm8 = vcmp.ge.f32.partialorder %v995_v48, 0.0  ;;  %v1011_v10 = vmul.f32 0.2, %v995_v48 }
 0x113   : > { %v566_v47 = vpop.f32.mrb[5].mxu1  ;;  %v1246_v58 = vpack.c.bf16 %v1018_v9, %v1018_v9  ;;  %v1021_v59 = vsel %vm1005_vm7, %v997_v45, %v1013_v51 }
 0x114   : > { %v1317_v55 = vpop.f32.mrb[6].mxu1  ;;  %1061 = vst.msk [vmem:[%s1688_s7 + $0x8] sm:$0xf] %vm1058_vm6, %v1248_v54  ;;  %v1249_v61 = vpack.c.bf16 %v1021_v59, %v1021_v59  ;;  %v1019_v62 = vsel %vm1003_vm8, %v995_v48, %v1011_v10  ;;  %v1348_v63 = vpop.f32.mrb[4].mxu0 }
 0x115   : > { %v569_v60 = vpop.f32.mrb[7].mxu1  ;;  %1059 = vst.msk [vmem:[%s1688_s7] sm:$0xf] %vm1058_vm6, %v1246_v58  ;;  %v1247_v0 = vpack.c.bf16 %v1019_v62, %v1019_v62  ;;  %v1354_v1 = vadd.f32 %v1348_v63, %v1316_v49  ;;  %v964_v2 = vpop.f32.mrb[5].mxu0 }
 0x116   : > { %1062 = vst.msk [vmem:[%s1688_s7 + $0xc] sm:$0xf] %vm1058_vm6, %v1249_v61  ;;  %v1355_v3 = vadd.f32 %v964_v2, %v566_v47  ;;  %v1349_v4 = vpop.f32.mrb[6].mxu0 }
 0x117   : > { %1060 = vst.msk [vmem:[%s1688_s7 + $0x4] sm:$0xf] %vm1058_vm6, %v1247_v0  ;;  %v1000_v5 = vadd.f32 %v1354_v1, %v1234_v34  ;;  %v1356_v6 = vadd.f32 %v1349_v4, %v1317_v55  ;;  %v967_v7 = vpop.f32.mrb[7].mxu0 }
 0x118   : > { %v998_v8 = vadd.f32 %v1355_v3, %v1234_v34  ;;  %v1357_v11 = vadd.f32 %v967_v7, %v569_v60 }
 0x119   : > { %vm1008_vm9 = vcmp.ge.f32.partialorder %v1000_v5, 0.0  ;;  %v1016_v12 = vmul.f32 0.2, %v1000_v5  ;;  %v1001_v13 = vadd.f32 %v1356_v6, %v1234_v34 }
 0x11a   : > { %vm1006_vm10 = vcmp.ge.f32.partialorder %v998_v8, 0.0  ;;  %v1014_v14 = vmul.f32 0.2, %v998_v8  ;;  %v999_v15 = vadd.f32 %v1357_v11, %v1234_v34 }
 0x11b   : > { %v1024_v16 = vsel %vm1008_vm9, %v1000_v5, %v1016_v12  ;;  %vm1009_vm11 = vcmp.ge.f32.partialorder %v1001_v13, 0.0  ;;  %v1017_v17 = vmul.f32 0.2, %v1001_v13 }
 0x11c   : > { %v1252_v18 = vpack.c.bf16 %v1024_v16, %v1024_v16  ;;  %v1022_v30 = vsel %vm1006_vm10, %v998_v8, %v1014_v14  ;;  %vm1007_vm12 = vcmp.ge.f32.partialorder %v999_v15, 0.0  ;;  %v1015_v32 = vmul.f32 0.2, %v999_v15 }
 0x11d   : > { %v1250_v52 = vpack.c.bf16 %v1022_v30, %v1022_v30  ;;  %v1025_v20 = vsel %vm1009_vm11, %v1001_v13, %v1017_v17 }
 0x11e   : > { %1065 = vst.msk [vmem:[%s1688_s7 + $0x18] sm:$0xf] %vm1058_vm6, %v1252_v18  ;;  %v1253_v23 = vpack.c.bf16 %v1025_v20, %v1025_v20  ;;  %v1023_v24 = vsel %vm1007_vm12, %v999_v15, %v1015_v32 }
 0x11f   : > { %1063 = vst.msk [vmem:[%s1688_s7 + $0x10] sm:$0xf] %vm1058_vm6, %v1250_v52  ;;  %v1251_v56 = vpack.c.bf16 %v1023_v24, %v1023_v24 }
 0x120   : > { %1066 = vst.msk [vmem:[%s1688_s7 + $0x1c] sm:$0xf] %vm1058_vm6, %v1253_v23 }
 0x121   : > { %1064 = vst.msk [vmem:[%s1688_s7 + $0x14] sm:$0xf] %vm1058_vm6, %v1251_v56 }
 0x122 PF: > { %s13_s14 = sadd.s32 1, %s1445_s14   ;;  %s1721_s12 = smov %s1441_s13 }
 0x123   : > { %p10_p5 = scmp.ge.s32.totalorder %s13_s14, 4   ;;  %s1722_s13 = smov %s1724_s15 }
 0x125   :  { %12 = sbr.rel (!%p10_p5) target bundleno = 2 (0x2), region = 64 }

// kernel: discriminator_forward.7
= control target key start
LH: loop header
LB: loop body
LE: loop exit
PB: predicated region body
PF: predicated region fallthrough
CT: control target
= control target key end

     0   :  { %s1926_s15 = smov 0   ;;  %s2432_s0 = inlined_call_operand.vmem [shape: bf16[2,5,5,128], index: 0, kind: input, shape index: {}]   ;;  %s2433_s1 = inlined_call_operand.vmem [shape: bf16[512,64], index: 1, kind: input, shape index: {}]   ;;  %s2434_s2 = inlined_call_operand.vmem [shape: f32[1,64], index: 2, kind: input, shape index: {}]   ;;  %s2435_s3 = inlined_call_operand.vmem [shape: bf16[16,64], index: 3, kind: input, shape index: {}]   ;;  %s2436_s4 = inlined_call_operand.vmem [shape: f32[2,1,128], index: 4, kind: output, shape index: {}]  }
   0x1 LB: > { %s1312_s16 = sadd.s32 4294967295, %s1897_s15   ;;  %p1316_p0 = scmp.ge.s32.totalorder %s1897_s15, 1  ;;  %s1897_s15 = sphi %s1926_s15, %s14_s15  }
   0x2   : > { %p162_p1 = scmp.lt.s32.totalorder %s1897_s15, 3 }
   0x4   : > { %p163_p2 = pnand %p1316_p0, %p162_p1 }
   0x5   : > { %v1937_v0 = vld [vmem:[%s2433_s1 + $0x40] sm:$0xff] (!%p163_p2)   ;;  %v1899_v1 = vmov (!%p163_p2), 0.0   ;;  %v1950_v3 = vld [vmem:[%s2433_s1 + $0x48] sm:$0xff] (!%p163_p2)   ;;  %vm1900_vm0 = vmmov (!%p163_p2), 0   ;;  %p186_p3 = scmp.lt.s32.totalorder (!%p163_p2), %s1312_s16, 1  ;;  %v1970_v5 = vld [vmem:[%s2433_s1 + $0x50] sm:$0xff] (!%p163_p2)  }
   0x6   : > { %166 = sbr.rel (%p163_p2) target bundleno = 720 (0x2d0), region = 36  ;;  %1511 = vmatprep.subr.bf16.mxu0 (!%p163_p2), %v1899_v1  ;;  %1531 = vmatprep.subr.bf16.mxu1 (!%p163_p2), %v1899_v1  ;;  %v1944_v2 = vld [vmem:[%s2433_s1] sm:$0xff] (!%p163_p2)   ;;  %v1959_v4 = vld [vmem:[%s2433_s1 + $0x8] sm:$0xff] (!%p163_p2)   ;;  %v1977_v6 = vld [vmem:[%s2433_s1 + $0x10] sm:$0xff] (!%p163_p2)   ;;  %vm654_vm2 = vcmask (!%p163_p2), 519168  }
   0x7   : > { %1512 = vmatpush3.bf16.msra.mxu0 (!%p163_p2), %v1937_v0  ;;  %1527 = vmatprep.mubr.msk.bf16.mxu0 (!%p163_p2), %vm1900_vm0, %v1899_v1  ;;  %v1985_v7 = vld [vmem:[%s2433_s1 + $0x58] sm:$0xff] (!%p163_p2)   ;;  %v2004_v9 = vld [vmem:[%s2433_s1 + $0x60] sm:$0xff] (!%p163_p2)   ;;  %v2019_v12 = vld [vmem:[%s2433_s1 + $0x68] sm:$0xff] (!%p163_p2)  }
   0x8   : > { %1532 = vmatpush3.bf16.msra.mxu1 (!%p163_p2), %v1944_v2  ;;  %1513 = vmatprep.subr.bf16.mxu0 (!%p163_p2), %v1899_v1  ;;  %v1992_v8 = vld [vmem:[%s2433_s1 + $0x18] sm:$0xff] (!%p163_p2)   ;;  %v2011_v10 = vld [vmem:[%s2433_s1 + $0x20] sm:$0xff] (!%p163_p2)   ;;  %v2026_v13 = vld [vmem:[%s2433_s1 + $0x28] sm:$0xff] (!%p163_p2)  }
   0x9   : > { %1533 = vmatprep.subr.bf16.mxu1 (!%p163_p2), %v1899_v1  ;;  %1547 = vmatprep.mubr.msk.bf16.mxu1 (!%p163_p2), %vm1900_vm0, %v1899_v1  ;;  %v2033_v15 = vld [vmem:[%s2433_s1 + $0x70] sm:$0xff] (!%p163_p2)   ;;  %v2047_v19 = vld [vmem:[%s2433_s1 + $0x78] sm:$0xff] (!%p163_p2)   ;;  %v2060_v22 = vld [vmem:[%s2433_s1 + $0x80] sm:$0xff] (!%p163_p2)  }
   0xa   : > { %v2040_v16 = vld [vmem:[%s2433_s1 + $0x30] sm:$0xff] (!%p163_p2)   ;;  %v2054_v20 = vld [vmem:[%s2433_s1 + $0x38] sm:$0xff] (!%p163_p2)   ;;  %v2069_v24 = vld [vmem:[%s2433_s1 + $0xc0] sm:$0xff] (!%p163_p2)  }
   0xb   : > { %1514 = vmatpush3.bf16.msra.mxu0 (!%p163_p2), %v1950_v3  ;;  %v2076_v25 = vld [vmem:[%s2433_s1 + $0x88] sm:$0xff] (!%p163_p2)   ;;  %v2094_v27 = vld [vmem:[%s2433_s1 + $0x90] sm:$0xff] (!%p163_p2)   ;;  %v2108_v29 = vld [vmem:[%s2433_s1 + $0x98] sm:$0xff] (!%p163_p2)  }
   0xc   : > { %1534 = vmatpush3.bf16.msra.mxu1 (!%p163_p2), %v1959_v4  ;;  %1515 = vmatprep.subr.bf16.mxu0 (!%p163_p2), %v1899_v1  ;;  %v2083_v26 = vld [vmem:[%s2433_s1 + $0xc8] sm:$0xff] (!%p163_p2)   ;;  %v2101_v28 = vld [vmem:[%s2433_s1 + $0xd0] sm:$0xff] (!%p163_p2)   ;;  %v2115_v30 = vld [vmem:[%s2433_s1 + $0xd8] sm:$0xff] (!%p163_p2)  }
   0xd   : > { %s2438_s16 = smov (!%p186_p3, %s1312_s16), 1  ;;  %1535 = vmatprep.subr.bf16.mxu1 %v1899_v1  ;;  %v2122_v31 = vld [vmem:[%s2433_s1 + $0xa0] sm:$0xff]   ;;  %v2136_v33 = vld [vmem:[%s2433_s1 + $0xa8] sm:$0xff]   ;;  %v2151_v36 = vld [vmem:[%s2433_s1 + $0xb0] sm:$0xff]  }
   0xe   : > { %s1831_s29 = smul.u32 20, %s2438_s16  ;;  %v2129_v32 = vld [vmem:[%s2433_s1 + $0xe0] sm:$0xff]   ;;  %v2144_v35 = vld [vmem:[%s2433_s1 + $0xe8] sm:$0xff]   ;;  %v2158_v38 = vld [vmem:[%s2433_s1 + $0xf0] sm:$0xff]   ;;  %s193_s30 = scalar_lea.vmem %s2436_s4, %s2438_s16 }
   0xf   : > { %1516 = vmatpush3.bf16.msra.mxu0 %v1970_v5  ;;  %v2165_v39 = vld [vmem:[%s2433_s1 + $0xb8] sm:$0xff]  }
  0x10   : > { %1536 = vmatpush3.bf16.msra.mxu1 %v1977_v6  ;;  %1517 = vmatprep.subr.bf16.mxu0 %v1899_v1  ;;  %s1998_s10 = scalar_lea.vmem %s2432_s0, %s1831_s29  ;;  %v2172_v42 = vld [vmem:[%s2433_s1 + $0xf8] sm:$0xff]  }
  0x11   : > { %1537 = vmatprep.subr.bf16.mxu1 %v1899_v1  ;;  %v1866_v11 = vld [vmem:[%s1998_s10] ss:$0 sps:$4 sm:$0x77]   ;;  %v1883_v34 = vld [vmem:[%s1998_s10 + $0x4] ss:$0 sps:$4 sm:$0x77]  }
  0x12   : > { %v235_v14 = vshll.u32 %v1866_v11, 16  ;;  %v233_v17 = vshrl.u32 %v1866_v11, 16  ;;  %v195_v23 = vld [vmem:[%s1998_s10] sm:$0x3]  ;;  %v546_v37 = vshll.u32 %v1883_v34, 16  ;;  %v544_v40 = vshrl.u32 %v1883_v34, 16 }
  0x13   : > { %1518 = vmatpush3.bf16.msra.mxu0 %v1985_v7  ;;  %v1335_v43 = vld [vmem:[%s1998_s10 + $0x4] sm:$0x3]  ;;  %v1884_v45 = vld [vmem:[%s1998_s10 + $0x8] ss:$0 sps:$4 sm:$0x77]  }
  0x14   : > { %1538 = vmatpush3.bf16.msra.mxu1 %v1992_v8  ;;  %1519 = vmatprep.subr.bf16.mxu0 %v1899_v1  ;;  %v237_v18 = vrot.slane %v235_v14, 1  ;;  %v548_v41 = vrot.slane %v546_v37, 1  ;;  %v797_v46 = vshll.u32 %v1884_v45, 16  ;;  %v795_v47 = vshrl.u32 %v1884_v45, 16  ;;  %v1355_v49 = vld [vmem:[%s1998_s10 + $0x8] sm:$0x3] }
  0x15   : > { %1539 = vmatprep.subr.bf16.mxu1 %v1899_v1  ;;  %v1885_v51 = vld [vmem:[%s1998_s10 + $0xc] ss:$0 sps:$4 sm:$0x77]   ;;  %v1886_v57 = vld [vmem:[%s1998_s10 + $0x10] ss:$0 sps:$4 sm:$0x77]  }
  0x16   : > { %v238_v21 = vor.u32 %v237_v18, %v233_v17  ;;  %v549_v44 = vor.u32 %v548_v41, %v544_v40  ;;  %v799_v48 = vrot.slane %v797_v46, 1  ;;  %v995_v52 = vshll.u32 %v1885_v51, 16  ;;  %v1358_v55 = vld [vmem:[%s1998_s10 + $0xc] sm:$0x3]  ;;  %v651_v18 = vld [vmem:[%s2435_s3] sm:$0x3] }
  0x17   : > { %1520 = vmatpush3.bf16.msra.mxu0 %v2004_v9  ;;  %v993_v53 = vshrl.u32 %v1885_v51, 16 }
  0x18   : > { %1540 = vmatpush3.bf16.msra.mxu1 %v2011_v10  ;;  %1521 = vmatprep.subr.bf16.mxu0 %v1899_v1  ;;  %v800_v50 = vor.u32 %v799_v48, %v795_v47  ;;  %v997_v54 = vrot.slane %v995_v52, 1 }
  0x19   : > { %1541 = vmatprep.subr.bf16.mxu1 %v1899_v1 }
  0x1a   : > { %v998_v56 = vor.u32 %v997_v54, %v993_v53 }
  0x1b   : > { %1522 = vmatpush3.bf16.msra.mxu0 %v2019_v12 }
  0x1c   : > { %1542 = vmatpush3.bf16.msra.mxu1 %v2026_v13  ;;  %1523 = vmatprep.subr.bf16.mxu0 %v1899_v1 }
  0x1d   : > { %1543 = vmatprep.subr.bf16.mxu1 %v1899_v1 }
  0x1f   : > { %1524 = vmatpush3.bf16.msra.mxu0 %v2033_v15 }
  0x20   : > { %1544 = vmatpush3.bf16.msra.mxu1 %v2040_v16  ;;  %1525 = vmatprep.subr.bf16.mxu0 %v1899_v1 }
  0x21   : > { %1545 = vmatprep.subr.bf16.mxu1 %v1899_v1 }
  0x23   : > { %1526 = vmatpush3.bf16.msra.mxu0 %v2047_v19 }
  0x24   : > { %1546 = vmatpush3.bf16.msra.mxu1 %v2054_v20  ;;  %1551 = vmatprep.subr.bf16.mxu0 %v1899_v1 }
  0x25   : > { %1571 = vmatprep.subr.bf16.mxu1 %v1899_v1 }
  0x26   : > { %1528 = vmatmul.mubr.bf16.vlgmr.msra.gmra.mrb[0].mxu0 %v238_v21  ;;  %v652_v21 = vunpack.c.l.bf16 %v651_v18 }
  0x27   : > { %1548 = vmatmul.mubr.bf16.vlgmr.msra.gmra.mrb[0].mxu1 %v195_v23  ;;  %1552 = vmatpush3.bf16.msra.mxu0 %v2060_v22 }
  0x28   : > { %1572 = vmatpush3.bf16.msra.mxu1 %v2069_v24  ;;  %1553 = vmatprep.subr.bf16.mxu0 %v1899_v1 }
  0x29   : > { %1573 = vmatprep.subr.bf16.mxu1 %v1899_v1  ;;  %1567 = vmatprep.mubr.msk.bf16.mxu0 %vm1900_vm0, %v1899_v1 }
  0x2a   : > { %1587 = vmatprep.mubr.msk.bf16.mxu1 %vm1900_vm0, %v1899_v1 }
  0x2b   : > { %1554 = vmatpush3.bf16.msra.mxu0 %v2076_v25 }
  0x2c   : > { %1574 = vmatpush3.bf16.msra.mxu1 %v2083_v26  ;;  %1555 = vmatprep.subr.bf16.mxu0 %v1899_v1 }
  0x2d   : > { %1575 = vmatprep.subr.bf16.mxu1 %v1899_v1 }
  0x2f   : > { %1556 = vmatpush3.bf16.msra.mxu0 %v2094_v27 }
  0x30   : > { %1576 = vmatpush3.bf16.msra.mxu1 %v2101_v28  ;;  %1557 = vmatprep.subr.bf16.mxu0 %v1899_v1 }
  0x31   : > { %1577 = vmatprep.subr.bf16.mxu1 %v1899_v1 }
  0x33   : > { %1558 = vmatpush3.bf16.msra.mxu0 %v2108_v29 }
  0x34   : > { %1578 = vmatpush3.bf16.msra.mxu1 %v2115_v30  ;;  %1559 = vmatprep.subr.bf16.mxu0 %v1899_v1 }
  0x35   : > { %1579 = vmatprep.subr.bf16.mxu1 %v1899_v1 }
  0x37   : > { %1560 = vmatpush3.bf16.msra.mxu0 %v2122_v31 }
  0x38   : > { %1580 = vmatpush3.bf16.msra.mxu1 %v2129_v32  ;;  %1561 = vmatprep.subr.bf16.mxu0 %v1899_v1 }
  0x39   : > { %1581 = vmatprep.subr.bf16.mxu1 %v1899_v1 }
  0x3b   : > { %1562 = vmatpush3.bf16.msra.mxu0 %v2136_v33 }
  0x3c   : > { %1582 = vmatpush3.bf16.msra.mxu1 %v2144_v35  ;;  %1563 = vmatprep.subr.bf16.mxu0 %v1899_v1 }
  0x3d   : > { %1583 = vmatprep.subr.bf16.mxu1 %v1899_v1 }
  0x3f   : > { %1564 = vmatpush3.bf16.msra.mxu0 %v2151_v36 }
  0x40   : > { %1584 = vmatpush3.bf16.msra.mxu1 %v2158_v38  ;;  %1565 = vmatprep.subr.bf16.mxu0 %v1899_v1 }
  0x41   : > { %1585 = vmatprep.subr.bf16.mxu1 %v1899_v1 }
  0x43   : > { %1566 = vmatpush3.bf16.msra.mxu0 %v2165_v39 }
  0x44   : > { %1586 = vmatpush3.bf16.msra.mxu1 %v2172_v42  ;;  %1591 = vmatprep.subr.bf16.mxu0 %v1899_v1 }
  0x45   : > { %1611 = vmatprep.subr.bf16.mxu1 %v1899_v1 }
  0x46   : > { %1568 = vmatmul.mubr.bf16.vlgmr.msra.gmra.mrb[4].mxu0 %v1335_v43 }
  0x47   : > { %1588 = vmatmul.mubr.bf16.vlgmr.msra.gmra.mrb[4].mxu1 %v549_v44  ;;  %1592 = vmatpush3.bf16.msra.mxu0 %v1937_v0 }
  0x48   : > { %1612 = vmatpush3.bf16.msra.mxu1 %v1944_v2  ;;  %1593 = vmatprep.subr.bf16.mxu0 %v1899_v1 }
  0x49   : > { %1613 = vmatprep.subr.bf16.mxu1 %v1899_v1  ;;  %1607 = vmatprep.mubr.msk.bf16.mxu0 %vm1900_vm0, %v1899_v1 }
  0x4a   : > { %1627 = vmatprep.mubr.msk.bf16.mxu1 %vm1900_vm0, %v1899_v1 }
  0x4b   : > { %1594 = vmatpush3.bf16.msra.mxu0 %v1950_v3 }
  0x4c   : > { %1614 = vmatpush3.bf16.msra.mxu1 %v1959_v4  ;;  %1595 = vmatprep.subr.bf16.mxu0 %v1899_v1 }
  0x4d   : > { %1615 = vmatprep.subr.bf16.mxu1 %v1899_v1 }
  0x4f   : > { %1596 = vmatpush3.bf16.msra.mxu0 %v1970_v5 }
  0x50   : > { %1616 = vmatpush3.bf16.msra.mxu1 %v1977_v6  ;;  %1597 = vmatprep.subr.bf16.mxu0 %v1899_v1 }
  0x51   : > { %1617 = vmatprep.subr.bf16.mxu1 %v1899_v1 }
  0x53   : > { %1598 = vmatpush3.bf16.msra.mxu0 %v1985_v7 }
  0x54   : > { %1618 = vmatpush3.bf16.msra.mxu1 %v1992_v8  ;;  %1599 = vmatprep.subr.bf16.mxu0 %v1899_v1 }
  0x55   : > { %1619 = vmatprep.subr.bf16.mxu1 %v1899_v1 }
  0x57   : > { %1600 = vmatpush3.bf16.msra.mxu0 %v2004_v9 }
  0x58   : > { %1620 = vmatpush3.bf16.msra.mxu1 %v2011_v10  ;;  %1601 = vmatprep.subr.bf16.mxu0 %v1899_v1 }
  0x59   : > { %1621 = vmatprep.subr.bf16.mxu1 %v1899_v1 }
  0x5b   : > { %1602 = vmatpush3.bf16.msra.mxu0 %v2019_v12 }
  0x5c   : > { %1622 = vmatpush3.bf16.msra.mxu1 %v2026_v13  ;;  %1603 = vmatprep.subr.bf16.mxu0 %v1899_v1 }
  0x5d   : > { %1623 = vmatprep.subr.bf16.mxu1 %v1899_v1 }
  0x5f   : > { %1604 = vmatpush3.bf16.msra.mxu0 %v2033_v15 }
  0x60   : > { %1624 = vmatpush3.bf16.msra.mxu1 %v2040_v16  ;;  %1605 = vmatprep.subr.bf16.mxu0 %v1899_v1 }
  0x61   : > { %1625 = vmatprep.subr.bf16.mxu1 %v1899_v1 }
  0x63   : > { %1606 = vmatpush3.bf16.msra.mxu0 %v2047_v19 }
  0x64   : > { %1626 = vmatpush3.bf16.msra.mxu1 %v2054_v20  ;;  %1631 = vmatprep.subr.bf16.mxu0 %v1899_v1 }
  0x65   : > { %1651 = vmatprep.subr.bf16.mxu1 %v1899_v1 }
  0x66   : > { %1608 = vmatmul.mubr.bf16.vlgmr.msra.gmra.mrb[8].mxu0 %v549_v44 }
  0x67   : > { %1628 = vmatmul.mubr.bf16.vlgmr.msra.gmra.mrb[8].mxu1 %v1335_v43  ;;  %1632 = vmatpush3.bf16.msra.mxu0 %v2060_v22 }
  0x68   : > { %1652 = vmatpush3.bf16.msra.mxu1 %v2069_v24  ;;  %1633 = vmatprep.subr.bf16.mxu0 %v1899_v1 }
  0x69   : > { %1653 = vmatprep.subr.bf16.mxu1 %v1899_v1  ;;  %1647 = vmatprep.mubr.msk.bf16.mxu0 %vm1900_vm0, %v1899_v1 }
  0x6a   : > { %1667 = vmatprep.mubr.msk.bf16.mxu1 %vm1900_vm0, %v1899_v1 }
  0x6b   : > { %1634 = vmatpush3.bf16.msra.mxu0 %v2076_v25 }
  0x6c   : > { %1654 = vmatpush3.bf16.msra.mxu1 %v2083_v26  ;;  %1635 = vmatprep.subr.bf16.mxu0 %v1899_v1 }
  0x6d   : > { %1655 = vmatprep.subr.bf16.mxu1 %v1899_v1 }
  0x6f   : > { %1636 = vmatpush3.bf16.msra.mxu0 %v2094_v27 }
  0x70   : > { %1656 = vmatpush3.bf16.msra.mxu1 %v2101_v28  ;;  %1637 = vmatprep.subr.bf16.mxu0 %v1899_v1 }
  0x71   : > { %1657 = vmatprep.subr.bf16.mxu1 %v1899_v1 }
  0x73   : > { %1638 = vmatpush3.bf16.msra.mxu0 %v2108_v29 }
  0x74   : > { %1658 = vmatpush3.bf16.msra.mxu1 %v2115_v30  ;;  %1639 = vmatprep.subr.bf16.mxu0 %v1899_v1 }
  0x75   : > { %1659 = vmatprep.subr.bf16.mxu1 %v1899_v1 }
  0x77   : > { %1640 = vmatpush3.bf16.msra.mxu0 %v2122_v31 }
  0x78   : > { %1660 = vmatpush3.bf16.msra.mxu1 %v2129_v32  ;;  %1641 = vmatprep.subr.bf16.mxu0 %v1899_v1 }
  0x79   : > { %1661 = vmatprep.subr.bf16.mxu1 %v1899_v1 }
  0x7b   : > { %1642 = vmatpush3.bf16.msra.mxu0 %v2136_v33 }
  0x7c   : > { %1662 = vmatpush3.bf16.msra.mxu1 %v2144_v35  ;;  %1643 = vmatprep.subr.bf16.mxu0 %v1899_v1 }
  0x7d   : > { %1663 = vmatprep.subr.bf16.mxu1 %v1899_v1 }
  0x7f   : > { %1644 = vmatpush3.bf16.msra.mxu0 %v2151_v36 }
  0x80   : > { %1664 = vmatpush3.bf16.msra.mxu1 %v2158_v38  ;;  %1645 = vmatprep.subr.bf16.mxu0 %v1899_v1 }
  0x81   : > { %1665 = vmatprep.subr.bf16.mxu1 %v1899_v1 }
  0x83   : > { %1646 = vmatpush3.bf16.msra.mxu0 %v2165_v39 }
  0x84   : > { %1666 = vmatpush3.bf16.msra.mxu1 %v2172_v42  ;;  %1671 = vmatprep.subr.bf16.mxu0 %v1899_v1 }
  0x85   : > { %1691 = vmatprep.subr.bf16.mxu1 %v1899_v1 }
  0x86   : > { %1648 = vmatmul.mubr.bf16.vlgmr.msra.gmra.mrb[12].mxu0 %v1355_v49 }
  0x87   : > { %1668 = vmatmul.mubr.bf16.vlgmr.msra.gmra.mrb[12].mxu1 %v800_v50  ;;  %1672 = vmatpush3.bf16.msra.mxu0 %v1937_v0 }
  0x88   : > { %1692 = vmatpush3.bf16.msra.mxu1 %v1944_v2  ;;  %1673 = vmatprep.subr.bf16.mxu0 %v1899_v1 }
  0x89   : > { %1693 = vmatprep.subr.bf16.mxu1 %v1899_v1  ;;  %1687 = vmatprep.mubr.msk.bf16.mxu0 %vm1900_vm0, %v1899_v1 }
  0x8a   : > { %1707 = vmatprep.mubr.msk.bf16.mxu1 %vm1900_vm0, %v1899_v1 }
  0x8b   : > { %1674 = vmatpush3.bf16.msra.mxu0 %v1950_v3 }
  0x8c   : > { %1694 = vmatpush3.bf16.msra.mxu1 %v1959_v4  ;;  %1675 = vmatprep.subr.bf16.mxu0 %v1899_v1 }
  0x8d   : > { %1695 = vmatprep.subr.bf16.mxu1 %v1899_v1 }
  0x8f   : > { %1676 = vmatpush3.bf16.msra.mxu0 %v1970_v5 }
  0x90   : > { %1696 = vmatpush3.bf16.msra.mxu1 %v1977_v6  ;;  %1677 = vmatprep.subr.bf16.mxu0 %v1899_v1 }
  0x91   : > { %1697 = vmatprep.subr.bf16.mxu1 %v1899_v1 }
  0x93   : > { %1678 = vmatpush3.bf16.msra.mxu0 %v1985_v7 }
  0x94   : > { %1698 = vmatpush3.bf16.msra.mxu1 %v1992_v8  ;;  %1679 = vmatprep.subr.bf16.mxu0 %v1899_v1 }
  0x95   : > { %1699 = vmatprep.subr.bf16.mxu1 %v1899_v1 }
  0x97   : > { %1680 = vmatpush3.bf16.msra.mxu0 %v2004_v9 }
  0x98   : > { %1700 = vmatpush3.bf16.msra.mxu1 %v2011_v10  ;;  %1681 = vmatprep.subr.bf16.mxu0 %v1899_v1 }
  0x99   : > { %1701 = vmatprep.subr.bf16.mxu1 %v1899_v1 }
  0x9b   : > { %1682 = vmatpush3.bf16.msra.mxu0 %v2019_v12 }
  0x9c   : > { %1702 = vmatpush3.bf16.msra.mxu1 %v2026_v13  ;;  %1683 = vmatprep.subr.bf16.mxu0 %v1899_v1 }
  0x9d   : > { %1703 = vmatprep.subr.bf16.mxu1 %v1899_v1 }
  0x9f   : > { %1684 = vmatpush3.bf16.msra.mxu0 %v2033_v15 }
  0xa0   : > { %1704 = vmatpush3.bf16.msra.mxu1 %v2040_v16  ;;  %1685 = vmatprep.subr.bf16.mxu0 %v1899_v1 }
  0xa1   : > { %1705 = vmatprep.subr.bf16.mxu1 %v1899_v1 }
  0xa3   : > { %1686 = vmatpush3.bf16.msra.mxu0 %v2047_v19 }
  0xa4   : > { %1706 = vmatpush3.bf16.msra.mxu1 %v2054_v20  ;;  %1711 = vmatprep.subr.bf16.mxu0 %v1899_v1 }
  0xa5   : > { %1731 = vmatprep.subr.bf16.mxu1 %v1899_v1 }
  0xa6   : > { %1688 = vmatmul.mubr.bf16.vlgmr.msra.gmra.mrb[16].mxu0 %v800_v50 }
  0xa7   : > { %1708 = vmatmul.mubr.bf16.vlgmr.msra.gmra.mrb[16].mxu1 %v1355_v49  ;;  %1712 = vmatpush3.bf16.msra.mxu0 %v2060_v22 }
  0xa8   : > { %1732 = vmatpush3.bf16.msra.mxu1 %v2069_v24  ;;  %1713 = vmatprep.subr.bf16.mxu0 %v1899_v1 }
  0xa9   : > { %1733 = vmatprep.subr.bf16.mxu1 %v1899_v1  ;;  %1727 = vmatprep.mubr.msk.bf16.mxu0 %vm1900_vm0, %v1899_v1 }
  0xaa   : > { %1747 = vmatprep.mubr.msk.bf16.mxu1 %vm1900_vm0, %v1899_v1 }
  0xab   : > { %1714 = vmatpush3.bf16.msra.mxu0 %v2076_v25 }
  0xac   : > { %1734 = vmatpush3.bf16.msra.mxu1 %v2083_v26  ;;  %1715 = vmatprep.subr.bf16.mxu0 %v1899_v1 }
  0xad   : > { %1735 = vmatprep.subr.bf16.mxu1 %v1899_v1 }
  0xaf   : > { %1716 = vmatpush3.bf16.msra.mxu0 %v2094_v27 }
  0xb0   : > { %1736 = vmatpush3.bf16.msra.mxu1 %v2101_v28  ;;  %1717 = vmatprep.subr.bf16.mxu0 %v1899_v1 }
  0xb1   : > { %1737 = vmatprep.subr.bf16.mxu1 %v1899_v1 }
  0xb3   : > { %1718 = vmatpush3.bf16.msra.mxu0 %v2108_v29 }
  0xb4   : > { %1738 = vmatpush3.bf16.msra.mxu1 %v2115_v30  ;;  %1719 = vmatprep.subr.bf16.mxu0 %v1899_v1 }
  0xb5   : > { %1739 = vmatprep.subr.bf16.mxu1 %v1899_v1 }
  0xb7   : > { %1720 = vmatpush3.bf16.msra.mxu0 %v2122_v31 }
  0xb8   : > { %1740 = vmatpush3.bf16.msra.mxu1 %v2129_v32  ;;  %1721 = vmatprep.subr.bf16.mxu0 %v1899_v1 }
  0xb9   : > { %1741 = vmatprep.subr.bf16.mxu1 %v1899_v1 }
  0xbb   : > { %1722 = vmatpush3.bf16.msra.mxu0 %v2136_v33 }
  0xbc   : > { %1742 = vmatpush3.bf16.msra.mxu1 %v2144_v35  ;;  %1723 = vmatprep.subr.bf16.mxu0 %v1899_v1 }
  0xbd   : > { %1743 = vmatprep.subr.bf16.mxu1 %v1899_v1 }
  0xbf   : > { %1724 = vmatpush3.bf16.msra.mxu0 %v2151_v36 }
  0xc0   : > { %1744 = vmatpush3.bf16.msra.mxu1 %v2158_v38  ;;  %1725 = vmatprep.subr.bf16.mxu0 %v1899_v1 }
  0xc1   : > { %1745 = vmatprep.subr.bf16.mxu1 %v1899_v1 }
  0xc3   : > { %1726 = vmatpush3.bf16.msra.mxu0 %v2165_v39 }
  0xc4   : > { %1746 = vmatpush3.bf16.msra.mxu1 %v2172_v42  ;;  %1751 = vmatprep.subr.bf16.mxu0 %v1899_v1 }
  0xc5   : > { %1771 = vmatprep.subr.bf16.mxu1 %v1899_v1 }
  0xc6   : > { %1728 = vmatmul.mubr.bf16.vlgmr.msra.gmra.mrb[20].mxu0 %v1358_v55 }
  0xc7   : > { %1748 = vmatmul.mubr.bf16.vlgmr.msra.gmra.mrb[20].mxu1 %v998_v56  ;;  %1752 = vmatpush3.bf16.msra.mxu0 %v1937_v0  ;;  %v1190_v0 = vshll.u32 %v1886_v57, 16 }
  0xc8   : > { %1772 = vmatpush3.bf16.msra.mxu1 %v1944_v2  ;;  %1753 = vmatprep.subr.bf16.mxu0 %v1899_v1 }
  0xc9   : > { %1773 = vmatprep.subr.bf16.mxu1 %v1899_v1  ;;  %1767 = vmatprep.mubr.msk.bf16.mxu0 %vm1900_vm0, %v1899_v1 }
  0xca   : > { %1787 = vmatprep.mubr.msk.bf16.mxu1 %vm1900_vm0, %v1899_v1 }
  0xcb   : > { %1754 = vmatpush3.bf16.msra.mxu0 %v1950_v3 }
  0xcc   : > { %1774 = vmatpush3.bf16.msra.mxu1 %v1959_v4  ;;  %1755 = vmatprep.subr.bf16.mxu0 %v1899_v1 }
  0xcd   : > { %1775 = vmatprep.subr.bf16.mxu1 %v1899_v1 }
  0xcf   : > { %1756 = vmatpush3.bf16.msra.mxu0 %v1970_v5  ;;  %v1188_v5 = vshrl.u32 %v1886_v57, 16 }
  0xd0   : > { %1776 = vmatpush3.bf16.msra.mxu1 %v1977_v6  ;;  %1757 = vmatprep.subr.bf16.mxu0 %v1899_v1  ;;  %v1192_v6 = vrot.slane %v1190_v0, 1 }
  0xd1   : > { %1777 = vmatprep.subr.bf16.mxu1 %v1899_v1 }
  0xd3   : > { %1758 = vmatpush3.bf16.msra.mxu0 %v1985_v7  ;;  %v1361_v7 = vld [vmem:[%s1998_s10 + $0x10] sm:$0x3] }
  0xd4   : > { %1778 = vmatpush3.bf16.msra.mxu1 %v1992_v8  ;;  %1759 = vmatprep.subr.bf16.mxu0 %v1899_v1  ;;  %v1193_v8 = vor.u32 %v1192_v6, %v1188_v5 }
  0xd5   : > { %1779 = vmatprep.subr.bf16.mxu1 %v1899_v1 }
  0xd7   : > { %1760 = vmatpush3.bf16.msra.mxu0 %v2004_v9 }
  0xd8   : > { %1780 = vmatpush3.bf16.msra.mxu1 %v2011_v10  ;;  %1761 = vmatprep.subr.bf16.mxu0 %v1899_v1 }
  0xd9   : > { %1781 = vmatprep.subr.bf16.mxu1 %v1899_v1 }
  0xdb   : > { %1762 = vmatpush3.bf16.msra.mxu0 %v2019_v12 }
  0xdc   : > { %1782 = vmatpush3.bf16.msra.mxu1 %v2026_v13  ;;  %1763 = vmatprep.subr.bf16.mxu0 %v1899_v1  ;;  %v2403_v13 = vld [vmem:[%s2434_s2] ss:$0 sm:$0xff] }
  0xdd   : > { %1783 = vmatprep.subr.bf16.mxu1 %v1899_v1 }
  0xdf   : > { %1764 = vmatpush3.bf16.msra.mxu0 %v2033_v15 }
  0xe0   : > { %1784 = vmatpush3.bf16.msra.mxu1 %v2040_v16  ;;  %1765 = vmatprep.subr.bf16.mxu0 %v1899_v1 }
  0xe1   : > { %1785 = vmatprep.subr.bf16.mxu1 %v1899_v1 }
  0xe3   : > { %1766 = vmatpush3.bf16.msra.mxu0 %v2047_v19 }
  0xe4   : > { %1786 = vmatpush3.bf16.msra.mxu1 %v2054_v20  ;;  %1791 = vmatprep.subr.bf16.mxu0 %v1899_v1 }
  0xe5   : > { %1811 = vmatprep.subr.bf16.mxu1 %v1899_v1 }
  0xe6   : > { %1768 = vmatmul.mubr.bf16.vlgmr.msra.gmra.mrb[24].mxu0 %v998_v56 }
  0xe7   : > { %1788 = vmatmul.mubr.bf16.vlgmr.msra.gmra.mrb[24].mxu1 %v1358_v55  ;;  %1792 = vmatpush3.bf16.msra.mxu0 %v2060_v22 }
  0xe8   : > { %1812 = vmatpush3.bf16.msra.mxu1 %v2069_v24  ;;  %1793 = vmatprep.subr.bf16.mxu0 %v1899_v1 }
  0xe9   : > { %1813 = vmatprep.subr.bf16.mxu1 %v1899_v1  ;;  %1807 = vmatprep.mubr.msk.bf16.mxu0 %vm1900_vm0, %v1899_v1 }
  0xea   : > { %1827 = vmatprep.mubr.msk.bf16.mxu1 %vm1900_vm0, %v1899_v1 }
  0xeb   : > { %1794 = vmatpush3.bf16.msra.mxu0 %v2076_v25 }
  0xec   : > { %1814 = vmatpush3.bf16.msra.mxu1 %v2083_v26  ;;  %1795 = vmatprep.subr.bf16.mxu0 %v1899_v1 }
  0xed   : > { %1815 = vmatprep.subr.bf16.mxu1 %v1899_v1 }
  0xef   : > { %1796 = vmatpush3.bf16.msra.mxu0 %v2094_v27 }
  0xf0   : > { %1816 = vmatpush3.bf16.msra.mxu1 %v2101_v28  ;;  %1797 = vmatprep.subr.bf16.mxu0 %v1899_v1 }
  0xf1   : > { %1817 = vmatprep.subr.bf16.mxu1 %v1899_v1 }
  0xf3   : > { %1798 = vmatpush3.bf16.msra.mxu0 %v2108_v29 }
  0xf4   : > { %1818 = vmatpush3.bf16.msra.mxu1 %v2115_v30  ;;  %1799 = vmatprep.subr.bf16.mxu0 %v1899_v1 }
  0xf5   : > { %1819 = vmatprep.subr.bf16.mxu1 %v1899_v1 }
  0xf7   : > { %1800 = vmatpush3.bf16.msra.mxu0 %v2122_v31 }
  0xf8   : > { %1820 = vmatpush3.bf16.msra.mxu1 %v2129_v32  ;;  %1801 = vmatprep.subr.bf16.mxu0 %v1899_v1 }
  0xf9   : > { %v322_v58 = vpop.f32.mrb[0].mxu0  ;;  %1821 = vmatprep.subr.bf16.mxu1 %v1899_v1 }
  0xfa   : > { %v410_v59 = vpop.f32.mrb[0].mxu1  ;;  %v1529_v60 = vpop.f32.mrb[1].mxu0 }
  0xfb   : > { %v411_v61 = vadd.f32 %v410_v59, %v322_v58  ;;  %v1549_v62 = vpop.f32.mrb[1].mxu1  ;;  %v325_v63 = vpop.f32.mrb[2].mxu0  ;;  %1802 = vmatpush3.bf16.msra.mxu0 %v2136_v33 }
  0xfc   : > { %v413_v2 = vpop.f32.mrb[2].mxu1  ;;  %1822 = vmatpush3.bf16.msra.mxu1 %v2144_v35  ;;  %v1530_v3 = vpop.f32.mrb[3].mxu0  ;;  %1803 = vmatprep.subr.bf16.mxu0 %v1899_v1  ;;  %v847_v35 = vld [vmem:[%s2435_s3] sm:$0xc] }
  0xfd   : > { %v1550_v4 = vpop.f32.mrb[3].mxu1  ;;  %1823 = vmatprep.subr.bf16.mxu1 %v1899_v1 }
  0xff   : > { %1804 = vmatpush3.bf16.msra.mxu0 %v2151_v36 }
 0x100   : > { %1824 = vmatpush3.bf16.msra.mxu1 %v2158_v38  ;;  %1805 = vmatprep.subr.bf16.mxu0 %v1899_v1 }
 0x101   : > { %1825 = vmatprep.subr.bf16.mxu1 %v1899_v1 }
 0x103   : > { %1806 = vmatpush3.bf16.msra.mxu0 %v2165_v39 }
 0x104   : > { %1826 = vmatpush3.bf16.msra.mxu1 %v2172_v42  ;;  %v848_v42 = vunpack.c.l.bf16 %v847_v35 }
 0x106   : > { %1808 = vmatmul.mubr.bf16.vlgmr.msra.gmra.mrb[28].mxu0 %v1361_v7  ;;  %v850_v48 = vrot.slane %v848_v42, 4 }
 0x107   : > { %1828 = vmatmul.mubr.bf16.vlgmr.msra.gmra.mrb[28].mxu1 %v1193_v8  ;;  %v1045_v8 = vld [vmem:[%s2435_s3 + $0x4] sm:$0x3] }
 0x119   : > { %v516_v9 = vpop.f32.mrb[4].mxu0 }
 0x11a   : > { %v522_v10 = vadd.f32 %v516_v9, %v411_v61  ;;  %v633_v11 = vpop.f32.mrb[4].mxu1  ;;  %v1569_v12 = vpop.f32.mrb[5].mxu0 }
 0x11b   : > { %v1589_v14 = vpop.f32.mrb[5].mxu1  ;;  %v519_v15 = vpop.f32.mrb[6].mxu0 }
 0x11c   : > { %v639_v1 = vadd.f32 %v633_v11, %v522_v10  ;;  %v636_v16 = vpop.f32.mrb[6].mxu1  ;;  %v1570_v17 = vpop.f32.mrb[7].mxu0  ;;  %v1046_v11 = vunpack.c.l.bf16 %v1045_v8 }
 0x11d   : > { %v1590_v19 = vpop.f32.mrb[7].mxu1 }
 0x11e   : > { %v647_v20 = vadd.f32 %v2403_v13, %v639_v1 }
 0x120   : > { %v649_v22 = vmul.f32 0.2, %v647_v20  ;;  %vm648_vm1 = vcmp.ge.f32.partialorder %v647_v20, 0.0 }
 0x122   : > { %v650_v23 = vsel %vm648_vm1, %v647_v20, %v649_v22 }
 0x123   : > { %v653_v24 = vmul.f32 %v652_v21, %v650_v23 }
 0x125   : > { %v655_v25 = vsel %vm654_vm2, %v653_v24, 0.0 }
 0x126   : > { %656 = vadd.xlane.f32.xlu0 %v655_v25 }
 0x139   : > { %v701_v26 = vpop.f32.mrb[8].mxu0 }
 0x13a   : > { %v741_v27 = vpop.f32.mrb[8].mxu1  ;;  %v1609_v28 = vpop.f32.mrb[9].mxu0 }
 0x13b   : > { %v742_v29 = vadd.f32 %v741_v27, %v701_v26  ;;  %v1629_v30 = vpop.f32.mrb[9].mxu1  ;;  %v704_v31 = vpop.f32.mrb[10].mxu0 }
 0x13c   : > { %v744_v32 = vpop.f32.mrb[10].mxu1  ;;  %v1610_v33 = vpop.f32.mrb[11].mxu0 }
 0x13d   : > { %v1630_v34 = vpop.f32.mrb[11].mxu1  ;;  %v1240_v32 = vld [vmem:[%s2435_s3 + $0x4] sm:$0xc] }
 0x159   : > { %v783_v36 = vpop.f32.mrb[12].mxu0 }
 0x15a   : > { %v789_v37 = vadd.f32 %v783_v36, %v742_v29  ;;  %v836_v38 = vpop.f32.mrb[12].mxu1  ;;  %v1649_v39 = vpop.f32.mrb[13].mxu0 }
 0x15b   : > { %v1669_v40 = vpop.f32.mrb[13].mxu1  ;;  %v786_v41 = vpop.f32.mrb[14].mxu0  ;;  %v1241_v39 = vunpack.c.l.bf16 %v1240_v32 }
 0x15c   : > { %v842_v43 = vadd.f32 %v836_v38, %v789_v37  ;;  %v839_v44 = vpop.f32.mrb[14].mxu1  ;;  %v1650_v45 = vpop.f32.mrb[15].mxu0 }
 0x15d   : > { %v1670_v46 = vpop.f32.mrb[15].mxu1  ;;  %v1243_v45 = vrot.slane %v1241_v39, 4 }
 0x15e   : > { %v843_v47 = vadd.f32 %v2403_v13, %v842_v43 }
 0x160   : > { %v845_v49 = vmul.f32 0.2, %v843_v47  ;;  %vm844_vm3 = vcmp.ge.f32.partialorder %v843_v47, 0.0 }
 0x162   : > { %v846_v50 = vsel %vm844_vm3, %v843_v47, %v845_v49 }
 0x163   : > { %v852_v51 = vmul.f32 %v850_v48, %v846_v50 }
 0x165   : > { %v853_v52 = vsel %vm654_vm2, %v852_v51, 0.0 }
 0x166   : > { %854 = vadd.xlane.f32.xlu0 %v853_v52 }
 0x179   : > { %v899_v53 = vpop.f32.mrb[16].mxu0 }
 0x17a   : > { %v939_v54 = vpop.f32.mrb[16].mxu1  ;;  %v1689_v55 = vpop.f32.mrb[17].mxu0 }
 0x17b   : > { %v940_v56 = vadd.f32 %v939_v54, %v899_v53  ;;  %v1709_v57 = vpop.f32.mrb[17].mxu1  ;;  %v902_v58 = vpop.f32.mrb[18].mxu0 }
 0x17c   : > { %v942_v59 = vpop.f32.mrb[18].mxu1  ;;  %v1690_v60 = vpop.f32.mrb[19].mxu0 }
 0x17d   : > { %v1710_v61 = vpop.f32.mrb[19].mxu1 }
 0x199   : > { %v981_v62 = vpop.f32.mrb[20].mxu0 }
 0x19a   : > { %v987_v63 = vadd.f32 %v981_v62, %v940_v56  ;;  %v1034_v0 = vpop.f32.mrb[20].mxu1  ;;  %v1729_v2 = vpop.f32.mrb[21].mxu0 }
 0x19b   : > { %v1749_v3 = vpop.f32.mrb[21].mxu1  ;;  %v984_v4 = vpop.f32.mrb[22].mxu0 }
 0x19c   : > { %v1040_v5 = vadd.f32 %v1034_v0, %v987_v63  ;;  %v1037_v6 = vpop.f32.mrb[22].mxu1  ;;  %v1730_v7 = vpop.f32.mrb[23].mxu0 }
 0x19d   : > { %v1750_v9 = vpop.f32.mrb[23].mxu1 }
 0x19e   : > { %v1041_v10 = vadd.f32 %v2403_v13, %v1040_v5 }
 0x1a0   : > { %v1043_v12 = vmul.f32 0.2, %v1041_v10  ;;  %vm1042_vm4 = vcmp.ge.f32.partialorder %v1041_v10, 0.0 }
 0x1a2   : > { %v1044_v14 = vsel %vm1042_vm4, %v1041_v10, %v1043_v12 }
 0x1a3   : > { %v1047_v15 = vmul.f32 %v1046_v11, %v1044_v14 }
 0x1a5   : > { %v1048_v1 = vsel %vm654_vm2, %v1047_v15, 0.0 }
 0x1a6   : > { %1049 = vadd.xlane.f32.xlu1 %v1048_v1 }
 0x1b3   : > { %v657_v16 = vpop.xlane.xlu0 %656 }
 0x1b4   : > { %v658_v17 = vrot.slane %v657_v16, 4 }
 0x1b6   : > { %v659_v18 = vadd.f32 %v658_v17, %v657_v16 }
 0x1b8   : > { %v660_v19 = vrot.slane %v659_v18, 2 }
 0x1b9   : > { %v1094_v20 = vpop.f32.mrb[24].mxu0 }
 0x1ba   : > { %v1134_v21 = vpop.f32.mrb[24].mxu1  ;;  %v1769_v22 = vpop.f32.mrb[25].mxu0  ;;  %v661_v23 = vadd.f32 %v660_v19, %v659_v18 }
 0x1bb   : > { %v1135_v24 = vadd.f32 %v1134_v21, %v1094_v20  ;;  %v1789_v25 = vpop.f32.mrb[25].mxu1  ;;  %v1097_v26 = vpop.f32.mrb[26].mxu0 }
 0x1bc   : > { %v1137_v27 = vpop.f32.mrb[26].mxu1  ;;  %v1770_v28 = vpop.f32.mrb[27].mxu0  ;;  %v662_v29 = vrot.slane %v661_v23, 1 }
 0x1bd   : > { %v1790_v30 = vpop.f32.mrb[27].mxu1 }
 0x1be   : > { %v663_v31 = vadd.f32 %v662_v29, %v661_v23 }
 0x1c0   : > { %1832 = vpush %v663_v31 }
 0x1d9   : > { %v1176_v33 = vpop.f32.mrb[28].mxu0 }
 0x1da   : > { %v1182_v34 = vadd.f32 %v1176_v33, %v1135_v24  ;;  %v1229_v35 = vpop.f32.mrb[28].mxu1  ;;  %v1809_v36 = vpop.f32.mrb[29].mxu0 }
 0x1db   : > { %v1829_v37 = vpop.f32.mrb[29].mxu1  ;;  %v1179_v38 = vpop.f32.mrb[30].mxu0 }
 0x1dc   : > { %v1235_v40 = vadd.f32 %v1229_v35, %v1182_v34  ;;  %v1232_v41 = vpop.f32.mrb[30].mxu1  ;;  %v1810_v42 = vpop.f32.mrb[31].mxu0 }
 0x1dd   : > { %v1830_v43 = vpop.f32.mrb[31].mxu1 }
 0x1de   : > { %v1236_v44 = vadd.f32 %v2403_v13, %v1235_v40 }
 0x1e0   : > { %v1238_v46 = vmul.f32 0.2, %v1236_v44  ;;  %vm1237_vm5 = vcmp.ge.f32.partialorder %v1236_v44, 0.0 }
 0x1e2   : > { %v1239_v47 = vsel %vm1237_vm5, %v1236_v44, %v1238_v46 }
 0x1e3   : > { %v1245_v48 = vmul.f32 %v1243_v45, %v1239_v47 }
 0x1e5   : > { %v1246_v49 = vsel %vm654_vm2, %v1245_v48, 0.0 }
 0x1e6   : > { %1247 = vadd.xlane.f32.xlu1 %v1246_v49 }
 0x1f1   : > { %s1833_s24 = spop %1832 }
 0x1f2   : > { %v665_v8 = vstv %s1833_s24 }
 0x1f3   : > { %v855_v50 = vpop.xlane.xlu0 %854 }
 0x1f4   : > { %v856_v51 = vrot.slane %v855_v50, 4 }
 0x1f6   : > { %v857_v52 = vadd.f32 %v856_v51, %v855_v50 }
 0x1f8   : > { %v858_v53 = vrot.slane %v857_v52, 2 }
 0x1fa   : > { %v859_v54 = vadd.f32 %v858_v53, %v857_v52 }
 0x1fc   : > { %v860_v55 = vrot.slane %v859_v54, 1 }
 0x1fe   : > { %v861_v56 = vadd.f32 %v860_v55, %v859_v54 }
 0x200   : > { %1834 = vpush %v861_v56 }
 0x231   : > { %s1835_s25 = spop %1834 }
 0x232   : > { %v863_v7 = vstv %s1835_s25 }
 0x233   : > { %v1050_v57 = vpop.xlane.xlu1 %1049  ;;  %v864_v10 = vadd.f32 %v863_v7, %v665_v8 }
 0x234   : > { %v1051_v58 = vrot.slane %v1050_v57, 4 }
 0x236   : > { %v1052_v59 = vadd.f32 %v1051_v58, %v1050_v57 }
 0x238   : > { %v1053_v13 = vrot.slane %v1052_v59, 2 }
 0x23a   : > { %v1054_v60 = vadd.f32 %v1053_v13, %v1052_v59 }
 0x23c   : > { %v1055_v61 = vrot.slane %v1054_v60, 1 }
 0x23e   : > { %v1056_v62 = vadd.f32 %v1055_v61, %v1054_v60 }
 0x240   : > { %1836 = vpush %v1056_v62 }
 0x271   : > { %s1837_s26 = spop %1836 }
 0x272   : > { %v1058_v9 = vstv %s1837_s26 }
 0x273   : > { %v1248_v63 = vpop.xlane.xlu1 %1247  ;;  %v1059_v11 = vadd.f32 %v1058_v9, %v864_v10 }
 0x274   : > { %v1249_v0 = vrot.slane %v1248_v63, 4 }
 0x276   : > { %v1250_v2 = vadd.f32 %v1249_v0, %v1248_v63 }
 0x278   : > { %v1251_v3 = vrot.slane %v1250_v2, 2 }
 0x27a   : > { %v1252_v4 = vadd.f32 %v1251_v3, %v1250_v2 }
 0x27c   : > { %v1253_v5 = vrot.slane %v1252_v4, 1 }
 0x27e   : > { %v1254_v6 = vadd.f32 %v1253_v5, %v1252_v4 }
 0x280   : > { %1838 = vpush %v1254_v6 }
 0x2b1   : > { %s1839_s27 = spop %1838 }
 0x2b2   : > { %v1256_v12 = vstv %s1839_s27 }
 0x2b3   : > { %v1257_v14 = vadd.f32 %v1256_v12, %v1059_v11 }
 0x2b5   : > { %v1364_v15 = vmul.f32 -1.442695, %v1257_v14 }
 0x2b7   : > { %1887 = vpow2.f32 %v1364_v15 }
 0x2c1   : > { %v1888_v1 = vpop.eup %1887 }
 0x2c2   : > { %v1261_v16 = vadd.f32 1.0, %v1888_v1 }
 0x2c4   : > { %1889 = vrcp.f32 %v1261_v16 }
 0x2ce   : > { %v1890_v17 = vpop.eup %1889 }
 0x2cf   : > { %1264 = vst [vmem:[%s193_s30] sm:$0x1] %v1890_v17 }
 0x2d0 PF: > { %s14_s15 = sadd.s32 1, %s1897_s15  }
 0x2d1   : > { %p11_p4 = scmp.ge.s32.totalorder %s14_s15, 4  }
 0x2d3   :  { %13 = sbr.rel (!%p11_p4) target bundleno = 1 (0x1), region = 70 }

</bundles_post_ra>
